<compile_context>
chip_gen: v7x
topology: tpu7x:2x2x1
jax: 0.10.0
libtpu: 0.0.40
codegen_flags: <defaults>
</compile_context>

<pallas_src>
import functools

import jax
import jax.numpy as jnp
import numpy as np
from jax.experimental import pallas as pl
from jax.experimental.pallas import tpu as pltpu

EPS = 1e-5
LANE = 128


def _round_up(x, m):
    return ((x + m - 1) // m) * m


# --------------------------------------------------------------------------
# In-kernel helpers.
# --------------------------------------------------------------------------
def _zero_halo(ref):
    """Zero the 1-pixel spatial halo of a (NB, H+2, W+2, Cp) VMEM scratch.

    Done per grid step (not once) so the grid axis can stay "parallel"
    (megacore-shardable on v7x); the halo is tiny, so this is cheap.
    """
    NB, Hp, Wp, Cp = ref.shape
    z_row = jnp.zeros((NB, 1, Wp, Cp), ref.dtype)
    z_col = jnp.zeros((NB, Hp, 1, Cp), ref.dtype)
    ref[:, 0:1, :, :] = z_row
    ref[:, Hp - 1:Hp, :, :] = z_row
    ref[:, :, 0:1, :] = z_col
    ref[:, :, Wp - 1:Wp, :] = z_col


def _conv3x3_from_padded(pad_ref, w_ref, H, W):
    """3x3 conv as 9 accumulating bf16 MXU dots -> f32 (M, Cp) accumulator.

    pad_ref: (NB, H+2, W+2, Cp) f32 scratch holding the spatially padded input.
    w_ref  : (9, Cp, Cp) bf16 resident weights (tap-major).
    Avoids materializing the (M, 9*Cp) im2col patch in VMEM.
    """
    NB, Hp, Wp, Cp = pad_ref.shape
    M = NB * H * W
    acc = None
    for t in range(9):          # unrolled; 9 MXU dots, f32 accumulation
        dy, dx = t // 3, t % 3
        tap = pad_ref[:, dy:dy + H, dx:dx + W, :].reshape(M, Cp)
        tap = tap.astype(jnp.bfloat16)
        d = jnp.dot(tap, w_ref[t], preferred_element_type=jnp.float32)
        acc = d if acc is None else acc + d
    return acc


def _partial_stats(acc_f32):
    """(M, Cp) f32 conv output -> (1, 2, Cp) per-tile [sum, sum-of-squares]."""
    s = jnp.sum(acc_f32, axis=0, keepdims=True)
    s2 = jnp.sum(acc_f32 * acc_f32, axis=0, keepdims=True)
    return jnp.concatenate([s, s2], axis=0).reshape(1, 2, acc_f32.shape[-1])


# --------------------------------------------------------------------------
# Phase 1: conv1 (9 bf16 dots) + per-tile BN1 partial statistics.
# --------------------------------------------------------------------------
def conv1_stats_kernel(x_ref, w_ref, acc_ref, stats_ref, xp_scr):
    # x_ref    : (NB, H, W, Cp)  f32 input tile (channel-padded)
    # w_ref    : (9, Cp, Cp)     bf16 conv1 weights (resident, const index)
    # acc_ref  : (NB, H, W, Cp)  bf16 conv1 output (pre-BN)
    # stats_ref: (1, 2, Cp)      f32 per-tile [sum, sum-of-squares]
    # xp_scr   : (NB, H+2, W+2, Cp) f32 scratch (spatial halo built here)
    NB, H, W, Cp = x_ref.shape
    _zero_halo(xp_scr)
    xp_scr[:, 1:H + 1, 1:W + 1, :] = x_ref[...]
    acc = _conv3x3_from_padded(xp_scr, w_ref, H, W)          # f32 (M, Cp)
    acc_ref[...] = acc.reshape(NB, H, W, Cp).astype(acc_ref.dtype)
    stats_ref[...] = _partial_stats(acc)                     # stats from f32


# --------------------------------------------------------------------------
# Phase 2: bn1 (precomputed scale/shift) + relu + conv2 + BN2 partial stats.
# --------------------------------------------------------------------------
def bn_relu_conv2_stats_kernel(acc1_ref, scale_ref, shift_ref, w_ref,
                               acc2_ref, stats_ref, h1p_scr):
    # acc1_ref : (NB, H, W, Cp) bf16 conv1 output
    # scale_ref, shift_ref: (1, Cp) f32 fused BN1 scale/shift (hoisted)
    # w_ref    : (9, Cp, Cp)    bf16 conv2 weights (resident)
    # acc2_ref : (NB, H, W, Cp) bf16 conv2 output (pre-BN)
    # stats_ref: (1, 2, Cp)     f32 per-tile [sum, sum-of-squares]
    # h1p_scr  : (NB, H+2, W+2, Cp) f32 scratch
    NB, H, W, Cp = acc1_ref.shape
    scale = scale_ref[...].reshape(1, 1, 1, Cp)
    shift = shift_ref[...].reshape(1, 1, 1, Cp)
    h1 = jnp.maximum(acc1_ref[...].astype(jnp.float32) * scale + shift, 0.0)

    _zero_halo(h1p_scr)
    h1p_scr[:, 1:H + 1, 1:W + 1, :] = h1
    acc = _conv3x3_from_padded(h1p_scr, w_ref, H, W)          # f32 (M, Cp)
    acc2_ref[...] = acc.reshape(NB, H, W, Cp).astype(acc2_ref.dtype)
    stats_ref[...] = _partial_stats(acc)


# --------------------------------------------------------------------------
# Phase 3: bn2 (precomputed scale/shift) + residual add + relu.
# --------------------------------------------------------------------------
def bn_add_relu_kernel(acc2_ref, x_ref, scale_ref, shift_ref, out_ref):
    Cp = acc2_ref.shape[-1]
    scale = scale_ref[...].reshape(1, 1, 1, Cp)
    shift = shift_ref[...].reshape(1, 1, 1, Cp)
    out = acc2_ref[...].astype(jnp.float32) * scale + shift + x_ref[...]
    out_ref[...] = jnp.maximum(out, 0.0).astype(out_ref.dtype)


# --------------------------------------------------------------------------
# Wrapper helpers.
# --------------------------------------------------------------------------
def _pick_batch_tile(n, target=8):
    bt = 1
    for d in range(1, min(n, target) + 1):
        if n % d == 0:
            bt = d
    return bt


def _pick_vmem_limit():
    # Generation-tuned budget: ~80% of physical VMEM (~102 MiB on v5e/v6e,
    # ~51 MiB on v7x).  Conservative fallback if the query is unavailable.
    try:
        cap = getattr(pltpu.get_tpu_info(), "vmem_capacity_bytes", None)
        if cap:
            return int(cap * 0.8)
    except Exception:
        pass
    return 48 * 1024 * 1024


def _bn_scale_shift(stats_partials, gamma_p, beta_p, m_total):
    """Reduce per-tile partials and fold BN into per-channel scale/shift."""
    s = jnp.sum(stats_partials, axis=0)                      # (2, Cp)
    mean = s[0] / m_total
    var = jnp.maximum(s[1] / m_total - mean * mean, 0.0)     # biased variance
    scale = gamma_p.reshape(-1) * jax.lax.rsqrt(var + EPS)
    shift = beta_p.reshape(-1) - mean * scale
    return scale.reshape(1, -1), shift.reshape(1, -1)


# --------------------------------------------------------------------------
# Full BasicBlock forward: NCHW <-> NHWC, lane padding, 3 pallas_calls.
# --------------------------------------------------------------------------
@functools.partial(jax.jit, static_argnames=("batch_tile",))
def basic_block_forward(x_nchw, w1, g1, b1, w2, g2, b2, batch_tile=None):
    """x_nchw: (N, C, H, W) float32 -> (N, C, H, W) float32."""
    N, C, H, W = x_nchw.shape
    assert w1.shape[-1] == C, "stride=1 / downsample=None requires planes == inplanes"
    NB = batch_tile if batch_tile is not None else _pick_batch_tile(N)
    assert N % NB == 0
    num_tiles = N // NB
    m_total = float(N * H * W)

    # Channel padding to a lane-dense width.  Padded channels stay identically
    # zero through conv / BN(gamma=0,beta=0) / relu / residual.
    Cp = _round_up(C, LANE)

    x_nhwc = jnp.transpose(x_nchw, (0, 2, 3, 1)).astype(jnp.float32)
    xq = jnp.pad(x_nhwc, ((0, 0), (0, 0), (0, 0), (0, Cp - C)))   # conv1 in + residual

    def pad_weight(w):  # (3,3,C,C) HWIO -> (9, Cp, Cp) tap-major, bf16
        wp = jnp.pad(w.astype(jnp.float32),
                     ((0, 0), (0, 0), (0, Cp - C), (0, Cp - C)))
        return wp.reshape(9, Cp, Cp).astype(jnp.bfloat16)

    def pad_vec(v):     # (1,C) -> (1,Cp)
        return jnp.pad(v.reshape(1, -1).astype(jnp.float32), ((0, 0), (0, Cp - C)))

    w1r, w2r = pad_weight(w1), pad_weight(w2)
    g1p, b1p, g2p, b2p = pad_vec(g1), pad_vec(b1), pad_vec(g2), pad_vec(b2)

    tile_spec = pl.BlockSpec((NB, H, W, Cp), lambda i: (i, 0, 0, 0))
    w_spec = pl.BlockSpec((9, Cp, Cp), lambda i: (0, 0, 0))        # resident weights
    vec_spec = pl.BlockSpec((1, Cp), lambda i: (0, 0))             # resident scale/shift
    stats_spec = pl.BlockSpec((1, 2, Cp), lambda i: (i, 0, 0))     # per-tile partials

    params = pltpu.CompilerParams(dimension_semantics=("parallel",),
                                  vmem_limit_bytes=_pick_vmem_limit())

    # ---- phase 1: conv1 + BN1 partial stats ----
    acc1, stats1 = pl.pallas_call(
        conv1_stats_kernel,
        grid=(num_tiles,),
        in_specs=[tile_spec, w_spec],
        out_specs=(tile_spec, stats_spec),
        out_shape=(jax.ShapeDtypeStruct((N, H, W, Cp), jnp.bfloat16),
                   jax.ShapeDtypeStruct((num_tiles, 2, Cp), jnp.float32)),
        scratch_shapes=[pltpu.VMEM((NB, H + 2, W + 2, Cp), jnp.float32)],
        compiler_params=params,
    )(xq, w1r)

    scale1, shift1 = _bn_scale_shift(stats1, g1p, b1p, m_total)

    # ---- phase 2: bn1 + relu + conv2 + BN2 partial stats ----
    acc2, stats2 = pl.pallas_call(
        bn_relu_conv2_stats_kernel,
        grid=(num_tiles,),
        in_specs=[tile_spec, vec_spec, vec_spec, w_spec],
        out_specs=(tile_spec, stats_spec),
        out_shape=(jax.ShapeDtypeStruct((N, H, W, Cp), jnp.bfloat16),
                   jax.ShapeDtypeStruct((num_tiles, 2, Cp), jnp.float32)),
        scratch_shapes=[pltpu.VMEM((NB, H + 2, W + 2, Cp), jnp.float32)],
        compiler_params=params,
    )(acc1, scale1, shift1, w2r)

    scale2, shift2 = _bn_scale_shift(stats2, g2p, b2p, m_total)

    # ---- phase 3: bn2 + residual + relu (output aliases acc2's buffer) ----
    out_p = pl.pallas_call(
        bn_add_relu_kernel,
        grid=(num_tiles,),
        in_specs=[tile_spec, tile_spec, vec_spec, vec_spec],
        out_specs=tile_spec,
        out_shape=jax.ShapeDtypeStruct((N, H, W, Cp), jnp.bfloat16),
        input_output_aliases={0: 0},
        compiler_params=params,
    )(acc2, xq, scale2, shift2)

    out_nhwc = out_p[..., :C].astype(jnp.float32)
    return jnp.transpose(out_nhwc, (0, 3, 1, 2))


# --------------------------------------------------------------------------
# Pure-JAX f32 reference (same math) for a correctness check.
# --------------------------------------------------------------------------
def reference_forward(x_nchw, w1, g1, b1, w2, g2, b2):
    def conv(x, w):  # x NHWC, w HWIO
        return jax.lax.conv_general_dilated(
            x, w, window_strides=(1, 1), padding=((1, 1), (1, 1)),
            dimension_numbers=("NHWC", "HWIO", "NHWC"),
            precision=jax.lax.Precision.HIGHEST)

    def bn(x, g, b):
        mean = jnp.mean(x, axis=(0, 1, 2), keepdims=True)
        var = jnp.mean((x - mean) ** 2, axis=(0, 1, 2), keepdims=True)
        return (x - mean) * jax.lax.rsqrt(var + EPS) * g.reshape(1, 1, 1, -1) \
            + b.reshape(1, 1, 1, -1)

    x = jnp.transpose(x_nchw, (0, 2, 3, 1)).astype(jnp.float32)
    h = jnp.maximum(bn(conv(x, w1), g1, b1), 0.0)
    h = bn(conv(h, w2), g2, b2)
    out = jnp.maximum(h + x, 0.0)
    return jnp.transpose(out, (0, 3, 1, 2))


if __name__ == "__main__":
    # Small CIFAR-ish shapes: batch=2, inplanes=planes=8, spatial=16x16.
    N, C, H, W = 2, 8, 16, 16
    key = jax.random.PRNGKey(0)
    kx, k1, k2, k3, k4 = jax.random.split(key, 5)

    x = jax.random.normal(kx, (N, C, H, W), dtype=jnp.float32)

    fan_in = 3 * 3 * C
    w1 = jax.random.normal(k1, (3, 3, C, C), dtype=jnp.float32) / np.sqrt(fan_in)
    w2 = jax.random.normal(k2, (3, 3, C, C), dtype=jnp.float32) / np.sqrt(fan_in)
    # BatchNorm affine params (perturbed from the 1/0 default to exercise the path).
    g1 = 1.0 + 0.1 * jax.random.normal(k3, (1, C), dtype=jnp.float32)
    b1 = 0.1 * jax.random.normal(k4, (1, C), dtype=jnp.float32)
    g2 = jnp.ones((1, C), jnp.float32)
    b2 = jnp.zeros((1, C), jnp.float32)

    out = jax.block_until_ready(basic_block_forward(x, w1, g1, b1, w2, g2, b2))
    ref = jax.block_until_ready(reference_forward(x, w1, g1, b1, w2, g2, b2))

    # Kernel uses bf16 MXU matmuls + bf16 inter-phase intermediates (f32
    # accumulation and f32 BN statistics), so compare with a bf16-level tolerance.
    np.testing.assert_allclose(np.asarray(out), np.asarray(ref),
                               rtol=5e-2, atol=5e-2)

    print("KERNEL_OK")
</pallas_src>

<mosaic_0001>
module attributes {stable_mosaic.version = 11 : i64} {
  func.func @bn_relu_conv2_stats_kernel(%arg0: i32, %arg1: memref<2x16x16x128xbf16, #tpu.memory_space<vmem>>, %arg2: memref<1x128xf32, #tpu.memory_space<vmem>>, %arg3: memref<1x128xf32, #tpu.memory_space<vmem>>, %arg4: memref<9x128x128xbf16, #tpu.memory_space<vmem>>, %arg5: memref<2x16x16x128xbf16, #tpu.memory_space<vmem>>, %arg6: memref<1x2x128xf32, #tpu.memory_space<vmem>>, %arg7: memref<2x18x18x128xf32, #tpu.memory_space<vmem>>) attributes {dimension_semantics = [#tpu.dimension_semantics<parallel>], iteration_bounds = array<i64: 1>, scalar_prefetch = 0 : i64, scratch_operands = 1 : i64, tpu.core_type = #tpu.core_type<tc>, window_params = [{transform_indices = @transform_0, window_bounds = array<i64: 2, 16, 16, 128>}, {pipeline_mode = #tpu.pipeline_mode<synchronous>, transform_indices = @transform_1, window_bounds = array<i64: 1, 128>}, {pipeline_mode = #tpu.pipeline_mode<synchronous>, transform_indices = @transform_2, window_bounds = array<i64: 1, 128>}, {pipeline_mode = #tpu.pipeline_mode<synchronous>, transform_indices = @transform_3, window_bounds = array<i64: 9, 128, 128>}, {transform_indices = @transform_4, window_bounds = array<i64: 2, 16, 16, 128>}, {transform_indices = @transform_5, window_bounds = array<i64: 1, 2, 128>}]} {
    %c0 = arith.constant 0 : index
    %c0_0 = arith.constant 0 : index
    %0 = vector.load %arg2[%c0, %c0_0] : memref<1x128xf32, #tpu.memory_space<vmem>>, vector<1x128xf32>
    %1 = vector.shape_cast %0 : vector<1x128xf32> to vector<1x1x1x128xf32>
    %c0_1 = arith.constant 0 : index
    %c0_2 = arith.constant 0 : index
    %2 = vector.load %arg3[%c0_1, %c0_2] : memref<1x128xf32, #tpu.memory_space<vmem>>, vector<1x128xf32>
    %3 = vector.shape_cast %2 : vector<1x128xf32> to vector<1x1x1x128xf32>
    %c0_3 = arith.constant 0 : index
    %c0_4 = arith.constant 0 : index
    %c0_5 = arith.constant 0 : index
    %c0_6 = arith.constant 0 : index
    %4 = vector.load %arg1[%c0_3, %c0_4, %c0_5, %c0_6] : memref<2x16x16x128xbf16, #tpu.memory_space<vmem>>, vector<2x16x16x128xbf16>
    %5 = arith.extf %4 : vector<2x16x16x128xbf16> to vector<2x16x16x128xf32>
    %6 = vector.broadcast %1 : vector<1x1x1x128xf32> to vector<2x16x16x128xf32>
    %7 = arith.mulf %5, %6 : vector<2x16x16x128xf32>
    %8 = vector.broadcast %3 : vector<1x1x1x128xf32> to vector<2x16x16x128xf32>
    %9 = arith.addf %7, %8 : vector<2x16x16x128xf32>
    %cst = arith.constant 0.000000e+00 : f32
    %10 = vector.broadcast %cst : f32 to vector<2x16x16x128xf32>
    %11 = arith.maximumf %9, %10 : vector<2x16x16x128xf32>
    %cst_7 = arith.constant 0.000000e+00 : f32
    %12 = vector.broadcast %cst_7 : f32 to vector<2x1x18x128xf32>
    %cst_8 = arith.constant 0.000000e+00 : f32
    %13 = vector.broadcast %cst_8 : f32 to vector<2x18x1x128xf32>
    %c0_9 = arith.constant 0 : index
    %c0_10 = arith.constant 0 : index
    %c0_11 = arith.constant 0 : index
    %c0_12 = arith.constant 0 : index
    %14 = vector.load %arg7[%c0_9, %c0_10, %c0_11, %c0_12] : memref<2x18x18x128xf32, #tpu.memory_space<vmem>>, vector<2x1x18x128xf32>
    tpu.vector_store %arg7[%c0_9, %c0_10, %c0_11, %c0_12], %12 {strides = array<i32>} : memref<2x18x18x128xf32, #tpu.memory_space<vmem>>, vector<2x1x18x128xf32>,
    %c0_13 = arith.constant 0 : index
    %c17 = arith.constant 17 : index
    %c0_14 = arith.constant 0 : index
    %c0_15 = arith.constant 0 : index
    %15 = vector.load %arg7[%c0_13, %c17, %c0_14, %c0_15] : memref<2x18x18x128xf32, #tpu.memory_space<vmem>>, vector<2x1x18x128xf32>
    tpu.vector_store %arg7[%c0_13, %c17, %c0_14, %c0_15], %12 {strides = array<i32>} : memref<2x18x18x128xf32, #tpu.memory_space<vmem>>, vector<2x1x18x128xf32>,
    %c0_16 = arith.constant 0 : index
    %c0_17 = arith.constant 0 : index
    %c0_18 = arith.constant 0 : index
    %c0_19 = arith.constant 0 : index
    %16 = vector.load %arg7[%c0_16, %c0_17, %c0_18, %c0_19] : memref<2x18x18x128xf32, #tpu.memory_space<vmem>>, vector<2x18x1x128xf32>
    tpu.vector_store %arg7[%c0_16, %c0_17, %c0_18, %c0_19], %13 {strides = array<i32>} : memref<2x18x18x128xf32, #tpu.memory_space<vmem>>, vector<2x18x1x128xf32>,
    %c0_20 = arith.constant 0 : index
    %c0_21 = arith.constant 0 : index
    %c17_22 = arith.constant 17 : index
    %c0_23 = arith.constant 0 : index
    %17 = vector.load %arg7[%c0_20, %c0_21, %c17_22, %c0_23] : memref<2x18x18x128xf32, #tpu.memory_space<vmem>>, vector<2x18x1x128xf32>
    tpu.vector_store %arg7[%c0_20, %c0_21, %c17_22, %c0_23], %13 {strides = array<i32>} : memref<2x18x18x128xf32, #tpu.memory_space<vmem>>, vector<2x18x1x128xf32>,
    %c0_24 = arith.constant 0 : index
    %c1 = arith.constant 1 : index
    %c1_25 = arith.constant 1 : index
    %c0_26 = arith.constant 0 : index
    %18 = vector.load %arg7[%c0_24, %c1, %c1_25, %c0_26] : memref<2x18x18x128xf32, #tpu.memory_space<vmem>>, vector<2x16x16x128xf32>
    tpu.vector_store %arg7[%c0_24, %c1, %c1_25, %c0_26], %11 {strides = array<i32>} : memref<2x18x18x128xf32, #tpu.memory_space<vmem>>, vector<2x16x16x128xf32>,
    %c0_27 = arith.constant 0 : index
    %c0_28 = arith.constant 0 : index
    %c0_29 = arith.constant 0 : index
    %c0_30 = arith.constant 0 : index
    %19 = vector.load %arg7[%c0_27, %c0_28, %c0_29, %c0_30] : memref<2x18x18x128xf32, #tpu.memory_space<vmem>>, vector<2x16x16x128xf32>
    %20 = vector.shape_cast %19 : vector<2x16x16x128xf32> to vector<512x128xf32>
    %21 = arith.truncf %20 : vector<512x128xf32> to vector<512x128xbf16>
    %c0_31 = arith.constant 0 : index
    %c0_32 = arith.constant 0 : index
    %c0_33 = arith.constant 0 : index
    %22 = vector.load %arg4[%c0_31, %c0_32, %c0_33] : memref<9x128x128xbf16, #tpu.memory_space<vmem>>, vector<1x128x128xbf16>
    %23 = vector.shape_cast %22 : vector<1x128x128xbf16> to vector<128x128xbf16>
    %cst_34 = arith.constant dense<0.000000e+00> : vector<512x128xf32>
    %24 = tpu.matmul %21, %23, %cst_34 {dimension_numbers = #tpu.dot_dimension_numbers<[1], [0], [0], [1], [0, 0, 1, 1], [], []>} : vector<512x128xbf16>, vector<128x128xbf16>, vector<512x128xf32> -> vector<512x128xf32>
    %c0_35 = arith.constant 0 : index
    %c0_36 = arith.constant 0 : index
    %c1_37 = arith.constant 1 : index
    %c0_38 = arith.constant 0 : index
    %25 = vector.load %arg7[%c0_35, %c0_36, %c1_37, %c0_38] : memref<2x18x18x128xf32, #tpu.memory_space<vmem>>, vector<2x16x16x128xf32>
    %26 = vector.shape_cast %25 : vector<2x16x16x128xf32> to vector<512x128xf32>
    %27 = arith.truncf %26 : vector<512x128xf32> to vector<512x128xbf16>
    %c1_39 = arith.constant 1 : index
    %c0_40 = arith.constant 0 : index
    %c0_41 = arith.constant 0 : index
    %28 = vector.load %arg4[%c1_39, %c0_40, %c0_41] : memref<9x128x128xbf16, #tpu.memory_space<vmem>>, vector<1x128x128xbf16>
    %29 = vector.shape_cast %28 : vector<1x128x128xbf16> to vector<128x128xbf16>
    %cst_42 = arith.constant dense<0.000000e+00> : vector<512x128xf32>
    %30 = tpu.matmul %27, %29, %cst_42 {dimension_numbers = #tpu.dot_dimension_numbers<[1], [0], [0], [1], [0, 0, 1, 1], [], []>} : vector<512x128xbf16>, vector<128x128xbf16>, vector<512x128xf32> -> vector<512x128xf32>
    %31 = arith.addf %24, %30 : vector<512x128xf32>
    %c0_43 = arith.constant 0 : index
    %c0_44 = arith.constant 0 : index
    %c2 = arith.constant 2 : index
    %c0_45 = arith.constant 0 : index
    %32 = vector.load %arg7[%c0_43, %c0_44, %c2, %c0_45] : memref<2x18x18x128xf32, #tpu.memory_space<vmem>>, vector<2x16x16x128xf32>
    %33 = vector.shape_cast %32 : vector<2x16x16x128xf32> to vector<512x128xf32>
    %34 = arith.truncf %33 : vector<512x128xf32> to vector<512x128xbf16>
    %c2_46 = arith.constant 2 : index
    %c0_47 = arith.constant 0 : index
    %c0_48 = arith.constant 0 : index
    %35 = vector.load %arg4[%c2_46, %c0_47, %c0_48] : memref<9x128x128xbf16, #tpu.memory_space<vmem>>, vector<1x128x128xbf16>
    %36 = vector.shape_cast %35 : vector<1x128x128xbf16> to vector<128x128xbf16>
    %cst_49 = arith.constant dense<0.000000e+00> : vector<512x128xf32>
    %37 = tpu.matmul %34, %36, %cst_49 {dimension_numbers = #tpu.dot_dimension_numbers<[1], [0], [0], [1], [0, 0, 1, 1], [], []>} : vector<512x128xbf16>, vector<128x128xbf16>, vector<512x128xf32> -> vector<512x128xf32>
    %38 = arith.addf %31, %37 : vector<512x128xf32>
    %c0_50 = arith.constant 0 : index
    %c1_51 = arith.constant 1 : index
    %c0_52 = arith.constant 0 : index
    %c0_53 = arith.constant 0 : index
    %39 = vector.load %arg7[%c0_50, %c1_51, %c0_52, %c0_53] : memref<2x18x18x128xf32, #tpu.memory_space<vmem>>, vector<2x16x16x128xf32>
    %40 = vector.shape_cast %39 : vector<2x16x16x128xf32> to vector<512x128xf32>
    %41 = arith.truncf %40 : vector<512x128xf32> to vector<512x128xbf16>
    %c3 = arith.constant 3 : index
    %c0_54 = arith.constant 0 : index
    %c0_55 = arith.constant 0 : index
    %42 = vector.load %arg4[%c3, %c0_54, %c0_55] : memref<9x128x128xbf16, #tpu.memory_space<vmem>>, vector<1x128x128xbf16>
    %43 = vector.shape_cast %42 : vector<1x128x128xbf16> to vector<128x128xbf16>
    %cst_56 = arith.constant dense<0.000000e+00> : vector<512x128xf32>
    %44 = tpu.matmul %41, %43, %cst_56 {dimension_numbers = #tpu.dot_dimension_numbers<[1], [0], [0], [1], [0, 0, 1, 1], [], []>} : vector<512x128xbf16>, vector<128x128xbf16>, vector<512x128xf32> -> vector<512x128xf32>
    %45 = arith.addf %38, %44 : vector<512x128xf32>
    %c0_57 = arith.constant 0 : index
    %c1_58 = arith.constant 1 : index
    %c1_59 = arith.constant 1 : index
    %c0_60 = arith.constant 0 : index
    %46 = vector.load %arg7[%c0_57, %c1_58, %c1_59, %c0_60] : memref<2x18x18x128xf32, #tpu.memory_space<vmem>>, vector<2x16x16x128xf32>
    %47 = vector.shape_cast %46 : vector<2x16x16x128xf32> to vector<512x128xf32>
    %48 = arith.truncf %47 : vector<512x128xf32> to vector<512x128xbf16>
    %c4 = arith.constant 4 : index
    %c0_61 = arith.constant 0 : index
    %c0_62 = arith.constant 0 : index
    %49 = vector.load %arg4[%c4, %c0_61, %c0_62] : memref<9x128x128xbf16, #tpu.memory_space<vmem>>, vector<1x128x128xbf16>
    %50 = vector.shape_cast %49 : vector<1x128x128xbf16> to vector<128x128xbf16>
    %cst_63 = arith.constant dense<0.000000e+00> : vector<512x128xf32>
    %51 = tpu.matmul %48, %50, %cst_63 {dimension_numbers = #tpu.dot_dimension_numbers<[1], [0], [0], [1], [0, 0, 1, 1], [], []>} : vector<512x128xbf16>, vector<128x128xbf16>, vector<512x128xf32> -> vector<512x128xf32>
    %52 = arith.addf %45, %51 : vector<512x128xf32>
    %c0_64 = arith.constant 0 : index
    %c1_65 = arith.constant 1 : index
    %c2_66 = arith.constant 2 : index
    %c0_67 = arith.constant 0 : index
    %53 = vector.load %arg7[%c0_64, %c1_65, %c2_66, %c0_67] : memref<2x18x18x128xf32, #tpu.memory_space<vmem>>, vector<2x16x16x128xf32>
    %54 = vector.shape_cast %53 : vector<2x16x16x128xf32> to vector<512x128xf32>
    %55 = arith.truncf %54 : vector<512x128xf32> to vector<512x128xbf16>
    %c5 = arith.constant 5 : index
    %c0_68 = arith.constant 0 : index
    %c0_69 = arith.constant 0 : index
    %56 = vector.load %arg4[%c5, %c0_68, %c0_69] : memref<9x128x128xbf16, #tpu.memory_space<vmem>>, vector<1x128x128xbf16>
    %57 = vector.shape_cast %56 : vector<1x128x128xbf16> to vector<128x128xbf16>
    %cst_70 = arith.constant dense<0.000000e+00> : vector<512x128xf32>
    %58 = tpu.matmul %55, %57, %cst_70 {dimension_numbers = #tpu.dot_dimension_numbers<[1], [0], [0], [1], [0, 0, 1, 1], [], []>} : vector<512x128xbf16>, vector<128x128xbf16>, vector<512x128xf32> -> vector<512x128xf32>
    %59 = arith.addf %52, %58 : vector<512x128xf32>
    %c0_71 = arith.constant 0 : index
    %c2_72 = arith.constant 2 : index
    %c0_73 = arith.constant 0 : index
    %c0_74 = arith.constant 0 : index
    %60 = vector.load %arg7[%c0_71, %c2_72, %c0_73, %c0_74] : memref<2x18x18x128xf32, #tpu.memory_space<vmem>>, vector<2x16x16x128xf32>
    %61 = vector.shape_cast %60 : vector<2x16x16x128xf32> to vector<512x128xf32>
    %62 = arith.truncf %61 : vector<512x128xf32> to vector<512x128xbf16>
    %c6 = arith.constant 6 : index
    %c0_75 = arith.constant 0 : index
    %c0_76 = arith.constant 0 : index
    %63 = vector.load %arg4[%c6, %c0_75, %c0_76] : memref<9x128x128xbf16, #tpu.memory_space<vmem>>, vector<1x128x128xbf16>
    %64 = vector.shape_cast %63 : vector<1x128x128xbf16> to vector<128x128xbf16>
    %cst_77 = arith.constant dense<0.000000e+00> : vector<512x128xf32>
    %65 = tpu.matmul %62, %64, %cst_77 {dimension_numbers = #tpu.dot_dimension_numbers<[1], [0], [0], [1], [0, 0, 1, 1], [], []>} : vector<512x128xbf16>, vector<128x128xbf16>, vector<512x128xf32> -> vector<512x128xf32>
    %66 = arith.addf %59, %65 : vector<512x128xf32>
    %c0_78 = arith.constant 0 : index
    %c2_79 = arith.constant 2 : index
    %c1_80 = arith.constant 1 : index
    %c0_81 = arith.constant 0 : index
    %67 = vector.load %arg7[%c0_78, %c2_79, %c1_80, %c0_81] : memref<2x18x18x128xf32, #tpu.memory_space<vmem>>, vector<2x16x16x128xf32>
    %68 = vector.shape_cast %67 : vector<2x16x16x128xf32> to vector<512x128xf32>
    %69 = arith.truncf %68 : vector<512x128xf32> to vector<512x128xbf16>
    %c7 = arith.constant 7 : index
    %c0_82 = arith.constant 0 : index
    %c0_83 = arith.constant 0 : index
    %70 = vector.load %arg4[%c7, %c0_82, %c0_83] : memref<9x128x128xbf16, #tpu.memory_space<vmem>>, vector<1x128x128xbf16>
    %71 = vector.shape_cast %70 : vector<1x128x128xbf16> to vector<128x128xbf16>
    %cst_84 = arith.constant dense<0.000000e+00> : vector<512x128xf32>
    %72 = tpu.matmul %69, %71, %cst_84 {dimension_numbers = #tpu.dot_dimension_numbers<[1], [0], [0], [1], [0, 0, 1, 1], [], []>} : vector<512x128xbf16>, vector<128x128xbf16>, vector<512x128xf32> -> vector<512x128xf32>
    %73 = arith.addf %66, %72 : vector<512x128xf32>
    %c0_85 = arith.constant 0 : index
    %c2_86 = arith.constant 2 : index
    %c2_87 = arith.constant 2 : index
    %c0_88 = arith.constant 0 : index
    %74 = vector.load %arg7[%c0_85, %c2_86, %c2_87, %c0_88] : memref<2x18x18x128xf32, #tpu.memory_space<vmem>>, vector<2x16x16x128xf32>
    %75 = vector.shape_cast %74 : vector<2x16x16x128xf32> to vector<512x128xf32>
    %76 = arith.truncf %75 : vector<512x128xf32> to vector<512x128xbf16>
    %c8 = arith.constant 8 : index
    %c0_89 = arith.constant 0 : index
    %c0_90 = arith.constant 0 : index
    %77 = vector.load %arg4[%c8, %c0_89, %c0_90] : memref<9x128x128xbf16, #tpu.memory_space<vmem>>, vector<1x128x128xbf16>
    %78 = vector.shape_cast %77 : vector<1x128x128xbf16> to vector<128x128xbf16>
    %cst_91 = arith.constant dense<0.000000e+00> : vector<512x128xf32>
    %79 = tpu.matmul %76, %78, %cst_91 {dimension_numbers = #tpu.dot_dimension_numbers<[1], [0], [0], [1], [0, 0, 1, 1], [], []>} : vector<512x128xbf16>, vector<128x128xbf16>, vector<512x128xf32> -> vector<512x128xf32>
    %80 = arith.addf %73, %79 : vector<512x128xf32>
    %81 = vector.shape_cast %80 : vector<512x128xf32> to vector<2x16x16x128xf32>
    %82 = arith.truncf %81 : vector<2x16x16x128xf32> to vector<2x16x16x128xbf16>
    %c0_92 = arith.constant 0 : index
    %c0_93 = arith.constant 0 : index
    %c0_94 = arith.constant 0 : index
    %c0_95 = arith.constant 0 : index
    %83 = vector.load %arg5[%c0_92, %c0_93, %c0_94, %c0_95] : memref<2x16x16x128xbf16, #tpu.memory_space<vmem>>, vector<2x16x16x128xbf16>
    tpu.vector_store %arg5[%c0_92, %c0_93, %c0_94, %c0_95], %82 {strides = array<i32>} : memref<2x16x16x128xbf16, #tpu.memory_space<vmem>>, vector<2x16x16x128xbf16>,
    %cst_96 = arith.constant dense<0.000000e+00> : vector<128xf32>
    %84 = vector.multi_reduction <add>, %80, %cst_96 [0] : vector<512x128xf32> to vector<128xf32>
    %85 = vector.shape_cast %84 : vector<128xf32> to vector<1x128xf32>
    %86 = arith.mulf %80, %80 : vector<512x128xf32>
    %cst_97 = arith.constant dense<0.000000e+00> : vector<128xf32>
    %87 = vector.multi_reduction <add>, %86, %cst_97 [0] : vector<512x128xf32> to vector<128xf32>
    %88 = vector.shape_cast %87 : vector<128xf32> to vector<1x128xf32>
    %89 = tpu.concatenate %85, %88 in 0 : vector<1x128xf32>, vector<1x128xf32> -> vector<2x128xf32>
    %90 = vector.shape_cast %89 : vector<2x128xf32> to vector<1x2x128xf32>
    %c0_98 = arith.constant 0 : index
    %c0_99 = arith.constant 0 : index
    %c0_100 = arith.constant 0 : index
    %91 = vector.load %arg6[%c0_98, %c0_99, %c0_100] : memref<1x2x128xf32, #tpu.memory_space<vmem>>, vector<1x2x128xf32>
    tpu.vector_store %arg6[%c0_98, %c0_99, %c0_100], %90 {strides = array<i32>} : memref<1x2x128xf32, #tpu.memory_space<vmem>>, vector<1x2x128xf32>,
    return
  }
  func.func @transform_0(%arg0: i32) -> (i32, i32, i32, i32) {
    %c0_i32 = arith.constant 0 : i32
    %c0_i32_0 = arith.constant 0 : i32
    %c0_i32_1 = arith.constant 0 : i32
    %c0_i32_2 = arith.constant 0 : i32
    return %arg0, %c0_i32, %c0_i32_0, %c0_i32_1 : i32, i32, i32, i32
  }
  func.func @transform_1(%arg0: i32) -> (i32, i32) {
    %c0_i32 = arith.constant 0 : i32
    %c0_i32_0 = arith.constant 0 : i32
    %c0_i32_1 = arith.constant 0 : i32
    return %c0_i32, %c0_i32_0 : i32, i32
  }
  func.func @transform_2(%arg0: i32) -> (i32, i32) {
    %c0_i32 = arith.constant 0 : i32
    %c0_i32_0 = arith.constant 0 : i32
    %c0_i32_1 = arith.constant 0 : i32
    return %c0_i32, %c0_i32_0 : i32, i32
  }
  func.func @transform_3(%arg0: i32) -> (i32, i32, i32) {
    %c0_i32 = arith.constant 0 : i32
    %c0_i32_0 = arith.constant 0 : i32
    %c0_i32_1 = arith.constant 0 : i32
    %c0_i32_2 = arith.constant 0 : i32
    return %c0_i32, %c0_i32_0, %c0_i32_1 : i32, i32, i32
  }
  func.func @transform_4(%arg0: i32) -> (i32, i32, i32, i32) {
    %c0_i32 = arith.constant 0 : i32
    %c0_i32_0 = arith.constant 0 : i32
    %c0_i32_1 = arith.constant 0 : i32
    %c0_i32_2 = arith.constant 0 : i32
    return %arg0, %c0_i32, %c0_i32_0, %c0_i32_1 : i32, i32, i32, i32
  }
  func.func @transform_5(%arg0: i32) -> (i32, i32, i32) {
    %c0_i32 = arith.constant 0 : i32
    %c0_i32_0 = arith.constant 0 : i32
    %c0_i32_1 = arith.constant 0 : i32
    return %arg0, %c0_i32, %c0_i32_0 : i32, i32, i32
  }
}

module attributes {stable_mosaic.version = 11 : i64} {
  func.func @bn_add_relu_kernel(%arg0: i32, %arg1: memref<2x16x16x128xbf16, #tpu.memory_space<vmem>>, %arg2: memref<2x16x16x128xf32, #tpu.memory_space<vmem>>, %arg3: memref<1x128xf32, #tpu.memory_space<vmem>>, %arg4: memref<1x128xf32, #tpu.memory_space<vmem>>, %arg5: memref<2x16x16x128xbf16, #tpu.memory_space<vmem>>) attributes {dimension_semantics = [#tpu.dimension_semantics<parallel>], iteration_bounds = array<i64: 1>, scalar_prefetch = 0 : i64, scratch_operands = 0 : i64, tpu.core_type = #tpu.core_type<tc>, window_params = [{transform_indices = @transform_0, window_bounds = array<i64: 2, 16, 16, 128>}, {transform_indices = @transform_1, window_bounds = array<i64: 2, 16, 16, 128>}, {pipeline_mode = #tpu.pipeline_mode<synchronous>, transform_indices = @transform_2, window_bounds = array<i64: 1, 128>}, {pipeline_mode = #tpu.pipeline_mode<synchronous>, transform_indices = @transform_3, window_bounds = array<i64: 1, 128>}, {transform_indices = @transform_4, window_bounds = array<i64: 2, 16, 16, 128>}]} {
    %c0 = arith.constant 0 : index
    %c0_0 = arith.constant 0 : index
    %0 = vector.load %arg3[%c0, %c0_0] : memref<1x128xf32, #tpu.memory_space<vmem>>, vector<1x128xf32>
    %1 = vector.shape_cast %0 : vector<1x128xf32> to vector<1x1x1x128xf32>
    %c0_1 = arith.constant 0 : index
    %c0_2 = arith.constant 0 : index
    %2 = vector.load %arg4[%c0_1, %c0_2] : memref<1x128xf32, #tpu.memory_space<vmem>>, vector<1x128xf32>
    %3 = vector.shape_cast %2 : vector<1x128xf32> to vector<1x1x1x128xf32>
    %c0_3 = arith.constant 0 : index
    %c0_4 = arith.constant 0 : index
    %c0_5 = arith.constant 0 : index
    %c0_6 = arith.constant 0 : index
    %4 = vector.load %arg1[%c0_3, %c0_4, %c0_5, %c0_6] : memref<2x16x16x128xbf16, #tpu.memory_space<vmem>>, vector<2x16x16x128xbf16>
    %5 = arith.extf %4 : vector<2x16x16x128xbf16> to vector<2x16x16x128xf32>
    %6 = vector.broadcast %1 : vector<1x1x1x128xf32> to vector<2x16x16x128xf32>
    %7 = arith.mulf %5, %6 : vector<2x16x16x128xf32>
    %8 = vector.broadcast %3 : vector<1x1x1x128xf32> to vector<2x16x16x128xf32>
    %9 = arith.addf %7, %8 : vector<2x16x16x128xf32>
    %c0_7 = arith.constant 0 : index
    %c0_8 = arith.constant 0 : index
    %c0_9 = arith.constant 0 : index
    %c0_10 = arith.constant 0 : index
    %10 = vector.load %arg2[%c0_7, %c0_8, %c0_9, %c0_10] : memref<2x16x16x128xf32, #tpu.memory_space<vmem>>, vector<2x16x16x128xf32>
    %11 = arith.addf %9, %10 : vector<2x16x16x128xf32>
    %cst = arith.constant 0.000000e+00 : f32
    %12 = vector.broadcast %cst : f32 to vector<2x16x16x128xf32>
    %13 = arith.maximumf %11, %12 : vector<2x16x16x128xf32>
    %14 = arith.truncf %13 : vector<2x16x16x128xf32> to vector<2x16x16x128xbf16>
    %c0_11 = arith.constant 0 : index
    %c0_12 = arith.constant 0 : index
    %c0_13 = arith.constant 0 : index
    %c0_14 = arith.constant 0 : index
    %15 = vector.load %arg5[%c0_11, %c0_12, %c0_13, %c0_14] : memref<2x16x16x128xbf16, #tpu.memory_space<vmem>>, vector<2x16x16x128xbf16>
    tpu.vector_store %arg5[%c0_11, %c0_12, %c0_13, %c0_14], %14 {strides = array<i32>} : memref<2x16x16x128xbf16, #tpu.memory_space<vmem>>, vector<2x16x16x128xbf16>,
    return
  }
  func.func @transform_0(%arg0: i32) -> (i32, i32, i32, i32) {
    %c0_i32 = arith.constant 0 : i32
    %c0_i32_0 = arith.constant 0 : i32
    %c0_i32_1 = arith.constant 0 : i32
    %c0_i32_2 = arith.constant 0 : i32
    return %arg0, %c0_i32, %c0_i32_0, %c0_i32_1 : i32, i32, i32, i32
  }
  func.func @transform_1(%arg0: i32) -> (i32, i32, i32, i32) {
    %c0_i32 = arith.constant 0 : i32
    %c0_i32_0 = arith.constant 0 : i32
    %c0_i32_1 = arith.constant 0 : i32
    %c0_i32_2 = arith.constant 0 : i32
    return %arg0, %c0_i32, %c0_i32_0, %c0_i32_1 : i32, i32, i32, i32
  }
  func.func @transform_2(%arg0: i32) -> (i32, i32) {
    %c0_i32 = arith.constant 0 : i32
    %c0_i32_0 = arith.constant 0 : i32
    %c0_i32_1 = arith.constant 0 : i32
    return %c0_i32, %c0_i32_0 : i32, i32
  }
  func.func @transform_3(%arg0: i32) -> (i32, i32) {
    %c0_i32 = arith.constant 0 : i32
    %c0_i32_0 = arith.constant 0 : i32
    %c0_i32_1 = arith.constant 0 : i32
    return %c0_i32, %c0_i32_0 : i32, i32
  }
  func.func @transform_4(%arg0: i32) -> (i32, i32, i32, i32) {
    %c0_i32 = arith.constant 0 : i32
    %c0_i32_0 = arith.constant 0 : i32
    %c0_i32_1 = arith.constant 0 : i32
    %c0_i32_2 = arith.constant 0 : i32
    return %arg0, %c0_i32, %c0_i32_0, %c0_i32_1 : i32, i32, i32, i32
  }
}

module attributes {stable_mosaic.version = 11 : i64} {
  func.func @conv1_stats_kernel(%arg0: i32, %arg1: memref<2x16x16x128xf32, #tpu.memory_space<vmem>>, %arg2: memref<9x128x128xbf16, #tpu.memory_space<vmem>>, %arg3: memref<2x16x16x128xbf16, #tpu.memory_space<vmem>>, %arg4: memref<1x2x128xf32, #tpu.memory_space<vmem>>, %arg5: memref<2x18x18x128xf32, #tpu.memory_space<vmem>>) attributes {dimension_semantics = [#tpu.dimension_semantics<parallel>], iteration_bounds = array<i64: 1>, scalar_prefetch = 0 : i64, scratch_operands = 1 : i64, tpu.core_type = #tpu.core_type<tc>, window_params = [{transform_indices = @transform_0, window_bounds = array<i64: 2, 16, 16, 128>}, {pipeline_mode = #tpu.pipeline_mode<synchronous>, transform_indices = @transform_1, window_bounds = array<i64: 9, 128, 128>}, {transform_indices = @transform_2, window_bounds = array<i64: 2, 16, 16, 128>}, {transform_indices = @transform_3, window_bounds = array<i64: 1, 2, 128>}]} {
    %cst = arith.constant 0.000000e+00 : f32
    %0 = vector.broadcast %cst : f32 to vector<2x1x18x128xf32>
    %cst_0 = arith.constant 0.000000e+00 : f32
    %1 = vector.broadcast %cst_0 : f32 to vector<2x18x1x128xf32>
    %c0 = arith.constant 0 : index
    %c0_1 = arith.constant 0 : index
    %c0_2 = arith.constant 0 : index
    %c0_3 = arith.constant 0 : index
    %2 = vector.load %arg5[%c0, %c0_1, %c0_2, %c0_3] : memref<2x18x18x128xf32, #tpu.memory_space<vmem>>, vector<2x1x18x128xf32>
    tpu.vector_store %arg5[%c0, %c0_1, %c0_2, %c0_3], %0 {strides = array<i32>} : memref<2x18x18x128xf32, #tpu.memory_space<vmem>>, vector<2x1x18x128xf32>,
    %c0_4 = arith.constant 0 : index
    %c17 = arith.constant 17 : index
    %c0_5 = arith.constant 0 : index
    %c0_6 = arith.constant 0 : index
    %3 = vector.load %arg5[%c0_4, %c17, %c0_5, %c0_6] : memref<2x18x18x128xf32, #tpu.memory_space<vmem>>, vector<2x1x18x128xf32>
    tpu.vector_store %arg5[%c0_4, %c17, %c0_5, %c0_6], %0 {strides = array<i32>} : memref<2x18x18x128xf32, #tpu.memory_space<vmem>>, vector<2x1x18x128xf32>,
    %c0_7 = arith.constant 0 : index
    %c0_8 = arith.constant 0 : index
    %c0_9 = arith.constant 0 : index
    %c0_10 = arith.constant 0 : index
    %4 = vector.load %arg5[%c0_7, %c0_8, %c0_9, %c0_10] : memref<2x18x18x128xf32, #tpu.memory_space<vmem>>, vector<2x18x1x128xf32>
    tpu.vector_store %arg5[%c0_7, %c0_8, %c0_9, %c0_10], %1 {strides = array<i32>} : memref<2x18x18x128xf32, #tpu.memory_space<vmem>>, vector<2x18x1x128xf32>,
    %c0_11 = arith.constant 0 : index
    %c0_12 = arith.constant 0 : index
    %c17_13 = arith.constant 17 : index
    %c0_14 = arith.constant 0 : index
    %5 = vector.load %arg5[%c0_11, %c0_12, %c17_13, %c0_14] : memref<2x18x18x128xf32, #tpu.memory_space<vmem>>, vector<2x18x1x128xf32>
    tpu.vector_store %arg5[%c0_11, %c0_12, %c17_13, %c0_14], %1 {strides = array<i32>} : memref<2x18x18x128xf32, #tpu.memory_space<vmem>>, vector<2x18x1x128xf32>,
    %c0_15 = arith.constant 0 : index
    %c0_16 = arith.constant 0 : index
    %c0_17 = arith.constant 0 : index
    %c0_18 = arith.constant 0 : index
    %6 = vector.load %arg1[%c0_15, %c0_16, %c0_17, %c0_18] : memref<2x16x16x128xf32, #tpu.memory_space<vmem>>, vector<2x16x16x128xf32>
    %c0_19 = arith.constant 0 : index
    %c1 = arith.constant 1 : index
    %c1_20 = arith.constant 1 : index
    %c0_21 = arith.constant 0 : index
    %7 = vector.load %arg5[%c0_19, %c1, %c1_20, %c0_21] : memref<2x18x18x128xf32, #tpu.memory_space<vmem>>, vector<2x16x16x128xf32>
    tpu.vector_store %arg5[%c0_19, %c1, %c1_20, %c0_21], %6 {strides = array<i32>} : memref<2x18x18x128xf32, #tpu.memory_space<vmem>>, vector<2x16x16x128xf32>,
    %c0_22 = arith.constant 0 : index
    %c0_23 = arith.constant 0 : index
    %c0_24 = arith.constant 0 : index
    %c0_25 = arith.constant 0 : index
    %8 = vector.load %arg5[%c0_22, %c0_23, %c0_24, %c0_25] : memref<2x18x18x128xf32, #tpu.memory_space<vmem>>, vector<2x16x16x128xf32>
    %9 = vector.shape_cast %8 : vector<2x16x16x128xf32> to vector<512x128xf32>
    %10 = arith.truncf %9 : vector<512x128xf32> to vector<512x128xbf16>
    %c0_26 = arith.constant 0 : index
    %c0_27 = arith.constant 0 : index
    %c0_28 = arith.constant 0 : index
    %11 = vector.load %arg2[%c0_26, %c0_27, %c0_28] : memref<9x128x128xbf16, #tpu.memory_space<vmem>>, vector<1x128x128xbf16>
    %12 = vector.shape_cast %11 : vector<1x128x128xbf16> to vector<128x128xbf16>
    %cst_29 = arith.constant dense<0.000000e+00> : vector<512x128xf32>
    %13 = tpu.matmul %10, %12, %cst_29 {dimension_numbers = #tpu.dot_dimension_numbers<[1], [0], [0], [1], [0, 0, 1, 1], [], []>} : vector<512x128xbf16>, vector<128x128xbf16>, vector<512x128xf32> -> vector<512x128xf32>
    %c0_30 = arith.constant 0 : index
    %c0_31 = arith.constant 0 : index
    %c1_32 = arith.constant 1 : index
    %c0_33 = arith.constant 0 : index
    %14 = vector.load %arg5[%c0_30, %c0_31, %c1_32, %c0_33] : memref<2x18x18x128xf32, #tpu.memory_space<vmem>>, vector<2x16x16x128xf32>
    %15 = vector.shape_cast %14 : vector<2x16x16x128xf32> to vector<512x128xf32>
    %16 = arith.truncf %15 : vector<512x128xf32> to vector<512x128xbf16>
    %c1_34 = arith.constant 1 : index
    %c0_35 = arith.constant 0 : index
    %c0_36 = arith.constant 0 : index
    %17 = vector.load %arg2[%c1_34, %c0_35, %c0_36] : memref<9x128x128xbf16, #tpu.memory_space<vmem>>, vector<1x128x128xbf16>
    %18 = vector.shape_cast %17 : vector<1x128x128xbf16> to vector<128x128xbf16>
    %cst_37 = arith.constant dense<0.000000e+00> : vector<512x128xf32>
    %19 = tpu.matmul %16, %18, %cst_37 {dimension_numbers = #tpu.dot_dimension_numbers<[1], [0], [0], [1], [0, 0, 1, 1], [], []>} : vector<512x128xbf16>, vector<128x128xbf16>, vector<512x128xf32> -> vector<512x128xf32>
    %20 = arith.addf %13, %19 : vector<512x128xf32>
    %c0_38 = arith.constant 0 : index
    %c0_39 = arith.constant 0 : index
    %c2 = arith.constant 2 : index
    %c0_40 = arith.constant 0 : index
    %21 = vector.load %arg5[%c0_38, %c0_39, %c2, %c0_40] : memref<2x18x18x128xf32, #tpu.memory_space<vmem>>, vector<2x16x16x128xf32>
    %22 = vector.shape_cast %21 : vector<2x16x16x128xf32> to vector<512x128xf32>
    %23 = arith.truncf %22 : vector<512x128xf32> to vector<512x128xbf16>
    %c2_41 = arith.constant 2 : index
    %c0_42 = arith.constant 0 : index
    %c0_43 = arith.constant 0 : index
    %24 = vector.load %arg2[%c2_41, %c0_42, %c0_43] : memref<9x128x128xbf16, #tpu.memory_space<vmem>>, vector<1x128x128xbf16>
    %25 = vector.shape_cast %24 : vector<1x128x128xbf16> to vector<128x128xbf16>
    %cst_44 = arith.constant dense<0.000000e+00> : vector<512x128xf32>
    %26 = tpu.matmul %23, %25, %cst_44 {dimension_numbers = #tpu.dot_dimension_numbers<[1], [0], [0], [1], [0, 0, 1, 1], [], []>} : vector<512x128xbf16>, vector<128x128xbf16>, vector<512x128xf32> -> vector<512x128xf32>
    %27 = arith.addf %20, %26 : vector<512x128xf32>
    %c0_45 = arith.constant 0 : index
    %c1_46 = arith.constant 1 : index
    %c0_47 = arith.constant 0 : index
    %c0_48 = arith.constant 0 : index
    %28 = vector.load %arg5[%c0_45, %c1_46, %c0_47, %c0_48] : memref<2x18x18x128xf32, #tpu.memory_space<vmem>>, vector<2x16x16x128xf32>
    %29 = vector.shape_cast %28 : vector<2x16x16x128xf32> to vector<512x128xf32>
    %30 = arith.truncf %29 : vector<512x128xf32> to vector<512x128xbf16>
    %c3 = arith.constant 3 : index
    %c0_49 = arith.constant 0 : index
    %c0_50 = arith.constant 0 : index
    %31 = vector.load %arg2[%c3, %c0_49, %c0_50] : memref<9x128x128xbf16, #tpu.memory_space<vmem>>, vector<1x128x128xbf16>
    %32 = vector.shape_cast %31 : vector<1x128x128xbf16> to vector<128x128xbf16>
    %cst_51 = arith.constant dense<0.000000e+00> : vector<512x128xf32>
    %33 = tpu.matmul %30, %32, %cst_51 {dimension_numbers = #tpu.dot_dimension_numbers<[1], [0], [0], [1], [0, 0, 1, 1], [], []>} : vector<512x128xbf16>, vector<128x128xbf16>, vector<512x128xf32> -> vector<512x128xf32>
    %34 = arith.addf %27, %33 : vector<512x128xf32>
    %c0_52 = arith.constant 0 : index
    %c1_53 = arith.constant 1 : index
    %c1_54 = arith.constant 1 : index
    %c0_55 = arith.constant 0 : index
    %35 = vector.load %arg5[%c0_52, %c1_53, %c1_54, %c0_55] : memref<2x18x18x128xf32, #tpu.memory_space<vmem>>, vector<2x16x16x128xf32>
    %36 = vector.shape_cast %35 : vector<2x16x16x128xf32> to vector<512x128xf32>
    %37 = arith.truncf %36 : vector<512x128xf32> to vector<512x128xbf16>
    %c4 = arith.constant 4 : index
    %c0_56 = arith.constant 0 : index
    %c0_57 = arith.constant 0 : index
    %38 = vector.load %arg2[%c4, %c0_56, %c0_57] : memref<9x128x128xbf16, #tpu.memory_space<vmem>>, vector<1x128x128xbf16>
    %39 = vector.shape_cast %38 : vector<1x128x128xbf16> to vector<128x128xbf16>
    %cst_58 = arith.constant dense<0.000000e+00> : vector<512x128xf32>
    %40 = tpu.matmul %37, %39, %cst_58 {dimension_numbers = #tpu.dot_dimension_numbers<[1], [0], [0], [1], [0, 0, 1, 1], [], []>} : vector<512x128xbf16>, vector<128x128xbf16>, vector<512x128xf32> -> vector<512x128xf32>
    %41 = arith.addf %34, %40 : vector<512x128xf32>
    %c0_59 = arith.constant 0 : index
    %c1_60 = arith.constant 1 : index
    %c2_61 = arith.constant 2 : index
    %c0_62 = arith.constant 0 : index
    %42 = vector.load %arg5[%c0_59, %c1_60, %c2_61, %c0_62] : memref<2x18x18x128xf32, #tpu.memory_space<vmem>>, vector<2x16x16x128xf32>
    %43 = vector.shape_cast %42 : vector<2x16x16x128xf32> to vector<512x128xf32>
    %44 = arith.truncf %43 : vector<512x128xf32> to vector<512x128xbf16>
    %c5 = arith.constant 5 : index
    %c0_63 = arith.constant 0 : index
    %c0_64 = arith.constant 0 : index
    %45 = vector.load %arg2[%c5, %c0_63, %c0_64] : memref<9x128x128xbf16, #tpu.memory_space<vmem>>, vector<1x128x128xbf16>
    %46 = vector.shape_cast %45 : vector<1x128x128xbf16> to vector<128x128xbf16>
    %cst_65 = arith.constant dense<0.000000e+00> : vector<512x128xf32>
    %47 = tpu.matmul %44, %46, %cst_65 {dimension_numbers = #tpu.dot_dimension_numbers<[1], [0], [0], [1], [0, 0, 1, 1], [], []>} : vector<512x128xbf16>, vector<128x128xbf16>, vector<512x128xf32> -> vector<512x128xf32>
    %48 = arith.addf %41, %47 : vector<512x128xf32>
    %c0_66 = arith.constant 0 : index
    %c2_67 = arith.constant 2 : index
    %c0_68 = arith.constant 0 : index
    %c0_69 = arith.constant 0 : index
    %49 = vector.load %arg5[%c0_66, %c2_67, %c0_68, %c0_69] : memref<2x18x18x128xf32, #tpu.memory_space<vmem>>, vector<2x16x16x128xf32>
    %50 = vector.shape_cast %49 : vector<2x16x16x128xf32> to vector<512x128xf32>
    %51 = arith.truncf %50 : vector<512x128xf32> to vector<512x128xbf16>
    %c6 = arith.constant 6 : index
    %c0_70 = arith.constant 0 : index
    %c0_71 = arith.constant 0 : index
    %52 = vector.load %arg2[%c6, %c0_70, %c0_71] : memref<9x128x128xbf16, #tpu.memory_space<vmem>>, vector<1x128x128xbf16>
    %53 = vector.shape_cast %52 : vector<1x128x128xbf16> to vector<128x128xbf16>
    %cst_72 = arith.constant dense<0.000000e+00> : vector<512x128xf32>
    %54 = tpu.matmul %51, %53, %cst_72 {dimension_numbers = #tpu.dot_dimension_numbers<[1], [0], [0], [1], [0, 0, 1, 1], [], []>} : vector<512x128xbf16>, vector<128x128xbf16>, vector<512x128xf32> -> vector<512x128xf32>
    %55 = arith.addf %48, %54 : vector<512x128xf32>
    %c0_73 = arith.constant 0 : index
    %c2_74 = arith.constant 2 : index
    %c1_75 = arith.constant 1 : index
    %c0_76 = arith.constant 0 : index
    %56 = vector.load %arg5[%c0_73, %c2_74, %c1_75, %c0_76] : memref<2x18x18x128xf32, #tpu.memory_space<vmem>>, vector<2x16x16x128xf32>
    %57 = vector.shape_cast %56 : vector<2x16x16x128xf32> to vector<512x128xf32>
    %58 = arith.truncf %57 : vector<512x128xf32> to vector<512x128xbf16>
    %c7 = arith.constant 7 : index
    %c0_77 = arith.constant 0 : index
    %c0_78 = arith.constant 0 : index
    %59 = vector.load %arg2[%c7, %c0_77, %c0_78] : memref<9x128x128xbf16, #tpu.memory_space<vmem>>, vector<1x128x128xbf16>
    %60 = vector.shape_cast %59 : vector<1x128x128xbf16> to vector<128x128xbf16>
    %cst_79 = arith.constant dense<0.000000e+00> : vector<512x128xf32>
    %61 = tpu.matmul %58, %60, %cst_79 {dimension_numbers = #tpu.dot_dimension_numbers<[1], [0], [0], [1], [0, 0, 1, 1], [], []>} : vector<512x128xbf16>, vector<128x128xbf16>, vector<512x128xf32> -> vector<512x128xf32>
    %62 = arith.addf %55, %61 : vector<512x128xf32>
    %c0_80 = arith.constant 0 : index
    %c2_81 = arith.constant 2 : index
    %c2_82 = arith.constant 2 : index
    %c0_83 = arith.constant 0 : index
    %63 = vector.load %arg5[%c0_80, %c2_81, %c2_82, %c0_83] : memref<2x18x18x128xf32, #tpu.memory_space<vmem>>, vector<2x16x16x128xf32>
    %64 = vector.shape_cast %63 : vector<2x16x16x128xf32> to vector<512x128xf32>
    %65 = arith.truncf %64 : vector<512x128xf32> to vector<512x128xbf16>
    %c8 = arith.constant 8 : index
    %c0_84 = arith.constant 0 : index
    %c0_85 = arith.constant 0 : index
    %66 = vector.load %arg2[%c8, %c0_84, %c0_85] : memref<9x128x128xbf16, #tpu.memory_space<vmem>>, vector<1x128x128xbf16>
    %67 = vector.shape_cast %66 : vector<1x128x128xbf16> to vector<128x128xbf16>
    %cst_86 = arith.constant dense<0.000000e+00> : vector<512x128xf32>
    %68 = tpu.matmul %65, %67, %cst_86 {dimension_numbers = #tpu.dot_dimension_numbers<[1], [0], [0], [1], [0, 0, 1, 1], [], []>} : vector<512x128xbf16>, vector<128x128xbf16>, vector<512x128xf32> -> vector<512x128xf32>
    %69 = arith.addf %62, %68 : vector<512x128xf32>
    %70 = vector.shape_cast %69 : vector<512x128xf32> to vector<2x16x16x128xf32>
    %71 = arith.truncf %70 : vector<2x16x16x128xf32> to vector<2x16x16x128xbf16>
    %c0_87 = arith.constant 0 : index
    %c0_88 = arith.constant 0 : index
    %c0_89 = arith.constant 0 : index
    %c0_90 = arith.constant 0 : index
    %72 = vector.load %arg3[%c0_87, %c0_88, %c0_89, %c0_90] : memref<2x16x16x128xbf16, #tpu.memory_space<vmem>>, vector<2x16x16x128xbf16>
    tpu.vector_store %arg3[%c0_87, %c0_88, %c0_89, %c0_90], %71 {strides = array<i32>} : memref<2x16x16x128xbf16, #tpu.memory_space<vmem>>, vector<2x16x16x128xbf16>,
    %cst_91 = arith.constant dense<0.000000e+00> : vector<128xf32>
    %73 = vector.multi_reduction <add>, %69, %cst_91 [0] : vector<512x128xf32> to vector<128xf32>
    %74 = vector.shape_cast %73 : vector<128xf32> to vector<1x128xf32>
    %75 = arith.mulf %69, %69 : vector<512x128xf32>
    %cst_92 = arith.constant dense<0.000000e+00> : vector<128xf32>
    %76 = vector.multi_reduction <add>, %75, %cst_92 [0] : vector<512x128xf32> to vector<128xf32>
    %77 = vector.shape_cast %76 : vector<128xf32> to vector<1x128xf32>
    %78 = tpu.concatenate %74, %77 in 0 : vector<1x128xf32>, vector<1x128xf32> -> vector<2x128xf32>
    %79 = vector.shape_cast %78 : vector<2x128xf32> to vector<1x2x128xf32>
    %c0_93 = arith.constant 0 : index
    %c0_94 = arith.constant 0 : index
    %c0_95 = arith.constant 0 : index
    %80 = vector.load %arg4[%c0_93, %c0_94, %c0_95] : memref<1x2x128xf32, #tpu.memory_space<vmem>>, vector<1x2x128xf32>
    tpu.vector_store %arg4[%c0_93, %c0_94, %c0_95], %79 {strides = array<i32>} : memref<1x2x128xf32, #tpu.memory_space<vmem>>, vector<1x2x128xf32>,
    return
  }
  func.func @transform_0(%arg0: i32) -> (i32, i32, i32, i32) {
    %c0_i32 = arith.constant 0 : i32
    %c0_i32_0 = arith.constant 0 : i32
    %c0_i32_1 = arith.constant 0 : i32
    %c0_i32_2 = arith.constant 0 : i32
    return %arg0, %c0_i32, %c0_i32_0, %c0_i32_1 : i32, i32, i32, i32
  }
  func.func @transform_1(%arg0: i32) -> (i32, i32, i32) {
    %c0_i32 = arith.constant 0 : i32
    %c0_i32_0 = arith.constant 0 : i32
    %c0_i32_1 = arith.constant 0 : i32
    %c0_i32_2 = arith.constant 0 : i32
    return %c0_i32, %c0_i32_0, %c0_i32_1 : i32, i32, i32
  }
  func.func @transform_2(%arg0: i32) -> (i32, i32, i32, i32) {
    %c0_i32 = arith.constant 0 : i32
    %c0_i32_0 = arith.constant 0 : i32
    %c0_i32_1 = arith.constant 0 : i32
    %c0_i32_2 = arith.constant 0 : i32
    return %arg0, %c0_i32, %c0_i32_0, %c0_i32_1 : i32, i32, i32, i32
  }
  func.func @transform_3(%arg0: i32) -> (i32, i32, i32) {
    %c0_i32 = arith.constant 0 : i32
    %c0_i32_0 = arith.constant 0 : i32
    %c0_i32_1 = arith.constant 0 : i32
    return %arg0, %c0_i32, %c0_i32_0 : i32, i32, i32
  }
}

</mosaic_0001>

<bundles_post_ra>
// kernel: basic_block_forward.5
= control target key start
LH: loop header
LB: loop body
LE: loop exit
PB: predicated region body
PF: predicated region fallthrough
CT: control target
= control target key end

     0   :  { %s1830_s0 = inlined_call_operand.vmem [shape: bf16[2,16,16,128], index: 0, kind: input, shape index: {}, may-alias: {0,4}]   ;;  %s1831_s2 = inlined_call_operand.vmem [shape: f32[1,128], index: 2, kind: input, shape index: {}]   ;;  %s1832_s3 = inlined_call_operand.vmem [shape: f32[1,128], index: 3, kind: input, shape index: {}]   ;;  %s1833_s1 = inlined_call_operand.vmem [shape: f32[2,16,16,128], index: 1, kind: input, shape index: {}]   ;;  %s1834_s4 = inlined_call_operand.vmem [shape: bf16[2,16,16,128], index: 4, kind: output, shape index: {}, may-alias: {0,4}]  }
   0x1   :  { %v1311_v0 = vld [vmem:[%s1831_s2] ss:$0 sm:$0xff]  ;;  %v1221_v4 = vld [vmem:[%s1830_s0 + $0x8] sm:$0xff]   ;;  %v1222_v8 = vld [vmem:[%s1830_s0 + $0x10] sm:$0xff]  }
   0x2   :  { %v934_v1 = vld [vmem:[%s1830_s0] sm:$0xff]   ;;  %v939_v6 = vunpack.c.l.bf16 %v1221_v4  ;;  %v940_v7 = vunpack.c.h.bf16 %v1221_v4  ;;  %v943_v11 = vunpack.c.l.bf16 %v1222_v8  ;;  %v944_v12 = vunpack.c.h.bf16 %v1222_v8  ;;  %v1223_v13 = vld [vmem:[%s1830_s0 + $0x18] sm:$0xff]   ;;  %v288_v15 = vld [vmem:[%s1833_s1 + $0x8] sm:$0xff] }
   0x3   :  { %v935_v2 = vunpack.c.l.bf16 %v934_v1  ;;  %v936_v3 = vunpack.c.h.bf16 %v934_v1  ;;  %v1322_v5 = vld [vmem:[%s1832_s3] ss:$0 sm:$0xff]  ;;  %v947_v18 = vunpack.c.l.bf16 %v1223_v13  ;;  %v948_v19 = vunpack.c.h.bf16 %v1223_v13  ;;  %v289_v22 = vld [vmem:[%s1833_s1 + $0x10] sm:$0xff]  ;;  %v290_v23 = vld [vmem:[%s1833_s1 + $0x18] sm:$0xff] }
   0x4   :  { %v287_v14 = vld [vmem:[%s1833_s1] sm:$0xff]  ;;  %v155_v16 = vmul.f32 %v939_v6, %v1311_v0  ;;  %v156_v17 = vmul.f32 %v940_v7, %v1311_v0  ;;  %v157_v24 = vmul.f32 %v943_v11, %v1311_v0  ;;  %v158_v25 = vmul.f32 %v944_v12, %v1311_v0  ;;  %v292_v29 = vld [vmem:[%s1833_s1 + $0x28] sm:$0xff]  ;;  %v293_v36 = vld [vmem:[%s1833_s1 + $0x30] sm:$0xff] }
   0x5   :  { %v153_v9 = vmul.f32 %v935_v2, %v1311_v0  ;;  %v154_v10 = vmul.f32 %v936_v3, %v1311_v0  ;;  %v291_v28 = vld [vmem:[%s1833_s1 + $0x20] sm:$0xff]  ;;  %v159_v30 = vmul.f32 %v947_v18, %v1311_v0  ;;  %v160_v31 = vmul.f32 %v948_v19, %v1311_v0  ;;  %v294_v37 = vld [vmem:[%s1833_s1 + $0x38] sm:$0xff]  ;;  %v1225_v51 = vld [vmem:[%s1830_s0 + $0x28] sm:$0xff]  }
   0x6   :  { %v225_v26 = vadd.f32 %v1322_v5, %v155_v16  ;;  %v226_v27 = vadd.f32 %v1322_v5, %v156_v17  ;;  %v227_v34 = vadd.f32 %v1322_v5, %v157_v24  ;;  %v228_v35 = vadd.f32 %v1322_v5, %v158_v25  ;;  %v1224_v42 = vld [vmem:[%s1830_s0 + $0x20] sm:$0xff]   ;;  %v1226_v56 = vld [vmem:[%s1830_s0 + $0x30] sm:$0xff]   ;;  %v1227_v61 = vld [vmem:[%s1830_s0 + $0x38] sm:$0xff]  }
   0x7   :  { %v223_v20 = vadd.f32 %v1322_v5, %v153_v9  ;;  %v224_v21 = vadd.f32 %v1322_v5, %v154_v10  ;;  %v229_v40 = vadd.f32 %v1322_v5, %v159_v30  ;;  %v230_v41 = vadd.f32 %v1322_v5, %v160_v31  ;;  %v295_v6 = vld [vmem:[%s1833_s1 + $0x40] sm:$0xff]  ;;  %v296_v10 = vld [vmem:[%s1833_s1 + $0x48] sm:$0xff]  ;;  %v298_v16 = vld [vmem:[%s1833_s1 + $0x58] sm:$0xff] }
   0x8   :  { %v353_v38 = vadd.f32 %v289_v22, %v225_v26  ;;  %v354_v39 = vadd.f32 %v290_v23, %v226_v27  ;;  %v355_v45 = vadd.f32 %v291_v28, %v227_v34  ;;  %v356_v46 = vadd.f32 %v292_v29, %v228_v35  ;;  %v299_v23 = vld [vmem:[%s1833_s1 + $0x60] sm:$0xff]  ;;  %v300_v24 = vld [vmem:[%s1833_s1 + $0x68] sm:$0xff]  ;;  %v301_v30 = vld [vmem:[%s1833_s1 + $0x70] sm:$0xff] }
   0x9   :  { %v351_v32 = vadd.f32 %v287_v14, %v223_v20  ;;  %v352_v33 = vadd.f32 %v288_v15, %v224_v21  ;;  %v357_v49 = vadd.f32 %v293_v36, %v229_v40  ;;  %v358_v50 = vadd.f32 %v294_v37, %v230_v41  ;;  %v297_v15 = vld [vmem:[%s1833_s1 + $0x50] sm:$0xff]  ;;  %v302_v36 = vld [vmem:[%s1833_s1 + $0x78] sm:$0xff] }
   0xa   :  { %v417_v47 = vmax.f32 %v353_v38, 0.0  ;;  %v418_v48 = vmax.f32 %v354_v39, 0.0  ;;  %v419_v53 = vmax.f32 %v355_v45, 0.0  ;;  %v420_v54 = vmax.f32 %v356_v46, 0.0 }
   0xb   :  { %v415_v43 = vmax.f32 %v351_v32, 0.0  ;;  %v416_v44 = vmax.f32 %v352_v33, 0.0  ;;  %v951_v55 = vunpack.c.l.bf16 %v1224_v42  ;;  %v421_v58 = vmax.f32 %v357_v49, 0.0 }
   0xc   :  { %v1069_v57 = vpack.c.bf16 %v418_v48, %v417_v47  ;;  %v422_v59 = vmax.f32 %v358_v50, 0.0  ;;  %v952_v60 = vunpack.c.h.bf16 %v1224_v42  ;;  %v1074_v62 = vpack.c.bf16 %v420_v54, %v419_v53 }
   0xd   :  { %v1064_v52 = vpack.c.bf16 %v416_v44, %v415_v43  ;;  %v161_v63 = vmul.f32 %v951_v55, %v1311_v0  ;;  %v955_v1 = vunpack.c.l.bf16 %v1225_v51  ;;  %v956_v2 = vunpack.c.h.bf16 %v1225_v51 }
   0xe   :  { %1252 = vst [vmem:[%s1834_s4 + $0x8] sm:$0xff] %v1069_v57   ;;  %v1079_v3 = vpack.c.bf16 %v422_v59, %v421_v58  ;;  %v162_v4 = vmul.f32 %v952_v60, %v1311_v0  ;;  %v959_v7 = vunpack.c.l.bf16 %v1226_v56  ;;  %v960_v8 = vunpack.c.h.bf16 %v1226_v56  ;;  %1253 = vst [vmem:[%s1834_s4 + $0x10] sm:$0xff] %v1074_v62   ;;  %v303_v58 = vld [vmem:[%s1833_s1 + $0x80] sm:$0xff] }
   0xf   :  { %1065 = vst [vmem:[%s1834_s4] sm:$0xff] %v1064_v52   ;;  %v231_v9 = vadd.f32 %v1322_v5, %v161_v63  ;;  %v163_v11 = vmul.f32 %v955_v1, %v1311_v0  ;;  %v164_v12 = vmul.f32 %v956_v2, %v1311_v0  ;;  %v963_v13 = vunpack.c.l.bf16 %v1227_v61 }
  0x10   :  { %1254 = vst [vmem:[%s1834_s4 + $0x18] sm:$0xff] %v1079_v3   ;;  %v232_v14 = vadd.f32 %v1322_v5, %v162_v4  ;;  %v165_v17 = vmul.f32 %v959_v7, %v1311_v0  ;;  %v166_v18 = vmul.f32 %v960_v8, %v1311_v0  ;;  %v964_v19 = vunpack.c.h.bf16 %v1227_v61  ;;  %v304_v3 = vld [vmem:[%s1833_s1 + $0x88] sm:$0xff] }
  0x11   :  { %v359_v20 = vadd.f32 %v295_v6, %v231_v9  ;;  %v233_v21 = vadd.f32 %v1322_v5, %v163_v11  ;;  %v234_v22 = vadd.f32 %v1322_v5, %v164_v12  ;;  %v167_v25 = vmul.f32 %v963_v13, %v1311_v0  ;;  %v306_v11 = vld [vmem:[%s1833_s1 + $0x98] sm:$0xff] }
  0x12   :  { %v360_v26 = vadd.f32 %v296_v10, %v232_v14  ;;  %v235_v27 = vadd.f32 %v1322_v5, %v165_v17  ;;  %v236_v28 = vadd.f32 %v1322_v5, %v166_v18  ;;  %v168_v29 = vmul.f32 %v964_v19, %v1311_v0  ;;  %v305_v10 = vld [vmem:[%s1833_s1 + $0x90] sm:$0xff]  ;;  %v308_v17 = vld [vmem:[%s1833_s1 + $0xa8] sm:$0xff] }
  0x13   :  { %v423_v32 = vmax.f32 %v359_v20, 0.0  ;;  %v361_v33 = vadd.f32 %v297_v15, %v233_v21  ;;  %v362_v34 = vadd.f32 %v298_v16, %v234_v22  ;;  %v237_v35 = vadd.f32 %v1322_v5, %v167_v25  ;;  %v307_v16 = vld [vmem:[%s1833_s1 + $0xa0] sm:$0xff]  ;;  %v309_v25 = vld [vmem:[%s1833_s1 + $0xb0] sm:$0xff] }
  0x14   :  { %v424_v37 = vmax.f32 %v360_v26, 0.0  ;;  %v363_v38 = vadd.f32 %v299_v23, %v235_v27  ;;  %v364_v39 = vadd.f32 %v300_v24, %v236_v28  ;;  %v238_v40 = vadd.f32 %v1322_v5, %v168_v29 }
  0x15   :  { %v425_v41 = vmax.f32 %v361_v33, 0.0  ;;  %v426_v42 = vmax.f32 %v362_v34, 0.0  ;;  %v365_v43 = vadd.f32 %v301_v30, %v237_v35  ;;  %v310_v33 = vld [vmem:[%s1833_s1 + $0xb8] sm:$0xff] }
  0x16   :  { %v1084_v46 = vpack.c.bf16 %v424_v37, %v423_v32  ;;  %v427_v47 = vmax.f32 %v363_v38, 0.0  ;;  %v428_v48 = vmax.f32 %v364_v39, 0.0  ;;  %v366_v49 = vadd.f32 %v302_v36, %v238_v40 }
  0x17   :  { %v1228_v31 = vld [vmem:[%s1830_s0 + $0x40] sm:$0xff]   ;;  %v1229_v45 = vld [vmem:[%s1830_s0 + $0x48] sm:$0xff]   ;;  %v1230_v50 = vld [vmem:[%s1830_s0 + $0x50] sm:$0xff]   ;;  %v1089_v51 = vpack.c.bf16 %v426_v42, %v425_v41  ;;  %v429_v52 = vmax.f32 %v365_v43, 0.0 }
  0x18   :  { %v967_v44 = vunpack.c.l.bf16 %v1228_v31  ;;  %v968_v53 = vunpack.c.h.bf16 %v1228_v31  ;;  %v1231_v55 = vld [vmem:[%s1830_s0 + $0x58] sm:$0xff]   ;;  %v1094_v56 = vpack.c.bf16 %v428_v48, %v427_v47  ;;  %v430_v57 = vmax.f32 %v366_v49, 0.0 }
  0x19   :  { %1255 = vst [vmem:[%s1834_s4 + $0x20] sm:$0xff] %v1084_v46   ;;  %v971_v59 = vunpack.c.l.bf16 %v1229_v45  ;;  %v972_v60 = vunpack.c.h.bf16 %v1229_v45  ;;  %1256 = vst [vmem:[%s1834_s4 + $0x28] sm:$0xff] %v1089_v51   ;;  %v975_v63 = vunpack.c.l.bf16 %v1230_v50  ;;  %v976_v1 = vunpack.c.h.bf16 %v1230_v50 }
  0x1a   :  { %v169_v54 = vmul.f32 %v967_v44, %v1311_v0  ;;  %v170_v61 = vmul.f32 %v968_v53, %v1311_v0  ;;  %1257 = vst [vmem:[%s1834_s4 + $0x30] sm:$0xff] %v1094_v56   ;;  %v1099_v2 = vpack.c.bf16 %v430_v57, %v429_v52  ;;  %v979_v7 = vunpack.c.l.bf16 %v1231_v55  ;;  %v311_v52 = vld [vmem:[%s1833_s1 + $0xc0] sm:$0xff]  ;;  %v312_v57 = vld [vmem:[%s1833_s1 + $0xc8] sm:$0xff] }
  0x1b   :  { %v171_v4 = vmul.f32 %v971_v59, %v1311_v0  ;;  %v172_v6 = vmul.f32 %v972_v60, %v1311_v0  ;;  %v173_v12 = vmul.f32 %v975_v63, %v1311_v0  ;;  %v174_v13 = vmul.f32 %v976_v1, %v1311_v0 }
  0x1c   :  { %v239_v62 = vadd.f32 %v1322_v5, %v169_v54  ;;  %v240_v8 = vadd.f32 %v1322_v5, %v170_v61  ;;  %1258 = vst [vmem:[%s1834_s4 + $0x38] sm:$0xff] %v1099_v2   ;;  %v980_v18 = vunpack.c.h.bf16 %v1231_v55  ;;  %v175_v19 = vmul.f32 %v979_v7, %v1311_v0 }
  0x1d   :  { %v241_v14 = vadd.f32 %v1322_v5, %v171_v4  ;;  %v242_v15 = vadd.f32 %v1322_v5, %v172_v6  ;;  %v243_v23 = vadd.f32 %v1322_v5, %v173_v12  ;;  %v244_v24 = vadd.f32 %v1322_v5, %v174_v13  ;;  %v314_v4 = vld [vmem:[%s1833_s1 + $0xd8] sm:$0xff]  ;;  %v316_v12 = vld [vmem:[%s1833_s1 + $0xe8] sm:$0xff] }
  0x1e   :  { %v367_v9 = vadd.f32 %v303_v58, %v239_v62  ;;  %v368_v21 = vadd.f32 %v304_v3, %v240_v8  ;;  %v176_v28 = vmul.f32 %v980_v18, %v1311_v0  ;;  %v245_v29 = vadd.f32 %v1322_v5, %v175_v19  ;;  %v313_v3 = vld [vmem:[%s1833_s1 + $0xd0] sm:$0xff] }
  0x1f   :  { %v369_v26 = vadd.f32 %v305_v10, %v241_v14  ;;  %v370_v27 = vadd.f32 %v306_v11, %v242_v15  ;;  %v371_v31 = vadd.f32 %v307_v16, %v243_v23  ;;  %v372_v32 = vadd.f32 %v308_v17, %v244_v24  ;;  %v315_v11 = vld [vmem:[%s1833_s1 + $0xe0] sm:$0xff]  ;;  %v317_v23 = vld [vmem:[%s1833_s1 + $0xf0] sm:$0xff] }
  0x20   :  { %v431_v22 = vmax.f32 %v367_v9, 0.0  ;;  %v432_v30 = vmax.f32 %v368_v21, 0.0  ;;  %v246_v37 = vadd.f32 %v1322_v5, %v176_v28  ;;  %v373_v38 = vadd.f32 %v309_v25, %v245_v29 }
  0x21   :  { %v433_v35 = vmax.f32 %v369_v26, 0.0  ;;  %v434_v36 = vmax.f32 %v370_v27, 0.0  ;;  %v435_v41 = vmax.f32 %v371_v31, 0.0  ;;  %v436_v42 = vmax.f32 %v372_v32, 0.0  ;;  %v318_v27 = vld [vmem:[%s1833_s1 + $0xf8] sm:$0xff] }
  0x22   :  { %v1104_v40 = vpack.c.bf16 %v432_v30, %v431_v22  ;;  %v374_v46 = vadd.f32 %v310_v33, %v246_v37  ;;  %v437_v47 = vmax.f32 %v373_v38, 0.0 }
  0x23   :  { %v1232_v20 = vld [vmem:[%s1830_s0 + $0x60] sm:$0xff]   ;;  %v1233_v39 = vld [vmem:[%s1830_s0 + $0x68] sm:$0xff]   ;;  %v1234_v44 = vld [vmem:[%s1830_s0 + $0x70] sm:$0xff]   ;;  %v1109_v45 = vpack.c.bf16 %v434_v36, %v433_v35  ;;  %v1114_v50 = vpack.c.bf16 %v436_v42, %v435_v41 }
  0x24   :  { %v983_v34 = vunpack.c.l.bf16 %v1232_v20  ;;  %v984_v43 = vunpack.c.h.bf16 %v1232_v20  ;;  %v1235_v49 = vld [vmem:[%s1830_s0 + $0x78] sm:$0xff]   ;;  %v987_v53 = vunpack.c.l.bf16 %v1233_v39  ;;  %v988_v54 = vunpack.c.h.bf16 %v1233_v39 }
  0x25   :  { %1259 = vst [vmem:[%s1834_s4 + $0x40] sm:$0xff] %v1104_v40   ;;  %1260 = vst [vmem:[%s1834_s4 + $0x48] sm:$0xff] %v1109_v45   ;;  %v438_v55 = vmax.f32 %v374_v46, 0.0  ;;  %v991_v58 = vunpack.c.l.bf16 %v1234_v44  ;;  %v992_v59 = vunpack.c.h.bf16 %v1234_v44  ;;  %v995_v63 = vunpack.c.l.bf16 %v1235_v49 }
  0x26   :  { %v177_v48 = vmul.f32 %v983_v34, %v1311_v0  ;;  %v178_v51 = vmul.f32 %v984_v43, %v1311_v0  ;;  %1261 = vst [vmem:[%s1834_s4 + $0x50] sm:$0xff] %v1114_v50   ;;  %v179_v61 = vmul.f32 %v987_v53, %v1311_v0  ;;  %v180_v62 = vmul.f32 %v988_v54, %v1311_v0 }
  0x27   :  { %v1119_v1 = vpack.c.bf16 %v438_v55, %v437_v47  ;;  %v181_v6 = vmul.f32 %v991_v58, %v1311_v0  ;;  %v182_v7 = vmul.f32 %v992_v59, %v1311_v0  ;;  %v996_v13 = vunpack.c.h.bf16 %v1235_v49  ;;  %v319_v47 = vld [vmem:[%s1833_s1 + $0x100] sm:$0xff] }
  0x28   :  { %v247_v56 = vadd.f32 %v1322_v5, %v177_v48  ;;  %v248_v60 = vadd.f32 %v1322_v5, %v178_v51  ;;  %v249_v9 = vadd.f32 %v1322_v5, %v179_v61  ;;  %v250_v10 = vadd.f32 %v1322_v5, %v180_v62  ;;  %v320_v51 = vld [vmem:[%s1833_s1 + $0x108] sm:$0xff]  ;;  %v322_v62 = vld [vmem:[%s1833_s1 + $0x118] sm:$0xff] }
  0x29   :  { %v251_v16 = vadd.f32 %v1322_v5, %v181_v6  ;;  %v252_v17 = vadd.f32 %v1322_v5, %v182_v7  ;;  %v183_v18 = vmul.f32 %v995_v63, %v1311_v0  ;;  %v184_v22 = vmul.f32 %v996_v13, %v1311_v0 }
  0x2a   :  { %v375_v2 = vadd.f32 %v311_v52, %v247_v56  ;;  %v376_v8 = vadd.f32 %v312_v57, %v248_v60  ;;  %v377_v20 = vadd.f32 %v313_v3, %v249_v9  ;;  %v378_v21 = vadd.f32 %v314_v4, %v250_v10  ;;  %v321_v56 = vld [vmem:[%s1833_s1 + $0x110] sm:$0xff]  ;;  %v323_v4 = vld [vmem:[%s1833_s1 + $0x120] sm:$0xff] }
  0x2b   :  { %v379_v24 = vadd.f32 %v315_v11, %v251_v16  ;;  %v380_v25 = vadd.f32 %v316_v12, %v252_v17  ;;  %v253_v26 = vadd.f32 %v1322_v5, %v183_v18  ;;  %v254_v33 = vadd.f32 %v1322_v5, %v184_v22  ;;  %v324_v11 = vld [vmem:[%s1833_s1 + $0x128] sm:$0xff]  ;;  %v325_v17 = vld [vmem:[%s1833_s1 + $0x130] sm:$0xff] }
  0x2c   :  { %v439_v15 = vmax.f32 %v375_v2, 0.0  ;;  %v440_v19 = vmax.f32 %v376_v8, 0.0  ;;  %v441_v31 = vmax.f32 %v377_v20, 0.0  ;;  %v442_v32 = vmax.f32 %v378_v21, 0.0  ;;  %v326_v21 = vld [vmem:[%s1833_s1 + $0x138] sm:$0xff] }
  0x2d   :  { %v1236_v14 = vld [vmem:[%s1830_s0 + $0x80] sm:$0xff]   ;;  %v443_v34 = vmax.f32 %v379_v24, 0.0  ;;  %v444_v35 = vmax.f32 %v380_v25, 0.0  ;;  %v381_v36 = vadd.f32 %v317_v23, %v253_v26  ;;  %v382_v40 = vadd.f32 %v318_v27, %v254_v33 }
  0x2e   :  { %1262 = vst [vmem:[%s1834_s4 + $0x58] sm:$0xff] %v1119_v1   ;;  %v999_v28 = vunpack.c.l.bf16 %v1236_v14  ;;  %v1124_v30 = vpack.c.bf16 %v440_v19, %v439_v15  ;;  %v1000_v37 = vunpack.c.h.bf16 %v1236_v14  ;;  %v1129_v39 = vpack.c.bf16 %v442_v32, %v441_v31 }
  0x2f   :  { %v1134_v44 = vpack.c.bf16 %v444_v35, %v443_v34  ;;  %v445_v45 = vmax.f32 %v381_v36, 0.0  ;;  %v446_v49 = vmax.f32 %v382_v40, 0.0  ;;  %v327_v36 = vld [vmem:[%s1833_s1 + $0x140] sm:$0xff] }
  0x30   :  { %v185_v41 = vmul.f32 %v999_v28, %v1311_v0  ;;  %v186_v46 = vmul.f32 %v1000_v37, %v1311_v0 }
  0x31   :  { %v1139_v59 = vpack.c.bf16 %v446_v49, %v445_v45  ;;  %v328_v45 = vld [vmem:[%s1833_s1 + $0x148] sm:$0xff] }
  0x32   :  { %v255_v50 = vadd.f32 %v1322_v5, %v185_v41  ;;  %v256_v54 = vadd.f32 %v1322_v5, %v186_v46 }
  0x34   :  { %v383_v60 = vadd.f32 %v319_v47, %v255_v50  ;;  %v384_v1 = vadd.f32 %v320_v51, %v256_v54  ;;  %v329_v51 = vld [vmem:[%s1833_s1 + $0x150] sm:$0xff] }
  0x35   :  { %v1237_v29 = vld [vmem:[%s1830_s0 + $0x88] sm:$0xff]   ;;  %v1238_v38 = vld [vmem:[%s1830_s0 + $0x90] sm:$0xff]  }
  0x36   :  { %1263 = vst [vmem:[%s1834_s4 + $0x60] sm:$0xff] %v1124_v30   ;;  %v1003_v42 = vunpack.c.l.bf16 %v1237_v29  ;;  %v1004_v48 = vunpack.c.h.bf16 %v1237_v29  ;;  %v1007_v53 = vunpack.c.l.bf16 %v1238_v38  ;;  %v1008_v57 = vunpack.c.h.bf16 %v1238_v38 }
  0x37   :  { %v447_v8 = vmax.f32 %v383_v60, 0.0  ;;  %v448_v13 = vmax.f32 %v384_v1, 0.0 }
  0x38   :  { %v187_v52 = vmul.f32 %v1003_v42, %v1311_v0  ;;  %v188_v55 = vmul.f32 %v1004_v48, %v1311_v0  ;;  %v189_v63 = vmul.f32 %v1007_v53, %v1311_v0  ;;  %v190_v3 = vmul.f32 %v1008_v57, %v1311_v0 }
  0x39   :  { %v1144_v24 = vpack.c.bf16 %v448_v13, %v447_v8 }
  0x3a   :  { %v257_v61 = vadd.f32 %v1322_v5, %v187_v52  ;;  %v258_v2 = vadd.f32 %v1322_v5, %v188_v55  ;;  %v259_v10 = vadd.f32 %v1322_v5, %v189_v63  ;;  %v260_v15 = vadd.f32 %v1322_v5, %v190_v3  ;;  %v330_v55 = vld [vmem:[%s1833_s1 + $0x158] sm:$0xff]  ;;  %v331_v63 = vld [vmem:[%s1833_s1 + $0x160] sm:$0xff]  ;;  %v332_v3 = vld [vmem:[%s1833_s1 + $0x168] sm:$0xff] }
  0x3c   :  { %v385_v9 = vadd.f32 %v321_v56, %v257_v61  ;;  %v386_v14 = vadd.f32 %v322_v62, %v258_v2  ;;  %v387_v19 = vadd.f32 %v323_v4, %v259_v10  ;;  %v388_v26 = vadd.f32 %v324_v11, %v260_v15  ;;  %v333_v10 = vld [vmem:[%s1833_s1 + $0x170] sm:$0xff] }
  0x3d   :  { %v1239_v43 = vld [vmem:[%s1830_s0 + $0x98] sm:$0xff]  }
  0x3e   :  { %1264 = vst [vmem:[%s1834_s4 + $0x68] sm:$0xff] %v1129_v39   ;;  %1265 = vst [vmem:[%s1834_s4 + $0x70] sm:$0xff] %v1134_v44   ;;  %v1011_v58 = vunpack.c.l.bf16 %v1239_v43  ;;  %v1012_v6 = vunpack.c.h.bf16 %v1239_v43  ;;  %v449_v18 = vmax.f32 %v385_v9, 0.0  ;;  %v450_v25 = vmax.f32 %v386_v14, 0.0 }
  0x3f   :  { %v451_v28 = vmax.f32 %v387_v19, 0.0  ;;  %v452_v34 = vmax.f32 %v388_v26, 0.0 }
  0x40   :  { %v191_v12 = vmul.f32 %v1011_v58, %v1311_v0  ;;  %v192_v16 = vmul.f32 %v1012_v6, %v1311_v0  ;;  %v1149_v33 = vpack.c.bf16 %v450_v25, %v449_v18 }
  0x41   :  { %v1154_v43 = vpack.c.bf16 %v452_v34, %v451_v28 }
  0x42   :  { %v261_v20 = vadd.f32 %v1322_v5, %v191_v12  ;;  %v262_v27 = vadd.f32 %v1322_v5, %v192_v16 }
  0x44   :  { %v389_v29 = vadd.f32 %v325_v17, %v261_v20  ;;  %v390_v35 = vadd.f32 %v326_v21, %v262_v27  ;;  %v334_v20 = vld [vmem:[%s1833_s1 + $0x178] sm:$0xff] }
  0x45   :  { %v1240_v7 = vld [vmem:[%s1830_s0 + $0xa0] sm:$0xff]  }
  0x46   :  { %1266 = vst [vmem:[%s1834_s4 + $0x78] sm:$0xff] %v1139_v59   ;;  %v1015_v22 = vunpack.c.l.bf16 %v1240_v7  ;;  %v1016_v30 = vunpack.c.h.bf16 %v1240_v7  ;;  %v453_v38 = vmax.f32 %v389_v29, 0.0  ;;  %v454_v44 = vmax.f32 %v390_v35, 0.0  ;;  %v336_v35 = vld [vmem:[%s1833_s1 + $0x188] sm:$0xff] }
  0x48   :  { %v193_v31 = vmul.f32 %v1015_v22, %v1311_v0  ;;  %v194_v39 = vmul.f32 %v1016_v30, %v1311_v0  ;;  %v1159_v53 = vpack.c.bf16 %v454_v44, %v453_v38  ;;  %v335_v30 = vld [vmem:[%s1833_s1 + $0x180] sm:$0xff] }
  0x4a   :  { %v263_v40 = vadd.f32 %v1322_v5, %v193_v31  ;;  %v264_v48 = vadd.f32 %v1322_v5, %v194_v39 }
  0x4c   :  { %v391_v49 = vadd.f32 %v327_v36, %v263_v40  ;;  %v392_v59 = vadd.f32 %v328_v45, %v264_v48  ;;  %v337_v45 = vld [vmem:[%s1833_s1 + $0x190] sm:$0xff] }
  0x4d   :  { %v1241_v23 = vld [vmem:[%s1830_s0 + $0xa8] sm:$0xff]   ;;  %v1242_v32 = vld [vmem:[%s1830_s0 + $0xb0] sm:$0xff]  }
  0x4e   :  { %1267 = vst [vmem:[%s1834_s4 + $0x80] sm:$0xff] %v1144_v24   ;;  %v1019_v37 = vunpack.c.l.bf16 %v1241_v23  ;;  %v1020_v41 = vunpack.c.h.bf16 %v1241_v23  ;;  %v1023_v47 = vunpack.c.l.bf16 %v1242_v32  ;;  %v1024_v52 = vunpack.c.h.bf16 %v1242_v32 }
  0x4f   :  { %v455_v60 = vmax.f32 %v391_v49, 0.0  ;;  %v456_v7 = vmax.f32 %v392_v59, 0.0  ;;  %v338_v49 = vld [vmem:[%s1833_s1 + $0x198] sm:$0xff] }
  0x50   :  { %v195_v46 = vmul.f32 %v1019_v37, %v1311_v0  ;;  %v196_v50 = vmul.f32 %v1020_v41, %v1311_v0  ;;  %v197_v56 = vmul.f32 %v1023_v47, %v1311_v0  ;;  %v198_v62 = vmul.f32 %v1024_v52, %v1311_v0 }
  0x51   :  { %v1164_v17 = vpack.c.bf16 %v456_v7, %v455_v60 }
  0x52   :  { %v265_v54 = vadd.f32 %v1322_v5, %v195_v46  ;;  %v266_v61 = vadd.f32 %v1322_v5, %v196_v50  ;;  %v267_v2 = vadd.f32 %v1322_v5, %v197_v56  ;;  %v268_v9 = vadd.f32 %v1322_v5, %v198_v62 }
  0x54   :  { %v393_v1 = vadd.f32 %v329_v51, %v265_v54  ;;  %v394_v8 = vadd.f32 %v330_v55, %v266_v61  ;;  %v395_v13 = vadd.f32 %v331_v63, %v267_v2  ;;  %v396_v19 = vadd.f32 %v332_v3, %v268_v9  ;;  %v340_v61 = vld [vmem:[%s1833_s1 + $0x1a8] sm:$0xff] }
  0x55   :  { %v1243_v42 = vld [vmem:[%s1830_s0 + $0xb8] sm:$0xff]  }
  0x56   :  { %1268 = vst [vmem:[%s1834_s4 + $0x88] sm:$0xff] %v1149_v33   ;;  %1269 = vst [vmem:[%s1834_s4 + $0x90] sm:$0xff] %v1154_v43   ;;  %v1027_v57 = vunpack.c.l.bf16 %v1243_v42  ;;  %v1028_v4 = vunpack.c.h.bf16 %v1243_v42  ;;  %v457_v12 = vmax.f32 %v393_v1, 0.0  ;;  %v458_v18 = vmax.f32 %v394_v8, 0.0 }
  0x57   :  { %v459_v22 = vmax.f32 %v395_v13, 0.0  ;;  %v460_v28 = vmax.f32 %v396_v19, 0.0 }
  0x58   :  { %v199_v6 = vmul.f32 %v1027_v57, %v1311_v0  ;;  %v200_v14 = vmul.f32 %v1028_v4, %v1311_v0  ;;  %v1169_v27 = vpack.c.bf16 %v458_v18, %v457_v12  ;;  %v339_v57 = vld [vmem:[%s1833_s1 + $0x1a0] sm:$0xff] }
  0x59   :  { %v1174_v38 = vpack.c.bf16 %v460_v28, %v459_v22  ;;  %v344_v28 = vld [vmem:[%s1833_s1 + $0x1c8] sm:$0xff] }
  0x5a   :  { %v269_v15 = vadd.f32 %v1322_v5, %v199_v6  ;;  %v270_v23 = vadd.f32 %v1322_v5, %v200_v14  ;;  %v342_v14 = vld [vmem:[%s1833_s1 + $0x1b8] sm:$0xff] }
  0x5c   :  { %v397_v24 = vadd.f32 %v333_v10, %v269_v15  ;;  %v398_v32 = vadd.f32 %v334_v20, %v270_v23  ;;  %v341_v10 = vld [vmem:[%s1833_s1 + $0x1b0] sm:$0xff] }
  0x5d   :  { %v1244_v58 = vld [vmem:[%s1830_s0 + $0xc0] sm:$0xff]  }
  0x5e   :  { %1270 = vst [vmem:[%s1834_s4 + $0x98] sm:$0xff] %v1159_v53   ;;  %v1031_v11 = vunpack.c.l.bf16 %v1244_v58  ;;  %v1032_v21 = vunpack.c.h.bf16 %v1244_v58  ;;  %v461_v33 = vmax.f32 %v397_v24, 0.0  ;;  %v462_v42 = vmax.f32 %v398_v32, 0.0 }
  0x60   :  { %v201_v25 = vmul.f32 %v1031_v11, %v1311_v0  ;;  %v202_v29 = vmul.f32 %v1032_v21, %v1311_v0  ;;  %v1179_v53 = vpack.c.bf16 %v462_v42, %v461_v33  ;;  %v346_v42 = vld [vmem:[%s1833_s1 + $0x1d8] sm:$0xff] }
  0x62   :  { %v271_v34 = vadd.f32 %v1322_v5, %v201_v25  ;;  %v272_v39 = vadd.f32 %v1322_v5, %v202_v29  ;;  %v343_v25 = vld [vmem:[%s1833_s1 + $0x1c0] sm:$0xff] }
  0x64   :  { %v399_v43 = vadd.f32 %v335_v30, %v271_v34  ;;  %v400_v47 = vadd.f32 %v336_v35, %v272_v39  ;;  %v345_v35 = vld [vmem:[%s1833_s1 + $0x1d0] sm:$0xff] }
  0x65   :  { %v1245_v16 = vld [vmem:[%s1830_s0 + $0xc8] sm:$0xff]   ;;  %v1246_v26 = vld [vmem:[%s1830_s0 + $0xd0] sm:$0xff]  }
  0x66   :  { %1271 = vst [vmem:[%s1834_s4 + $0xa0] sm:$0xff] %v1164_v17   ;;  %v1035_v31 = vunpack.c.l.bf16 %v1245_v16  ;;  %v1036_v36 = vunpack.c.h.bf16 %v1245_v16  ;;  %v1039_v41 = vunpack.c.l.bf16 %v1246_v26  ;;  %v1040_v46 = vunpack.c.h.bf16 %v1246_v26 }
  0x67   :  { %v463_v54 = vmax.f32 %v399_v43, 0.0  ;;  %v464_v58 = vmax.f32 %v400_v47, 0.0 }
  0x68   :  { %v203_v40 = vmul.f32 %v1035_v31, %v1311_v0  ;;  %v204_v44 = vmul.f32 %v1036_v36, %v1311_v0  ;;  %v205_v50 = vmul.f32 %v1039_v41, %v1311_v0  ;;  %v206_v56 = vmul.f32 %v1040_v46, %v1311_v0 }
  0x69   :  { %v1184_v6 = vpack.c.bf16 %v464_v58, %v463_v54 }
  0x6a   :  { %v273_v48 = vadd.f32 %v1322_v5, %v203_v40  ;;  %v274_v55 = vadd.f32 %v1322_v5, %v204_v44  ;;  %v275_v60 = vadd.f32 %v1322_v5, %v205_v50  ;;  %v276_v1 = vadd.f32 %v1322_v5, %v206_v56  ;;  %v347_v50 = vld [vmem:[%s1833_s1 + $0x1e0] sm:$0xff] }
  0x6c   :  { %v401_v59 = vadd.f32 %v337_v45, %v273_v48  ;;  %v402_v63 = vadd.f32 %v338_v49, %v274_v55  ;;  %v403_v8 = vadd.f32 %v339_v57, %v275_v60  ;;  %v404_v12 = vadd.f32 %v340_v61, %v276_v1  ;;  %v348_v57 = vld [vmem:[%s1833_s1 + $0x1e8] sm:$0xff] }
  0x6d   :  { %v1247_v37 = vld [vmem:[%s1830_s0 + $0xd8] sm:$0xff]  }
  0x6e   :  { %1272 = vst [vmem:[%s1834_s4 + $0xa8] sm:$0xff] %v1169_v27   ;;  %1273 = vst [vmem:[%s1834_s4 + $0xb0] sm:$0xff] %v1174_v38   ;;  %v1043_v51 = vunpack.c.l.bf16 %v1247_v37  ;;  %v1044_v62 = vunpack.c.h.bf16 %v1247_v37  ;;  %v465_v7 = vmax.f32 %v401_v59, 0.0  ;;  %v466_v11 = vmax.f32 %v402_v63, 0.0  ;;  %v349_v63 = vld [vmem:[%s1833_s1 + $0x1f0] sm:$0xff] }
  0x6f   :  { %v467_v16 = vmax.f32 %v403_v8, 0.0  ;;  %v468_v22 = vmax.f32 %v404_v12, 0.0 }
  0x70   :  { %v207_v2 = vmul.f32 %v1043_v51, %v1311_v0  ;;  %v208_v9 = vmul.f32 %v1044_v62, %v1311_v0  ;;  %v1189_v21 = vpack.c.bf16 %v466_v11, %v465_v7 }
  0x71   :  { %v1194_v32 = vpack.c.bf16 %v468_v22, %v467_v16 }
  0x72   :  { %v277_v13 = vadd.f32 %v1322_v5, %v207_v2  ;;  %v278_v17 = vadd.f32 %v1322_v5, %v208_v9 }
  0x74   :  { %v405_v23 = vadd.f32 %v341_v10, %v277_v13  ;;  %v406_v26 = vadd.f32 %v342_v14, %v278_v17 }
  0x75   :  { %v1248_v52 = vld [vmem:[%s1830_s0 + $0xe0] sm:$0xff]  }
  0x76   :  { %1274 = vst [vmem:[%s1834_s4 + $0xb8] sm:$0xff] %v1179_v53   ;;  %v1047_v3 = vunpack.c.l.bf16 %v1248_v52  ;;  %v1048_v15 = vunpack.c.h.bf16 %v1248_v52  ;;  %v469_v33 = vmax.f32 %v405_v23, 0.0  ;;  %v470_v37 = vmax.f32 %v406_v26, 0.0 }
  0x78   :  { %v209_v18 = vmul.f32 %v1047_v3, %v1311_v0  ;;  %v210_v24 = vmul.f32 %v1048_v15, %v1311_v0  ;;  %v1199_v46 = vpack.c.bf16 %v470_v37, %v469_v33  ;;  %v350_v3 = vld [vmem:[%s1833_s1 + $0x1f8] sm:$0xff] }
  0x7a   :  { %v279_v27 = vadd.f32 %v1322_v5, %v209_v18  ;;  %v280_v34 = vadd.f32 %v1322_v5, %v210_v24 }
  0x7c   :  { %v407_v38 = vadd.f32 %v343_v25, %v279_v27  ;;  %v408_v41 = vadd.f32 %v344_v28, %v280_v34 }
  0x7d   :  { %v1249_v4 = vld [vmem:[%s1830_s0 + $0xe8] sm:$0xff]  }
  0x7e   :  { %1275 = vst [vmem:[%s1834_s4 + $0xc0] sm:$0xff] %v1184_v6   ;;  %v1051_v19 = vunpack.c.l.bf16 %v1249_v4  ;;  %v1052_v29 = vunpack.c.h.bf16 %v1249_v4  ;;  %v471_v47 = vmax.f32 %v407_v38, 0.0  ;;  %v472_v51 = vmax.f32 %v408_v41, 0.0 }
  0x80   :  { %v211_v30 = vmul.f32 %v1051_v19, %v1311_v0  ;;  %v212_v39 = vmul.f32 %v1052_v29, %v1311_v0  ;;  %v1204_v59 = vpack.c.bf16 %v472_v51, %v471_v47 }
  0x82   :  { %v281_v40 = vadd.f32 %v1322_v5, %v211_v30  ;;  %v282_v48 = vadd.f32 %v1322_v5, %v212_v39 }
  0x84   :  { %v409_v49 = vadd.f32 %v345_v35, %v281_v40  ;;  %v410_v55 = vadd.f32 %v346_v42, %v282_v48 }
  0x85   :  { %v1250_v20 = vld [vmem:[%s1830_s0 + $0xf0] sm:$0xff]   ;;  %v1251_v31 = vld [vmem:[%s1830_s0 + $0xf8] sm:$0xff]  }
  0x86   :  { %1276 = vst [vmem:[%s1834_s4 + $0xc8] sm:$0xff] %v1189_v21   ;;  %v1055_v36 = vunpack.c.l.bf16 %v1250_v20  ;;  %1277 = vst [vmem:[%s1834_s4 + $0xd0] sm:$0xff] %v1194_v32   ;;  %v1056_v43 = vunpack.c.h.bf16 %v1250_v20  ;;  %v1059_v45 = vunpack.c.l.bf16 %v1251_v31  ;;  %v1060_v54 = vunpack.c.h.bf16 %v1251_v31 }
  0x87   :  { %1278 = vst [vmem:[%s1834_s4 + $0xd8] sm:$0xff] %v1199_v46   ;;  %v473_v56 = vmax.f32 %v409_v49, 0.0  ;;  %v474_v1 = vmax.f32 %v410_v55, 0.0  ;;  %1279 = vst [vmem:[%s1834_s4 + $0xe0] sm:$0xff] %v1204_v59  }
  0x88   :  { %v213_v44 = vmul.f32 %v1055_v36, %v1311_v0  ;;  %v214_v52 = vmul.f32 %v1056_v43, %v1311_v0  ;;  %v215_v58 = vmul.f32 %v1059_v45, %v1311_v0  ;;  %v216_v62 = vmul.f32 %v1060_v54, %v1311_v0 }
  0x89   :  { %v1209_v0 = vpack.c.bf16 %v474_v1, %v473_v56 }
  0x8a   :  { %v283_v53 = vadd.f32 %v1322_v5, %v213_v44  ;;  %v284_v60 = vadd.f32 %v1322_v5, %v214_v52  ;;  %v285_v2 = vadd.f32 %v1322_v5, %v215_v58  ;;  %v286_v7 = vadd.f32 %v1322_v5, %v216_v62 }
  0x8b   :  { %1280 = vst [vmem:[%s1834_s4 + $0xe8] sm:$0xff] %v1209_v0  }
  0x8c   :  { %v411_v61 = vadd.f32 %v347_v50, %v283_v53  ;;  %v412_v4 = vadd.f32 %v348_v57, %v284_v60  ;;  %v413_v8 = vadd.f32 %v349_v63, %v285_v2  ;;  %v414_v10 = vadd.f32 %v350_v3, %v286_v7 }
  0x8e   :  { %v475_v6 = vmax.f32 %v411_v61, 0.0  ;;  %v476_v9 = vmax.f32 %v412_v4, 0.0  ;;  %v477_v11 = vmax.f32 %v413_v8, 0.0  ;;  %v478_v13 = vmax.f32 %v414_v10, 0.0 }
  0x90   :  { %v1214_v12 = vpack.c.bf16 %v476_v9, %v475_v6  ;;  %v1219_v14 = vpack.c.bf16 %v478_v13, %v477_v11 }
  0x92   :  { %1281 = vst [vmem:[%s1834_s4 + $0xf0] sm:$0xff] %v1214_v12   ;;  %1282 = vst [vmem:[%s1834_s4 + $0xf8] sm:$0xff] %v1219_v14  }

// kernel: basic_block_forward.4
= control target key start
LH: loop header
LB: loop body
LE: loop exit
PB: predicated region body
PF: predicated region fallthrough
CT: control target
= control target key end

     0   :  { %v7907_v1 = vmov 0.0   ;;  %vm5524_vm0 = vcmask 1040384   ;;  %s9391_s3 = inlined_call_operand.vmem [shape: bf16[9,128,128], index: 3, kind: input, shape index: {}]   ;;  %s9392_s0 = inlined_call_operand.vmem [shape: bf16[2,16,16,128], index: 0, kind: input, shape index: {}]   ;;  %s9393_s1 = inlined_call_operand.vmem [shape: f32[1,128], index: 1, kind: input, shape index: {}]   ;;  %s9394_s2 = inlined_call_operand.vmem [shape: f32[1,128], index: 2, kind: input, shape index: {}]   ;;  %s9395_s4 = inlined_call_operand.vmem [shape: bf16[2,16,16,128], index: 4, kind: output, shape index: {0}]   ;;  %s9396_s5 = inlined_call_operand.vmem [shape: f32[1,2,128], index: 5, kind: output, shape index: {1}]  }
   0x1   :  { %v7941_v0 = vld [vmem:[%s9391_s3 + $0x40] sm:$0xff]   ;;  %354 = vst [vmem:[#allocation2] sm:$0xff] %v7907_v1  ;;  %355 = vst [vmem:[#allocation2 + $0x8] sm:$0xff] %v7907_v1  ;;  %v7826_v3 = vld [vmem:[%s9391_s3 + $0x48] sm:$0xff]  }
   0x2   :  { %356 = vst [vmem:[#allocation2 + $0x10] sm:$0x3] %v7907_v1  ;;  %357 = vst [vmem:[#allocation2 + $0x1b0] sm:$0xff] %v7907_v1  ;;  %v7825_v2 = vld [vmem:[%s9391_s3 + $0x100] sm:$0xff]   ;;  %6575 = vmatprep.subr.bf16.mxu1 %v7941_v0  ;;  %v7827_v4 = vld [vmem:[%s9391_s3 + $0x108] sm:$0xff]  }
   0x3   :  { %358 = vst [vmem:[#allocation2 + $0x1b8] sm:$0xff] %v7907_v1  ;;  %359 = vst [vmem:[#allocation2 + $0x1c0] sm:$0x3] %v7907_v1  ;;  %6895 = vmatprep.subr.bf16.mxu0 %v7825_v2  ;;  %6576 = vmatpush3.bf16.msra.mxu1 %v7941_v0  ;;  %v7828_v5 = vld [vmem:[%s9391_s3 + $0x50] sm:$0xff]   ;;  %v7830_v7 = vld [vmem:[%s9391_s3 + $0x58] sm:$0xff]  }
   0x4   :  { %361 = vst [vmem:[#allocation2 + $0x198] sm:$0xff] %v7907_v1  ;;  %362 = vst [vmem:[#allocation2 + $0x1a0] sm:$0xff] %v7907_v1  ;;  %6896 = vmatpush3.bf16.msra.mxu0 %v7825_v2  ;;  %6577 = vmatprep.subr.bf16.mxu1 %v7826_v3  ;;  %v7829_v6 = vld [vmem:[%s9391_s3 + $0x110] sm:$0xff]   ;;  %v7831_v8 = vld [vmem:[%s9391_s3 + $0x118] sm:$0xff]  }
   0x5   :  { %363 = vst [vmem:[#allocation2 + $0x1a8] sm:$0x3] %v7907_v1  ;;  %364 = vst [vmem:[#allocation2 + $0x348] sm:$0xff] %v7907_v1  ;;  %6897 = vmatprep.subr.bf16.mxu0 %v7827_v4  ;;  %v7832_v9 = vld [vmem:[%s9391_s3 + $0x60] sm:$0xff]   ;;  %v7834_v11 = vld [vmem:[%s9391_s3 + $0x68] sm:$0xff]  }
   0x6   :  { %365 = vst [vmem:[#allocation2 + $0x350] sm:$0xff] %v7907_v1  ;;  %366 = vst [vmem:[#allocation2 + $0x358] sm:$0x3] %v7907_v1  ;;  %v7833_v10 = vld [vmem:[%s9391_s3 + $0x120] sm:$0xff]   ;;  %v7835_v12 = vld [vmem:[%s9391_s3 + $0x128] sm:$0xff]  }
   0x7   :  { %368 = vst [vmem:[#allocation2 + $0x18] sm:$0x1] %v7907_v1  ;;  %369 = vst [vmem:[#allocation2 + $0x30] sm:$0x1] %v7907_v1  ;;  %6578 = vmatpush3.bf16.msra.mxu1 %v7826_v3  ;;  %v8065_v16 = vld [vmem:[%s9393_s1] ss:$0 sm:$0xff] }
   0x8   :  { %370 = vst [vmem:[#allocation2 + $0x48] sm:$0x1] %v7907_v1  ;;  %371 = vst [vmem:[#allocation2 + $0x60] sm:$0x1] %v7907_v1  ;;  %6898 = vmatpush3.bf16.msra.mxu0 %v7827_v4  ;;  %6579 = vmatprep.subr.bf16.mxu1 %v7828_v5  ;;  %v616_v13 = vld [vmem:[#allocation2 + $0x1] sm:$0xff]  ;;  %v7836_v18 = vld [vmem:[%s9391_s3 + $0x70] sm:$0xff]  }
   0x9   :  { %372 = vst [vmem:[#allocation2 + $0x78] sm:$0x1] %v7907_v1  ;;  %373 = vst [vmem:[#allocation2 + $0x90] sm:$0x1] %v7907_v1  ;;  %6899 = vmatprep.subr.bf16.mxu0 %v7829_v6  ;;  %v617_v14 = vld [vmem:[#allocation2 + $0x9] sm:$0xff]  ;;  %v5866_v17 = vld [vmem:[%s9392_s0] sm:$0xff]  }
   0xa   :  { %374 = vst [vmem:[#allocation2 + $0xa8] sm:$0x1] %v7907_v1  ;;  %375 = vst [vmem:[#allocation2 + $0xc0] sm:$0x1] %v7907_v1  ;;  %v680_v15 = vpack.c.bf16 %v617_v14, %v616_v13  ;;  %v5867_v19 = vunpack.c.l.bf16 %v5866_v17  ;;  %v5868_v20 = vunpack.c.h.bf16 %v5866_v17  ;;  %v6153_v21 = vld [vmem:[%s9392_s0 + $0x8] sm:$0xff]   ;;  %v6154_v27 = vld [vmem:[%s9392_s0 + $0x10] sm:$0xff]  }
   0xb   :  { %376 = vst [vmem:[#allocation2 + $0xd8] sm:$0x1] %v7907_v1  ;;  %377 = vst [vmem:[#allocation2 + $0xf0] sm:$0x1] %v7907_v1  ;;  %6580 = vmatpush3.bf16.msra.mxu1 %v7828_v5  ;;  %v8079_v22 = vld [vmem:[%s9394_s2] ss:$0 sm:$0xff]  ;;  %v5871_v23 = vunpack.c.l.bf16 %v6153_v21  ;;  %v5872_v24 = vunpack.c.h.bf16 %v6153_v21  ;;  %v5875_v32 = vunpack.c.l.bf16 %v6154_v27  ;;  %v5876_v33 = vunpack.c.h.bf16 %v6154_v27 }
   0xc   :  { %378 = vst [vmem:[#allocation2 + $0x108] sm:$0x1] %v7907_v1  ;;  %379 = vst [vmem:[#allocation2 + $0x120] sm:$0x1] %v7907_v1  ;;  %6900 = vmatpush3.bf16.msra.mxu0 %v7829_v6  ;;  %6581 = vmatprep.subr.bf16.mxu1 %v7830_v7  ;;  %v156_v25 = vmul.f32 %v5867_v19, %v8065_v16  ;;  %v157_v26 = vmul.f32 %v5868_v20, %v8065_v16  ;;  %v6155_v28 = vld [vmem:[%s9392_s0 + $0x18] sm:$0xff]   ;;  %v7837_v29 = vld [vmem:[%s9391_s3 + $0x130] sm:$0xff]  }
   0xd   :  { %380 = vst [vmem:[#allocation2 + $0x138] sm:$0x1] %v7907_v1  ;;  %381 = vst [vmem:[#allocation2 + $0x150] sm:$0x1] %v7907_v1  ;;  %6901 = vmatprep.subr.bf16.mxu0 %v7831_v8  ;;  %6591 = vmatprep.mubr.bf16.mxu1 %v680_v15  ;;  %v158_v30 = vmul.f32 %v5871_v23, %v8065_v16  ;;  %v159_v31 = vmul.f32 %v5872_v24, %v8065_v16  ;;  %v5879_v36 = vunpack.c.l.bf16 %v6155_v28  ;;  %v6156_v42 = vld [vmem:[%s9392_s0 + $0x20] sm:$0xff]   ;;  %v7838_v43 = vld [vmem:[%s9391_s3 + $0x78] sm:$0xff]  }
   0xe   :  { %382 = vst [vmem:[#allocation2 + $0x168] sm:$0x1] %v7907_v1  ;;  %383 = vst [vmem:[#allocation2 + $0x180] sm:$0x1] %v7907_v1  ;;  %v226_v34 = vadd.f32 %v8079_v22, %v156_v25  ;;  %v227_v35 = vadd.f32 %v8079_v22, %v157_v26  ;;  %v5880_v37 = vunpack.c.h.bf16 %v6155_v28  ;;  %v160_v40 = vmul.f32 %v5875_v32, %v8065_v16  ;;  %v7839_v44 = vld [vmem:[%s9391_s3 + $0x138] sm:$0xff]   ;;  %v6157_v49 = vld [vmem:[%s9392_s0 + $0x28] sm:$0xff]  }
   0xf   :  { %386 = vst [vmem:[#allocation2 + $0x1c8] sm:$0x1] %v7907_v1  ;;  %387 = vst [vmem:[#allocation2 + $0x1e0] sm:$0x1] %v7907_v1  ;;  %6582 = vmatpush3.bf16.msra.mxu1 %v7830_v7  ;;  %v228_v38 = vadd.f32 %v8079_v22, %v158_v30  ;;  %v229_v39 = vadd.f32 %v8079_v22, %v159_v31  ;;  %v161_v41 = vmul.f32 %v5876_v33, %v8065_v16  ;;  %v6158_v58 = vld [vmem:[%s9392_s0 + $0x30] sm:$0xff]   ;;  %v7840_v59 = vld [vmem:[%s9391_s3] sm:$0xff]  }
  0x10   :  { %388 = vst [vmem:[#allocation2 + $0x1f8] sm:$0x1] %v7907_v1  ;;  %389 = vst [vmem:[#allocation2 + $0x210] sm:$0x1] %v7907_v1  ;;  %6902 = vmatpush3.bf16.msra.mxu0 %v7831_v8  ;;  %6583 = vmatprep.subr.bf16.mxu1 %v7832_v9  ;;  %v290_v45 = vmax.f32 %v226_v34, 0.0  ;;  %v291_v46 = vmax.f32 %v227_v35, 0.0  ;;  %v162_v47 = vmul.f32 %v5879_v36, %v8065_v16  ;;  %v5883_v57 = vunpack.c.l.bf16 %v6156_v42 }
  0x11   :  { %390 = vst [vmem:[#allocation2 + $0x228] sm:$0x1] %v7907_v1  ;;  %391 = vst [vmem:[#allocation2 + $0x240] sm:$0x1] %v7907_v1  ;;  %6903 = vmatprep.subr.bf16.mxu0 %v7833_v10  ;;  %v163_v48 = vmul.f32 %v5880_v37, %v8065_v16  ;;  %v292_v50 = vmax.f32 %v228_v38, 0.0  ;;  %v293_v51 = vmax.f32 %v229_v39, 0.0  ;;  %v230_v52 = vadd.f32 %v8079_v22, %v160_v40 }
  0x12   :  { %392 = vst [vmem:[#allocation2 + $0x258] sm:$0x1] %v7907_v1  ;;  %393 = vst [vmem:[#allocation2 + $0x270] sm:$0x1] %v7907_v1  ;;  %v231_v53 = vadd.f32 %v8079_v22, %v161_v41  ;;  %v2495_v54 = vpack.c.bf16 %v291_v46, %v290_v45  ;;  %v8117_v55 = vadd.f32 %v8079_v22, %v162_v47  ;;  %v5884_v62 = vunpack.c.h.bf16 %v6156_v42  ;;  %v6159_v63 = vld [vmem:[%s9392_s0 + $0x38] sm:$0xff]   ;;  %v7841_v5 = vld [vmem:[%s9391_s3 + $0x140] sm:$0xff]  }
  0x13   :  { %394 = vst [vmem:[#allocation2 + $0x288] sm:$0x1] %v7907_v1  ;;  %395 = vst [vmem:[#allocation2 + $0x2a0] sm:$0x1] %v7907_v1  ;;  %6584 = vmatpush3.bf16.msra.mxu1 %v7832_v9  ;;  %v8120_v56 = vadd.f32 %v8079_v22, %v163_v48  ;;  %v294_v60 = vmax.f32 %v230_v52, 0.0  ;;  %v164_v2 = vmul.f32 %v5883_v57, %v8065_v16  ;;  %v5887_v3 = vunpack.c.l.bf16 %v6157_v49  ;;  %v7842_v24 = vld [vmem:[%s9391_s3 + $0x148] sm:$0xff]  }
  0x14   :  { %396 = vst [vmem:[#allocation2 + $0x2b8] sm:$0x1] %v7907_v1  ;;  %397 = vst [vmem:[#allocation2 + $0x2d0] sm:$0x1] %v7907_v1  ;;  %6904 = vmatpush3.bf16.msra.mxu0 %v7833_v10  ;;  %6585 = vmatprep.subr.bf16.mxu1 %v7834_v11  ;;  %v295_v61 = vmax.f32 %v231_v53, 0.0  ;;  %v296_v0 = vmax.f32 %v8117_v55, 0.0  ;;  %v2496_v4 = vpack.c.bf16 %v293_v51, %v292_v50  ;;  %v5888_v7 = vunpack.c.h.bf16 %v6157_v49 }
  0x15   :  { %398 = vst [vmem:[#allocation2 + $0x2e8] sm:$0x1] %v7907_v1  ;;  %399 = vst [vmem:[#allocation2 + $0x300] sm:$0x1] %v7907_v1  ;;  %6905 = vmatprep.subr.bf16.mxu0 %v7835_v12  ;;  %6911 = vmatprep.mubr.bf16.mxu0 %v2495_v54  ;;  %v165_v6 = vmul.f32 %v5884_v62, %v8065_v16  ;;  %v5891_v8 = vunpack.c.l.bf16 %v6158_v58  ;;  %v8145_v10 = vadd.f32 %v8079_v22, %v164_v2  ;;  %v7843_v26 = vld [vmem:[%s9391_s3 + $0x8] sm:$0xff]   ;;  %v7844_v38 = vld [vmem:[%s9391_s3 + $0x150] sm:$0xff]  }
  0x16   :  { %400 = vst [vmem:[#allocation2 + $0x318] sm:$0x1] %v7907_v1  ;;  %401 = vst [vmem:[#allocation2 + $0x330] sm:$0x1] %v7907_v1  ;;  %v8138_v9 = vpack.c.bf16 %v295_v61, %v294_v60  ;;  %v167_v14 = vmul.f32 %v5888_v7, %v8065_v16  ;;  %v5895_v17 = vunpack.c.l.bf16 %v6159_v63  ;;  %v5896_v23 = vunpack.c.h.bf16 %v6159_v63  ;;  %v6161_v34 = vld [vmem:[%s9392_s0 + $0x48] sm:$0xff]   ;;  %v6163_v48 = vld [vmem:[%s9392_s0 + $0x58] sm:$0xff]  }
  0x17   :  { %404 = vst [vmem:[#allocation2 + $0x29] sm:$0x1] %v7907_v1  ;;  %405 = vst [vmem:[#allocation2 + $0x41] sm:$0x1] %v7907_v1  ;;  %6586 = vmatpush3.bf16.msra.mxu1 %v7834_v11  ;;  %v166_v11 = vmul.f32 %v5887_v3, %v8065_v16  ;;  %v8149_v13 = vadd.f32 %v8079_v22, %v165_v6  ;;  %v168_v15 = vmul.f32 %v5891_v8, %v8065_v16  ;;  %v6164_v57 = vld [vmem:[%s9392_s0 + $0x60] sm:$0xff]   ;;  %v7845_v62 = vld [vmem:[%s9391_s3 + $0x158] sm:$0xff]  }
  0x18   :  { %406 = vst [vmem:[#allocation2 + $0x59] sm:$0x1] %v7907_v1  ;;  %407 = vst [vmem:[#allocation2 + $0x71] sm:$0x1] %v7907_v1  ;;  %6906 = vmatpush3.bf16.msra.mxu0 %v7835_v12  ;;  %6587 = vmatprep.subr.bf16.mxu1 %v7836_v18  ;;  %v5892_v12 = vunpack.c.h.bf16 %v6158_v58  ;;  %v298_v19 = vmax.f32 %v8145_v10, 0.0  ;;  %v8169_v27 = vadd.f32 %v8079_v22, %v167_v14  ;;  %v5904_v47 = vunpack.c.h.bf16 %v6161_v34  ;;  %v7849_v7 = vld [vmem:[%s9391_s3 + $0x18] sm:$0xff]  }
  0x19   :  { %408 = vst [vmem:[#allocation2 + $0x89] sm:$0x1] %v7907_v1  ;;  %409 = vst [vmem:[#allocation2 + $0xa1] sm:$0x1] %v7907_v1  ;;  %6907 = vmatprep.subr.bf16.mxu0 %v7837_v29  ;;  %v8158_v20 = vadd.f32 %v8079_v22, %v166_v11  ;;  %v299_v25 = vmax.f32 %v8149_v13, 0.0  ;;  %v8172_v28 = vadd.f32 %v8079_v22, %v168_v15  ;;  %v5915_v6 = vunpack.c.l.bf16 %v6164_v57  ;;  %v6165_v8 = vld [vmem:[%s9392_s0 + $0x68] sm:$0xff]  }
  0x1a   :  { %410 = vst [vmem:[#allocation2 + $0xb9] sm:$0x1] %v7907_v1  ;;  %411 = vst [vmem:[#allocation2 + $0xd1] sm:$0x1] %v7907_v1  ;;  %v169_v21 = vmul.f32 %v5892_v12, %v8065_v16  ;;  %v171_v32 = vmul.f32 %v5896_v23, %v8065_v16  ;;  %v301_v35 = vmax.f32 %v8169_v27, 0.0  ;;  %v7847_v13 = vld [vmem:[%s9391_s3 + $0x160] sm:$0xff]   ;;  %v5919_v27 = vunpack.c.l.bf16 %v6165_v8 }
  0x1b   :  { %412 = vst [vmem:[#allocation2 + $0xe9] sm:$0x1] %v7907_v1  ;;  %413 = vst [vmem:[#allocation2 + $0x101] sm:$0x1] %v7907_v1  ;;  %6588 = vmatpush3.bf16.msra.mxu1 %v7836_v18  ;;  %v6160_v18 = vld [vmem:[%s9392_s0 + $0x40] sm:$0xff]   ;;  %v300_v30 = vmax.f32 %v8158_v20, 0.0  ;;  %v8231_v58 = vpack.c.bf16 %v299_v25, %v298_v19 }
  0x1c   :  { %414 = vst [vmem:[#allocation2 + $0x119] sm:$0x1] %v7907_v1  ;;  %415 = vst [vmem:[#allocation2 + $0x131] sm:$0x1] %v7907_v1  ;;  %6908 = vmatpush3.bf16.msra.mxu0 %v7837_v29  ;;  %6589 = vmatprep.subr.bf16.mxu1 %v7838_v43  ;;  %v170_v29 = vmul.f32 %v5895_v17, %v8065_v16  ;;  %v8177_v31 = vadd.f32 %v8079_v22, %v169_v21  ;;  %v5899_v33 = vunpack.c.l.bf16 %v6160_v18 }
  0x1d   :  { %416 = vst [vmem:[#allocation2 + $0x149] sm:$0x1] %v7907_v1  ;;  %417 = vst [vmem:[#allocation2 + $0x161] sm:$0x1] %v7907_v1  ;;  %6909 = vmatprep.subr.bf16.mxu0 %v7839_v44  ;;  %v302_v36 = vmax.f32 %v8172_v28, 0.0  ;;  %v8195_v40 = vadd.f32 %v8079_v22, %v171_v32  ;;  %v5900_v41 = vunpack.c.h.bf16 %v6160_v18  ;;  %v5916_v17 = vunpack.c.h.bf16 %v6164_v57  ;;  %v6166_v18 = vld [vmem:[%s9392_s0 + $0x70] sm:$0xff]  }
  0x1e   :  { %418 = vst [vmem:[#allocation2 + $0x179] sm:$0x1] %v7907_v1  ;;  %419 = vst [vmem:[#allocation2 + $0x191] sm:$0x1] %v7907_v1  ;;  %v8186_v37 = vadd.f32 %v8079_v22, %v170_v29  ;;  %v303_v39 = vmax.f32 %v8177_v31, 0.0  ;;  %v172_v42 = vmul.f32 %v5899_v33, %v8065_v16  ;;  %v6167_v29 = vld [vmem:[%s9392_s0 + $0x78] sm:$0xff]   ;;  %v182_v31 = vmul.f32 %v5919_v27, %v8065_v16 }
  0x1f   :  { %422 = vst [vmem:[#allocation2 + $0x1d9] sm:$0x1] %v7907_v1  ;;  %423 = vst [vmem:[#allocation2 + $0x1f1] sm:$0x1] %v7907_v1  ;;  %6590 = vmatpush3.bf16.msra.mxu1 %v7838_v43  ;;  %v7846_v43 = vld [vmem:[%s9391_s3 + $0x10] sm:$0xff]  }
  0x20   :  { %424 = vst [vmem:[#allocation2 + $0x209] sm:$0x1] %v7907_v1  ;;  %425 = vst [vmem:[#allocation2 + $0x221] sm:$0x1] %v7907_v1  ;;  %6910 = vmatpush3.bf16.msra.mxu0 %v7839_v44  ;;  %6655 = vmatprep.subr.bf16.mxu1 %v7840_v59  ;;  %v6162_v44 = vld [vmem:[%s9392_s0 + $0x50] sm:$0xff]   ;;  %v8222_v52 = vadd.f32 %v8079_v22, %v172_v42  ;;  %v8308_v32 = vpack.c.bf16 %v303_v39, %v302_v36 }
  0x21   :  { %426 = vst [vmem:[#allocation2 + $0x239] sm:$0x1] %v7907_v1  ;;  %427 = vst [vmem:[#allocation2 + $0x251] sm:$0x1] %v7907_v1  ;;  %6975 = vmatprep.subr.bf16.mxu0 %v7841_v5  ;;  %v5907_v55 = vunpack.c.l.bf16 %v6162_v44 }
  0x22   :  { %428 = vst [vmem:[#allocation2 + $0x269] sm:$0x1] %v7907_v1  ;;  %429 = vst [vmem:[#allocation2 + $0x281] sm:$0x1] %v7907_v1  ;;  %6592 = vmatmul.mubr.bf16.vlgmr.msra.gmra.mrb[0].mxu1 %v2495_v54  ;;  %v175_v54 = vmul.f32 %v5904_v47, %v8065_v16  ;;  %v8335_v47 = vadd.f32 %v8079_v22, %v182_v31 }
  0x23   :  { %430 = vst [vmem:[#allocation2 + $0x299] sm:$0x1] %v7907_v1  ;;  %431 = vst [vmem:[#allocation2 + $0x2b1] sm:$0x1] %v7907_v1  ;;  %6912 = vmatmul.mubr.bf16.vlgmr.msra.gmra.mrb[0].mxu0 %v2496_v4  ;;  %6656 = vmatpush3.bf16.msra.mxu1 %v7840_v59 }
  0x24   :  { %432 = vst [vmem:[#allocation2 + $0x2c9] sm:$0x1] %v7907_v1  ;;  %433 = vst [vmem:[#allocation2 + $0x2e1] sm:$0x1] %v7907_v1  ;;  %6976 = vmatpush3.bf16.msra.mxu0 %v7841_v5  ;;  %6595 = vmatprep.mubr.bf16.mxu1 %v2496_v4  ;;  %v5912_v4 = vunpack.c.h.bf16 %v6163_v48  ;;  %v316_v57 = vmax.f32 %v8335_v47, 0.0 }
  0x25   :  { %434 = vst [vmem:[#allocation2 + $0x2f9] sm:$0x1] %v7907_v1  ;;  %435 = vst [vmem:[#allocation2 + $0x311] sm:$0x1] %v7907_v1  ;;  %6915 = vmatprep.mubr.bf16.mxu0 %v8138_v9  ;;  %6977 = vmatprep.subr.bf16.mxu0 %v7842_v24 }
  0x26   :  { %436 = vst [vmem:[#allocation2 + $0x329] sm:$0x1] %v7907_v1  ;;  %437 = vst [vmem:[#allocation2 + $0x341] sm:$0x1] %v7907_v1  ;;  %6657 = vmatprep.subr.bf16.mxu1 %v7843_v26  ;;  %v179_v14 = vmul.f32 %v5912_v4, %v8065_v16 }
  0x27   :  { %403 = vst [vmem:[#allocation2 + $0x11] sm:$0x1] %v7907_v1  ;;  %367 = vst [vmem:[#allocation2] sm:$0x1] %v7907_v1  ;;  %6658 = vmatpush3.bf16.msra.mxu1 %v7843_v26  ;;  %v181_v26 = vmul.f32 %v5916_v17, %v8065_v16 }
  0x28   :  { %384 = vst [vmem:[#allocation2 + $0x198] sm:$0x1] %v7907_v1  ;;  %385 = vst [vmem:[#allocation2 + $0x1b0] sm:$0x1] %v7907_v1  ;;  %6978 = vmatpush3.bf16.msra.mxu0 %v7842_v24  ;;  %6659 = vmatprep.subr.bf16.mxu1 %v7846_v43  ;;  %v180_v24 = vmul.f32 %v5915_v6, %v8065_v16 }
  0x29   :  { %402 = vst [vmem:[#allocation2 + $0x348] sm:$0x1] %v7907_v1  ;;  %420 = vst [vmem:[#allocation2 + $0x1a9] sm:$0x1] %v7907_v1  ;;  %6979 = vmatprep.subr.bf16.mxu0 %v7844_v38  ;;  %v8321_v28 = vadd.f32 %v8079_v22, %v181_v26 }
  0x2a   :  { %421 = vst [vmem:[#allocation2 + $0x1c1] sm:$0x1] %v7907_v1  ;;  %438 = vst [vmem:[#allocation2 + $0x359] sm:$0x1] %v7907_v1  ;;  %v297_v1 = vmax.f32 %v8120_v56, 0.0  ;;  %v5908_v56 = vunpack.c.h.bf16 %v6162_v44  ;;  %6596 = vmatmul.mubr.bf16.gmra.mrb[4].mxu1 %v8138_v9  ;;  %v8315_v33 = vadd.f32 %v8079_v22, %v180_v24  ;;  %v5927_v44 = vunpack.c.l.bf16 %v6167_v29 }
  0x2b   :  { %440 = vst [vmem:[#allocation2 + $0x19] sm:$0xff] %v290_v45  ;;  %441 = vst [vmem:[#allocation2 + $0x21] sm:$0xff] %v291_v46  ;;  %v304_v45 = vmax.f32 %v8186_v37, 0.0  ;;  %v5903_v46 = vunpack.c.l.bf16 %v6161_v34  ;;  %6660 = vmatpush3.bf16.msra.mxu1 %v7846_v43  ;;  %v5920_v34 = vunpack.c.h.bf16 %v6165_v8 }
  0x2c   :  { %442 = vst [vmem:[#allocation2 + $0x31] sm:$0xff] %v292_v50  ;;  %443 = vst [vmem:[#allocation2 + $0x39] sm:$0xff] %v293_v51  ;;  %v2498_v49 = vpack.c.bf16 %v297_v1, %v296_v0  ;;  %v305_v50 = vmax.f32 %v8195_v40, 0.0  ;;  %v173_v51 = vmul.f32 %v5900_v41, %v8065_v16  ;;  %v177_v2 = vmul.f32 %v5908_v56, %v8065_v16  ;;  %v6168_v56 = vld [vmem:[%s9392_s0 + $0x80] sm:$0xff]  }
  0x2d   :  { %444 = vst [vmem:[#allocation2 + $0x49] sm:$0xff] %v294_v60  ;;  %445 = vst [vmem:[#allocation2 + $0x51] sm:$0xff] %v295_v61  ;;  %v174_v53 = vmul.f32 %v5903_v46, %v8065_v16  ;;  %v306_v60 = vmax.f32 %v8222_v52, 0.0  ;;  %v5911_v61 = vunpack.c.l.bf16 %v6163_v48  ;;  %6980 = vmatpush3.bf16.msra.mxu0 %v7844_v38  ;;  %6661 = vmatprep.subr.bf16.mxu1 %v7849_v7  ;;  %v314_v41 = vmax.f32 %v8315_v33, 0.0 }
  0x2e   :  { %446 = vst [vmem:[#allocation2 + $0x61] sm:$0xff] %v296_v0  ;;  %447 = vst [vmem:[#allocation2 + $0x69] sm:$0xff] %v297_v1  ;;  %v8236_v59 = vadd.f32 %v8079_v22, %v173_v51  ;;  %v8246_v0 = vadd.f32 %v8079_v22, %v175_v54  ;;  %v176_v1 = vmul.f32 %v5907_v55, %v8065_v16  ;;  %6916 = vmatmul.mubr.bf16.gmra.mrb[4].mxu0 %v2498_v49 }
  0x2f   :  { %448 = vst [vmem:[#allocation2 + $0x79] sm:$0xff] %v298_v19  ;;  %449 = vst [vmem:[#allocation2 + $0x81] sm:$0xff] %v299_v25  ;;  %v8243_v63 = vadd.f32 %v8079_v22, %v174_v53  ;;  %v178_v5 = vmul.f32 %v5911_v61, %v8065_v16  ;;  %6599 = vmatprep.mubr.bf16.mxu1 %v2498_v49  ;;  %v8267_v12 = vadd.f32 %v8079_v22, %v177_v2  ;;  %v7854_v49 = vld [vmem:[%s9391_s3 + $0x28] sm:$0xff]  }
  0x30   :  { %450 = vst [vmem:[#allocation2 + $0x91] sm:$0xff] %v300_v30  ;;  %451 = vst [vmem:[#allocation2 + $0x99] sm:$0xff] %v301_v35  ;;  %v307_v3 = vmax.f32 %v8236_v59, 0.0  ;;  %v309_v10 = vmax.f32 %v8246_v0, 0.0  ;;  %v8264_v11 = vadd.f32 %v8079_v22, %v176_v1  ;;  %6919 = vmatprep.mubr.bf16.mxu0 %v8231_v58  ;;  %v2500_v19 = vpack.c.bf16 %v301_v35, %v300_v30  ;;  %v7852_v30 = vld [vmem:[%s9391_s3 + $0x20] sm:$0xff]   ;;  %v7851_v59 = vld [vmem:[%s9391_s3 + $0x178] sm:$0xff]  }
  0x31   :  { %452 = vst [vmem:[#allocation2 + $0xa9] sm:$0xff] %v302_v36  ;;  %453 = vst [vmem:[#allocation2 + $0xb1] sm:$0xff] %v303_v39  ;;  %v308_v9 = vmax.f32 %v8243_v63, 0.0  ;;  %v8277_v15 = vadd.f32 %v8079_v22, %v178_v5  ;;  %6981 = vmatprep.subr.bf16.mxu0 %v7845_v62  ;;  %v311_v23 = vmax.f32 %v8267_v12, 0.0  ;;  %v8294_v25 = vadd.f32 %v8079_v22, %v179_v14  ;;  %v7848_v39 = vld [vmem:[%s9391_s3 + $0x168] sm:$0xff]   ;;  %v7856_v14 = vld [vmem:[%s9391_s3 + $0x30] sm:$0xff]  }
  0x32   :  { %454 = vst [vmem:[#allocation2 + $0xc1] sm:$0xff] %v304_v45  ;;  %455 = vst [vmem:[#allocation2 + $0xc9] sm:$0xff] %v305_v50  ;;  %v310_v21 = vmax.f32 %v8264_v11, 0.0  ;;  %v5923_v35 = vunpack.c.l.bf16 %v6166_v18  ;;  %6982 = vmatpush3.bf16.msra.mxu0 %v7845_v62  ;;  %v5924_v36 = vunpack.c.h.bf16 %v6166_v18  ;;  %v183_v42 = vmul.f32 %v5920_v34, %v8065_v16  ;;  %6662 = vmatpush3.bf16.msra.mxu1 %v7849_v7  ;;  %v7850_v62 = vld [vmem:[%s9391_s3 + $0x170] sm:$0xff]   ;;  %v6169_v5 = vld [vmem:[%s9392_s0 + $0x88] sm:$0xff]  }
  0x33   :  { %456 = vst [vmem:[#allocation2 + $0xd9] sm:$0xff] %v306_v60  ;;  %457 = vst [vmem:[#allocation2 + $0xe1] sm:$0xff] %v307_v3  ;;  %v312_v20 = vmax.f32 %v8277_v15, 0.0  ;;  %v313_v38 = vmax.f32 %v8294_v25, 0.0  ;;  %6983 = vmatprep.subr.bf16.mxu0 %v7847_v13  ;;  %6600 = vmatmul.mubr.bf16.gmra.mrb[8].mxu1 %v8231_v58  ;;  %v315_v46 = vmax.f32 %v8321_v28, 0.0  ;;  %v5928_v54 = vunpack.c.h.bf16 %v6167_v29  ;;  %v7858_v34 = vld [vmem:[%s9391_s3 + $0x38] sm:$0xff]  }
  0x34   :  { %458 = vst [vmem:[#allocation2 + $0xf1] sm:$0xff] %v308_v9  ;;  %459 = vst [vmem:[#allocation2 + $0xf9] sm:$0xff] %v309_v10  ;;  %v184_v43 = vmul.f32 %v5923_v35, %v8065_v16  ;;  %v185_v48 = vmul.f32 %v5924_v36, %v8065_v16  ;;  %6663 = vmatprep.subr.bf16.mxu1 %v7852_v30  ;;  %6603 = vmatprep.mubr.bf16.mxu1 %v2500_v19  ;;  %v5931_v7 = vunpack.c.l.bf16 %v6168_v56  ;;  %v6173_v63 = vld [vmem:[%s9392_s0 + $0xa8] sm:$0xff]   ;;  %v8467_v0 = vld [vmem:[%s9391_s3 + $0x80] sm:$0xff]  }
  0x35   :  { %460 = vst [vmem:[#allocation2 + $0x109] sm:$0xff] %v310_v21  ;;  %461 = vst [vmem:[#allocation2 + $0x111] sm:$0xff] %v311_v23  ;;  %v8344_v51 = vadd.f32 %v8079_v22, %v183_v42  ;;  %v186_v55 = vmul.f32 %v5927_v44, %v8065_v16  ;;  %v187_v2 = vmul.f32 %v5928_v54, %v8065_v16  ;;  %v5932_v8 = vunpack.c.h.bf16 %v6168_v56  ;;  %v8437_v44 = vld [vmem:[%s9391_s3 + $0x180] sm:$0xff]  }
  0x36   :  { %462 = vst [vmem:[#allocation2 + $0x121] sm:$0xff] %v312_v20  ;;  %463 = vst [vmem:[#allocation2 + $0x129] sm:$0xff] %v313_v38  ;;  %6920 = vmatmul.mubr.bf16.gmra.mrb[8].mxu0 %v2500_v19  ;;  %v8347_v53 = vadd.f32 %v8079_v22, %v184_v43  ;;  %v8358_v58 = vadd.f32 %v8079_v22, %v185_v48  ;;  %6664 = vmatpush3.bf16.msra.mxu1 %v7852_v30  ;;  %v6176_v15 = vld [vmem:[%s9392_s0 + $0xc0] sm:$0xff]  }
  0x37   :  { %464 = vst [vmem:[#allocation2 + $0x139] sm:$0xff] %v314_v41  ;;  %6923 = vmatprep.mubr.bf16.mxu0 %v8308_v32  ;;  %6984 = vmatpush3.bf16.msra.mxu0 %v7847_v13  ;;  %465 = vst [vmem:[#allocation2 + $0x141] sm:$0xff] %v315_v46  ;;  %v317_v61 = vmax.f32 %v8344_v51, 0.0  ;;  %v8367_v4 = vadd.f32 %v8079_v22, %v186_v55  ;;  %v6170_v13 = vld [vmem:[%s9392_s0 + $0x90] sm:$0xff]   ;;  %v2502_v17 = vpack.c.bf16 %v305_v50, %v304_v45  ;;  %v6171_v50 = vld [vmem:[%s9392_s0 + $0x98] sm:$0xff]  }
  0x38   :  { %6985 = vmatprep.subr.bf16.mxu0 %v7848_v39  ;;  %v318_v1 = vmax.f32 %v8347_v53, 0.0  ;;  %466 = vst [vmem:[#allocation2 + $0x151] sm:$0xff] %v316_v57  ;;  %v319_v6 = vmax.f32 %v8358_v58, 0.0  ;;  %6665 = vmatprep.subr.bf16.mxu1 %v7854_v49  ;;  %v8390_v18 = vadd.f32 %v8079_v22, %v187_v2  ;;  %v8397_v24 = vpack.c.bf16 %v307_v3, %v306_v60  ;;  %v6172_v55 = vld [vmem:[%s9392_s0 + $0xa0] sm:$0xff]  }
  0x39   :  { %467 = vst [vmem:[#allocation2 + $0x159] sm:$0xff] %v317_v61  ;;  %v320_v19 = vmax.f32 %v8367_v4, 0.0  ;;  %v188_v37 = vmul.f32 %v5931_v7, %v8065_v16  ;;  %v189_v40 = vmul.f32 %v5932_v8, %v8065_v16  ;;  %v5935_v45 = vunpack.c.l.bf16 %v6169_v5  ;;  %v6180_v58 = vld [vmem:[%s9392_s0 + $0xe0] sm:$0xff]  }
  0x3a   :  { %468 = vst [vmem:[#allocation2 + $0x169] sm:$0xff] %v318_v1  ;;  %469 = vst [vmem:[#allocation2 + $0x171] sm:$0xff] %v319_v6  ;;  %v321_v52 = vmax.f32 %v8390_v18, 0.0  ;;  %v5936_v60 = vunpack.c.h.bf16 %v6169_v5  ;;  %v5939_v3 = vunpack.c.l.bf16 %v6170_v13  ;;  %6666 = vmatpush3.bf16.msra.mxu1 %v7854_v49  ;;  %v5940_v30 = vunpack.c.h.bf16 %v6170_v13 }
  0x3b   :  { %6986 = vmatpush3.bf16.msra.mxu0 %v7848_v39  ;;  %470 = vst [vmem:[#allocation2 + $0x181] sm:$0xff] %v320_v19  ;;  %6604 = vmatmul.mubr.bf16.gmra.mrb[12].mxu1 %v8308_v32  ;;  %v8414_v26 = vadd.f32 %v8079_v22, %v188_v37  ;;  %v8417_v27 = vadd.f32 %v8079_v22, %v189_v40  ;;  %v5943_v31 = vunpack.c.l.bf16 %v6171_v50  ;;  %v5944_v54 = vunpack.c.h.bf16 %v6171_v50 }
  0x3c   :  { %6987 = vmatprep.subr.bf16.mxu0 %v7850_v62  ;;  %v190_v29 = vmul.f32 %v5935_v45, %v8065_v16  ;;  %6667 = vmatprep.subr.bf16.mxu1 %v7856_v14  ;;  %471 = vst [vmem:[#allocation2 + $0x189] sm:$0xff] %v321_v52  ;;  %v191_v32 = vmul.f32 %v5936_v60, %v8065_v16  ;;  %v5948_v11 = vunpack.c.h.bf16 %v6172_v55 }
  0x3d   :  { %6607 = vmatprep.mubr.bf16.mxu1 %v2502_v17  ;;  %v192_v35 = vmul.f32 %v5939_v3, %v8065_v16  ;;  %v322_v36 = vmax.f32 %v8414_v26, 0.0  ;;  %v323_v39 = vmax.f32 %v8417_v27, 0.0  ;;  %v193_v43 = vmul.f32 %v5940_v30, %v8065_v16 }
  0x3e   :  { %6924 = vmatmul.mubr.bf16.gmra.mrb[12].mxu0 %v2502_v17  ;;  %v8431_v42 = vadd.f32 %v8079_v22, %v190_v29  ;;  %v8440_v48 = vadd.f32 %v8079_v22, %v191_v32  ;;  %6668 = vmatpush3.bf16.msra.mxu1 %v7856_v14  ;;  %v2504_v56 = vpack.c.bf16 %v309_v10, %v308_v9  ;;  %v5947_v17 = vunpack.c.l.bf16 %v6172_v55 }
  0x3f   :  { %6927 = vmatprep.mubr.bf16.mxu0 %v8397_v24  ;;  %6988 = vmatpush3.bf16.msra.mxu0 %v7850_v62  ;;  %v8443_v49 = vadd.f32 %v8079_v22, %v192_v35  ;;  %472 = vst [vmem:[#allocation2 + $0x1c9] sm:$0xff] %v322_v36  ;;  %473 = vst [vmem:[#allocation2 + $0x1d1] sm:$0xff] %v323_v39  ;;  %v8458_v2 = vadd.f32 %v8079_v22, %v193_v43 }
  0x40   :  { %6989 = vmatprep.subr.bf16.mxu0 %v7851_v59  ;;  %v324_v62 = vmax.f32 %v8431_v42, 0.0  ;;  %v194_v5 = vmul.f32 %v5943_v31, %v8065_v16  ;;  %6669 = vmatprep.subr.bf16.mxu1 %v7858_v34  ;;  %v2505_v9 = vpack.c.bf16 %v311_v23, %v310_v21  ;;  %v325_v10 = vmax.f32 %v8440_v48, 0.0  ;;  %v6174_v23 = vld [vmem:[%s9392_s0 + $0xb0] sm:$0xff]   ;;  %v2951_v48 = vld [vmem:[#allocation2 + $0x62] sm:$0xff] }
  0x41   :  { %v326_v7 = vmax.f32 %v8443_v49, 0.0  ;;  %v195_v8 = vmul.f32 %v5944_v54, %v8065_v16  ;;  %v327_v13 = vmax.f32 %v8458_v2, 0.0  ;;  %v5951_v21 = vunpack.c.l.bf16 %v6173_v63  ;;  %v2955_v2 = vld [vmem:[#allocation2 + $0x92] sm:$0xff] }
  0x42   :  { %474 = vst [vmem:[#allocation2 + $0x1e1] sm:$0xff] %v324_v62  ;;  %v8480_v14 = vadd.f32 %v8079_v22, %v194_v5  ;;  %475 = vst [vmem:[#allocation2 + $0x1e9] sm:$0xff] %v325_v10  ;;  %6670 = vmatpush3.bf16.msra.mxu1 %v7858_v34  ;;  %v196_v40 = vmul.f32 %v5947_v17, %v8065_v16  ;;  %v197_v45 = vmul.f32 %v5948_v11, %v8065_v16  ;;  %v6175_v34 = vld [vmem:[%s9392_s0 + $0xb8] sm:$0xff]   ;;  %v6177_v11 = vld [vmem:[%s9392_s0 + $0xc8] sm:$0xff]  }
  0x43   :  { %6990 = vmatpush3.bf16.msra.mxu0 %v7851_v59  ;;  %476 = vst [vmem:[#allocation2 + $0x1f9] sm:$0xff] %v326_v7  ;;  %v8488_v12 = vadd.f32 %v8079_v22, %v195_v8  ;;  %6608 = vmatmul.mubr.bf16.gmra.mrb[16].mxu1 %v8397_v24  ;;  %477 = vst [vmem:[#allocation2 + $0x201] sm:$0xff] %v327_v13  ;;  %v5952_v59 = vunpack.c.h.bf16 %v6173_v63  ;;  %v198_v60 = vmul.f32 %v5951_v21, %v8065_v16 }
  0x44   :  { %7055 = vmatprep.subr.bf16.mxu0 %v8437_v44  ;;  %v328_v37 = vmax.f32 %v8480_v14, 0.0  ;;  %6735 = vmatprep.subr.bf16.mxu1 %v8467_v0  ;;  %v8505_v24 = vadd.f32 %v8079_v22, %v196_v40  ;;  %v8508_v3 = vadd.f32 %v8079_v22, %v197_v45  ;;  %v5955_v29 = vunpack.c.l.bf16 %v6174_v23  ;;  %v2958_v14 = vld [vmem:[#allocation2 + $0xb2] sm:$0xff] }
  0x45   :  { %6611 = vmatprep.mubr.bf16.mxu1 %v2504_v56  ;;  %v329_v50 = vmax.f32 %v8488_v12, 0.0  ;;  %v5956_v30 = vunpack.c.h.bf16 %v6174_v23  ;;  %v2506_v32 = vpack.c.bf16 %v313_v38, %v312_v20  ;;  %v199_v35 = vmul.f32 %v5952_v59, %v8065_v16  ;;  %v7861_v12 = vld [vmem:[%s9391_s3 + $0x1a0] sm:$0xff]  }
  0x46   :  { %6928 = vmatmul.mubr.bf16.gmra.mrb[16].mxu0 %v2504_v56  ;;  %478 = vst [vmem:[#allocation2 + $0x211] sm:$0xff] %v328_v37  ;;  %v8521_v31 = vadd.f32 %v8079_v22, %v198_v60  ;;  %v330_v43 = vmax.f32 %v8505_v24, 0.0  ;;  %v331_v54 = vmax.f32 %v8508_v3, 0.0  ;;  %v200_v55 = vmul.f32 %v5955_v29, %v8065_v16  ;;  %v2959_v24 = vld [vmem:[#allocation2 + $0xc2] sm:$0xff]  ;;  %v2960_v3 = vld [vmem:[#allocation2 + $0xca] sm:$0xff] }
  0x47   :  { %6931 = vmatprep.mubr.bf16.mxu0 %v2505_v9  ;;  %479 = vst [vmem:[#allocation2 + $0x219] sm:$0xff] %v329_v50  ;;  %v201_v56 = vmul.f32 %v5956_v30, %v8065_v16  ;;  %v8531_v25 = vadd.f32 %v8079_v22, %v199_v35  ;;  %v5959_v38 = vunpack.c.l.bf16 %v6175_v34  ;;  %v5960_v5 = vunpack.c.h.bf16 %v6175_v34 }
  0x48   :  { %v332_v20 = vmax.f32 %v8521_v31, 0.0  ;;  %v2507_v63 = vpack.c.bf16 %v315_v46, %v314_v41  ;;  %480 = vst [vmem:[#allocation2 + $0x229] sm:$0xff] %v330_v43  ;;  %481 = vst [vmem:[#allocation2 + $0x231] sm:$0xff] %v331_v54  ;;  %v8543_v8 = vadd.f32 %v8079_v22, %v200_v55  ;;  %v5963_v46 = vunpack.c.l.bf16 %v6176_v15  ;;  %v7865_v31 = vld [vmem:[%s9391_s3 + $0x1b0] sm:$0xff]  }
  0x49   :  { %v8546_v17 = vadd.f32 %v8079_v22, %v201_v56  ;;  %v333_v33 = vmax.f32 %v8531_v25, 0.0  ;;  %v202_v28 = vmul.f32 %v5959_v38, %v8065_v16  ;;  %v203_v41 = vmul.f32 %v5960_v5, %v8065_v16  ;;  %v6179_v56 = vld [vmem:[%s9392_s0 + $0xd8] sm:$0xff]  }
  0x4a   :  { %482 = vst [vmem:[#allocation2 + $0x241] sm:$0xff] %v332_v20  ;;  %v334_v21 = vmax.f32 %v8543_v8, 0.0  ;;  %v5964_v40 = vunpack.c.h.bf16 %v6176_v15  ;;  %v5967_v60 = vunpack.c.l.bf16 %v6177_v11  ;;  %v204_v29 = vmul.f32 %v5963_v46, %v8065_v16  ;;  %v2963_v8 = vld [vmem:[#allocation2 + $0xf2] sm:$0xff] }
  0x4b   :  { %6612 = vmatmul.mubr.bf16.gmra.mrb[20].mxu1 %v2505_v9  ;;  %v335_v23 = vmax.f32 %v8546_v17, 0.0  ;;  %483 = vst [vmem:[#allocation2 + $0x249] sm:$0xff] %v333_v33  ;;  %v8561_v45 = vadd.f32 %v8079_v22, %v202_v28  ;;  %v8564_v59 = vadd.f32 %v8079_v22, %v203_v41  ;;  %v6178_v9 = vld [vmem:[%s9392_s0 + $0xd0] sm:$0xff]   ;;  %v5968_v34 = vunpack.c.h.bf16 %v6177_v11  ;;  %v2964_v17 = vld [vmem:[#allocation2 + $0xfa] sm:$0xff] }
  0x4c   :  { %6615 = vmatprep.mubr.bf16.mxu1 %v2506_v32  ;;  %484 = vst [vmem:[#allocation2 + $0x259] sm:$0xff] %v334_v21  ;;  %v205_v30 = vmul.f32 %v5964_v40, %v8065_v16  ;;  %v206_v55 = vmul.f32 %v5967_v60, %v8065_v16  ;;  %v8582_v15 = vadd.f32 %v8079_v22, %v204_v29  ;;  %v5971_v28 = vunpack.c.l.bf16 %v6178_v9  ;;  %v648_v60 = vld [vmem:[#allocation2 + $0x1b1] sm:$0xff] }
  0x4d   :  { %485 = vst [vmem:[#allocation2 + $0x261] sm:$0xff] %v335_v23  ;;  %v9401_v35 = vmax.f32 %v8564_v59, 0.0  ;;  %v207_v5 = vmul.f32 %v5968_v34, %v8065_v16  ;;  %v2508_v11 = vpack.c.bf16 %v317_v61, %v316_v57  ;;  %v2509_v41 = vpack.c.bf16 %v319_v6, %v318_v1  ;;  %v649_v61 = vld [vmem:[#allocation2 + $0x1b9] sm:$0xff] }
  0x4e   :  { %6932 = vmatmul.mubr.bf16.gmra.mrb[20].mxu0 %v2506_v32  ;;  %v336_v32 = vmax.f32 %v8561_v45, 0.0  ;;  %v8585_v38 = vadd.f32 %v8079_v22, %v205_v30  ;;  %v8601_v46 = vadd.f32 %v8079_v22, %v206_v55  ;;  %v5972_v40 = vunpack.c.h.bf16 %v6178_v9  ;;  %v2945_v55 = vld [vmem:[#allocation2 + $0x1a] sm:$0xff] }
  0x4f   :  { %6935 = vmatprep.mubr.bf16.mxu0 %v2507_v63  ;;  %487 = vst [vmem:[#allocation2 + $0x279] sm:$0xff] %v9401_v35  ;;  %v9399_v47 = vmax.f32 %v8582_v15, 0.0  ;;  %v8606_v53 = vadd.f32 %v8079_v22, %v207_v5  ;;  %v208_v57 = vmul.f32 %v5971_v28, %v8065_v16  ;;  %v5975_v9 = vunpack.c.l.bf16 %v6179_v56  ;;  %v2946_v5 = vld [vmem:[#allocation2 + $0x22] sm:$0xff] }
  0x50   :  { %486 = vst [vmem:[#allocation2 + $0x271] sm:$0xff] %v336_v32  ;;  %v9397_v51 = vmax.f32 %v8585_v38, 0.0  ;;  %v9398_v1 = vmax.f32 %v8601_v46, 0.0  ;;  %v209_v6 = vmul.f32 %v5972_v40, %v8065_v16  ;;  %v5976_v29 = vunpack.c.h.bf16 %v6179_v56  ;;  %v8763_v45 = vld [vmem:[%s9391_s3 + $0x1c0] sm:$0xff]  }
  0x51   :  { %488 = vst [vmem:[#allocation2 + $0x289] sm:$0xff] %v9399_v47  ;;  %v9400_v30 = vmax.f32 %v8606_v53, 0.0  ;;  %v8620_v34 = vadd.f32 %v8079_v22, %v208_v57  ;;  %v210_v56 = vmul.f32 %v5975_v9, %v8065_v16  ;;  %v5979_v40 = vunpack.c.l.bf16 %v6180_v58  ;;  %v6181_v57 = vld [vmem:[%s9392_s0 + $0xe8] sm:$0xff]  }
  0x52   :  { %489 = vst [vmem:[#allocation2 + $0x291] sm:$0xff] %v9397_v51  ;;  %490 = vst [vmem:[#allocation2 + $0x2a1] sm:$0xff] %v9398_v1  ;;  %v211_v28 = vmul.f32 %v5976_v29, %v8065_v16  ;;  %v696_v51 = vpack.c.bf16 %v649_v61, %v648_v60  ;;  %v5980_v1 = vunpack.c.h.bf16 %v6180_v58  ;;  %v6182_v60 = vld [vmem:[%s9392_s0 + $0xf0] sm:$0xff]   ;;  %v3009_v61 = vpack.c.bf16 %v2946_v5, %v2945_v55 }
  0x53   :  { %6616 = vmatmul.mubr.bf16.gmra.mrb[24].mxu1 %v2507_v63  ;;  %v8625_v63 = vadd.f32 %v8079_v22, %v209_v6  ;;  %491 = vst [vmem:[#allocation2 + $0x2a9] sm:$0xff] %v9400_v30  ;;  %v8637_v47 = vadd.f32 %v8079_v22, %v210_v56  ;;  %v212_v29 = vmul.f32 %v5979_v40, %v8065_v16  ;;  %v5983_v30 = vunpack.c.l.bf16 %v6181_v57 }
  0x54   :  { %6619 = vmatprep.mubr.bf16.mxu1 %v2508_v11  ;;  %v8640_v9 = vadd.f32 %v8079_v22, %v211_v28  ;;  %v213_v58 = vmul.f32 %v5980_v1, %v8065_v16  ;;  %v5984_v35 = vunpack.c.h.bf16 %v6181_v57  ;;  %v2510_v56 = vpack.c.bf16 %v321_v52, %v320_v19 }
  0x55   :  { %v343_v6 = vmax.f32 %v8625_v63, 0.0  ;;  %v344_v28 = vmax.f32 %v8637_v47, 0.0  ;;  %v8658_v55 = vadd.f32 %v8079_v22, %v212_v29  ;;  %v214_v1 = vmul.f32 %v5983_v30, %v8065_v16 }
  0x56   :  { %6936 = vmatmul.mubr.bf16.gmra.mrb[24].mxu0 %v2508_v11  ;;  %v342_v11 = vmax.f32 %v8620_v34, 0.0  ;;  %v9402_v40 = vmax.f32 %v8640_v9, 0.0  ;;  %v8661_v5 = vadd.f32 %v8079_v22, %v213_v58  ;;  %v215_v4 = vmul.f32 %v5984_v35, %v8065_v16  ;;  %v7896_v16 = vld [vmem:[%s9393_s1] ss:$0 sm:$0xff]  ;;  %v2947_v58 = vld [vmem:[#allocation2 + $0x32] sm:$0xff] }
  0x57   :  { %6939 = vmatprep.mubr.bf16.mxu0 %v2509_v41  ;;  %493 = vst [vmem:[#allocation2 + $0x2c1] sm:$0xff] %v343_v6  ;;  %v5987_v57 = vunpack.c.l.bf16 %v6182_v60  ;;  %494 = vst [vmem:[#allocation2 + $0x2d1] sm:$0xff] %v344_v28  ;;  %v346_v18 = vmax.f32 %v8658_v55, 0.0  ;;  %v5988_v19 = vunpack.c.h.bf16 %v6182_v60  ;;  %v8672_v29 = vadd.f32 %v8079_v22, %v214_v1  ;;  %v2949_v60 = vld [vmem:[#allocation2 + $0x4a] sm:$0xff]  ;;  %v2950_v1 = vld [vmem:[#allocation2 + $0x52] sm:$0xff] }
  0x58   :  { %492 = vst [vmem:[#allocation2 + $0x2b9] sm:$0xff] %v342_v11  ;;  %495 = vst [vmem:[#allocation2 + $0x2d9] sm:$0xff] %v9402_v40  ;;  %v9403_v52 = vmax.f32 %v8661_v5, 0.0  ;;  %v8675_v30 = vadd.f32 %v8079_v22, %v215_v4  ;;  %v2948_v40 = vld [vmem:[#allocation2 + $0x3a] sm:$0xff]  ;;  %v698_v26 = vpack.c.bf16 %v325_v10, %v324_v62  ;;  %v2952_v62 = vld [vmem:[#allocation2 + $0x6a] sm:$0xff]  ;;  %v703_v25 = vpack.c.bf16 %v335_v23, %v334_v21 }
  0x59   :  { %v216_v35 = vmul.f32 %v7896_v16, %v5987_v57  ;;  %496 = vst [vmem:[#allocation2 + $0x2e9] sm:$0xff] %v346_v18  ;;  %v348_v22 = vmax.f32 %v8672_v29, 0.0  ;;  %v2953_v10 = vld [vmem:[#allocation2 + $0x7a] sm:$0xff]  ;;  %v2965_v21 = vld [vmem:[#allocation2 + $0x10a] sm:$0xff]  ;;  %v2966_v23 = vld [vmem:[#allocation2 + $0x112] sm:$0xff]  ;;  %v9410_v34 = vmax.f32 %v8661_v5, 0.0 }
  0x5a   :  { %497 = vst [vmem:[#allocation2 + $0x2f1] sm:$0xff] %v9403_v52  ;;  %v349_v4 = vmax.f32 %v8675_v30, 0.0  ;;  %v3010_v52 = vpack.c.bf16 %v2948_v40, %v2947_v58  ;;  %v2954_v40 = vld [vmem:[#allocation2 + $0x82] sm:$0xff]  ;;  %v7857_v58 = vld [vmem:[%s9391_s3 + $0x190] sm:$0xff]  }
  0x5b   :  { %6620 = vmatmul.mubr.bf16.gmra.mrb[28].mxu1 %v2509_v41  ;;  %v217_v41 = vmul.f32 %v7896_v16, %v5988_v19  ;;  %498 = vst [vmem:[#allocation2 + $0x301] sm:$0xff] %v348_v22  ;;  %v709_v63 = vpack.c.bf16 %v9410_v34, %v346_v18  ;;  %v8794_v18 = vld [vmem:[#allocation2 + $0x8] sm:$0xff]  ;;  %v2994_v34 = vld [vmem:[#allocation2 + $0x292] sm:$0xff] }
  0x5c   :  { %6623 = vmatprep.mubr.bf16.mxu1 %v696_v51  ;;  %v7897_v51 = vld [vmem:[%s9394_s2] ss:$0 sm:$0xff]  ;;  %499 = vst [vmem:[#allocation2 + $0x309] sm:$0xff] %v349_v4  ;;  %v710_v47 = vpack.c.bf16 %v349_v4, %v348_v22  ;;  %v506_v22 = vld [vmem:[#allocation2 + $0x18] sm:$0xff] }
  0x5d   :  { %v8691_v57 = vadd.f32 %v7897_v51, %v217_v41  ;;  %v507_v4 = vld [vmem:[#allocation2 + $0x20] sm:$0xff] }
  0x5e   :  { %6940 = vmatmul.mubr.bf16.gmra.mrb[28].mxu0 %v2510_v56  ;;  %v8689_v56 = vadd.f32 %v7897_v51, %v216_v35  ;;  %v6183_v35 = vld [vmem:[%s9392_s0 + $0xf8] sm:$0xff]  }
  0x5f   :  { %6991 = vmatprep.mubr.bf16.mxu0 %v3009_v61  ;;  %v697_v61 = vpack.c.bf16 %v323_v39, %v322_v36  ;;  %v351_v27 = vmax.f32 %v8691_v57, 0.0  ;;  %v3011_v36 = vpack.c.bf16 %v2950_v1, %v2949_v60  ;;  %v7855_v39 = vld [vmem:[%s9391_s3 + $0x188] sm:$0xff]   ;;  %v5991_v41 = vunpack.c.l.bf16 %v6183_v35 }
  0x60   :  { %v350_v19 = vmax.f32 %v8689_v56, 0.0  ;;  %v5992_v42 = vunpack.c.h.bf16 %v6183_v35  ;;  %v2981_v56 = vld [vmem:[#allocation2 + $0x1fa] sm:$0xff]  ;;  %v569_v57 = vpack.c.bf16 %v507_v4, %v506_v22  ;;  %v2998_v22 = vld [vmem:[#allocation2 + $0x2c2] sm:$0xff] }
  0x61   :  { %501 = vst [vmem:[#allocation2 + $0x321] sm:$0xff] %v351_v27  ;;  %v218_v60 = vmul.f32 %v7896_v16, %v5991_v41  ;;  %v7859_v41 = vld [vmem:[%s9391_s3 + $0x198] sm:$0xff]   ;;  %v8843_v4 = vld [vmem:[%s9391_s3 + $0xc0] sm:$0xff]  }
  0x62   :  { %500 = vst [vmem:[#allocation2 + $0x319] sm:$0xff] %v350_v19  ;;  %v219_v1 = vmul.f32 %v7896_v16, %v5992_v42  ;;  %v711_v55 = vpack.c.bf16 %v351_v27, %v350_v19 }
  0x63   :  { %6624 = vmatmul.mubr.bf16.gmra.mrb[32].mxu1 %v697_v61  ;;  %v3012_v61 = vpack.c.bf16 %v2952_v62, %v2951_v48  ;;  %v288_v35 = vadd.f32 %v7897_v51, %v218_v60  ;;  %v9407_v60 = vmax.f32 %v8601_v46, 0.0 }
  0x64   :  { %6627 = vmatprep.mubr.bf16.mxu1 %v698_v26  ;;  %v289_v26 = vadd.f32 %v7897_v51, %v219_v1  ;;  %v702_v51 = vpack.c.bf16 %v333_v33, %v332_v20  ;;  %v3016_v20 = vpack.c.bf16 %v2960_v3, %v2959_v24  ;;  %v9404_v33 = vmax.f32 %v8564_v59, 0.0  ;;  %v7862_v3 = vld [vmem:[%s9391_s3 + $0x88] sm:$0xff]  }
  0x65   :  { %v352_v16 = vmax.f32 %v288_v35, 0.0  ;;  %v9405_v59 = vmax.f32 %v8582_v15, 0.0  ;;  %v9408_v1 = vmax.f32 %v8606_v53, 0.0  ;;  %v2968_v35 = vld [vmem:[#allocation2 + $0x12a] sm:$0xff]  ;;  %v2969_v15 = vld [vmem:[#allocation2 + $0x13a] sm:$0xff]  ;;  %v9409_v53 = vmax.f32 %v8640_v9, 0.0 }
  0x66   :  { %6992 = vmatmul.mubr.bf16.vlgmr.msra.gmra.mrb[0].mxu0 %v3010_v52  ;;  %v699_v52 = vpack.c.bf16 %v327_v13, %v326_v7  ;;  %v353_v49 = vmax.f32 %v289_v26, 0.0  ;;  %v2956_v7 = vld [vmem:[#allocation2 + $0x9a] sm:$0xff]  ;;  %v2957_v13 = vld [vmem:[#allocation2 + $0xaa] sm:$0xff]  ;;  %v704_v48 = vpack.c.bf16 %v9404_v33, %v336_v32  ;;  %v9406_v32 = vmax.f32 %v8585_v38, 0.0  ;;  %v2970_v26 = vld [vmem:[#allocation2 + $0x142] sm:$0xff] }
  0x67   :  { %7056 = vmatpush3.bf16.msra.mxu0 %v8437_v44  ;;  %6995 = vmatprep.mubr.bf16.mxu0 %v3011_v36  ;;  %v700_v44 = vpack.c.bf16 %v329_v50, %v328_v37  ;;  %v3013_v36 = vpack.c.bf16 %v2954_v40, %v2953_v10  ;;  %502 = vst [vmem:[#allocation2 + $0x331] sm:$0xff] %v352_v16  ;;  %v7867_v10 = vld [vmem:[%s9391_s3 + $0x1b8] sm:$0xff]   ;;  %v2975_v9 = vld [vmem:[#allocation2 + $0x182] sm:$0xff] }
  0x68   :  { %7057 = vmatprep.subr.bf16.mxu0 %v7855_v39  ;;  %503 = vst [vmem:[#allocation2 + $0x339] sm:$0xff] %v353_v49  ;;  %v701_v37 = vpack.c.bf16 %v331_v54, %v330_v43  ;;  %v3014_v50 = vpack.c.bf16 %v2956_v7, %v2955_v2  ;;  %v3015_v42 = vpack.c.bf16 %v2958_v14, %v2957_v13  ;;  %v2961_v43 = vld [vmem:[#allocation2 + $0xda] sm:$0xff]  ;;  %v2962_v54 = vld [vmem:[#allocation2 + $0xe2] sm:$0xff]  ;;  %v2971_v16 = vld [vmem:[#allocation2 + $0x152] sm:$0xff] }
  0x69   :  { %v3017_v62 = vpack.c.bf16 %v2962_v54, %v2961_v43  ;;  %v705_v40 = vpack.c.bf16 %v9406_v32, %v9405_v59  ;;  %v707_v38 = vpack.c.bf16 %v343_v6, %v342_v11  ;;  %v2972_v49 = vld [vmem:[#allocation2 + $0x15a] sm:$0xff]  ;;  %v2973_v2 = vld [vmem:[#allocation2 + $0x16a] sm:$0xff]  ;;  %v2974_v7 = vld [vmem:[#allocation2 + $0x172] sm:$0xff] }
  0x6a   :  { %v3022_v11 = vpack.c.bf16 %v2972_v49, %v2971_v16  ;;  %v3023_v6 = vpack.c.bf16 %v2974_v7, %v2973_v2  ;;  %v504_v13 = vld [vmem:[#allocation2] sm:$0xff]  ;;  %v2977_v14 = vld [vmem:[#allocation2 + $0x1ca] sm:$0xff]  ;;  %v514_v59 = vld [vmem:[#allocation2 + $0x78] sm:$0xff] }
  0x6b   :  { %7058 = vmatpush3.bf16.msra.mxu0 %v7855_v39  ;;  %6628 = vmatmul.mubr.bf16.gmra.mrb[36].mxu1 %v699_v52  ;;  %v7863_v39 = vld [vmem:[%s9391_s3 + $0x1a8] sm:$0xff]   ;;  %v706_v52 = vpack.c.bf16 %v9408_v1, %v9407_v60  ;;  %v568_v29 = vpack.c.bf16 %v8794_v18, %v504_v13  ;;  %v511_v54 = vld [vmem:[#allocation2 + $0x50] sm:$0xff]  ;;  %v2984_v33 = vld [vmem:[#allocation2 + $0x21a] sm:$0xff] }
  0x6c   :  { %7059 = vmatprep.subr.bf16.mxu0 %v7857_v58  ;;  %6631 = vmatprep.mubr.bf16.mxu1 %v700_v44  ;;  %v2967_v44 = vld [vmem:[#allocation2 + $0x122] sm:$0xff]  ;;  %v2988_v60 = vld [vmem:[#allocation2 + $0x24a] sm:$0xff]  ;;  %v517_v1 = vld [vmem:[#allocation2 + $0x98] sm:$0xff] }
  0x6d   :  { %v3020_v46 = vpack.c.bf16 %v2968_v35, %v2967_v44  ;;  %v510_v43 = vld [vmem:[#allocation2 + $0x48] sm:$0xff]  ;;  %v515_v32 = vld [vmem:[#allocation2 + $0x80] sm:$0xff]  ;;  %v2991_v16 = vld [vmem:[#allocation2 + $0x272] sm:$0xff] }
  0x6e   :  { %6996 = vmatmul.mubr.bf16.gmra.mrb[4].mxu0 %v3012_v61  ;;  %v3019_v61 = vpack.c.bf16 %v2966_v23, %v2965_v21  ;;  %v7866_v23 = vld [vmem:[%s9391_s3 + $0x98] sm:$0xff]   ;;  %v7868_v44 = vld [vmem:[%s9391_s3 + $0xa0] sm:$0xff]   ;;  %v8819_v35 = vpack.c.bf16 %v515_v32, %v514_v59  ;;  %v521_v2 = vld [vmem:[#allocation2 + $0xc8] sm:$0xff] }
  0x6f   :  { %6999 = vmatprep.mubr.bf16.mxu0 %v3013_v36  ;;  %7060 = vmatpush3.bf16.msra.mxu0 %v7857_v58  ;;  %v3018_v58 = vpack.c.bf16 %v2964_v17, %v2963_v8  ;;  %v708_v36 = vpack.c.bf16 %v9409_v53, %v344_v28  ;;  %v2976_v28 = vld [vmem:[#allocation2 + $0x18a] sm:$0xff]  ;;  %v8807_v8 = vpack.c.bf16 %v511_v54, %v510_v43  ;;  %v2992_v49 = vld [vmem:[#allocation2 + $0x27a] sm:$0xff]  ;;  %v3002_v54 = vld [vmem:[#allocation2 + $0x2f2] sm:$0xff] }
  0x70   :  { %7061 = vmatprep.subr.bf16.mxu0 %v7859_v41  ;;  %v3024_v5 = vpack.c.bf16 %v2976_v28, %v2975_v9  ;;  %v518_v53 = vld [vmem:[#allocation2 + $0xa8] sm:$0xff]  ;;  %v7874_v28 = vld [vmem:[%s9391_s3 + $0xb8] sm:$0xff]  }
  0x71   :  { %v2993_v7 = vld [vmem:[#allocation2 + $0x28a] sm:$0xff]  ;;  %v522_v13 = vld [vmem:[#allocation2 + $0xd8] sm:$0xff]  ;;  %v3006_v32 = vld [vmem:[#allocation2 + $0x322] sm:$0xff] }
  0x72   :  { %v3033_v9 = vpack.c.bf16 %v2994_v34, %v2993_v7  ;;  %v3001_v43 = vld [vmem:[#allocation2 + $0x2ea] sm:$0xff]  ;;  %v3005_v59 = vld [vmem:[#allocation2 + $0x31a] sm:$0xff] }
  0x73   :  { %7062 = vmatpush3.bf16.msra.mxu0 %v7859_v41  ;;  %6632 = vmatmul.mubr.bf16.gmra.mrb[40].mxu1 %v701_v37  ;;  %v3021_v41 = vpack.c.bf16 %v2970_v26, %v2969_v15  ;;  %v2979_v37 = vld [vmem:[#allocation2 + $0x1e2] sm:$0xff] }
  0x74   :  { %7063 = vmatprep.subr.bf16.mxu0 %v7861_v12  ;;  %6635 = vmatprep.mubr.bf16.mxu1 %v702_v51  ;;  %v508_v51 = vld [vmem:[#allocation2 + $0x30] sm:$0xff] }
  0x76   :  { %7000 = vmatmul.mubr.bf16.gmra.mrb[8].mxu0 %v3014_v50  ;;  %v2980_v50 = vld [vmem:[#allocation2 + $0x1ea] sm:$0xff] }
  0x77   :  { %7003 = vmatprep.mubr.bf16.mxu0 %v3015_v42  ;;  %7064 = vmatpush3.bf16.msra.mxu0 %v7861_v12  ;;  %v2978_v12 = vld [vmem:[#allocation2 + $0x1d2] sm:$0xff]  ;;  %v2982_v42 = vld [vmem:[#allocation2 + $0x202] sm:$0xff]  ;;  %v3026_v19 = vpack.c.bf16 %v2980_v50, %v2979_v37 }
  0x78   :  { %7065 = vmatprep.subr.bf16.mxu0 %v7863_v39  ;;  %v3025_v30 = vpack.c.bf16 %v2978_v12, %v2977_v14  ;;  %v3027_v24 = vpack.c.bf16 %v2982_v42, %v2981_v56  ;;  %v523_v14 = vld [vmem:[#allocation2 + $0xe0] sm:$0xff]  ;;  %v524_v12 = vld [vmem:[#allocation2 + $0xf0] sm:$0xff]  ;;  %v526_v56 = vld [vmem:[#allocation2 + $0x108] sm:$0xff] }
  0x79   :  { %v8845_v37 = vpack.c.bf16 %v523_v14, %v522_v13  ;;  %v527_v42 = vld [vmem:[#allocation2 + $0x110] sm:$0xff] }
  0x7a   :  { %v7873_v13 = vld [vmem:[%s9391_s3 + $0x1d0] sm:$0xff]  }
  0x7b   :  { %7066 = vmatpush3.bf16.msra.mxu0 %v7863_v39  ;;  %6636 = vmatmul.mubr.bf16.gmra.mrb[44].mxu1 %v703_v25  ;;  %v509_v39 = vld [vmem:[#allocation2 + $0x38] sm:$0xff]  ;;  %v513_v25 = vld [vmem:[#allocation2 + $0x68] sm:$0xff] }
  0x7c   :  { %7067 = vmatprep.subr.bf16.mxu0 %v7865_v31  ;;  %6639 = vmatprep.mubr.bf16.mxu1 %v704_v48  ;;  %v8797_v27 = vpack.c.bf16 %v509_v39, %v508_v51  ;;  %v7864_v48 = vld [vmem:[%s9391_s3 + $0x90] sm:$0xff]  }
  0x7e   :  { %7004 = vmatmul.mubr.bf16.gmra.mrb[12].mxu0 %v3016_v20  ;;  %v2983_v20 = vld [vmem:[#allocation2 + $0x212] sm:$0xff] }
  0x7f   :  { %7007 = vmatprep.mubr.bf16.mxu0 %v3017_v62  ;;  %7068 = vmatpush3.bf16.msra.mxu0 %v7865_v31  ;;  %v512_v31 = vld [vmem:[#allocation2 + $0x60] sm:$0xff]  ;;  %v2985_v62 = vld [vmem:[#allocation2 + $0x22a] sm:$0xff]  ;;  %v3028_v17 = vpack.c.bf16 %v2984_v33, %v2983_v20  ;;  %v3037_v33 = vpack.c.bf16 %v3002_v54, %v3001_v43 }
  0x80   :  { %7069 = vmatprep.subr.bf16.mxu0 %v7867_v10  ;;  %v8809_v21 = vpack.c.bf16 %v513_v25, %v512_v31  ;;  %v8852_v31 = vpack.c.bf16 %v527_v42, %v526_v56  ;;  %v553_v56 = vld [vmem:[#allocation2 + $0x278] sm:$0xff]  ;;  %v7881_v42 = vld [vmem:[%s9391_s3 + $0x1f0] sm:$0xff]   ;;  %v557_v43 = vld [vmem:[#allocation2 + $0x2a8] sm:$0xff] }
  0x81   :  { %v8923_v54 = vld [vmem:[%s9391_s3 + $0x200] sm:$0xff]  }
  0x83   :  { %7070 = vmatpush3.bf16.msra.mxu0 %v7867_v10  ;;  %6640 = vmatmul.mubr.bf16.gmra.mrb[48].mxu1 %v705_v40  ;;  %v2986_v10 = vld [vmem:[#allocation2 + $0x232] sm:$0xff] }
  0x84   :  { %7135 = vmatprep.subr.bf16.mxu0 %v8763_v45  ;;  %6643 = vmatprep.mubr.bf16.mxu1 %v706_v52  ;;  %v516_v40 = vld [vmem:[#allocation2 + $0x90] sm:$0xff]  ;;  %v2989_v52 = vld [vmem:[#allocation2 + $0x25a] sm:$0xff] }
  0x85   :  { %v8821_v26 = vpack.c.bf16 %v517_v1, %v516_v40  ;;  %v3039_v1 = vpack.c.bf16 %v3006_v32, %v3005_v59  ;;  %v565_v59 = vld [vmem:[#allocation2 + $0x308] sm:$0xff]  ;;  %v3488_v32 = vld [vmem:[#allocation2 + $0x180] sm:$0xff] }
  0x86   :  { %7008 = vmatmul.mubr.bf16.gmra.mrb[16].mxu0 %v3018_v58  ;;  %v2987_v58 = vld [vmem:[#allocation2 + $0x242] sm:$0xff] }
  0x87   :  { %7011 = vmatprep.mubr.bf16.mxu0 %v3019_v61  ;;  %v2990_v61 = vld [vmem:[#allocation2 + $0x262] sm:$0xff]  ;;  %v3030_v15 = vpack.c.bf16 %v2988_v60, %v2987_v58 }
  0x8b   :  { %6644 = vmatmul.mubr.bf16.gmra.mrb[52].mxu1 %v707_v38  ;;  %v3031_v38 = vpack.c.bf16 %v2990_v61, %v2989_v52  ;;  %v534_v52 = vld [vmem:[#allocation2 + $0x168] sm:$0xff]  ;;  %v535_v61 = vld [vmem:[#allocation2 + $0x170] sm:$0xff] }
  0x8c   :  { %6647 = vmatprep.mubr.bf16.mxu1 %v708_v36  ;;  %v519_v36 = vld [vmem:[#allocation2 + $0xb0] sm:$0xff] }
  0x8e   :  { %7012 = vmatmul.mubr.bf16.gmra.mrb[20].mxu0 %v3020_v46  ;;  %v7870_v46 = vld [vmem:[%s9391_s3 + $0xa8] sm:$0xff]  }
  0x8f   :  { %7015 = vmatprep.mubr.bf16.mxu0 %v3021_v41  ;;  %v520_v41 = vld [vmem:[#allocation2 + $0xc0] sm:$0xff] }
  0x93   :  { %6648 = vmatmul.mubr.bf16.gmra.mrb[56].mxu1 %v709_v63  ;;  %v7872_v63 = vld [vmem:[%s9391_s3 + $0xb0] sm:$0xff]  }
  0x94   :  { %6651 = vmatprep.mubr.bf16.mxu1 %v710_v47  ;;  %v3032_v47 = vpack.c.bf16 %v2992_v49, %v2991_v16  ;;  %v539_v16 = vld [vmem:[#allocation2 + $0x1d0] sm:$0xff]  ;;  %v540_v49 = vld [vmem:[#allocation2 + $0x1e0] sm:$0xff] }
  0x96   :  { %7016 = vmatmul.mubr.bf16.gmra.mrb[24].mxu0 %v3022_v11  ;;  %v8831_v11 = vpack.c.bf16 %v519_v36, %v518_v53 }
  0x97   :  { %7019 = vmatprep.mubr.bf16.mxu0 %v3023_v6  ;;  %v8833_v6 = vpack.c.bf16 %v521_v2, %v520_v41  ;;  %v538_v41 = vld [vmem:[#allocation2 + $0x1c8] sm:$0xff] }
  0x98   :  { %v541_v2 = vld [vmem:[#allocation2 + $0x1e8] sm:$0xff]  ;;  %v585_v7 = vpack.c.bf16 %v539_v16, %v538_v41  ;;  %v1405_v41 = vld [vmem:[#allocation2 + $0x1a] sm:$0xff]  ;;  %v1407_v16 = vld [vmem:[#allocation2 + $0x32] sm:$0xff] }
  0x99   :  { %v8869_v34 = vpack.c.bf16 %v541_v2, %v540_v49  ;;  %v1408_v49 = vld [vmem:[#allocation2 + $0x3a] sm:$0xff] }
  0x9b   :  { %6652 = vmatmul.mubr.bf16.gmra.mrb[60].mxu1 %v711_v55  ;;  %v2995_v55 = vld [vmem:[#allocation2 + $0x2a2] sm:$0xff] }
  0x9c   :  { %6671 = vmatprep.mubr.bf16.mxu1 %v568_v29  ;;  %v525_v29 = vld [vmem:[#allocation2 + $0xf8] sm:$0xff] }
  0x9d   :  { %v8847_v51 = vpack.c.bf16 %v525_v29, %v524_v12  ;;  %v7877_v29 = vld [vmem:[%s9391_s3 + $0x1e0] sm:$0xff]  }
  0x9e   :  { %7020 = vmatmul.mubr.bf16.gmra.mrb[28].mxu0 %v3024_v5  ;;  %v2996_v5 = vld [vmem:[#allocation2 + $0x2aa] sm:$0xff] }
  0x9f   :  { %7023 = vmatprep.mubr.bf16.mxu0 %v3025_v30  ;;  %v2997_v30 = vld [vmem:[#allocation2 + $0x2ba] sm:$0xff]  ;;  %v3034_v50 = vpack.c.bf16 %v2996_v5, %v2995_v55  ;;  %v549_v5 = vld [vmem:[#allocation2 + $0x248] sm:$0xff] }
  0xa0   :  { %v3035_v39 = vpack.c.bf16 %v2998_v22, %v2997_v30  ;;  %v548_v55 = vld [vmem:[#allocation2 + $0x240] sm:$0xff] }
  0xa1   :  { %v8897_v22 = vpack.c.bf16 %v549_v5, %v548_v55  ;;  %v7884_v55 = vld [vmem:[%s9391_s3 + $0xe0] sm:$0xff]  }
  0xa3   :  { %6672 = vmatmul.mubr.bf16.vlgmr.msra.gmra.mrb[0].mxu1 %v569_v57  ;;  %v528_v57 = vld [vmem:[#allocation2 + $0x120] sm:$0xff] }
  0xa4   :  { %6736 = vmatpush3.bf16.msra.mxu1 %v8467_v0  ;;  %6675 = vmatprep.mubr.bf16.mxu1 %v8797_v27  ;;  %v3029_v0 = vpack.c.bf16 %v2986_v10, %v2985_v62  ;;  %v531_v62 = vld [vmem:[#allocation2 + $0x140] sm:$0xff]  ;;  %v532_v10 = vld [vmem:[#allocation2 + $0x150] sm:$0xff] }
  0xa5   :  { %6737 = vmatprep.subr.bf16.mxu1 %v7862_v3 }
  0xa6   :  { %7024 = vmatmul.mubr.bf16.gmra.mrb[32].mxu0 %v3026_v19  ;;  %v2999_v19 = vld [vmem:[#allocation2 + $0x2d2] sm:$0xff] }
  0xa7   :  { %7027 = vmatprep.mubr.bf16.mxu0 %v3027_v24  ;;  %v3000_v24 = vld [vmem:[#allocation2 + $0x2da] sm:$0xff] }
  0xa8   :  { %6738 = vmatpush3.bf16.msra.mxu1 %v7862_v3  ;;  %v529_v3 = vld [vmem:[#allocation2 + $0x128] sm:$0xff]  ;;  %v3036_v25 = vpack.c.bf16 %v3000_v24, %v2999_v19  ;;  %v555_v24 = vld [vmem:[#allocation2 + $0x290] sm:$0xff] }
  0xa9   :  { %6739 = vmatprep.subr.bf16.mxu1 %v7864_v48  ;;  %v8854_v20 = vpack.c.bf16 %v529_v3, %v528_v57  ;;  %v556_v3 = vld [vmem:[#allocation2 + $0x2a0] sm:$0xff] }
  0xab   :  { %6676 = vmatmul.mubr.bf16.gmra.mrb[4].mxu1 %v8807_v8 }
  0xac   :  { %6679 = vmatprep.mubr.bf16.mxu1 %v8809_v21  ;;  %6740 = vmatpush3.bf16.msra.mxu1 %v7864_v48  ;;  %v530_v48 = vld [vmem:[#allocation2 + $0x138] sm:$0xff] }
  0xad   :  { %6741 = vmatprep.subr.bf16.mxu1 %v7866_v23  ;;  %v8858_v40 = vpack.c.bf16 %v531_v62, %v530_v48  ;;  %v560_v48 = vld [vmem:[#allocation2 + $0x2d0] sm:$0xff]  ;;  %v561_v62 = vld [vmem:[#allocation2 + $0x2d8] sm:$0xff] }
  0xae   :  { %7028 = vmatmul.mubr.bf16.gmra.mrb[36].mxu0 %v3028_v17  ;;  %v3003_v17 = vld [vmem:[#allocation2 + $0x302] sm:$0xff] }
  0xaf   :  { %7031 = vmatprep.mubr.bf16.mxu0 %v3029_v0  ;;  %v3004_v0 = vld [vmem:[#allocation2 + $0x30a] sm:$0xff] }
  0xb0   :  { %6742 = vmatpush3.bf16.msra.mxu1 %v7866_v23  ;;  %v533_v23 = vld [vmem:[#allocation2 + $0x158] sm:$0xff]  ;;  %v3038_v58 = vpack.c.bf16 %v3004_v0, %v3003_v17  ;;  %v8936_v17 = vpack.c.bf16 %v561_v62, %v560_v48  ;;  %v562_v0 = vld [vmem:[#allocation2 + $0x2e8] sm:$0xff] }
  0xb1   :  { %6743 = vmatprep.subr.bf16.mxu1 %v7868_v44  ;;  %v8860_v60 = vpack.c.bf16 %v533_v23, %v532_v10  ;;  %v564_v23 = vld [vmem:[#allocation2 + $0x300] sm:$0xff]  ;;  %v1428_v48 = vld [vmem:[#allocation2 + $0x12a] sm:$0xff] }
  0xb3   :  { %6680 = vmatmul.mubr.bf16.gmra.mrb[8].mxu1 %v8819_v35 }
  0xb4   :  { %6683 = vmatprep.mubr.bf16.mxu1 %v8821_v26  ;;  %6744 = vmatpush3.bf16.msra.mxu1 %v7868_v44  ;;  %v3007_v44 = vld [vmem:[#allocation2 + $0x332] sm:$0xff] }
  0xb5   :  { %6745 = vmatprep.subr.bf16.mxu1 %v7870_v46 }
  0xb6   :  { %7032 = vmatmul.mubr.bf16.gmra.mrb[40].mxu0 %v3030_v15  ;;  %v3008_v15 = vld [vmem:[#allocation2 + $0x33a] sm:$0xff] }
  0xb7   :  { %7035 = vmatprep.mubr.bf16.mxu0 %v3031_v38  ;;  %v536_v38 = vld [vmem:[#allocation2 + $0x1b0] sm:$0xff]  ;;  %v3040_v53 = vpack.c.bf16 %v3008_v15, %v3007_v44  ;;  %v1403_v44 = vld [vmem:[#allocation2 + $0x2] sm:$0xff] }
  0xb8   :  { %6746 = vmatpush3.bf16.msra.mxu1 %v7870_v46  ;;  %v8864_v46 = vpack.c.bf16 %v535_v61, %v534_v52  ;;  %v584_v36 = vpack.c.bf16 %v8794_v18, %v536_v38  ;;  %v567_v61 = vld [vmem:[#allocation2 + $0x320] sm:$0xff]  ;;  %v1404_v15 = vld [vmem:[#allocation2 + $0xa] sm:$0xff] }
  0xb9   :  { %6747 = vmatprep.subr.bf16.mxu1 %v7872_v63 }
  0xbb   :  { %6684 = vmatmul.mubr.bf16.gmra.mrb[12].mxu1 %v8831_v11 }
  0xbc   :  { %6687 = vmatprep.mubr.bf16.mxu1 %v8833_v6  ;;  %6748 = vmatpush3.bf16.msra.mxu1 %v7872_v63  ;;  %v7871_v63 = vld [vmem:[%s9391_s3 + $0x1c8] sm:$0xff]  }
  0xbd   :  { %6749 = vmatprep.subr.bf16.mxu1 %v7874_v28 }
  0xbe   :  { %7036 = vmatmul.mubr.bf16.gmra.mrb[44].mxu0 %v3032_v47  ;;  %v542_v47 = vld [vmem:[#allocation2 + $0x1f8] sm:$0xff] }
  0xbf   :  { %7039 = vmatprep.mubr.bf16.mxu0 %v3033_v9  ;;  %v543_v9 = vld [vmem:[#allocation2 + $0x200] sm:$0xff] }
  0xc0   :  { %6750 = vmatpush3.bf16.msra.mxu1 %v7874_v28  ;;  %v545_v28 = vld [vmem:[#allocation2 + $0x218] sm:$0xff]  ;;  %v8881_v14 = vpack.c.bf16 %v543_v9, %v542_v47  ;;  %v1409_v47 = vld [vmem:[#allocation2 + $0x4a] sm:$0xff] }
  0xc1   :  { %6815 = vmatprep.subr.bf16.mxu1 %v8843_v4  ;;  %v1410_v9 = vld [vmem:[#allocation2 + $0x52] sm:$0xff] }
  0xc3   :  { %6688 = vmatmul.mubr.bf16.gmra.mrb[16].mxu1 %v8845_v37 }
  0xc4   :  { %6691 = vmatprep.mubr.bf16.mxu1 %v8847_v51 }
  0xc6   :  { %7040 = vmatmul.mubr.bf16.gmra.mrb[48].mxu0 %v3034_v50  ;;  %v551_v50 = vld [vmem:[#allocation2 + $0x260] sm:$0xff] }
  0xc7   :  { %7043 = vmatprep.mubr.bf16.mxu0 %v3035_v39  ;;  %v552_v39 = vld [vmem:[#allocation2 + $0x270] sm:$0xff] }
  0xc8   :  { %v8911_v19 = vpack.c.bf16 %v553_v56, %v552_v39  ;;  %v7888_v39 = vld [vmem:[%s9391_s3 + $0xf0] sm:$0xff]  }
  0xcb   :  { %6692 = vmatmul.mubr.bf16.gmra.mrb[20].mxu1 %v8852_v31 }
  0xcc   :  { %6695 = vmatprep.mubr.bf16.mxu1 %v8854_v20 }
  0xce   :  { %7044 = vmatmul.mubr.bf16.gmra.mrb[52].mxu0 %v3036_v25 }
  0xcf   :  { %7047 = vmatprep.mubr.bf16.mxu0 %v3037_v33  ;;  %v8927_v33 = vpack.c.bf16 %v557_v43, %v556_v3 }
  0xd3   :  { %6696 = vmatmul.mubr.bf16.gmra.mrb[24].mxu1 %v8858_v40 }
  0xd4   :  { %6699 = vmatprep.mubr.bf16.mxu1 %v8860_v60 }
  0xd6   :  { %7048 = vmatmul.mubr.bf16.gmra.mrb[56].mxu0 %v3038_v58 }
  0xd7   :  { %7051 = vmatprep.mubr.bf16.mxu0 %v3039_v1  ;;  %v8944_v1 = vpack.c.bf16 %v565_v59, %v564_v23  ;;  %v1431_v23 = vld [vmem:[#allocation2 + $0x152] sm:$0xff]  ;;  %v1432_v59 = vld [vmem:[#allocation2 + $0x15a] sm:$0xff] }
  0xdb   :  { %6700 = vmatmul.mubr.bf16.gmra.mrb[28].mxu1 %v8864_v46 }
  0xdc   :  { %6703 = vmatprep.mubr.bf16.mxu1 %v584_v36  ;;  %v1467_v36 = vpack.c.bf16 %v1404_v15, %v1403_v44  ;;  %v1435_v44 = vld [vmem:[#allocation2 + $0x1b2] sm:$0xff]  ;;  %v1436_v15 = vld [vmem:[#allocation2 + $0x1ba] sm:$0xff] }
  0xde   :  { %7052 = vmatmul.mubr.bf16.gmra.mrb[60].mxu0 %v3040_v53 }
  0xdf   :  { %7071 = vmatprep.mubr.bf16.mxu0 %v8797_v27  ;;  %v544_v27 = vld [vmem:[#allocation2 + $0x210] sm:$0xff] }
  0xe0   :  { %v8883_v12 = vpack.c.bf16 %v545_v28, %v544_v27  ;;  %v1412_v27 = vld [vmem:[#allocation2 + $0x6a] sm:$0xff] }
  0xe1   :  { %v7880_v28 = vld [vmem:[%s9391_s3 + $0xd0] sm:$0xff]  }
  0xe3   :  { %6704 = vmatmul.mubr.bf16.gmra.mrb[32].mxu1 %v585_v7  ;;  %v8957_v7 = vpack.c.bf16 %v1408_v49, %v1407_v16  ;;  %v1483_v16 = vpack.c.bf16 %v1436_v15, %v1435_v44  ;;  %v7893_v44 = vld [vmem:[%s9391_s3 + $0x228] sm:$0xff]   ;;  %v1449_v15 = vld [vmem:[#allocation2 + $0x25a] sm:$0xff] }
  0xe4   :  { %6707 = vmatprep.mubr.bf16.mxu1 %v8869_v34 }
  0xe6   :  { %7072 = vmatmul.mubr.bf16.vlgmr.msra.gmra.mrb[0].mxu0 %v8807_v8  ;;  %v7875_v8 = vld [vmem:[%s9391_s3 + $0x1d8] sm:$0xff]  }
  0xe7   :  { %7136 = vmatpush3.bf16.msra.mxu0 %v8763_v45  ;;  %7075 = vmatprep.mubr.bf16.mxu0 %v8809_v21  ;;  %v546_v45 = vld [vmem:[#allocation2 + $0x228] sm:$0xff]  ;;  %v547_v21 = vld [vmem:[#allocation2 + $0x230] sm:$0xff] }
  0xe8   :  { %7137 = vmatprep.subr.bf16.mxu0 %v7871_v63  ;;  %v8895_v30 = vpack.c.bf16 %v547_v21, %v546_v45  ;;  %v1415_v45 = vld [vmem:[#allocation2 + $0x92] sm:$0xff]  ;;  %v1416_v21 = vld [vmem:[#allocation2 + $0x9a] sm:$0xff] }
  0xeb   :  { %7138 = vmatpush3.bf16.msra.mxu0 %v7871_v63  ;;  %6708 = vmatmul.mubr.bf16.gmra.mrb[36].mxu1 %v8881_v14  ;;  %v7878_v63 = vld [vmem:[%s9391_s3 + $0xc8] sm:$0xff]  }
  0xec   :  { %7139 = vmatprep.subr.bf16.mxu0 %v7873_v13  ;;  %6711 = vmatprep.mubr.bf16.mxu1 %v8883_v12 }
  0xee   :  { %7076 = vmatmul.mubr.bf16.gmra.mrb[4].mxu0 %v8819_v35  ;;  %v7879_v35 = vld [vmem:[%s9391_s3 + $0x1e8] sm:$0xff]  }
  0xef   :  { %7079 = vmatprep.mubr.bf16.mxu0 %v8821_v26  ;;  %7140 = vmatpush3.bf16.msra.mxu0 %v7873_v13  ;;  %v550_v26 = vld [vmem:[#allocation2 + $0x258] sm:$0xff]  ;;  %v8969_v13 = vpack.c.bf16 %v1410_v9, %v1409_v47  ;;  %v1439_v9 = vld [vmem:[#allocation2 + $0x1e2] sm:$0xff] }
  0xf0   :  { %7141 = vmatprep.subr.bf16.mxu0 %v7875_v8  ;;  %v8909_v57 = vpack.c.bf16 %v551_v50, %v550_v26  ;;  %v1419_v26 = vld [vmem:[#allocation2 + $0xc2] sm:$0xff]  ;;  %v1420_v50 = vld [vmem:[#allocation2 + $0xca] sm:$0xff] }
  0xf1   :  { %v3977_v47 = vld [vmem:[#allocation2 + $0x51] sm:$0xff] }
  0xf3   :  { %7142 = vmatpush3.bf16.msra.mxu0 %v7875_v8  ;;  %6712 = vmatmul.mubr.bf16.gmra.mrb[40].mxu1 %v8895_v30 }
  0xf4   :  { %7143 = vmatprep.subr.bf16.mxu0 %v7877_v29  ;;  %6715 = vmatprep.mubr.bf16.mxu1 %v8897_v22 }
  0xf6   :  { %7080 = vmatmul.mubr.bf16.gmra.mrb[8].mxu0 %v8831_v11  ;;  %v7883_v11 = vld [vmem:[%s9391_s3 + $0x1f8] sm:$0xff]  }
  0xf7   :  { %7083 = vmatprep.mubr.bf16.mxu0 %v8833_v6  ;;  %7144 = vmatpush3.bf16.msra.mxu0 %v7877_v29  ;;  %v554_v6 = vld [vmem:[#allocation2 + $0x288] sm:$0xff]  ;;  %v8985_v29 = vpack.c.bf16 %v1416_v21, %v1415_v45  ;;  %v1441_v21 = vld [vmem:[#allocation2 + $0x1fa] sm:$0xff] }
  0xf8   :  { %7145 = vmatprep.subr.bf16.mxu0 %v7879_v35  ;;  %v8925_v25 = vpack.c.bf16 %v555_v24, %v554_v6  ;;  %v1423_v6 = vld [vmem:[#allocation2 + $0xf2] sm:$0xff]  ;;  %v1424_v24 = vld [vmem:[#allocation2 + $0xfa] sm:$0xff]  ;;  %v7887_v45 = vld [vmem:[%s9391_s3 + $0x208] sm:$0xff]  }
  0xf9   :  { %v9010_v43 = vpack.c.bf16 %v1424_v24, %v1423_v6 }
  0xfb   :  { %7146 = vmatpush3.bf16.msra.mxu0 %v7879_v35  ;;  %6716 = vmatmul.mubr.bf16.gmra.mrb[44].mxu1 %v8909_v57  ;;  %v1418_v35 = vld [vmem:[#allocation2 + $0xb2] sm:$0xff] }
  0xfc   :  { %7147 = vmatprep.subr.bf16.mxu0 %v7881_v42  ;;  %6719 = vmatprep.mubr.bf16.mxu1 %v8911_v19 }
  0xfe   :  { %7084 = vmatmul.mubr.bf16.gmra.mrb[12].mxu0 %v8845_v37  ;;  %v558_v37 = vld [vmem:[#allocation2 + $0x2b8] sm:$0xff] }
  0xff   :  { %7087 = vmatprep.mubr.bf16.mxu0 %v8847_v51  ;;  %7148 = vmatpush3.bf16.msra.mxu0 %v7881_v42  ;;  %v559_v51 = vld [vmem:[#allocation2 + $0x2c0] sm:$0xff]  ;;  %v8999_v42 = vpack.c.bf16 %v1420_v50, %v1419_v26  ;;  %v3982_v50 = vld [vmem:[#allocation2 + $0x91] sm:$0xff] }
 0x100   :  { %7149 = vmatprep.subr.bf16.mxu0 %v7883_v11  ;;  %v8934_v10 = vpack.c.bf16 %v559_v51, %v558_v37  ;;  %v9015_v37 = vld [vmem:[%s9391_s3 + $0x100] sm:$0xff]  }
 0x101   :  { %v1427_v51 = vld [vmem:[#allocation2 + $0x122] sm:$0xff]  ;;  %v1444_v26 = vld [vmem:[#allocation2 + $0x21a] sm:$0xff] }
 0x103   :  { %7150 = vmatpush3.bf16.msra.mxu0 %v7883_v11  ;;  %6720 = vmatmul.mubr.bf16.gmra.mrb[48].mxu1 %v8925_v25  ;;  %v1422_v11 = vld [vmem:[#allocation2 + $0xe2] sm:$0xff] }
 0x104   :  { %7215 = vmatprep.subr.bf16.mxu0 %v8923_v54  ;;  %6723 = vmatprep.mubr.bf16.mxu1 %v8927_v33 }
 0x106   :  { %7088 = vmatmul.mubr.bf16.gmra.mrb[16].mxu0 %v8852_v31  ;;  %v563_v31 = vld [vmem:[#allocation2 + $0x2f0] sm:$0xff] }
 0x107   :  { %7091 = vmatprep.mubr.bf16.mxu0 %v8854_v20  ;;  %v3489_v20 = vld [vmem:[#allocation2 + $0x188] sm:$0xff]  ;;  %v8942_v58 = vpack.c.bf16 %v563_v31, %v562_v0  ;;  %v9024_v0 = vpack.c.bf16 %v1428_v48, %v1427_v51  ;;  %v1429_v31 = vld [vmem:[#allocation2 + $0x13a] sm:$0xff]  ;;  %v3985_v48 = vld [vmem:[#allocation2 + $0xb1] sm:$0xff] }
 0x108   :  { %v8946_v52 = vpack.c.bf16 %v3489_v20, %v3488_v32  ;;  %v3520_v32 = vld [vmem:[#allocation2 + $0x330] sm:$0xff] }
 0x109   :  { %v3984_v51 = vld [vmem:[#allocation2 + $0xa9] sm:$0xff] }
 0x10b   :  { %6724 = vmatmul.mubr.bf16.gmra.mrb[52].mxu1 %v8934_v10 }
 0x10c   :  { %6727 = vmatprep.mubr.bf16.mxu1 %v8936_v17 }
 0x10e   :  { %7092 = vmatmul.mubr.bf16.gmra.mrb[20].mxu0 %v8858_v40  ;;  %v566_v40 = vld [vmem:[#allocation2 + $0x318] sm:$0xff] }
 0x10f   :  { %7095 = vmatprep.mubr.bf16.mxu0 %v8860_v60  ;;  %v3490_v60 = vld [vmem:[#allocation2 + $0x198] sm:$0xff]  ;;  %v8952_v38 = vpack.c.bf16 %v567_v61, %v566_v40  ;;  %v9032_v40 = vpack.c.bf16 %v1432_v59, %v1431_v23  ;;  %v3986_v23 = vld [vmem:[#allocation2 + $0xc1] sm:$0xff]  ;;  %v3987_v59 = vld [vmem:[#allocation2 + $0xc9] sm:$0xff] }
 0x110   :  { %v3539_v53 = vpack.c.bf16 %v8794_v18, %v3490_v60  ;;  %v1434_v60 = vld [vmem:[#allocation2 + $0x172] sm:$0xff] }
 0x113   :  { %6728 = vmatmul.mubr.bf16.gmra.mrb[56].mxu1 %v8942_v58 }
 0x114   :  { %6731 = vmatprep.mubr.bf16.mxu1 %v8944_v1 }
 0x116   :  { %7096 = vmatmul.mubr.bf16.gmra.mrb[24].mxu0 %v8864_v46  ;;  %v1406_v46 = vld [vmem:[#allocation2 + $0x22] sm:$0xff] }
 0x117   :  { %7099 = vmatprep.mubr.bf16.mxu0 %v8946_v52  ;;  %v1468_v2 = vpack.c.bf16 %v1406_v46, %v1405_v41 }
 0x11b   :  { %6732 = vmatmul.mubr.bf16.gmra.mrb[60].mxu1 %v8952_v38 }
 0x11c   :  { %6751 = vmatprep.mubr.bf16.mxu1 %v1467_v36  ;;  %v3975_v36 = vld [vmem:[#allocation2 + $0x39] sm:$0xff] }
 0x11e   :  { %7100 = vmatmul.mubr.bf16.gmra.mrb[28].mxu0 %v3539_v53  ;;  %v3974_v53 = vld [vmem:[#allocation2 + $0x31] sm:$0xff] }
 0x11f   :  { %7103 = vmatprep.mubr.bf16.mxu0 %v8869_v34  ;;  %v1411_v34 = vld [vmem:[#allocation2 + $0x62] sm:$0xff]  ;;  %v4038_v49 = vpack.c.bf16 %v3975_v36, %v3974_v53  ;;  %v3988_v36 = vld [vmem:[#allocation2 + $0xd9] sm:$0xff] }
 0x120   :  { %v8971_v8 = vpack.c.bf16 %v1412_v27, %v1411_v34  ;;  %v1440_v34 = vld [vmem:[#allocation2 + $0x1ea] sm:$0xff]  ;;  %v3978_v27 = vld [vmem:[#allocation2 + $0x61] sm:$0xff] }
 0x121   :  { %v1450_v53 = vld [vmem:[#allocation2 + $0x262] sm:$0xff] }
 0x123   :  { %6752 = vmatmul.mubr.bf16.vlgmr.msra.gmra.mrb[0].mxu1 %v1468_v2  ;;  %v1438_v2 = vld [vmem:[#allocation2 + $0x1d2] sm:$0xff] }
 0x124   :  { %6816 = vmatpush3.bf16.msra.mxu1 %v8843_v4  ;;  %6755 = vmatprep.mubr.bf16.mxu1 %v8957_v7  ;;  %v7882_v4 = vld [vmem:[%s9391_s3 + $0xd8] sm:$0xff]  }
 0x125   :  { %6817 = vmatprep.subr.bf16.mxu1 %v7878_v63 }
 0x126   :  { %7104 = vmatmul.mubr.bf16.gmra.mrb[32].mxu0 %v8881_v14  ;;  %v1413_v14 = vld [vmem:[#allocation2 + $0x7a] sm:$0xff] }
 0x127   :  { %7107 = vmatprep.mubr.bf16.mxu0 %v8883_v12  ;;  %v1414_v12 = vld [vmem:[#allocation2 + $0x82] sm:$0xff] }
 0x128   :  { %6818 = vmatpush3.bf16.msra.mxu1 %v7878_v63  ;;  %v8983_v5 = vpack.c.bf16 %v1414_v12, %v1413_v14  ;;  %v3976_v63 = vld [vmem:[#allocation2 + $0x49] sm:$0xff]  ;;  %v9044_v12 = vpack.c.bf16 %v1440_v34, %v1439_v9 }
 0x129   :  { %6819 = vmatprep.subr.bf16.mxu1 %v7880_v28  ;;  %v4039_v14 = vpack.c.bf16 %v3977_v47, %v3976_v63  ;;  %v7894_v63 = vld [vmem:[%s9391_s3 + $0x230] sm:$0xff]   ;;  %v9078_v47 = vpack.c.bf16 %v1450_v53, %v1449_v15  ;;  %v1463_v15 = vld [vmem:[#allocation2 + $0x302] sm:$0xff] }
 0x12a   :  { %v1464_v53 = vld [vmem:[#allocation2 + $0x30a] sm:$0xff] }
 0x12b   :  { %6756 = vmatmul.mubr.bf16.gmra.mrb[4].mxu1 %v8969_v13 }
 0x12c   :  { %6759 = vmatprep.mubr.bf16.mxu1 %v8971_v8  ;;  %6820 = vmatpush3.bf16.msra.mxu1 %v7880_v28  ;;  %v3979_v28 = vld [vmem:[#allocation2 + $0x69] sm:$0xff] }
 0x12d   :  { %6821 = vmatprep.subr.bf16.mxu1 %v7882_v4 }
 0x12e   :  { %7108 = vmatmul.mubr.bf16.gmra.mrb[36].mxu0 %v8895_v30  ;;  %v7886_v30 = vld [vmem:[%s9391_s3 + $0xe8] sm:$0xff]  }
 0x12f   :  { %7111 = vmatprep.mubr.bf16.mxu0 %v8897_v22  ;;  %v1417_v22 = vld [vmem:[#allocation2 + $0xaa] sm:$0xff] }
 0x130   :  { %6822 = vmatpush3.bf16.msra.mxu1 %v7882_v4  ;;  %v8997_v56 = vpack.c.bf16 %v1418_v35, %v1417_v22  ;;  %v3981_v22 = vld [vmem:[#allocation2 + $0x81] sm:$0xff]  ;;  %v1443_v35 = vld [vmem:[#allocation2 + $0x212] sm:$0xff] }
 0x131   :  { %6823 = vmatprep.subr.bf16.mxu1 %v7884_v55  ;;  %v9056_v6 = vpack.c.bf16 %v1444_v26, %v1443_v35 }
 0x133   :  { %6760 = vmatmul.mubr.bf16.gmra.mrb[8].mxu1 %v8983_v5 }
 0x134   :  { %6763 = vmatprep.mubr.bf16.mxu1 %v8985_v29  ;;  %6824 = vmatpush3.bf16.msra.mxu1 %v7884_v55  ;;  %v1442_v55 = vld [vmem:[#allocation2 + $0x202] sm:$0xff] }
 0x135   :  { %6825 = vmatprep.subr.bf16.mxu1 %v7886_v30 }
 0x136   :  { %7112 = vmatmul.mubr.bf16.gmra.mrb[40].mxu0 %v8909_v57  ;;  %v7890_v57 = vld [vmem:[%s9391_s3 + $0xf8] sm:$0xff]  }
 0x137   :  { %7115 = vmatprep.mubr.bf16.mxu0 %v8911_v19  ;;  %v1421_v19 = vld [vmem:[#allocation2 + $0xda] sm:$0xff] }
 0x138   :  { %6826 = vmatpush3.bf16.msra.mxu1 %v7886_v30  ;;  %v9008_v3 = vpack.c.bf16 %v1422_v11, %v1421_v19  ;;  %v3980_v30 = vld [vmem:[#allocation2 + $0x79] sm:$0xff]  ;;  %v9054_v19 = vpack.c.bf16 %v1442_v55, %v1441_v21  ;;  %v1455_v21 = vld [vmem:[#allocation2 + $0x2a2] sm:$0xff]  ;;  %v1456_v55 = vld [vmem:[#allocation2 + $0x2aa] sm:$0xff] }
 0x139   :  { %6827 = vmatprep.subr.bf16.mxu1 %v7888_v39  ;;  %v4041_v11 = vpack.c.bf16 %v3981_v22, %v3980_v30  ;;  %v3994_v30 = vld [vmem:[#allocation2 + $0x121] sm:$0xff]  ;;  %v3995_v22 = vld [vmem:[#allocation2 + $0x129] sm:$0xff] }
 0x13b   :  { %6764 = vmatmul.mubr.bf16.gmra.mrb[12].mxu1 %v8997_v56 }
 0x13c   :  { %6767 = vmatprep.mubr.bf16.mxu1 %v8999_v42  ;;  %6828 = vmatpush3.bf16.msra.mxu1 %v7888_v39  ;;  %v3983_v39 = vld [vmem:[#allocation2 + $0x99] sm:$0xff] }
 0x13d   :  { %6829 = vmatprep.subr.bf16.mxu1 %v7890_v57  ;;  %v4042_v24 = vpack.c.bf16 %v3983_v39, %v3982_v50  ;;  %v9089_v50 = vpack.c.bf16 %v1456_v55, %v1455_v21  ;;  %v4048_v39 = vpack.c.bf16 %v3995_v22, %v3994_v30 }
 0x13e   :  { %7116 = vmatmul.mubr.bf16.gmra.mrb[44].mxu0 %v8925_v25  ;;  %v1425_v25 = vld [vmem:[#allocation2 + $0x10a] sm:$0xff] }
 0x13f   :  { %7119 = vmatprep.mubr.bf16.mxu0 %v8927_v33  ;;  %v1426_v33 = vld [vmem:[#allocation2 + $0x112] sm:$0xff] }
 0x140   :  { %6830 = vmatpush3.bf16.msra.mxu1 %v7890_v57  ;;  %v9022_v62 = vpack.c.bf16 %v1426_v33, %v1425_v25  ;;  %v7889_v57 = vld [vmem:[%s9391_s3 + $0x210] sm:$0xff]  }
 0x141   :  { %7295 = vmatprep.subr.bf16.mxu1 %v9015_v37  ;;  %v1445_v25 = vld [vmem:[#allocation2 + $0x22a] sm:$0xff]  ;;  %v1446_v33 = vld [vmem:[#allocation2 + $0x232] sm:$0xff] }
 0x143   :  { %6768 = vmatmul.mubr.bf16.gmra.mrb[16].mxu1 %v9008_v3 }
 0x144   :  { %6771 = vmatprep.mubr.bf16.mxu1 %v9010_v43 }
 0x146   :  { %7120 = vmatmul.mubr.bf16.gmra.mrb[48].mxu0 %v8934_v10  ;;  %v1430_v10 = vld [vmem:[#allocation2 + $0x142] sm:$0xff] }
 0x147   :  { %7123 = vmatprep.mubr.bf16.mxu0 %v8936_v17  ;;  %v3521_v17 = vld [vmem:[#allocation2 + $0x338] sm:$0xff]  ;;  %v9030_v20 = vpack.c.bf16 %v1430_v10, %v1429_v31  ;;  %v1447_v31 = vld [vmem:[#allocation2 + $0x242] sm:$0xff]  ;;  %v1448_v10 = vld [vmem:[#allocation2 + $0x24a] sm:$0xff] }
 0x148   :  { %v9034_v61 = vpack.c.bf16 %v3521_v17, %v3520_v32  ;;  %v7892_v32 = vld [vmem:[%s9391_s3 + $0x220] sm:$0xff]   ;;  %v9066_v17 = vpack.c.bf16 %v1446_v33, %v1445_v25  ;;  %v1459_v25 = vld [vmem:[#allocation2 + $0x2d2] sm:$0xff] }
 0x149   :  { %v1460_v33 = vld [vmem:[#allocation2 + $0x2da] sm:$0xff] }
 0x14b   :  { %6772 = vmatmul.mubr.bf16.gmra.mrb[20].mxu1 %v9022_v62 }
 0x14c   :  { %6775 = vmatprep.mubr.bf16.mxu1 %v9024_v0 }
 0x14e   :  { %7124 = vmatmul.mubr.bf16.gmra.mrb[52].mxu0 %v8942_v58  ;;  %v1433_v58 = vld [vmem:[#allocation2 + $0x16a] sm:$0xff] }
 0x14f   :  { %7127 = vmatprep.mubr.bf16.mxu0 %v8944_v1  ;;  %v3522_v1 = vld [vmem:[#allocation2 + $0x348] sm:$0xff]  ;;  %v9040_v41 = vpack.c.bf16 %v1434_v60, %v1433_v58  ;;  %v4043_v58 = vpack.c.bf16 %v3985_v48, %v3984_v51  ;;  %v9068_v60 = vpack.c.bf16 %v1448_v10, %v1447_v31  ;;  %v3998_v51 = vld [vmem:[#allocation2 + $0x151] sm:$0xff]  ;;  %v3999_v48 = vld [vmem:[#allocation2 + $0x159] sm:$0xff] }
 0x150   :  { %v3555_v46 = vpack.c.bf16 %v8794_v18, %v3522_v1  ;;  %v4040_v18 = vpack.c.bf16 %v3979_v28, %v3978_v27  ;;  %v4044_v1 = vpack.c.bf16 %v3987_v59, %v3986_v23  ;;  %v7895_v28 = vld [vmem:[%s9391_s3 + $0x238] sm:$0xff]   ;;  %v9095_v23 = vpack.c.bf16 %v1460_v33, %v1459_v25 }
 0x151   :  { %v4050_v59 = vpack.c.bf16 %v3999_v48, %v3998_v51  ;;  %v4010_v25 = vld [vmem:[#allocation2 + $0x211] sm:$0xff]  ;;  %v4011_v33 = vld [vmem:[#allocation2 + $0x219] sm:$0xff] }
 0x153   :  { %6776 = vmatmul.mubr.bf16.gmra.mrb[24].mxu1 %v9030_v20 }
 0x154   :  { %6779 = vmatprep.mubr.bf16.mxu1 %v9032_v40 }
 0x156   :  { %7128 = vmatmul.mubr.bf16.gmra.mrb[56].mxu0 %v8952_v38  ;;  %v1437_v38 = vld [vmem:[#allocation2 + $0x1ca] sm:$0xff] }
 0x157   :  { %7131 = vmatprep.mubr.bf16.mxu0 %v9034_v61  ;;  %v1484_v4 = vpack.c.bf16 %v1438_v2, %v1437_v38  ;;  %v3990_v38 = vld [vmem:[#allocation2 + $0xf1] sm:$0xff]  ;;  %v3991_v2 = vld [vmem:[#allocation2 + $0xf9] sm:$0xff] }
 0x158   :  { %v4046_v27 = vpack.c.bf16 %v3991_v2, %v3990_v38  ;;  %v9101_v38 = vpack.c.bf16 %v1464_v53, %v1463_v15  ;;  %v1925_v15 = vld [vmem:[#allocation2 + $0x78] sm:$0xff]  ;;  %v1926_v53 = vld [vmem:[#allocation2 + $0x80] sm:$0xff] }
 0x15b   :  { %6780 = vmatmul.mubr.bf16.gmra.mrb[28].mxu1 %v9040_v41 }
 0x15c   :  { %6783 = vmatprep.mubr.bf16.mxu1 %v1483_v16  ;;  %v1451_v16 = vld [vmem:[#allocation2 + $0x272] sm:$0xff] }
 0x15e   :  { %7132 = vmatmul.mubr.bf16.gmra.mrb[60].mxu0 %v3555_v46  ;;  %v3989_v46 = vld [vmem:[#allocation2 + $0xe1] sm:$0xff] }
 0x15f   :  { %7151 = vmatprep.mubr.bf16.mxu0 %v4038_v49  ;;  %v1452_v49 = vld [vmem:[#allocation2 + $0x27a] sm:$0xff]  ;;  %v4045_v9 = vpack.c.bf16 %v3989_v46, %v3988_v36  ;;  %v4003_v46 = vld [vmem:[#allocation2 + $0x189] sm:$0xff] }
 0x160   :  { %v9080_v34 = vpack.c.bf16 %v1452_v49, %v1451_v16  ;;  %v4002_v36 = vld [vmem:[#allocation2 + $0x181] sm:$0xff] }
 0x161   :  { %v4052_v2 = vpack.c.bf16 %v4003_v46, %v4002_v36  ;;  %v4014_v36 = vld [vmem:[#allocation2 + $0x241] sm:$0xff]  ;;  %v4015_v46 = vld [vmem:[#allocation2 + $0x249] sm:$0xff] }
 0x163   :  { %6784 = vmatmul.mubr.bf16.gmra.mrb[32].mxu1 %v1484_v4  ;;  %v1453_v4 = vld [vmem:[#allocation2 + $0x28a] sm:$0xff] }
 0x164   :  { %6787 = vmatprep.mubr.bf16.mxu1 %v9044_v12 }
 0x166   :  { %7152 = vmatmul.mubr.bf16.vlgmr.msra.gmra.mrb[0].mxu0 %v4039_v14  ;;  %v1454_v14 = vld [vmem:[#allocation2 + $0x292] sm:$0xff] }
 0x167   :  { %7216 = vmatpush3.bf16.msra.mxu0 %v8923_v54  ;;  %7155 = vmatprep.mubr.bf16.mxu0 %v4040_v18  ;;  %v7891_v54 = vld [vmem:[%s9391_s3 + $0x218] sm:$0xff]   ;;  %v3992_v18 = vld [vmem:[#allocation2 + $0x109] sm:$0xff]  ;;  %v9087_v35 = vpack.c.bf16 %v1454_v14, %v1453_v4  ;;  %v1918_v14 = vld [vmem:[#allocation2 + $0x20] sm:$0xff] }
 0x168   :  { %7217 = vmatprep.subr.bf16.mxu0 %v7887_v45  ;;  %v1917_v4 = vld [vmem:[#allocation2 + $0x18] sm:$0xff] }
 0x169   :  { %v1981_v30 = vpack.c.bf16 %v1918_v14, %v1917_v4  ;;  %v1928_v4 = vld [vmem:[#allocation2 + $0x98] sm:$0xff] }
 0x16a   :  { %v4016_v14 = vld [vmem:[#allocation2 + $0x259] sm:$0xff] }
 0x16b   :  { %7218 = vmatpush3.bf16.msra.mxu0 %v7887_v45  ;;  %6788 = vmatmul.mubr.bf16.gmra.mrb[36].mxu1 %v9054_v19  ;;  %v3993_v45 = vld [vmem:[#allocation2 + $0x111] sm:$0xff] }
 0x16c   :  { %7219 = vmatprep.subr.bf16.mxu0 %v7889_v57  ;;  %6791 = vmatprep.mubr.bf16.mxu1 %v9056_v6  ;;  %v4047_v26 = vpack.c.bf16 %v3993_v45, %v3992_v18  ;;  %v4006_v18 = vld [vmem:[#allocation2 + $0x1e1] sm:$0xff]  ;;  %v4007_v45 = vld [vmem:[#allocation2 + $0x1e9] sm:$0xff] }
 0x16d   :  { %v9107_v22 = vpack.c.bf16 %v4007_v45, %v4006_v18  ;;  %v4017_v18 = vld [vmem:[#allocation2 + $0x261] sm:$0xff] }
 0x16e   :  { %7156 = vmatmul.mubr.bf16.gmra.mrb[4].mxu0 %v4041_v11  ;;  %v1458_v11 = vld [vmem:[#allocation2 + $0x2c2] sm:$0xff] }
 0x16f   :  { %7159 = vmatprep.mubr.bf16.mxu0 %v4042_v24  ;;  %7220 = vmatpush3.bf16.msra.mxu0 %v7889_v57  ;;  %v1457_v57 = vld [vmem:[#allocation2 + $0x2ba] sm:$0xff]  ;;  %v1929_v45 = vld [vmem:[#allocation2 + $0xa8] sm:$0xff] }
 0x170   :  { %7221 = vmatprep.subr.bf16.mxu0 %v7891_v54  ;;  %v3996_v24 = vld [vmem:[#allocation2 + $0x139] sm:$0xff]  ;;  %v9093_v31 = vpack.c.bf16 %v1458_v11, %v1457_v57  ;;  %v4009_v11 = vld [vmem:[#allocation2 + $0x201] sm:$0xff] }
 0x171   :  { %v4008_v57 = vld [vmem:[#allocation2 + $0x1f9] sm:$0xff] }
 0x172   :  { %v9111_v48 = vpack.c.bf16 %v4009_v11, %v4008_v57  ;;  %v9133_v11 = vpack.c.bf16 %v4017_v18, %v4016_v14  ;;  %v4025_v14 = vld [vmem:[#allocation2 + $0x2c1] sm:$0xff] }
 0x173   :  { %7222 = vmatpush3.bf16.msra.mxu0 %v7891_v54  ;;  %6792 = vmatmul.mubr.bf16.gmra.mrb[40].mxu1 %v9066_v17  ;;  %v3997_v54 = vld [vmem:[#allocation2 + $0x141] sm:$0xff] }
 0x174   :  { %7223 = vmatprep.subr.bf16.mxu0 %v7892_v32  ;;  %6795 = vmatprep.mubr.bf16.mxu1 %v9068_v60  ;;  %v4049_v10 = vpack.c.bf16 %v3997_v54, %v3996_v24  ;;  %v1921_v24 = vld [vmem:[#allocation2 + $0x48] sm:$0xff]  ;;  %v1922_v54 = vld [vmem:[#allocation2 + $0x50] sm:$0xff] }
 0x175   :  { %v1937_v18 = vld [vmem:[#allocation2 + $0x108] sm:$0xff] }
 0x176   :  { %7160 = vmatmul.mubr.bf16.gmra.mrb[8].mxu0 %v4043_v58  ;;  %v1462_v58 = vld [vmem:[#allocation2 + $0x2f2] sm:$0xff] }
 0x177   :  { %7163 = vmatprep.mubr.bf16.mxu0 %v4044_v1  ;;  %7224 = vmatpush3.bf16.msra.mxu0 %v7892_v32  ;;  %v1461_v32 = vld [vmem:[#allocation2 + $0x2ea] sm:$0xff] }
 0x178   :  { %7225 = vmatprep.subr.bf16.mxu0 %v7893_v44  ;;  %v4000_v1 = vld [vmem:[#allocation2 + $0x169] sm:$0xff]  ;;  %v9099_v16 = vpack.c.bf16 %v1462_v58, %v1461_v32  ;;  %v1923_v32 = vld [vmem:[#allocation2 + $0x60] sm:$0xff] }
 0x179   :  { %v1924_v58 = vld [vmem:[#allocation2 + $0x68] sm:$0xff] }
 0x17b   :  { %7226 = vmatpush3.bf16.msra.mxu0 %v7893_v44  ;;  %6796 = vmatmul.mubr.bf16.gmra.mrb[44].mxu1 %v9078_v47  ;;  %v4001_v44 = vld [vmem:[#allocation2 + $0x171] sm:$0xff] }
 0x17c   :  { %7227 = vmatprep.subr.bf16.mxu0 %v7894_v63  ;;  %6799 = vmatprep.mubr.bf16.mxu1 %v9080_v34  ;;  %v4051_v49 = vpack.c.bf16 %v4001_v44, %v4000_v1  ;;  %v4012_v1 = vld [vmem:[#allocation2 + $0x229] sm:$0xff]  ;;  %v4013_v44 = vld [vmem:[#allocation2 + $0x231] sm:$0xff] }
 0x17e   :  { %7164 = vmatmul.mubr.bf16.gmra.mrb[12].mxu0 %v4045_v9  ;;  %v1466_v9 = vld [vmem:[#allocation2 + $0x322] sm:$0xff] }
 0x17f   :  { %7167 = vmatprep.mubr.bf16.mxu0 %v4046_v27  ;;  %7228 = vmatpush3.bf16.msra.mxu0 %v7894_v63  ;;  %v1465_v63 = vld [vmem:[#allocation2 + $0x31a] sm:$0xff] }
 0x180   :  { %7229 = vmatprep.subr.bf16.mxu0 %v7895_v28  ;;  %v4004_v27 = vld [vmem:[#allocation2 + $0x199] sm:$0xff]  ;;  %v9105_v21 = vpack.c.bf16 %v1466_v9, %v1465_v63  ;;  %v9121_v63 = vpack.c.bf16 %v4013_v44, %v4012_v1  ;;  %v9123_v9 = vpack.c.bf16 %v4015_v46, %v4014_v36  ;;  %v4022_v44 = vld [vmem:[#allocation2 + $0x2a1] sm:$0xff] }
 0x181   :  { %v1934_v1 = vld [vmem:[#allocation2 + $0xe0] sm:$0xff] }
 0x183   :  { %7230 = vmatpush3.bf16.msra.mxu0 %v7895_v28  ;;  %6800 = vmatmul.mubr.bf16.gmra.mrb[48].mxu1 %v9087_v35  ;;  %v4005_v28 = vld [vmem:[#allocation2 + $0x1a1] sm:$0xff] }
 0x184   :  { %6803 = vmatprep.mubr.bf16.mxu1 %v9089_v50  ;;  %v4053_v55 = vpack.c.bf16 %v4005_v28, %v4004_v27  ;;  %v7901_v27 = vld [vmem:[%s9391_s3 + $0x110] sm:$0xff]  }
 0x185   :  { %v1927_v28 = vld [vmem:[#allocation2 + $0x90] sm:$0xff] }
 0x186   :  { %7168 = vmatmul.mubr.bf16.gmra.mrb[16].mxu0 %v4047_v26  ;;  %v1919_v26 = vld [vmem:[#allocation2 + $0x30] sm:$0xff]  ;;  %v1986_v57 = vpack.c.bf16 %v1928_v4, %v1927_v28  ;;  %v1936_v28 = vld [vmem:[#allocation2 + $0xf8] sm:$0xff] }
 0x187   :  { %7171 = vmatprep.mubr.bf16.mxu0 %v4048_v39  ;;  %v1920_v39 = vld [vmem:[#allocation2 + $0x38] sm:$0xff] }
 0x188   :  { %v1982_v51 = vpack.c.bf16 %v1920_v39, %v1919_v26  ;;  %v4019_v26 = vld [vmem:[#allocation2 + $0x279] sm:$0xff] }
 0x189   :  { %v7902_v39 = vld [vmem:[%s9391_s3 + $0x118] sm:$0xff]  }
 0x18a   :  { %v4024_v4 = vld [vmem:[#allocation2 + $0x2b9] sm:$0xff] }
 0x18b   :  { %6804 = vmatmul.mubr.bf16.gmra.mrb[52].mxu1 %v9093_v31 }
 0x18c   :  { %6807 = vmatprep.mubr.bf16.mxu1 %v9095_v23 }
 0x18e   :  { %7172 = vmatmul.mubr.bf16.gmra.mrb[20].mxu0 %v4049_v10  ;;  %v1983_v10 = vpack.c.bf16 %v1922_v54, %v1921_v24 }
 0x18f   :  { %7175 = vmatprep.mubr.bf16.mxu0 %v4050_v59  ;;  %v9113_v59 = vpack.c.bf16 %v4011_v33, %v4010_v25  ;;  %v7903_v25 = vld [vmem:[%s9391_s3 + $0x120] sm:$0xff]  }
 0x190   :  { %v1931_v33 = vld [vmem:[#allocation2 + $0xc0] sm:$0xff] }
 0x193   :  { %6808 = vmatmul.mubr.bf16.gmra.mrb[56].mxu1 %v9099_v16 }
 0x194   :  { %6811 = vmatprep.mubr.bf16.mxu1 %v9101_v38 }
 0x196   :  { %7176 = vmatmul.mubr.bf16.gmra.mrb[24].mxu0 %v4051_v49  ;;  %v7900_v49 = vld [vmem:[%s9391_s3 + $0x108] sm:$0xff]  }
 0x197   :  { %7179 = vmatprep.mubr.bf16.mxu0 %v4052_v2  ;;  %v1984_v2 = vpack.c.bf16 %v1924_v58, %v1923_v32  ;;  %v4021_v32 = vld [vmem:[#allocation2 + $0x291] sm:$0xff] }
 0x198   :  { %v1933_v58 = vld [vmem:[#allocation2 + $0xd8] sm:$0xff] }
 0x19b   :  { %6812 = vmatmul.mubr.bf16.gmra.mrb[60].mxu1 %v9105_v21 }
 0x19c   :  { %6831 = vmatprep.mubr.bf16.mxu1 %v1981_v30  ;;  %v4018_v30 = vld [vmem:[#allocation2 + $0x271] sm:$0xff] }
 0x19d   :  { %v9135_v54 = vpack.c.bf16 %v4019_v26, %v4018_v30  ;;  %v4027_v30 = vld [vmem:[#allocation2 + $0x2d9] sm:$0xff] }
 0x19e   :  { %7180 = vmatmul.mubr.bf16.gmra.mrb[28].mxu0 %v4053_v55  ;;  %v1930_v55 = vld [vmem:[#allocation2 + $0xb0] sm:$0xff]  ;;  %v7906_v26 = vld [vmem:[%s9391_s3 + $0x138] sm:$0xff]  }
 0x19f   :  { %7183 = vmatprep.mubr.bf16.mxu0 %v9107_v22  ;;  %v1987_v24 = vpack.c.bf16 %v1930_v55, %v1929_v45  ;;  %v1938_v45 = vld [vmem:[#allocation2 + $0x110] sm:$0xff] }
 0x1a0   :  { %v4026_v55 = vld [vmem:[#allocation2 + $0x2d1] sm:$0xff] }
 0x1a3   :  { %6832 = vmatmul.mubr.bf16.vlgmr.msra.gmra.mrb[0].mxu1 %v1982_v51  ;;  %v1932_v51 = vld [vmem:[#allocation2 + $0xc8] sm:$0xff] }
 0x1a4   :  { %7303 = vmatpush3.bf16.msra.mxu1 %v9015_v37  ;;  %6835 = vmatprep.mubr.bf16.mxu1 %v1983_v10  ;;  %v1985_v37 = vpack.c.bf16 %v1926_v53, %v1925_v15  ;;  %v4020_v10 = vld [vmem:[#allocation2 + $0x289] sm:$0xff]  ;;  %v1988_v36 = vpack.c.bf16 %v1932_v51, %v1931_v33  ;;  %v1939_v33 = vld [vmem:[#allocation2 + $0x120] sm:$0xff] }
 0x1a5   :  { %7296 = vmatprep.subr.bf16.mxu1 %v7900_v49  ;;  %v4023_v15 = vld [vmem:[#allocation2 + $0x2a9] sm:$0xff]  ;;  %v9145_v46 = vpack.c.bf16 %v4021_v32, %v4020_v10  ;;  %v4029_v32 = vld [vmem:[#allocation2 + $0x2f1] sm:$0xff] }
 0x1a6   :  { %7184 = vmatmul.mubr.bf16.gmra.mrb[32].mxu0 %v9111_v48  ;;  %v7904_v53 = vld [vmem:[%s9391_s3 + $0x128] sm:$0xff]  }
 0x1a7   :  { %7187 = vmatprep.mubr.bf16.mxu0 %v9113_v59  ;;  %v1940_v51 = vld [vmem:[#allocation2 + $0x128] sm:$0xff] }
 0x1a8   :  { %7304 = vmatpush3.bf16.msra.mxu1 %v7900_v49  ;;  %v1989_v49 = vpack.c.bf16 %v1934_v1, %v1933_v58  ;;  %v4028_v10 = vld [vmem:[#allocation2 + $0x2e9] sm:$0xff]  ;;  %v1941_v58 = vld [vmem:[#allocation2 + $0x138] sm:$0xff]  ;;  %v1942_v1 = vld [vmem:[#allocation2 + $0x140] sm:$0xff] }
 0x1a9   :  { %7297 = vmatprep.subr.bf16.mxu1 %v7901_v27 }
 0x1ab   :  { %6836 = vmatmul.mubr.bf16.gmra.mrb[4].mxu1 %v1984_v2  ;;  %v9147_v2 = vpack.c.bf16 %v4023_v15, %v4022_v44  ;;  %v4030_v44 = vld [vmem:[#allocation2 + $0x301] sm:$0xff]  ;;  %v4031_v15 = vld [vmem:[#allocation2 + $0x309] sm:$0xff] }
 0x1ac   :  { %6839 = vmatprep.mubr.bf16.mxu1 %v1985_v37  ;;  %7305 = vmatpush3.bf16.msra.mxu1 %v7901_v27  ;;  %v7905_v37 = vld [vmem:[%s9391_s3 + $0x130] sm:$0xff]  }
 0x1ad   :  { %7298 = vmatprep.subr.bf16.mxu1 %v7902_v39  ;;  %v1935_v27 = vld [vmem:[#allocation2 + $0xf0] sm:$0xff] }
 0x1ae   :  { %7188 = vmatmul.mubr.bf16.gmra.mrb[36].mxu0 %v9121_v63 }
 0x1af   :  { %7191 = vmatprep.mubr.bf16.mxu0 %v9123_v9 }
 0x1b0   :  { %7306 = vmatpush3.bf16.msra.mxu1 %v7902_v39  ;;  %v1990_v39 = vpack.c.bf16 %v1936_v28, %v1935_v27  ;;  %v1943_v27 = vld [vmem:[#allocation2 + $0x150] sm:$0xff]  ;;  %v1944_v28 = vld [vmem:[#allocation2 + $0x158] sm:$0xff] }
 0x1b1   :  { %7299 = vmatprep.subr.bf16.mxu1 %v7903_v25 }
 0x1b3   :  { %6840 = vmatmul.mubr.bf16.gmra.mrb[8].mxu1 %v1986_v57  ;;  %v9157_v57 = vpack.c.bf16 %v4025_v14, %v4024_v4  ;;  %v4032_v4 = vld [vmem:[#allocation2 + $0x319] sm:$0xff]  ;;  %v4033_v14 = vld [vmem:[#allocation2 + $0x321] sm:$0xff] }
 0x1b4   :  { %6843 = vmatprep.mubr.bf16.mxu1 %v1987_v24  ;;  %7307 = vmatpush3.bf16.msra.mxu1 %v7903_v25  ;;  %v1991_v24 = vpack.c.bf16 %v1938_v45, %v1937_v18  ;;  %v9159_v25 = vpack.c.bf16 %v4027_v30, %v4026_v55  ;;  %v1945_v18 = vld [vmem:[#allocation2 + $0x168] sm:$0xff]  ;;  %v1946_v45 = vld [vmem:[#allocation2 + $0x170] sm:$0xff]  ;;  %v4035_v30 = vld [vmem:[#allocation2 + $0x339] sm:$0xff] }
 0x1b5   :  { %7300 = vmatprep.subr.bf16.mxu1 %v7904_v53  ;;  %v4034_v55 = vld [vmem:[#allocation2 + $0x331] sm:$0xff] }
 0x1b6   :  { %7192 = vmatmul.mubr.bf16.gmra.mrb[40].mxu0 %v9133_v11 }
 0x1b7   :  { %7195 = vmatprep.mubr.bf16.mxu0 %v9135_v54 }
 0x1b8   :  { %7308 = vmatpush3.bf16.msra.mxu1 %v7904_v53  ;;  %v1992_v53 = vpack.c.bf16 %v1940_v51, %v1939_v33  ;;  %v9171_v33 = vpack.c.bf16 %v4035_v30, %v4034_v55  ;;  %v4036_v51 = vld [vmem:[#allocation2 + $0x349] sm:$0xff] }
 0x1b9   :  { %7301 = vmatprep.subr.bf16.mxu1 %v7905_v37 }
 0x1bb   :  { %6844 = vmatmul.mubr.bf16.gmra.mrb[12].mxu1 %v1988_v36  ;;  %v9163_v36 = vpack.c.bf16 %v4029_v32, %v4028_v10  ;;  %v4037_v10 = vld [vmem:[#allocation2 + $0x351] sm:$0xff]  ;;  %v1949_v32 = vld [vmem:[#allocation2 + $0x1c8] sm:$0xff] }
 0x1bc   :  { %6847 = vmatprep.mubr.bf16.mxu1 %v1989_v49  ;;  %7309 = vmatpush3.bf16.msra.mxu1 %v7905_v37  ;;  %v1993_v49 = vpack.c.bf16 %v1942_v1, %v1941_v58  ;;  %v9165_v37 = vpack.c.bf16 %v4031_v15, %v4030_v44  ;;  %v1950_v58 = vld [vmem:[#allocation2 + $0x1d0] sm:$0xff]  ;;  %v4069_v1 = vpack.c.bf16 %v4037_v10, %v4036_v51  ;;  %v1951_v15 = vld [vmem:[#allocation2 + $0x1e0] sm:$0xff] }
 0x1bd   :  { %7302 = vmatprep.subr.bf16.mxu1 %v7906_v26  ;;  %v1997_v44 = vpack.c.bf16 %v1950_v58, %v1949_v32  ;;  %v1962_v51 = vld [vmem:[#allocation2 + $0x260] sm:$0xff]  ;;  %v1964_v32 = vld [vmem:[#allocation2 + $0x278] sm:$0xff]  ;;  %v1965_v58 = vld [vmem:[#allocation2 + $0x288] sm:$0xff] }
 0x1be   :  { %7196 = vmatmul.mubr.bf16.gmra.mrb[44].mxu0 %v9145_v46 }
 0x1bf   :  { %7199 = vmatprep.mubr.bf16.mxu0 %v9147_v2 }
 0x1c0   :  { %7310 = vmatpush3.bf16.msra.mxu1 %v7906_v26  ;;  %v1994_v26 = vpack.c.bf16 %v1944_v28, %v1943_v27  ;;  %v1954_v27 = vld [vmem:[#allocation2 + $0x200] sm:$0xff] }
 0x1c3   :  { %6848 = vmatmul.mubr.bf16.gmra.mrb[16].mxu1 %v1990_v39  ;;  %v9169_v39 = vpack.c.bf16 %v4033_v14, %v4032_v4  ;;  %v1955_v14 = vld [vmem:[#allocation2 + $0x210] sm:$0xff] }
 0x1c4   :  { %6851 = vmatprep.mubr.bf16.mxu1 %v1991_v24  ;;  %v1995_v24 = vpack.c.bf16 %v1946_v45, %v1945_v18  ;;  %v1956_v18 = vld [vmem:[#allocation2 + $0x218] sm:$0xff]  ;;  %v1957_v45 = vld [vmem:[#allocation2 + $0x228] sm:$0xff] }
 0x1c5   :  { %v2000_v55 = vpack.c.bf16 %v1956_v18, %v1955_v14  ;;  %v1974_v14 = vld [vmem:[#allocation2 + $0x2f0] sm:$0xff] }
 0x1c6   :  { %7200 = vmatmul.mubr.bf16.gmra.mrb[48].mxu0 %v9157_v57 }
 0x1c7   :  { %7203 = vmatprep.mubr.bf16.mxu0 %v9159_v25 }
 0x1cb   :  { %6852 = vmatmul.mubr.bf16.gmra.mrb[20].mxu1 %v1992_v53  ;;  %v1952_v53 = vld [vmem:[#allocation2 + $0x1e8] sm:$0xff] }
 0x1cc   :  { %6855 = vmatprep.mubr.bf16.mxu1 %v1993_v49  ;;  %v1953_v49 = vld [vmem:[#allocation2 + $0x1f8] sm:$0xff]  ;;  %v1998_v28 = vpack.c.bf16 %v1952_v53, %v1951_v15  ;;  %v1968_v15 = vld [vmem:[#allocation2 + $0x2a8] sm:$0xff] }
 0x1cd   :  { %v1999_v4 = vpack.c.bf16 %v1954_v27, %v1953_v49  ;;  %v1969_v53 = vld [vmem:[#allocation2 + $0x2b8] sm:$0xff]  ;;  %v1970_v49 = vld [vmem:[#allocation2 + $0x2c0] sm:$0xff] }
 0x1ce   :  { %7204 = vmatmul.mubr.bf16.gmra.mrb[52].mxu0 %v9163_v36  ;;  %v2007_v27 = vpack.c.bf16 %v1970_v49, %v1969_v53 }
 0x1cf   :  { %7207 = vmatprep.mubr.bf16.mxu0 %v9165_v37 }
 0x1d3   :  { %6856 = vmatmul.mubr.bf16.gmra.mrb[24].mxu1 %v1994_v26  ;;  %v1960_v26 = vld [vmem:[#allocation2 + $0x248] sm:$0xff] }
 0x1d4   :  { %6859 = vmatprep.mubr.bf16.mxu1 %v1995_v24  ;;  %v1961_v24 = vld [vmem:[#allocation2 + $0x258] sm:$0xff] }
 0x1d5   :  { %v2003_v10 = vpack.c.bf16 %v1962_v51, %v1961_v24  ;;  %v4519_v51 = vld [vmem:[#allocation2 + $0x1a2] sm:$0xff] }
 0x1d6   :  { %7208 = vmatmul.mubr.bf16.gmra.mrb[56].mxu0 %v9169_v39 }
 0x1d7   :  { %7211 = vmatprep.mubr.bf16.mxu0 %v9171_v33 }
 0x1db   :  { %6860 = vmatmul.mubr.bf16.gmra.mrb[28].mxu1 %v8946_v52  ;;  %v1958_v52 = vld [vmem:[#allocation2 + $0x230] sm:$0xff] }
 0x1dc   :  { %6863 = vmatprep.mubr.bf16.mxu1 %v1997_v44  ;;  %v2001_v30 = vpack.c.bf16 %v1958_v52, %v1957_v45  ;;  %v1976_v45 = vld [vmem:[#allocation2 + $0x308] sm:$0xff]  ;;  %v1977_v52 = vld [vmem:[#allocation2 + $0x318] sm:$0xff] }
 0x1de   :  { %7212 = vmatmul.mubr.bf16.gmra.mrb[60].mxu0 %v4069_v1  ;;  %v1966_v1 = vld [vmem:[#allocation2 + $0x290] sm:$0xff] }
 0x1df   :  { %7231 = vmatprep.mubr.bf16.mxu0 %v8957_v7  ;;  %v1959_v7 = vld [vmem:[#allocation2 + $0x240] sm:$0xff]  ;;  %v2005_v44 = vpack.c.bf16 %v1966_v1, %v1965_v58 }
 0x1e3   :  { %6864 = vmatmul.mubr.bf16.gmra.mrb[32].mxu1 %v1998_v28  ;;  %v1972_v28 = vld [vmem:[#allocation2 + $0x2d8] sm:$0xff] }
 0x1e4   :  { %6867 = vmatprep.mubr.bf16.mxu1 %v1999_v4  ;;  %v1973_v4 = vld [vmem:[#allocation2 + $0x2e8] sm:$0xff] }
 0x1e5   :  { %v2009_v18 = vpack.c.bf16 %v1974_v14, %v1973_v4 }
 0x1e6   :  { %7232 = vmatmul.mubr.bf16.vlgmr.msra.gmra.mrb[0].mxu0 %v8969_v13  ;;  %v2002_v13 = vpack.c.bf16 %v1960_v26, %v1959_v7 }
 0x1e7   :  { %7235 = vmatprep.mubr.bf16.mxu0 %v8971_v8  ;;  %v1963_v8 = vld [vmem:[#allocation2 + $0x270] sm:$0xff] }
 0x1eb   :  { %6868 = vmatmul.mubr.bf16.gmra.mrb[36].mxu1 %v2000_v55  ;;  %v1978_v55 = vld [vmem:[#allocation2 + $0x320] sm:$0xff] }
 0x1ec   :  { %6871 = vmatprep.mubr.bf16.mxu1 %v2001_v30  ;;  %v4517_v30 = vld [vmem:[#allocation2 + $0x18a] sm:$0xff]  ;;  %v2011_v26 = vpack.c.bf16 %v1978_v55, %v1977_v52 }
 0x1ee   :  { %7236 = vmatmul.mubr.bf16.gmra.mrb[4].mxu0 %v8983_v5  ;;  %v2004_v5 = vpack.c.bf16 %v1964_v32, %v1963_v8 }
 0x1ef   :  { %7239 = vmatprep.mubr.bf16.mxu0 %v8985_v29  ;;  %v1967_v29 = vld [vmem:[#allocation2 + $0x2a0] sm:$0xff] }
 0x1f3   :  { %6872 = vmatmul.mubr.bf16.gmra.mrb[40].mxu1 %v2002_v13  ;;  %v2464_v13 = vld [vmem:[#allocation2 + $0x1d1] sm:$0xff] }
 0x1f4   :  { %6875 = vmatprep.mubr.bf16.mxu1 %v2003_v10 }
 0x1f6   :  { %7240 = vmatmul.mubr.bf16.gmra.mrb[8].mxu0 %v8997_v56  ;;  %v2006_v56 = vpack.c.bf16 %v1968_v15, %v1967_v29 }
 0x1f7   :  { %7243 = vmatprep.mubr.bf16.mxu0 %v8999_v42  ;;  %v1971_v42 = vld [vmem:[#allocation2 + $0x2d0] sm:$0xff] }
 0x1fb   :  { %6876 = vmatmul.mubr.bf16.gmra.mrb[44].mxu1 %v2004_v5 }
 0x1fc   :  { %6879 = vmatprep.mubr.bf16.mxu1 %v2005_v44 }
 0x1fe   :  { %7244 = vmatmul.mubr.bf16.gmra.mrb[12].mxu0 %v9008_v3  ;;  %v2008_v3 = vpack.c.bf16 %v1972_v28, %v1971_v42 }
 0x1ff   :  { %7247 = vmatprep.mubr.bf16.mxu0 %v9010_v43  ;;  %v1975_v43 = vld [vmem:[#allocation2 + $0x300] sm:$0xff] }
 0x200   :  { %v2010_v7 = vpack.c.bf16 %v1976_v45, %v1975_v43 }
 0x203   :  { %6880 = vmatmul.mubr.bf16.gmra.mrb[48].mxu1 %v2006_v56 }
 0x204   :  { %6883 = vmatprep.mubr.bf16.mxu1 %v2007_v27 }
 0x206   :  { %7248 = vmatmul.mubr.bf16.gmra.mrb[16].mxu0 %v9022_v62  ;;  %v4516_v62 = vld [vmem:[#allocation2 + $0x182] sm:$0xff] }
 0x207   :  { %7251 = vmatprep.mubr.bf16.mxu0 %v9024_v0  ;;  %v4566_v24 = vpack.c.bf16 %v4517_v30, %v4516_v62  ;;  %v4518_v0 = vld [vmem:[#allocation2 + $0x19a] sm:$0xff] }
 0x208   :  { %v4567_v10 = vpack.c.bf16 %v4519_v51, %v4518_v0 }
 0x20b   :  { %6884 = vmatmul.mubr.bf16.gmra.mrb[52].mxu1 %v2008_v3 }
 0x20c   :  { %6887 = vmatprep.mubr.bf16.mxu1 %v2009_v18 }
 0x20e   :  { %7252 = vmatmul.mubr.bf16.gmra.mrb[20].mxu0 %v9030_v20  ;;  %v2463_v20 = vld [vmem:[#allocation2 + $0x1c9] sm:$0xff] }
 0x20f   :  { %7255 = vmatprep.mubr.bf16.mxu0 %v9032_v40  ;;  %v2511_v8 = vpack.c.bf16 %v2464_v13, %v2463_v20  ;;  %v4548_v40 = vld [vmem:[#allocation2 + $0x332] sm:$0xff] }
 0x213   :  { %6888 = vmatmul.mubr.bf16.gmra.mrb[56].mxu1 %v2010_v7 }
 0x214   :  { %6891 = vmatprep.mubr.bf16.mxu1 %v2011_v26 }
 0x216   :  { %7256 = vmatmul.mubr.bf16.gmra.mrb[24].mxu0 %v9040_v41 }
 0x217   :  { %7259 = vmatprep.mubr.bf16.mxu0 %v4566_v24 }
 0x21b   :  { %6892 = vmatmul.mubr.bf16.gmra.mrb[60].mxu1 %v9034_v61  ;;  %v4549_v61 = vld [vmem:[#allocation2 + $0x33a] sm:$0xff] }
 0x21c   :  { %6943 = vmatprep.mubr.bf16.mxu1 %v2511_v8  ;;  %v4582_v41 = vpack.c.bf16 %v4549_v61, %v4548_v40 }
 0x21e   :  { %7260 = vmatmul.mubr.bf16.gmra.mrb[28].mxu0 %v4567_v10 }
 0x21f   :  { %7263 = vmatprep.mubr.bf16.mxu0 %v9044_v12  ;;  %v4550_v12 = vld [vmem:[#allocation2 + $0x34a] sm:$0xff] }
 0x223   :  { %6944 = vmatmul.mubr.bf16.vlgmr.msra.gmra.mrb[32].mxu1 %v9107_v22 }
 0x224   :  { %6947 = vmatprep.mubr.bf16.mxu1 %v9111_v48 }
 0x226   :  { %7264 = vmatmul.mubr.bf16.gmra.mrb[32].mxu0 %v9054_v19  ;;  %v4551_v19 = vld [vmem:[#allocation2 + $0x352] sm:$0xff] }
 0x227   :  { %7267 = vmatprep.mubr.bf16.mxu0 %v9056_v6  ;;  %v4583_v6 = vpack.c.bf16 %v4551_v19, %v4550_v12 }
 0x22b   :  { %6948 = vmatmul.mubr.bf16.gmra.mrb[36].mxu1 %v9113_v59 }
 0x22c   :  { %6951 = vmatprep.mubr.bf16.mxu1 %v9121_v63 }
 0x22e   :  { %7268 = vmatmul.mubr.bf16.gmra.mrb[36].mxu0 %v9066_v17 }
 0x22f   :  { %7271 = vmatprep.mubr.bf16.mxu0 %v9068_v60 }
 0x233   :  { %6952 = vmatmul.mubr.bf16.gmra.mrb[40].mxu1 %v9123_v9 }
 0x234   :  { %6955 = vmatprep.mubr.bf16.mxu1 %v9133_v11 }
 0x236   :  { %7272 = vmatmul.mubr.bf16.gmra.mrb[40].mxu0 %v9078_v47 }
 0x237   :  { %7275 = vmatprep.mubr.bf16.mxu0 %v9080_v34 }
 0x23b   :  { %6956 = vmatmul.mubr.bf16.gmra.mrb[44].mxu1 %v9135_v54 }
 0x23c   :  { %6959 = vmatprep.mubr.bf16.mxu1 %v9145_v46 }
 0x23e   :  { %7276 = vmatmul.mubr.bf16.gmra.mrb[44].mxu0 %v9087_v35 }
 0x23f   :  { %7279 = vmatprep.mubr.bf16.mxu0 %v9089_v50 }
 0x243   :  { %6960 = vmatmul.mubr.bf16.gmra.mrb[48].mxu1 %v9147_v2 }
 0x244   :  { %6963 = vmatprep.mubr.bf16.mxu1 %v9157_v57 }
 0x246   :  { %7280 = vmatmul.mubr.bf16.gmra.mrb[48].mxu0 %v9093_v31 }
 0x247   :  { %7283 = vmatprep.mubr.bf16.mxu0 %v9095_v23 }
 0x24b   :  { %6964 = vmatmul.mubr.bf16.gmra.mrb[52].mxu1 %v9159_v25 }
 0x24c   :  { %6967 = vmatprep.mubr.bf16.mxu1 %v9163_v36 }
 0x24e   :  { %7284 = vmatmul.mubr.bf16.gmra.mrb[52].mxu0 %v9099_v16 }
 0x24f   :  { %7287 = vmatprep.mubr.bf16.mxu0 %v9101_v38 }
 0x253   :  { %6968 = vmatmul.mubr.bf16.gmra.mrb[56].mxu1 %v9165_v37 }
 0x254   :  { %6971 = vmatprep.mubr.bf16.mxu1 %v9169_v39 }
 0x256   :  { %7288 = vmatmul.mubr.bf16.gmra.mrb[56].mxu0 %v9105_v21 }
 0x257   :  { %7291 = vmatprep.mubr.bf16.mxu0 %v4582_v41 }
 0x25b   :  { %6972 = vmatmul.mubr.bf16.gmra.mrb[60].mxu1 %v9171_v33 }
 0x25e   :  { %7292 = vmatmul.mubr.bf16.gmra.mrb[60].mxu0 %v4583_v6 }
 0x276   :  { %v6833_v17 = vpop.f32.mrb[0].mxu1 }
 0x277   :  { %v2112_v60 = vpop.f32.mrb[1].mxu1 }
 0x278   :  { %v6834_v47 = vpop.f32.mrb[2].mxu1 }
 0x279   :  { %v2115_v34 = vpop.f32.mrb[3].mxu1 }
 0x27e   :  { %v6837_v35 = vpop.f32.mrb[4].mxu1 }
 0x27f   :  { %v2128_v50 = vpop.f32.mrb[5].mxu1 }
 0x280   :  { %v6838_v31 = vpop.f32.mrb[6].mxu1 }
 0x281   :  { %v2131_v23 = vpop.f32.mrb[7].mxu1 }
 0x286   :  { %v9220_v16 = vpop.f32.mrb[8].mxu1 }
 0x287   :  { %v9222_v38 = vpop.f32.mrb[9].mxu1 }
 0x288   :  { %v9224_v21 = vpop.f32.mrb[10].mxu1 }
 0x289   :  { %v9226_v22 = vpop.f32.mrb[11].mxu1 }
 0x28e   :  { %v9228_v48 = vpop.f32.mrb[12].mxu1 }
 0x28f   :  { %v9230_v59 = vpop.f32.mrb[13].mxu1 }
 0x290   :  { %v9232_v63 = vpop.f32.mrb[14].mxu1 }
 0x291   :  { %v9234_v9 = vpop.f32.mrb[15].mxu1 }
 0x296   :  { %v9236_v11 = vpop.f32.mrb[16].mxu1 }
 0x297   :  { %v9238_v54 = vpop.f32.mrb[17].mxu1 }
 0x298   :  { %v9240_v46 = vpop.f32.mrb[18].mxu1 }
 0x299   :  { %v9242_v2 = vpop.f32.mrb[19].mxu1 }
 0x29e   :  { %v9244_v57 = vpop.f32.mrb[20].mxu1 }
 0x29f   :  { %v9246_v25 = vpop.f32.mrb[21].mxu1 }
 0x2a0   :  { %v9248_v36 = vpop.f32.mrb[22].mxu1 }
 0x2a1   :  { %v9250_v37 = vpop.f32.mrb[23].mxu1 }
 0x2a6   :  { %v9252_v39 = vpop.f32.mrb[24].mxu1 }
 0x2a7   :  { %v9254_v33 = vpop.f32.mrb[25].mxu1 }
 0x2a8   :  { %v9256_v32 = vpop.f32.mrb[26].mxu1 }
 0x2a9   :  { %v9258_v58 = vpop.f32.mrb[27].mxu1 }
 0x2ae   :  { %v9260_v1 = vpop.f32.mrb[28].mxu1 }
 0x2af   :  { %v9262_v5 = vpop.f32.mrb[29].mxu1 }
 0x2b0   :  { %v9264_v44 = vpop.f32.mrb[30].mxu1 }
 0x2b1   :  { %v9266_v29 = vpop.f32.mrb[31].mxu1 }
 0x2b9   :  { %v7233_v15 = vpop.f32.mrb[0].mxu0 }
 0x2ba   :  { %v7311_v53 = vadd.f32 %v7233_v15, %v6833_v17  ;;  %v4683_v49 = vpop.f32.mrb[1].mxu0 }
 0x2bb   :  { %v7312_v56 = vadd.f32 %v4683_v49, %v2112_v60  ;;  %v7234_v27 = vpop.f32.mrb[2].mxu0 }
 0x2bc   :  { %v7313_v42 = vadd.f32 %v7234_v27, %v6834_v47  ;;  %v4686_v28 = vpop.f32.mrb[3].mxu0  ;;  %v5393_v52 = vmul.f32 %v7311_v53, %v7311_v53 }
 0x2bd   :  { %v7314_v4 = vadd.f32 %v4686_v28, %v2115_v34  ;;  %v5391_v3 = vmul.f32 %v7312_v56, %v7312_v56 }
 0x2be   :  { %v6001_v14 = vpack.c.bf16 %v7313_v42, %v7311_v53  ;;  %v5394_v24 = vmul.f32 %v7313_v42, %v7313_v42 }
 0x2bf   :  { %v5996_v18 = vpack.c.bf16 %v7314_v4, %v7312_v56  ;;  %v5322_v43 = vadd.f32 %v7314_v4, %v7312_v56  ;;  %v5392_v45 = vmul.f32 %v7314_v4, %v7314_v4 }
 0x2c0   :  { %6184 = vst [vmem:[%s9395_s4 + $0x8] sm:$0xff] %v6001_v14  }
 0x2c1   :  { %5997 = vst [vmem:[%s9395_s4] sm:$0xff] %v5996_v18   ;;  %v5323_v55 = vadd.f32 %v7311_v53, %v5322_v43  ;;  %v5455_v62 = vadd.f32 %v5392_v45, %v5391_v3  ;;  %v7237_v30 = vpop.f32.mrb[4].mxu0 }
 0x2c2   :  { %v7315_v7 = vadd.f32 %v7237_v30, %v6837_v35  ;;  %v4699_v26 = vpop.f32.mrb[5].mxu0 }
 0x2c3   :  { %v5456_v0 = vadd.f32 %v5455_v62, %v5393_v52  ;;  %v7316_v51 = vadd.f32 %v4699_v26, %v2128_v50  ;;  %v5324_v20 = vadd.f32 %v7313_v42, %v5323_v55  ;;  %v7238_v13 = vpop.f32.mrb[6].mxu0 }
 0x2c4   :  { %v7317_v10 = vadd.f32 %v7238_v13, %v6838_v31  ;;  %v4702_v8 = vpop.f32.mrb[7].mxu0  ;;  %v5397_v34 = vmul.f32 %v7315_v7, %v7315_v7 }
 0x2c5   :  { %v5325_v40 = vadd.f32 %v7316_v51, %v5324_v20  ;;  %v5395_v61 = vmul.f32 %v7316_v51, %v7316_v51  ;;  %v5457_v41 = vadd.f32 %v5456_v0, %v5394_v24  ;;  %v7318_v12 = vadd.f32 %v4702_v8, %v2131_v23 }
 0x2c6   :  { %v6011_v19 = vpack.c.bf16 %v7317_v10, %v7315_v7  ;;  %v5398_v53 = vmul.f32 %v7317_v10, %v7317_v10 }
 0x2c7   :  { %v5458_v6 = vadd.f32 %v5457_v41, %v5395_v61  ;;  %v6006_v17 = vpack.c.bf16 %v7318_v12, %v7316_v51  ;;  %v5326_v60 = vadd.f32 %v7318_v12, %v5325_v40  ;;  %v5396_v47 = vmul.f32 %v7318_v12, %v7318_v12 }
 0x2c8   :  { %6186 = vst [vmem:[%s9395_s4 + $0x18] sm:$0xff] %v6011_v19  }
 0x2c9   :  { %6185 = vst [vmem:[%s9395_s4 + $0x10] sm:$0xff] %v6006_v17   ;;  %v5327_v35 = vadd.f32 %v7315_v7, %v5326_v60  ;;  %v5459_v50 = vadd.f32 %v5458_v6, %v5396_v47  ;;  %v7241_v31 = vpop.f32.mrb[8].mxu0 }
 0x2ca   :  { %v7319_v15 = vadd.f32 %v7241_v31, %v9220_v16  ;;  %v4715_v23 = vpop.f32.mrb[9].mxu0 }
 0x2cb   :  { %v5460_v49 = vadd.f32 %v5459_v50, %v5397_v34  ;;  %v7320_v56 = vadd.f32 %v4715_v23, %v9222_v38  ;;  %v5328_v27 = vadd.f32 %v7317_v10, %v5327_v35  ;;  %v7242_v42 = vpop.f32.mrb[10].mxu0 }
 0x2cc   :  { %v7321_v28 = vadd.f32 %v7242_v42, %v9224_v21  ;;  %v4718_v4 = vpop.f32.mrb[11].mxu0  ;;  %v5401_v38 = vmul.f32 %v7319_v15, %v7319_v15 }
 0x2cd   :  { %v5329_v14 = vadd.f32 %v7320_v56, %v5328_v27  ;;  %v5399_v3 = vmul.f32 %v7320_v56, %v7320_v56  ;;  %v5461_v18 = vadd.f32 %v5460_v49, %v5398_v53  ;;  %v7322_v43 = vadd.f32 %v4718_v4, %v9226_v22 }
 0x2ce   :  { %v6021_v45 = vpack.c.bf16 %v7321_v28, %v7319_v15  ;;  %v5402_v24 = vmul.f32 %v7321_v28, %v7321_v28 }
 0x2cf   :  { %v5462_v52 = vadd.f32 %v5461_v18, %v5399_v3  ;;  %v6016_v55 = vpack.c.bf16 %v7322_v43, %v7320_v56  ;;  %v5330_v62 = vadd.f32 %v7322_v43, %v5329_v14  ;;  %v5400_v16 = vmul.f32 %v7322_v43, %v7322_v43 }
 0x2d0   :  { %6188 = vst [vmem:[%s9395_s4 + $0x28] sm:$0xff] %v6021_v45  }
 0x2d1   :  { %6187 = vst [vmem:[%s9395_s4 + $0x20] sm:$0xff] %v6016_v55   ;;  %v5331_v21 = vadd.f32 %v7319_v15, %v5330_v62  ;;  %v5463_v30 = vadd.f32 %v5462_v52, %v5400_v16  ;;  %v7245_v7 = vpop.f32.mrb[12].mxu0 }
 0x2d2   :  { %v7323_v26 = vadd.f32 %v7245_v7, %v9228_v48  ;;  %v4731_v22 = vpop.f32.mrb[13].mxu0 }
 0x2d3   :  { %v5464_v0 = vadd.f32 %v5463_v30, %v5401_v38  ;;  %v7324_v51 = vadd.f32 %v4731_v22, %v9230_v59  ;;  %v5332_v20 = vadd.f32 %v7321_v28, %v5331_v21  ;;  %v7246_v13 = vpop.f32.mrb[14].mxu0 }
 0x2d4   :  { %v7325_v10 = vadd.f32 %v7246_v13, %v9232_v63  ;;  %v4734_v8 = vpop.f32.mrb[15].mxu0  ;;  %v5405_v59 = vmul.f32 %v7323_v26, %v7323_v26 }
 0x2d5   :  { %v5333_v40 = vadd.f32 %v7324_v51, %v5332_v20  ;;  %v5403_v61 = vmul.f32 %v7324_v51, %v7324_v51  ;;  %v5465_v41 = vadd.f32 %v5464_v0, %v5402_v24  ;;  %v7326_v12 = vadd.f32 %v4734_v8, %v9234_v9 }
 0x2d6   :  { %v6031_v19 = vpack.c.bf16 %v7325_v10, %v7323_v26  ;;  %v5406_v50 = vmul.f32 %v7325_v10, %v7325_v10 }
 0x2d7   :  { %v5466_v6 = vadd.f32 %v5465_v41, %v5403_v61  ;;  %v6026_v17 = vpack.c.bf16 %v7326_v12, %v7324_v51  ;;  %v5334_v60 = vadd.f32 %v7326_v12, %v5333_v40  ;;  %v5404_v48 = vmul.f32 %v7326_v12, %v7326_v12 }
 0x2d8   :  { %6190 = vst [vmem:[%s9395_s4 + $0x38] sm:$0xff] %v6031_v19  }
 0x2d9   :  { %6189 = vst [vmem:[%s9395_s4 + $0x30] sm:$0xff] %v6026_v17   ;;  %v5335_v63 = vadd.f32 %v7323_v26, %v5334_v60  ;;  %v5467_v47 = vadd.f32 %v5466_v6, %v5404_v48  ;;  %v7249_v34 = vpop.f32.mrb[16].mxu0 }
 0x2da   :  { %v7327_v35 = vadd.f32 %v7249_v34, %v9236_v11  ;;  %v4747_v9 = vpop.f32.mrb[17].mxu0 }
 0x2db   :  { %v5468_v31 = vadd.f32 %v5467_v47, %v5405_v59  ;;  %v7328_v15 = vadd.f32 %v4747_v9, %v9238_v54  ;;  %v5336_v23 = vadd.f32 %v7325_v10, %v5335_v63  ;;  %v7250_v53 = vpop.f32.mrb[18].mxu0 }
 0x2dc   :  { %v7329_v49 = vadd.f32 %v7250_v53, %v9240_v46  ;;  %v4750_v56 = vpop.f32.mrb[19].mxu0  ;;  %v5409_v54 = vmul.f32 %v7327_v35, %v7327_v35 }
 0x2dd   :  { %v5337_v27 = vadd.f32 %v7328_v15, %v5336_v23  ;;  %v5407_v42 = vmul.f32 %v7328_v15, %v7328_v15  ;;  %v5469_v28 = vadd.f32 %v5468_v31, %v5406_v50  ;;  %v7330_v4 = vadd.f32 %v4750_v56, %v9242_v2 }
 0x2de   :  { %v6041_v14 = vpack.c.bf16 %v7329_v49, %v7327_v35  ;;  %v5410_v62 = vmul.f32 %v7329_v49, %v7329_v49 }
 0x2df   :  { %v5470_v3 = vadd.f32 %v5469_v28, %v5407_v42  ;;  %v6036_v18 = vpack.c.bf16 %v7330_v4, %v7328_v15  ;;  %v5338_v43 = vadd.f32 %v7330_v4, %v5337_v27  ;;  %v5408_v11 = vmul.f32 %v7330_v4, %v7330_v4 }
 0x2e0   :  { %6192 = vst [vmem:[%s9395_s4 + $0x48] sm:$0xff] %v6041_v14  }
 0x2e1   :  { %6191 = vst [vmem:[%s9395_s4 + $0x40] sm:$0xff] %v6036_v18   ;;  %v5339_v46 = vadd.f32 %v7327_v35, %v5338_v43  ;;  %v5471_v45 = vadd.f32 %v5470_v3, %v5408_v11  ;;  %v7253_v52 = vpop.f32.mrb[20].mxu0 }
 0x2e2   :  { %v7331_v55 = vadd.f32 %v7253_v52, %v9244_v57  ;;  %v4763_v2 = vpop.f32.mrb[21].mxu0 }
 0x2e3   :  { %v5472_v16 = vadd.f32 %v5471_v45, %v5409_v54  ;;  %v7332_v38 = vadd.f32 %v4763_v2, %v9246_v25  ;;  %v5340_v21 = vadd.f32 %v7329_v49, %v5339_v46  ;;  %v7254_v30 = vpop.f32.mrb[22].mxu0 }
 0x2e4   :  { %v7333_v7 = vadd.f32 %v7254_v30, %v9248_v36  ;;  %v4766_v26 = vpop.f32.mrb[23].mxu0  ;;  %v5413_v25 = vmul.f32 %v7331_v55, %v7331_v55 }
 0x2e5   :  { %v5341_v22 = vadd.f32 %v7332_v38, %v5340_v21  ;;  %v5411_v24 = vmul.f32 %v7332_v38, %v7332_v38  ;;  %v5473_v0 = vadd.f32 %v5472_v16, %v5410_v62  ;;  %v7334_v51 = vadd.f32 %v4766_v26, %v9250_v37 }
 0x2e6   :  { %v6051_v20 = vpack.c.bf16 %v7333_v7, %v7331_v55  ;;  %v5414_v12 = vmul.f32 %v7333_v7, %v7333_v7 }
 0x2e7   :  { %v5474_v13 = vadd.f32 %v5473_v0, %v5411_v24  ;;  %v6046_v10 = vpack.c.bf16 %v7334_v51, %v7332_v38  ;;  %v5342_v8 = vadd.f32 %v7334_v51, %v5341_v22  ;;  %v5412_v57 = vmul.f32 %v7334_v51, %v7334_v51 }
 0x2e8   :  { %6194 = vst [vmem:[%s9395_s4 + $0x58] sm:$0xff] %v6051_v20  }
 0x2e9   :  { %6193 = vst [vmem:[%s9395_s4 + $0x50] sm:$0xff] %v6046_v10   ;;  %v5343_v36 = vadd.f32 %v7331_v55, %v5342_v8  ;;  %v5475_v40 = vadd.f32 %v5474_v13, %v5412_v57  ;;  %v7257_v61 = vpop.f32.mrb[24].mxu0 }
 0x2ea   :  { %v7335_v41 = vadd.f32 %v7257_v61, %v9252_v39  ;;  %v4779_v37 = vpop.f32.mrb[25].mxu0 }
 0x2eb   :  { %v5476_v19 = vadd.f32 %v5475_v40, %v5413_v25  ;;  %v7336_v6 = vadd.f32 %v4779_v37, %v9254_v33  ;;  %v5344_v17 = vadd.f32 %v7333_v7, %v5343_v36  ;;  %v7258_v60 = vpop.f32.mrb[26].mxu0 }
 0x2ec   :  { %v7337_v48 = vadd.f32 %v7258_v60, %v9256_v32  ;;  %v4782_v59 = vpop.f32.mrb[27].mxu0  ;;  %v5417_v33 = vmul.f32 %v7335_v41, %v7335_v41 }
 0x2ed   :  { %v5345_v63 = vadd.f32 %v7336_v6, %v5344_v17  ;;  %v5415_v47 = vmul.f32 %v7336_v6, %v7336_v6  ;;  %v5477_v34 = vadd.f32 %v5476_v19, %v5414_v12  ;;  %v7338_v35 = vadd.f32 %v4782_v59, %v9258_v58 }
 0x2ee   :  { %v6061_v9 = vpack.c.bf16 %v7337_v48, %v7335_v41  ;;  %v5418_v56 = vmul.f32 %v7337_v48, %v7337_v48 }
 0x2ef   :  { %v5478_v50 = vadd.f32 %v5477_v34, %v5415_v47  ;;  %v6056_v31 = vpack.c.bf16 %v7338_v35, %v7336_v6  ;;  %v5346_v15 = vadd.f32 %v7338_v35, %v5345_v63  ;;  %v5416_v39 = vmul.f32 %v7338_v35, %v7338_v35 }
 0x2f0   :  { %6196 = vst [vmem:[%s9395_s4 + $0x68] sm:$0xff] %v6061_v9  }
 0x2f1   :  { %6195 = vst [vmem:[%s9395_s4 + $0x60] sm:$0xff] %v6056_v31   ;;  %v5347_v32 = vadd.f32 %v7335_v41, %v5346_v15  ;;  %v5479_v23 = vadd.f32 %v5478_v50, %v5416_v39  ;;  %v7261_v53 = vpop.f32.mrb[28].mxu0 }
 0x2f2   :  { %v7339_v49 = vadd.f32 %v7261_v53, %v9260_v1  ;;  %v4795_v58 = vpop.f32.mrb[29].mxu0 }
 0x2f3   :  { %v5480_v27 = vadd.f32 %v5479_v23, %v5417_v33  ;;  %v7340_v42 = vadd.f32 %v4795_v58, %v9262_v5  ;;  %v5348_v28 = vadd.f32 %v7337_v48, %v5347_v32  ;;  %v7262_v4 = vpop.f32.mrb[30].mxu0 }
 0x2f4   :  { %v7341_v14 = vadd.f32 %v7262_v4, %v9264_v44  ;;  %v4798_v3 = vpop.f32.mrb[31].mxu0  ;;  %v5421_v2 = vmul.f32 %v7339_v49, %v7339_v49 }
 0x2f5   :  { %v5349_v18 = vadd.f32 %v7340_v42, %v5348_v28  ;;  %v5419_v43 = vmul.f32 %v7340_v42, %v7340_v42  ;;  %v5481_v11 = vadd.f32 %v5480_v27, %v5418_v56  ;;  %v7342_v54 = vadd.f32 %v4798_v3, %v9266_v29 }
 0x2f6   :  { %v6071_v46 = vpack.c.bf16 %v7341_v14, %v7339_v49  ;;  %v6945_v5 = vpop.f32.mrb[32].mxu1  ;;  %v5422_v7 = vmul.f32 %v7341_v14, %v7341_v14 }
 0x2f7   :  { %v5482_v45 = vadd.f32 %v5481_v11, %v5419_v43  ;;  %v6066_v52 = vpack.c.bf16 %v7342_v54, %v7340_v42  ;;  %v5350_v55 = vadd.f32 %v7342_v54, %v5349_v18  ;;  %v5420_v1 = vmul.f32 %v7342_v54, %v7342_v54  ;;  %v2754_v38 = vpop.f32.mrb[33].mxu1 }
 0x2f8   :  { %6198 = vst [vmem:[%s9395_s4 + $0x78] sm:$0xff] %v6071_v46   ;;  %v6946_v30 = vpop.f32.mrb[34].mxu1 }
 0x2f9   :  { %6197 = vst [vmem:[%s9395_s4 + $0x70] sm:$0xff] %v6066_v52   ;;  %v5351_v44 = vadd.f32 %v7339_v49, %v5350_v55  ;;  %v5483_v62 = vadd.f32 %v5482_v45, %v5420_v1  ;;  %v7265_v16 = vpop.f32.mrb[32].mxu0  ;;  %v2757_v51 = vpop.f32.mrb[35].mxu1 }
 0x2fa   :  { %v7343_v29 = vadd.f32 %v7265_v16, %v6945_v5  ;;  %v4811_v21 = vpop.f32.mrb[33].mxu0 }
 0x2fb   :  { %v5484_v26 = vadd.f32 %v5483_v62, %v5421_v2  ;;  %v7344_v22 = vadd.f32 %v4811_v21, %v2754_v38  ;;  %v5352_v24 = vadd.f32 %v7341_v14, %v5351_v44  ;;  %v7266_v0 = vpop.f32.mrb[34].mxu0 }
 0x2fc   :  { %v7345_v20 = vadd.f32 %v7266_v0, %v6946_v30  ;;  %v4814_v13 = vpop.f32.mrb[35].mxu0  ;;  %v5425_v19 = vmul.f32 %v7343_v29, %v7343_v29 }
 0x2fd   :  { %v5353_v10 = vadd.f32 %v7344_v22, %v5352_v24  ;;  %v5423_v8 = vmul.f32 %v7344_v22, %v7344_v22  ;;  %v5485_v57 = vadd.f32 %v5484_v26, %v5422_v7  ;;  %v7346_v25 = vadd.f32 %v4814_v13, %v2757_v51 }
 0x2fe   :  { %v6081_v36 = vpack.c.bf16 %v7345_v20, %v7343_v29  ;;  %v6949_v12 = vpop.f32.mrb[36].mxu1  ;;  %v5426_v34 = vmul.f32 %v7345_v20, %v7345_v20 }
 0x2ff   :  { %v5486_v40 = vadd.f32 %v5485_v57, %v5423_v8  ;;  %v6076_v61 = vpack.c.bf16 %v7346_v25, %v7344_v22  ;;  %v5354_v41 = vadd.f32 %v7346_v25, %v5353_v10  ;;  %v5424_v37 = vmul.f32 %v7346_v25, %v7346_v25  ;;  %v2770_v48 = vpop.f32.mrb[37].mxu1 }
 0x300   :  { %6200 = vst [vmem:[%s9395_s4 + $0x88] sm:$0xff] %v6081_v36   ;;  %v6950_v47 = vpop.f32.mrb[38].mxu1 }
 0x301   :  { %6199 = vst [vmem:[%s9395_s4 + $0x80] sm:$0xff] %v6076_v61   ;;  %v5355_v6 = vadd.f32 %v7343_v29, %v5354_v41  ;;  %v5487_v17 = vadd.f32 %v5486_v40, %v5424_v37  ;;  %v7269_v60 = vpop.f32.mrb[36].mxu0  ;;  %v2773_v15 = vpop.f32.mrb[39].mxu1 }
 0x302   :  { %v7347_v59 = vadd.f32 %v7269_v60, %v6949_v12  ;;  %v4827_v63 = vpop.f32.mrb[37].mxu0 }
 0x303   :  { %v5488_v35 = vadd.f32 %v5487_v17, %v5425_v19  ;;  %v7348_v9 = vadd.f32 %v4827_v63, %v2770_v48  ;;  %v5356_v50 = vadd.f32 %v7345_v20, %v5355_v6  ;;  %v7270_v31 = vpop.f32.mrb[38].mxu0 }
 0x304   :  { %v7349_v39 = vadd.f32 %v7270_v31, %v6950_v47  ;;  %v4830_v33 = vpop.f32.mrb[39].mxu0  ;;  %v5429_v14 = vmul.f32 %v7347_v59, %v7347_v59 }
 0x305   :  { %v5357_v32 = vadd.f32 %v7348_v9, %v5356_v50  ;;  %v5427_v23 = vmul.f32 %v7348_v9, %v7348_v9  ;;  %v5489_v53 = vadd.f32 %v5488_v35, %v5426_v34  ;;  %v7350_v49 = vadd.f32 %v4830_v33, %v2773_v15 }
 0x306   :  { %v6091_v58 = vpack.c.bf16 %v7349_v39, %v7347_v59  ;;  %v6953_v4 = vpop.f32.mrb[40].mxu1  ;;  %v5430_v52 = vmul.f32 %v7349_v39, %v7349_v39 }
 0x307   :  { %v5490_v56 = vadd.f32 %v5489_v53, %v5427_v23  ;;  %v6086_v27 = vpack.c.bf16 %v7350_v49, %v7348_v9  ;;  %v5358_v42 = vadd.f32 %v7350_v49, %v5357_v32  ;;  %v5428_v28 = vmul.f32 %v7350_v49, %v7350_v49  ;;  %v2786_v11 = vpop.f32.mrb[41].mxu1 }
 0x308   :  { %6202 = vst [vmem:[%s9395_s4 + $0x98] sm:$0xff] %v6091_v58   ;;  %v6954_v45 = vpop.f32.mrb[42].mxu1 }
 0x309   :  { %6201 = vst [vmem:[%s9395_s4 + $0x90] sm:$0xff] %v6086_v27   ;;  %v5359_v3 = vadd.f32 %v7347_v59, %v5358_v42  ;;  %v5491_v18 = vadd.f32 %v5490_v56, %v5428_v28  ;;  %v7273_v43 = vpop.f32.mrb[40].mxu0  ;;  %v2789_v44 = vpop.f32.mrb[43].mxu1 }
 0x30a   :  { %v7351_v54 = vadd.f32 %v7273_v43, %v6953_v4  ;;  %v4843_v46 = vpop.f32.mrb[41].mxu0 }
 0x30b   :  { %v5492_v55 = vadd.f32 %v5491_v18, %v5429_v14  ;;  %v7352_v1 = vadd.f32 %v4843_v46, %v2786_v11  ;;  %v5360_v5 = vadd.f32 %v7349_v39, %v5359_v3  ;;  %v7274_v2 = vpop.f32.mrb[42].mxu0 }
 0x30c   :  { %v7353_v62 = vadd.f32 %v7274_v2, %v6954_v45  ;;  %v4846_v16 = vpop.f32.mrb[43].mxu0  ;;  %v5433_v20 = vmul.f32 %v7351_v54, %v7351_v54 }
 0x30d   :  { %v5361_v38 = vadd.f32 %v7352_v1, %v5360_v5  ;;  %v5431_v29 = vmul.f32 %v7352_v1, %v7352_v1  ;;  %v5493_v21 = vadd.f32 %v5492_v55, %v5430_v52  ;;  %v7354_v30 = vadd.f32 %v4846_v16, %v2789_v44 }
 0x30e   :  { %v6101_v7 = vpack.c.bf16 %v7353_v62, %v7351_v54  ;;  %v6957_v51 = vpop.f32.mrb[44].mxu1  ;;  %v5434_v61 = vmul.f32 %v7353_v62, %v7353_v62 }
 0x30f   :  { %v5494_v26 = vadd.f32 %v5493_v21, %v5431_v29  ;;  %v6096_v22 = vpack.c.bf16 %v7354_v30, %v7352_v1  ;;  %v5362_v24 = vadd.f32 %v7354_v30, %v5361_v38  ;;  %v5432_v0 = vmul.f32 %v7354_v30, %v7354_v30  ;;  %v2802_v57 = vpop.f32.mrb[45].mxu1 }
 0x310   :  { %6204 = vst [vmem:[%s9395_s4 + $0xa8] sm:$0xff] %v6101_v7   ;;  %v6958_v40 = vpop.f32.mrb[46].mxu1 }
 0x311   :  { %6203 = vst [vmem:[%s9395_s4 + $0xa0] sm:$0xff] %v6096_v22   ;;  %v5363_v13 = vadd.f32 %v7351_v54, %v5362_v24  ;;  %v5495_v10 = vadd.f32 %v5494_v26, %v5432_v0  ;;  %v7277_v8 = vpop.f32.mrb[44].mxu0  ;;  %v2805_v6 = vpop.f32.mrb[47].mxu1 }
 0x312   :  { %v7355_v25 = vadd.f32 %v7277_v8, %v6957_v51  ;;  %v4859_v36 = vpop.f32.mrb[45].mxu0 }
 0x313   :  { %v5496_v41 = vadd.f32 %v5495_v10, %v5433_v20  ;;  %v7356_v37 = vadd.f32 %v4859_v36, %v2802_v57  ;;  %v5364_v12 = vadd.f32 %v7353_v62, %v5363_v13  ;;  %v7278_v19 = vpop.f32.mrb[46].mxu0 }
 0x314   :  { %v7357_v17 = vadd.f32 %v7278_v19, %v6958_v40  ;;  %v4862_v60 = vpop.f32.mrb[47].mxu0  ;;  %v5437_v39 = vmul.f32 %v7355_v25, %v7355_v25 }
 0x315   :  { %v5365_v48 = vadd.f32 %v7356_v37, %v5364_v12  ;;  %v5435_v59 = vmul.f32 %v7356_v37, %v7356_v37  ;;  %v5497_v63 = vadd.f32 %v5496_v41, %v5434_v61  ;;  %v7358_v47 = vadd.f32 %v4862_v60, %v2805_v6 }
 0x316   :  { %v6111_v34 = vpack.c.bf16 %v7357_v17, %v7355_v25  ;;  %v6961_v15 = vpop.f32.mrb[48].mxu1  ;;  %v5438_v27 = vmul.f32 %v7357_v17, %v7357_v17 }
 0x317   :  { %v5498_v35 = vadd.f32 %v5497_v63, %v5435_v59  ;;  %v6106_v9 = vpack.c.bf16 %v7358_v47, %v7356_v37  ;;  %v5366_v50 = vadd.f32 %v7358_v47, %v5365_v48  ;;  %v5436_v31 = vmul.f32 %v7358_v47, %v7358_v47  ;;  %v2818_v53 = vpop.f32.mrb[49].mxu1 }
 0x318   :  { %6206 = vst [vmem:[%s9395_s4 + $0xb8] sm:$0xff] %v6111_v34   ;;  %v6962_v56 = vpop.f32.mrb[50].mxu1 }
 0x319   :  { %6205 = vst [vmem:[%s9395_s4 + $0xb0] sm:$0xff] %v6106_v9   ;;  %v5367_v33 = vadd.f32 %v7355_v25, %v5366_v50  ;;  %v5499_v32 = vadd.f32 %v5498_v35, %v5436_v31  ;;  %v7281_v23 = vpop.f32.mrb[48].mxu0  ;;  %v2821_v3 = vpop.f32.mrb[51].mxu1 }
 0x31a   :  { %v7359_v49 = vadd.f32 %v7281_v23, %v6961_v15  ;;  %v4875_v58 = vpop.f32.mrb[49].mxu0 }
 0x31b   :  { %v5500_v42 = vadd.f32 %v5499_v32, %v5437_v39  ;;  %v7360_v28 = vadd.f32 %v4875_v58, %v2818_v53  ;;  %v5368_v4 = vadd.f32 %v7357_v17, %v5367_v33  ;;  %v7282_v14 = vpop.f32.mrb[50].mxu0 }
 0x31c   :  { %v7361_v18 = vadd.f32 %v7282_v14, %v6962_v56  ;;  %v4878_v43 = vpop.f32.mrb[51].mxu0  ;;  %v5441_v62 = vmul.f32 %v7359_v49, %v7359_v49 }
 0x31d   :  { %v5369_v11 = vadd.f32 %v7360_v28, %v5368_v4  ;;  %v5439_v54 = vmul.f32 %v7360_v28, %v7360_v28  ;;  %v5501_v46 = vadd.f32 %v5500_v42, %v5438_v27  ;;  %v7362_v45 = vadd.f32 %v4878_v43, %v2821_v3 }
 0x31e   :  { %v6121_v52 = vpack.c.bf16 %v7361_v18, %v7359_v49  ;;  %v6965_v44 = vpop.f32.mrb[52].mxu1  ;;  %v5442_v22 = vmul.f32 %v7361_v18, %v7361_v18 }
 0x31f   :  { %v5502_v55 = vadd.f32 %v5501_v46, %v5439_v54  ;;  %v6116_v1 = vpack.c.bf16 %v7362_v45, %v7360_v28  ;;  %v5370_v5 = vadd.f32 %v7362_v45, %v5369_v11  ;;  %v5440_v2 = vmul.f32 %v7362_v45, %v7362_v45  ;;  %v2834_v21 = vpop.f32.mrb[53].mxu1 }
 0x320   :  { %6208 = vst [vmem:[%s9395_s4 + $0xc8] sm:$0xff] %v6121_v52   ;;  %v6966_v26 = vpop.f32.mrb[54].mxu1 }
 0x321   :  { %6207 = vst [vmem:[%s9395_s4 + $0xc0] sm:$0xff] %v6116_v1   ;;  %v5371_v16 = vadd.f32 %v7359_v49, %v5370_v5  ;;  %v5503_v38 = vadd.f32 %v5502_v55, %v5440_v2  ;;  %v7285_v29 = vpop.f32.mrb[52].mxu0  ;;  %v2837_v13 = vpop.f32.mrb[55].mxu1 }
 0x322   :  { %v7363_v30 = vadd.f32 %v7285_v29, %v6965_v44  ;;  %v4891_v7 = vpop.f32.mrb[53].mxu0 }
 0x323   :  { %v5504_v24 = vadd.f32 %v5503_v38, %v5441_v62  ;;  %v7364_v0 = vadd.f32 %v4891_v7, %v2834_v21  ;;  %v5372_v51 = vadd.f32 %v7361_v18, %v5371_v16  ;;  %v7286_v20 = vpop.f32.mrb[54].mxu0 }
 0x324   :  { %v7365_v10 = vadd.f32 %v7286_v20, %v6966_v26  ;;  %v4894_v8 = vpop.f32.mrb[55].mxu0  ;;  %v5445_v17 = vmul.f32 %v7363_v30, %v7363_v30 }
 0x325   :  { %v5373_v57 = vadd.f32 %v7364_v0, %v5372_v51  ;;  %v5443_v25 = vmul.f32 %v7364_v0, %v7364_v0  ;;  %v5505_v36 = vadd.f32 %v5504_v24, %v5442_v22  ;;  %v7366_v40 = vadd.f32 %v4894_v8, %v2837_v13 }
 0x326   :  { %v6131_v61 = vpack.c.bf16 %v7365_v10, %v7363_v30  ;;  %v6969_v6 = vpop.f32.mrb[56].mxu1  ;;  %v5446_v9 = vmul.f32 %v7365_v10, %v7365_v10 }
 0x327   :  { %v5506_v41 = vadd.f32 %v5505_v36, %v5443_v25  ;;  %v6126_v37 = vpack.c.bf16 %v7366_v40, %v7364_v0  ;;  %v5374_v12 = vadd.f32 %v7366_v40, %v5373_v57  ;;  %v5444_v19 = vmul.f32 %v7366_v40, %v7366_v40  ;;  %v2850_v63 = vpop.f32.mrb[57].mxu1 }
 0x328   :  { %6210 = vst [vmem:[%s9395_s4 + $0xd8] sm:$0xff] %v6131_v61   ;;  %v6970_v35 = vpop.f32.mrb[58].mxu1 }
 0x329   :  { %6209 = vst [vmem:[%s9395_s4 + $0xd0] sm:$0xff] %v6126_v37   ;;  %v5375_v60 = vadd.f32 %v7363_v30, %v5374_v12  ;;  %v5507_v48 = vadd.f32 %v5506_v41, %v5444_v19  ;;  %v7289_v59 = vpop.f32.mrb[56].mxu0  ;;  %v2853_v33 = vpop.f32.mrb[59].mxu1 }
 0x32a   :  { %v7367_v47 = vadd.f32 %v7289_v59, %v6969_v6  ;;  %v4907_v34 = vpop.f32.mrb[57].mxu0 }
 0x32b   :  { %v5508_v50 = vadd.f32 %v5507_v48, %v5445_v17  ;;  %v7368_v31 = vadd.f32 %v4907_v34, %v2850_v63  ;;  %v5376_v15 = vadd.f32 %v7365_v10, %v5375_v60  ;;  %v7290_v39 = vpop.f32.mrb[58].mxu0 }
 0x32c   :  { %v7369_v32 = vadd.f32 %v7290_v39, %v6970_v35  ;;  %v4910_v23 = vpop.f32.mrb[59].mxu0  ;;  %v5449_v18 = vmul.f32 %v7367_v47, %v7367_v47 }
 0x32d   :  { %v5377_v53 = vadd.f32 %v7368_v31, %v5376_v15  ;;  %v5447_v49 = vmul.f32 %v7368_v31, %v7368_v31  ;;  %v5509_v58 = vadd.f32 %v5508_v50, %v5446_v9  ;;  %v7370_v56 = vadd.f32 %v4910_v23, %v2853_v33 }
 0x32e   :  { %v6141_v27 = vpack.c.bf16 %v7369_v32, %v7367_v47  ;;  %v6973_v3 = vpop.f32.mrb[60].mxu1  ;;  %v5450_v1 = vmul.f32 %v7369_v32, %v7369_v32 }
 0x32f   :  { %v5510_v42 = vadd.f32 %v5509_v58, %v5447_v49  ;;  %v6136_v28 = vpack.c.bf16 %v7370_v56, %v7368_v31  ;;  %v5378_v4 = vadd.f32 %v7370_v56, %v5377_v53  ;;  %v5448_v14 = vmul.f32 %v7370_v56, %v7370_v56  ;;  %v2866_v46 = vpop.f32.mrb[61].mxu1 }
 0x330   :  { %6212 = vst [vmem:[%s9395_s4 + $0xe8] sm:$0xff] %v6141_v27   ;;  %v6974_v55 = vpop.f32.mrb[62].mxu1 }
 0x331   :  { %6211 = vst [vmem:[%s9395_s4 + $0xe0] sm:$0xff] %v6136_v28   ;;  %v5379_v43 = vadd.f32 %v7367_v47, %v5378_v4  ;;  %v5511_v11 = vadd.f32 %v5510_v42, %v5448_v14  ;;  %v7293_v54 = vpop.f32.mrb[60].mxu0  ;;  %v2869_v16 = vpop.f32.mrb[63].mxu1 }
 0x332   :  { %v7371_v45 = vadd.f32 %v7293_v54, %v6973_v3  ;;  %v4923_v52 = vpop.f32.mrb[61].mxu0 }
 0x333   :  { %v5512_v5 = vadd.f32 %v5511_v11, %v5449_v18  ;;  %v7372_v2 = vadd.f32 %v4923_v52, %v2866_v46  ;;  %v5380_v44 = vadd.f32 %v7369_v32, %v5379_v43  ;;  %v7294_v62 = vpop.f32.mrb[62].mxu0 }
 0x334   :  { %v7373_v38 = vadd.f32 %v7294_v62, %v6974_v55  ;;  %v4926_v29 = vpop.f32.mrb[63].mxu0  ;;  %v5453_v13 = vmul.f32 %v7371_v45, %v7371_v45 }
 0x335   :  { %v5381_v21 = vadd.f32 %v7372_v2, %v5380_v44  ;;  %v5451_v30 = vmul.f32 %v7372_v2, %v7372_v2  ;;  %v5513_v7 = vadd.f32 %v5512_v5, %v5450_v1  ;;  %v7374_v26 = vadd.f32 %v4926_v29, %v2869_v16 }
 0x336   :  { %v6151_v22 = vpack.c.bf16 %v7373_v38, %v7371_v45  ;;  %v5454_v57 = vmul.f32 %v7373_v38, %v7373_v38 }
 0x337   :  { %v5514_v24 = vadd.f32 %v5513_v7, %v5451_v30  ;;  %v6146_v0 = vpack.c.bf16 %v7374_v26, %v7372_v2  ;;  %v5382_v51 = vadd.f32 %v7374_v26, %v5381_v21  ;;  %v5452_v20 = vmul.f32 %v7374_v26, %v7374_v26 }
 0x338   :  { %6214 = vst [vmem:[%s9395_s4 + $0xf8] sm:$0xff] %v6151_v22  }
 0x339   :  { %6213 = vst [vmem:[%s9395_s4 + $0xf0] sm:$0xff] %v6146_v0   ;;  %v5383_v10 = vadd.f32 %v7371_v45, %v5382_v51  ;;  %v5515_v8 = vadd.f32 %v5514_v24, %v5452_v20 }
 0x33b   :  { %v5384_v25 = vadd.f32 %v7373_v38, %v5383_v10  ;;  %v5516_v36 = vadd.f32 %v5515_v8, %v5453_v13 }
 0x33d   :  { %v5385_v40 = vrot.slane %v5384_v25, 4  ;;  %v5517_v61 = vadd.f32 %v5516_v36, %v5454_v57 }
 0x33f   :  { %v5386_v41 = vadd.f32 %v5385_v40, %v5384_v25  ;;  %v5518_v37 = vrot.slane %v5517_v61, 4 }
 0x341   :  { %v5387_v12 = vrot.slane %v5386_v41, 2  ;;  %v5519_v19 = vadd.f32 %v5518_v37, %v5517_v61 }
 0x343   :  { %v5388_v6 = vadd.f32 %v5387_v12, %v5386_v41  ;;  %v5520_v17 = vrot.slane %v5519_v19, 2 }
 0x345   :  { %v5389_v60 = vrot.slane %v5388_v6, 1  ;;  %v5521_v48 = vadd.f32 %v5520_v17, %v5519_v19 }
 0x347   :  { %v5522_v59 = vrot.slane %v5521_v48, 1  ;;  %v5390_v63 = vadd.f32 %v5389_v60, %v5388_v6 }
 0x349   :  { %v5523_v47 = vadd.f32 %v5522_v59, %v5521_v48 }
 0x34b   :  { %v5525_v34 = vsel %vm5524_vm0, %v5390_v63, %v5523_v47 }
 0x34c   :  { %5526 = vst [vmem:[%s9396_s5] sm:$0x3] %v5525_v34 }

// kernel: basic_block_forward.3
= control target key start
LH: loop header
LB: loop body
LE: loop exit
PB: predicated region body
PF: predicated region fallthrough
CT: control target
= control target key end

     0   :  { %v7468_v1 = vmov 0.0   ;;  %vm5248_vm0 = vcmask 1040384   ;;  %s8761_s1 = inlined_call_operand.vmem [shape: bf16[9,128,128], index: 1, kind: input, shape index: {}]   ;;  %s8762_s0 = inlined_call_operand.vmem [shape: f32[2,16,16,128], index: 0, kind: input, shape index: {}]   ;;  %s8763_s2 = inlined_call_operand.vmem [shape: bf16[2,16,16,128], index: 2, kind: output, shape index: {0}]   ;;  %s8764_s3 = inlined_call_operand.vmem [shape: f32[1,2,128], index: 3, kind: output, shape index: {1}]  }
   0x1   :  { %v7492_v0 = vld [vmem:[%s8761_s1 + $0x40] sm:$0xff]   ;;  %14 = vst [vmem:[#allocation2] sm:$0xff] %v7468_v1  ;;  %15 = vst [vmem:[#allocation2 + $0x8] sm:$0xff] %v7468_v1  ;;  %v7389_v3 = vld [vmem:[%s8761_s1 + $0x48] sm:$0xff]  }
   0x2   :  { %16 = vst [vmem:[#allocation2 + $0x10] sm:$0x3] %v7468_v1  ;;  %17 = vst [vmem:[#allocation2 + $0x1b0] sm:$0xff] %v7468_v1  ;;  %v7388_v2 = vld [vmem:[%s8761_s1 + $0x100] sm:$0xff]   ;;  %6138 = vmatprep.subr.bf16.mxu1 %v7492_v0  ;;  %v7390_v4 = vld [vmem:[%s8761_s1 + $0x108] sm:$0xff]  }
   0x3   :  { %18 = vst [vmem:[#allocation2 + $0x1b8] sm:$0xff] %v7468_v1  ;;  %19 = vst [vmem:[#allocation2 + $0x1c0] sm:$0x3] %v7468_v1  ;;  %6458 = vmatprep.subr.bf16.mxu0 %v7388_v2  ;;  %6139 = vmatpush3.bf16.msra.mxu1 %v7492_v0  ;;  %v7391_v5 = vld [vmem:[%s8761_s1 + $0x50] sm:$0xff]   ;;  %v7393_v7 = vld [vmem:[%s8761_s1 + $0x58] sm:$0xff]  }
   0x4   :  { %21 = vst [vmem:[#allocation2 + $0x198] sm:$0xff] %v7468_v1  ;;  %22 = vst [vmem:[#allocation2 + $0x1a0] sm:$0xff] %v7468_v1  ;;  %6459 = vmatpush3.bf16.msra.mxu0 %v7388_v2  ;;  %6140 = vmatprep.subr.bf16.mxu1 %v7389_v3  ;;  %v7392_v6 = vld [vmem:[%s8761_s1 + $0x110] sm:$0xff]   ;;  %v7394_v8 = vld [vmem:[%s8761_s1 + $0x118] sm:$0xff]  }
   0x5   :  { %23 = vst [vmem:[#allocation2 + $0x1a8] sm:$0x3] %v7468_v1  ;;  %24 = vst [vmem:[#allocation2 + $0x348] sm:$0xff] %v7468_v1  ;;  %6460 = vmatprep.subr.bf16.mxu0 %v7390_v4  ;;  %v7395_v9 = vld [vmem:[%s8761_s1 + $0x60] sm:$0xff]   ;;  %v7397_v11 = vld [vmem:[%s8761_s1 + $0x68] sm:$0xff]  }
   0x6   :  { %25 = vst [vmem:[#allocation2 + $0x350] sm:$0xff] %v7468_v1  ;;  %26 = vst [vmem:[#allocation2 + $0x358] sm:$0x3] %v7468_v1  ;;  %v7396_v10 = vld [vmem:[%s8761_s1 + $0x120] sm:$0xff]   ;;  %v7398_v12 = vld [vmem:[%s8761_s1 + $0x128] sm:$0xff]  }
   0x7   :  { %28 = vst [vmem:[#allocation2 + $0x18] sm:$0x1] %v7468_v1  ;;  %29 = vst [vmem:[#allocation2 + $0x30] sm:$0x1] %v7468_v1  ;;  %6141 = vmatpush3.bf16.msra.mxu1 %v7389_v3  ;;  %v99_v15 = vld [vmem:[%s8762_s0] sm:$0xff]  ;;  %v100_v17 = vld [vmem:[%s8762_s0 + $0x8] sm:$0xff] }
   0x8   :  { %30 = vst [vmem:[#allocation2 + $0x48] sm:$0x1] %v7468_v1  ;;  %31 = vst [vmem:[#allocation2 + $0x60] sm:$0x1] %v7468_v1  ;;  %6461 = vmatpush3.bf16.msra.mxu0 %v7390_v4  ;;  %6142 = vmatprep.subr.bf16.mxu1 %v7391_v5  ;;  %v340_v13 = vld [vmem:[#allocation2 + $0x1] sm:$0xff]  ;;  %v7399_v18 = vld [vmem:[%s8761_s1 + $0x70] sm:$0xff]   ;;  %v7622_v19 = vpack.c.bf16 %v100_v17, %v99_v15 }
   0x9   :  { %32 = vst [vmem:[#allocation2 + $0x78] sm:$0x1] %v7468_v1  ;;  %33 = vst [vmem:[#allocation2 + $0x90] sm:$0x1] %v7468_v1  ;;  %6462 = vmatprep.subr.bf16.mxu0 %v7392_v6  ;;  %v341_v14 = vld [vmem:[#allocation2 + $0x9] sm:$0xff]  ;;  %v102_v21 = vld [vmem:[%s8762_s0 + $0x18] sm:$0xff] }
   0xa   :  { %34 = vst [vmem:[#allocation2 + $0xa8] sm:$0x1] %v7468_v1  ;;  %35 = vst [vmem:[#allocation2 + $0xc0] sm:$0x1] %v7468_v1  ;;  %v404_v16 = vpack.c.bf16 %v341_v14, %v340_v13  ;;  %v101_v20 = vld [vmem:[%s8762_s0 + $0x10] sm:$0xff]  ;;  %v103_v23 = vld [vmem:[%s8762_s0 + $0x20] sm:$0xff]  ;;  %6474 = vmatprep.mubr.bf16.mxu0 %v7622_v19 }
   0xb   :  { %36 = vst [vmem:[#allocation2 + $0xd8] sm:$0x1] %v7468_v1  ;;  %37 = vst [vmem:[#allocation2 + $0xf0] sm:$0x1] %v7468_v1  ;;  %6143 = vmatpush3.bf16.msra.mxu1 %v7391_v5  ;;  %v7400_v22 = vld [vmem:[%s8761_s1 + $0x130] sm:$0xff]   ;;  %v104_v24 = vld [vmem:[%s8762_s0 + $0x28] sm:$0xff]  ;;  %v2220_v43 = vpack.c.bf16 %v102_v21, %v101_v20 }
   0xc   :  { %38 = vst [vmem:[#allocation2 + $0x108] sm:$0x1] %v7468_v1  ;;  %39 = vst [vmem:[#allocation2 + $0x120] sm:$0x1] %v7468_v1  ;;  %6463 = vmatpush3.bf16.msra.mxu0 %v7392_v6  ;;  %6144 = vmatprep.subr.bf16.mxu1 %v7393_v7  ;;  %v7642_v25 = vld [vmem:[%s8762_s0 + $0x30] sm:$0xff]  ;;  %v7648_v26 = vld [vmem:[%s8762_s0 + $0x38] sm:$0xff]  ;;  %v2221_v49 = vpack.c.bf16 %v104_v24, %v103_v23 }
   0xd   :  { %40 = vst [vmem:[#allocation2 + $0x138] sm:$0x1] %v7468_v1  ;;  %41 = vst [vmem:[#allocation2 + $0x150] sm:$0x1] %v7468_v1  ;;  %6464 = vmatprep.subr.bf16.mxu0 %v7394_v8  ;;  %6154 = vmatprep.mubr.bf16.mxu1 %v404_v16  ;;  %v7655_v27 = vld [vmem:[%s8762_s0 + $0x40] sm:$0xff]  ;;  %v7660_v28 = vld [vmem:[%s8762_s0 + $0x48] sm:$0xff]  ;;  %v2222_v61 = vpack.c.bf16 %v7648_v26, %v7642_v25 }
   0xe   :  { %42 = vst [vmem:[#allocation2 + $0x168] sm:$0x1] %v7468_v1  ;;  %43 = vst [vmem:[#allocation2 + $0x180] sm:$0x1] %v7468_v1  ;;  %v7401_v29 = vld [vmem:[%s8761_s1 + $0x78] sm:$0xff]   ;;  %v7670_v30 = vld [vmem:[%s8762_s0 + $0x50] sm:$0xff]  ;;  %v2223_v62 = vpack.c.bf16 %v7660_v28, %v7655_v27 }
   0xf   :  { %46 = vst [vmem:[#allocation2 + $0x1c8] sm:$0x1] %v7468_v1  ;;  %47 = vst [vmem:[#allocation2 + $0x1e0] sm:$0x1] %v7468_v1  ;;  %6145 = vmatpush3.bf16.msra.mxu1 %v7393_v7  ;;  %v7675_v31 = vld [vmem:[%s8762_s0 + $0x58] sm:$0xff]  ;;  %v7685_v33 = vld [vmem:[%s8762_s0 + $0x60] sm:$0xff] }
  0x10   :  { %48 = vst [vmem:[#allocation2 + $0x1f8] sm:$0x1] %v7468_v1  ;;  %49 = vst [vmem:[#allocation2 + $0x210] sm:$0x1] %v7468_v1  ;;  %6465 = vmatpush3.bf16.msra.mxu0 %v7394_v8  ;;  %6146 = vmatprep.subr.bf16.mxu1 %v7395_v9  ;;  %v7402_v32 = vld [vmem:[%s8761_s1 + $0x138] sm:$0xff]   ;;  %v7690_v34 = vld [vmem:[%s8762_s0 + $0x68] sm:$0xff] }
  0x11   :  { %50 = vst [vmem:[#allocation2 + $0x228] sm:$0x1] %v7468_v1  ;;  %51 = vst [vmem:[#allocation2 + $0x240] sm:$0x1] %v7468_v1  ;;  %6466 = vmatprep.subr.bf16.mxu0 %v7396_v10  ;;  %v7696_v35 = vld [vmem:[%s8762_s0 + $0x70] sm:$0xff]  ;;  %v7701_v36 = vld [vmem:[%s8762_s0 + $0x78] sm:$0xff] }
  0x12   :  { %52 = vst [vmem:[#allocation2 + $0x258] sm:$0x1] %v7468_v1  ;;  %53 = vst [vmem:[#allocation2 + $0x270] sm:$0x1] %v7468_v1  ;;  %v7403_v37 = vld [vmem:[%s8761_s1] sm:$0xff]   ;;  %v7717_v39 = vld [vmem:[%s8762_s0 + $0x88] sm:$0xff] }
  0x13   :  { %54 = vst [vmem:[#allocation2 + $0x288] sm:$0x1] %v7468_v1  ;;  %55 = vst [vmem:[#allocation2 + $0x2a0] sm:$0x1] %v7468_v1  ;;  %6147 = vmatpush3.bf16.msra.mxu1 %v7395_v9  ;;  %v7712_v38 = vld [vmem:[%s8762_s0 + $0x80] sm:$0xff]  ;;  %v7727_v41 = vld [vmem:[%s8762_s0 + $0x90] sm:$0xff] }
  0x14   :  { %56 = vst [vmem:[#allocation2 + $0x2b8] sm:$0x1] %v7468_v1  ;;  %57 = vst [vmem:[#allocation2 + $0x2d0] sm:$0x1] %v7468_v1  ;;  %6467 = vmatpush3.bf16.msra.mxu0 %v7396_v10  ;;  %6148 = vmatprep.subr.bf16.mxu1 %v7397_v11  ;;  %v7404_v40 = vld [vmem:[%s8761_s1 + $0x140] sm:$0xff]   ;;  %v7732_v42 = vld [vmem:[%s8762_s0 + $0x98] sm:$0xff]  ;;  %v2224_v10 = vpack.c.bf16 %v7675_v31, %v7670_v30 }
  0x15   :  { %58 = vst [vmem:[#allocation2 + $0x2e8] sm:$0x1] %v7468_v1  ;;  %59 = vst [vmem:[#allocation2 + $0x300] sm:$0x1] %v7468_v1  ;;  %6468 = vmatprep.subr.bf16.mxu0 %v7398_v12  ;;  %v7405_v44 = vld [vmem:[%s8761_s1 + $0x148] sm:$0xff]   ;;  %v7742_v45 = vld [vmem:[%s8762_s0 + $0xa0] sm:$0xff] }
  0x16   :  { %60 = vst [vmem:[#allocation2 + $0x318] sm:$0x1] %v7468_v1  ;;  %61 = vst [vmem:[#allocation2 + $0x330] sm:$0x1] %v7468_v1  ;;  %v7747_v46 = vld [vmem:[%s8762_s0 + $0xa8] sm:$0xff]  ;;  %v7754_v47 = vld [vmem:[%s8762_s0 + $0xb0] sm:$0xff] }
  0x17   :  { %64 = vst [vmem:[#allocation2 + $0x29] sm:$0x1] %v7468_v1  ;;  %65 = vst [vmem:[#allocation2 + $0x41] sm:$0x1] %v7468_v1  ;;  %6149 = vmatpush3.bf16.msra.mxu1 %v7397_v11  ;;  %v7759_v48 = vld [vmem:[%s8762_s0 + $0xb8] sm:$0xff]  ;;  %v7406_v50 = vld [vmem:[%s8761_s1 + $0x8] sm:$0xff]  }
  0x18   :  { %66 = vst [vmem:[#allocation2 + $0x59] sm:$0x1] %v7468_v1  ;;  %67 = vst [vmem:[#allocation2 + $0x71] sm:$0x1] %v7468_v1  ;;  %6469 = vmatpush3.bf16.msra.mxu0 %v7398_v12  ;;  %6150 = vmatprep.subr.bf16.mxu1 %v7399_v18  ;;  %v7769_v51 = vld [vmem:[%s8762_s0 + $0xc0] sm:$0xff]  ;;  %v7775_v52 = vld [vmem:[%s8762_s0 + $0xc8] sm:$0xff]  ;;  %v2225_v12 = vpack.c.bf16 %v7690_v34, %v7685_v33 }
  0x19   :  { %68 = vst [vmem:[#allocation2 + $0x89] sm:$0x1] %v7468_v1  ;;  %69 = vst [vmem:[#allocation2 + $0xa1] sm:$0x1] %v7468_v1  ;;  %6470 = vmatprep.subr.bf16.mxu0 %v7400_v22  ;;  %v7407_v53 = vld [vmem:[%s8761_s1 + $0x150] sm:$0xff]   ;;  %v7790_v55 = vld [vmem:[%s8762_s0 + $0xd8] sm:$0xff] }
  0x1a   :  { %70 = vst [vmem:[#allocation2 + $0xb9] sm:$0x1] %v7468_v1  ;;  %71 = vst [vmem:[#allocation2 + $0xd1] sm:$0x1] %v7468_v1  ;;  %v7785_v54 = vld [vmem:[%s8762_s0 + $0xd0] sm:$0xff]  ;;  %v7800_v57 = vld [vmem:[%s8762_s0 + $0xe0] sm:$0xff] }
  0x1b   :  { %72 = vst [vmem:[#allocation2 + $0xe9] sm:$0x1] %v7468_v1  ;;  %73 = vst [vmem:[#allocation2 + $0x101] sm:$0x1] %v7468_v1  ;;  %6151 = vmatpush3.bf16.msra.mxu1 %v7399_v18  ;;  %v7409_v56 = vld [vmem:[%s8761_s1 + $0x10] sm:$0xff]   ;;  %v7805_v58 = vld [vmem:[%s8762_s0 + $0xe8] sm:$0xff] }
  0x1c   :  { %74 = vst [vmem:[#allocation2 + $0x119] sm:$0x1] %v7468_v1  ;;  %75 = vst [vmem:[#allocation2 + $0x131] sm:$0x1] %v7468_v1  ;;  %6471 = vmatpush3.bf16.msra.mxu0 %v7400_v22  ;;  %6152 = vmatprep.subr.bf16.mxu1 %v7401_v29  ;;  %v7810_v59 = vld [vmem:[%s8762_s0 + $0xf0] sm:$0xff]  ;;  %v7817_v60 = vld [vmem:[%s8762_s0 + $0xf8] sm:$0xff] }
  0x1d   :  { %76 = vst [vmem:[#allocation2 + $0x149] sm:$0x1] %v7468_v1  ;;  %77 = vst [vmem:[#allocation2 + $0x161] sm:$0x1] %v7468_v1  ;;  %6472 = vmatprep.subr.bf16.mxu0 %v7402_v32  ;;  %v7408_v63 = vld [vmem:[%s8761_s1 + $0x158] sm:$0xff]   ;;  %v7831_v0 = vld [vmem:[%s8762_s0 + $0x100] sm:$0xff] }
  0x1e   :  { %78 = vst [vmem:[#allocation2 + $0x179] sm:$0x1] %v7468_v1  ;;  %79 = vst [vmem:[#allocation2 + $0x191] sm:$0x1] %v7468_v1  ;;  %v7412_v2 = vld [vmem:[%s8761_s1 + $0x18] sm:$0xff]   ;;  %v7846_v3 = vld [vmem:[%s8762_s0 + $0x110] sm:$0xff] }
  0x1f   :  { %82 = vst [vmem:[#allocation2 + $0x1d9] sm:$0x1] %v7468_v1  ;;  %83 = vst [vmem:[#allocation2 + $0x1f1] sm:$0x1] %v7468_v1  ;;  %6153 = vmatpush3.bf16.msra.mxu1 %v7401_v29  ;;  %v7851_v4 = vld [vmem:[%s8762_s0 + $0x118] sm:$0xff]  ;;  %v7410_v5 = vld [vmem:[%s8761_s1 + $0x160] sm:$0xff]   ;;  %v2227_v29 = vpack.c.bf16 %v7717_v39, %v7712_v38 }
  0x20   :  { %84 = vst [vmem:[#allocation2 + $0x209] sm:$0x1] %v7468_v1  ;;  %85 = vst [vmem:[#allocation2 + $0x221] sm:$0x1] %v7468_v1  ;;  %6473 = vmatpush3.bf16.msra.mxu0 %v7402_v32  ;;  %6218 = vmatprep.subr.bf16.mxu1 %v7403_v37  ;;  %v7861_v6 = vld [vmem:[%s8762_s0 + $0x120] sm:$0xff]  ;;  %v7866_v7 = vld [vmem:[%s8762_s0 + $0x128] sm:$0xff] }
  0x21   :  { %86 = vst [vmem:[#allocation2 + $0x239] sm:$0x1] %v7468_v1  ;;  %87 = vst [vmem:[#allocation2 + $0x251] sm:$0x1] %v7468_v1  ;;  %6538 = vmatprep.subr.bf16.mxu0 %v7404_v40  ;;  %v7415_v8 = vld [vmem:[%s8761_s1 + $0x20] sm:$0xff]   ;;  %v7876_v9 = vld [vmem:[%s8762_s0 + $0x130] sm:$0xff] }
  0x22   :  { %88 = vst [vmem:[#allocation2 + $0x269] sm:$0x1] %v7468_v1  ;;  %89 = vst [vmem:[#allocation2 + $0x281] sm:$0x1] %v7468_v1  ;;  %6155 = vmatmul.mubr.bf16.vlgmr.msra.gmra.mrb[0].mxu1 %v7622_v19  ;;  %v7883_v11 = vld [vmem:[%s8762_s0 + $0x138] sm:$0xff]  ;;  %v7892_v13 = vld [vmem:[%s8762_s0 + $0x140] sm:$0xff] }
  0x23   :  { %90 = vst [vmem:[#allocation2 + $0x299] sm:$0x1] %v7468_v1  ;;  %91 = vst [vmem:[#allocation2 + $0x2b1] sm:$0x1] %v7468_v1  ;;  %6475 = vmatmul.mubr.bf16.vlgmr.msra.gmra.mrb[0].mxu0 %v2220_v43  ;;  %6219 = vmatpush3.bf16.msra.mxu1 %v7403_v37  ;;  %v7897_v14 = vld [vmem:[%s8762_s0 + $0x148] sm:$0xff]  ;;  %v7915_v18 = vld [vmem:[%s8762_s0 + $0x158] sm:$0xff] }
  0x24   :  { %92 = vst [vmem:[#allocation2 + $0x2c9] sm:$0x1] %v7468_v1  ;;  %93 = vst [vmem:[#allocation2 + $0x2e1] sm:$0x1] %v7468_v1  ;;  %6539 = vmatpush3.bf16.msra.mxu0 %v7404_v40  ;;  %6158 = vmatprep.mubr.bf16.mxu1 %v2220_v43  ;;  %v7417_v16 = vld [vmem:[%s8761_s1 + $0x28] sm:$0xff]   ;;  %v7922_v19 = vld [vmem:[%s8762_s0 + $0x160] sm:$0xff] }
  0x25   :  { %94 = vst [vmem:[#allocation2 + $0x2f9] sm:$0x1] %v7468_v1  ;;  %95 = vst [vmem:[#allocation2 + $0x311] sm:$0x1] %v7468_v1  ;;  %6478 = vmatprep.mubr.bf16.mxu0 %v2221_v49  ;;  %6540 = vmatprep.subr.bf16.mxu0 %v7405_v44  ;;  %v7414_v32 = vld [vmem:[%s8761_s1 + $0x178] sm:$0xff]   ;;  %v7996_v37 = vld [vmem:[%s8762_s0 + $0x1a8] sm:$0xff] }
  0x26   :  { %96 = vst [vmem:[#allocation2 + $0x329] sm:$0x1] %v7468_v1  ;;  %97 = vst [vmem:[#allocation2 + $0x341] sm:$0x1] %v7468_v1  ;;  %6220 = vmatprep.subr.bf16.mxu1 %v7406_v50  ;;  %v8010_v40 = vld [vmem:[%s8762_s0 + $0x1b0] sm:$0xff]  ;;  %v8015_v43 = vld [vmem:[%s8762_s0 + $0x1b8] sm:$0xff] }
  0x27   :  { %63 = vst [vmem:[#allocation2 + $0x11] sm:$0x1] %v7468_v1  ;;  %27 = vst [vmem:[#allocation2] sm:$0x1] %v7468_v1  ;;  %6221 = vmatpush3.bf16.msra.mxu1 %v7406_v50  ;;  %v2228_v50 = vpack.c.bf16 %v7732_v42, %v7727_v41 }
  0x28   :  { %44 = vst [vmem:[#allocation2 + $0x198] sm:$0x1] %v7468_v1  ;;  %45 = vst [vmem:[#allocation2 + $0x1b0] sm:$0x1] %v7468_v1  ;;  %6541 = vmatpush3.bf16.msra.mxu0 %v7405_v44  ;;  %6222 = vmatprep.subr.bf16.mxu1 %v7409_v56  ;;  %v432_v44 = vpack.c.bf16 %v8015_v43, %v8010_v40 }
  0x29   :  { %62 = vst [vmem:[#allocation2 + $0x348] sm:$0x1] %v7468_v1  ;;  %80 = vst [vmem:[#allocation2 + $0x1a9] sm:$0x1] %v7468_v1  ;;  %6542 = vmatprep.subr.bf16.mxu0 %v7407_v53 }
  0x2a   :  { %81 = vst [vmem:[#allocation2 + $0x1c1] sm:$0x1] %v7468_v1  ;;  %98 = vst [vmem:[#allocation2 + $0x359] sm:$0x1] %v7468_v1  ;;  %v7836_v1 = vld [vmem:[%s8762_s0 + $0x108] sm:$0xff]  ;;  %6159 = vmatmul.mubr.bf16.gmra.mrb[4].mxu1 %v2221_v49  ;;  %v8024_v49 = vld [vmem:[%s8762_s0 + $0x1c0] sm:$0xff] }
  0x2b   :  { %164 = vst [vmem:[#allocation2 + $0x19] sm:$0xff] %v99_v15  ;;  %165 = vst [vmem:[#allocation2 + $0x21] sm:$0xff] %v100_v17  ;;  %6479 = vmatmul.mubr.bf16.gmra.mrb[4].mxu0 %v2222_v61  ;;  %6162 = vmatprep.mubr.bf16.mxu1 %v2222_v61  ;;  %v7411_v15 = vld [vmem:[%s8761_s1 + $0x168] sm:$0xff]   ;;  %v7910_v17 = vld [vmem:[%s8762_s0 + $0x150] sm:$0xff] }
  0x2c   :  { %166 = vst [vmem:[#allocation2 + $0x31] sm:$0xff] %v101_v20  ;;  %167 = vst [vmem:[#allocation2 + $0x39] sm:$0xff] %v102_v21  ;;  %6482 = vmatprep.mubr.bf16.mxu0 %v2223_v62  ;;  %6543 = vmatpush3.bf16.msra.mxu0 %v7407_v53  ;;  %v7413_v20 = vld [vmem:[%s8761_s1 + $0x170] sm:$0xff]   ;;  %v7930_v21 = vld [vmem:[%s8762_s0 + $0x168] sm:$0xff] }
  0x2d   :  { %168 = vst [vmem:[#allocation2 + $0x49] sm:$0xff] %v103_v23  ;;  %169 = vst [vmem:[#allocation2 + $0x51] sm:$0xff] %v104_v24  ;;  %6544 = vmatprep.subr.bf16.mxu0 %v7408_v63  ;;  %6223 = vmatpush3.bf16.msra.mxu1 %v7409_v56  ;;  %v427_v22 = vpack.c.bf16 %v7930_v21, %v7922_v19  ;;  %v7939_v23 = vld [vmem:[%s8762_s0 + $0x170] sm:$0xff]  ;;  %v7944_v24 = vld [vmem:[%s8762_s0 + $0x178] sm:$0xff]  ;;  %v2229_v56 = vpack.c.bf16 %v7747_v46, %v7742_v45 }
  0x2e   :  { %170 = vst [vmem:[#allocation2 + $0x61] sm:$0xff] %v7642_v25  ;;  %171 = vst [vmem:[#allocation2 + $0x69] sm:$0xff] %v7648_v26  ;;  %6224 = vmatprep.subr.bf16.mxu1 %v7412_v2  ;;  %v2226_v25 = vpack.c.bf16 %v7701_v36, %v7696_v35  ;;  %v428_v26 = vpack.c.bf16 %v7944_v24, %v7939_v23  ;;  %v8031_v53 = vld [vmem:[%s8762_s0 + $0x1c8] sm:$0xff] }
  0x2f   :  { %172 = vst [vmem:[#allocation2 + $0x79] sm:$0xff] %v7655_v27  ;;  %173 = vst [vmem:[#allocation2 + $0x81] sm:$0xff] %v7660_v28  ;;  %v7955_v27 = vld [vmem:[%s8762_s0 + $0x180] sm:$0xff]  ;;  %v7960_v28 = vld [vmem:[%s8762_s0 + $0x188] sm:$0xff]  ;;  %v433_v61 = vpack.c.bf16 %v8031_v53, %v8024_v49 }
  0x30   :  { %174 = vst [vmem:[#allocation2 + $0x91] sm:$0xff] %v7670_v30  ;;  %175 = vst [vmem:[#allocation2 + $0x99] sm:$0xff] %v7675_v31  ;;  %6545 = vmatpush3.bf16.msra.mxu0 %v7408_v63  ;;  %v429_v30 = vpack.c.bf16 %v7960_v28, %v7955_v27  ;;  %v7419_v31 = vld [vmem:[%s8761_s1 + $0x30] sm:$0xff]   ;;  %v8065_v63 = vld [vmem:[%s8762_s0 + $0x1e8] sm:$0xff] }
  0x31   :  { %176 = vst [vmem:[#allocation2 + $0xa9] sm:$0xff] %v7685_v33  ;;  %177 = vst [vmem:[#allocation2 + $0xb1] sm:$0xff] %v7690_v34  ;;  %6546 = vmatprep.subr.bf16.mxu0 %v7410_v5  ;;  %6225 = vmatpush3.bf16.msra.mxu1 %v7412_v2  ;;  %v7977_v33 = vld [vmem:[%s8762_s0 + $0x190] sm:$0xff]  ;;  %v7982_v34 = vld [vmem:[%s8762_s0 + $0x198] sm:$0xff] }
  0x32   :  { %178 = vst [vmem:[#allocation2 + $0xc1] sm:$0xff] %v7696_v35  ;;  %179 = vst [vmem:[#allocation2 + $0xc9] sm:$0xff] %v7701_v36  ;;  %6163 = vmatmul.mubr.bf16.gmra.mrb[8].mxu1 %v2223_v62  ;;  %6226 = vmatprep.subr.bf16.mxu1 %v7415_v8  ;;  %v430_v35 = vpack.c.bf16 %v7982_v34, %v7977_v33  ;;  %v7991_v36 = vld [vmem:[%s8762_s0 + $0x1a0] sm:$0xff] }
  0x33   :  { %180 = vst [vmem:[#allocation2 + $0xd9] sm:$0xff] %v7712_v38  ;;  %181 = vst [vmem:[#allocation2 + $0xe1] sm:$0xff] %v7717_v39  ;;  %6483 = vmatmul.mubr.bf16.gmra.mrb[8].mxu0 %v2224_v10  ;;  %6166 = vmatprep.mubr.bf16.mxu1 %v2224_v10  ;;  %v8001_v38 = vld [vmem:[%s8761_s1 + $0x180] sm:$0xff]   ;;  %v431_v39 = vpack.c.bf16 %v7996_v37, %v7991_v36  ;;  %v2231_v10 = vpack.c.bf16 %v7775_v52, %v7769_v51 }
  0x34   :  { %182 = vst [vmem:[#allocation2 + $0xf1] sm:$0xff] %v7727_v41  ;;  %183 = vst [vmem:[#allocation2 + $0xf9] sm:$0xff] %v7732_v42  ;;  %6486 = vmatprep.mubr.bf16.mxu0 %v2225_v12  ;;  %6547 = vmatpush3.bf16.msra.mxu0 %v7410_v5  ;;  %v7421_v41 = vld [vmem:[%s8761_s1 + $0x38] sm:$0xff]   ;;  %v8046_v42 = vld [vmem:[%s8762_s0 + $0x1d0] sm:$0xff]  ;;  %v2230_v5 = vpack.c.bf16 %v7759_v48, %v7754_v47 }
  0x35   :  { %184 = vst [vmem:[#allocation2 + $0x109] sm:$0xff] %v7742_v45  ;;  %185 = vst [vmem:[#allocation2 + $0x111] sm:$0xff] %v7747_v46  ;;  %6548 = vmatprep.subr.bf16.mxu0 %v7411_v15  ;;  %6227 = vmatpush3.bf16.msra.mxu1 %v7415_v8  ;;  %v8051_v45 = vld [vmem:[%s8762_s0 + $0x1d8] sm:$0xff]  ;;  %v8060_v62 = vld [vmem:[%s8762_s0 + $0x1e0] sm:$0xff] }
  0x36   :  { %186 = vst [vmem:[#allocation2 + $0x121] sm:$0xff] %v7754_v47  ;;  %187 = vst [vmem:[#allocation2 + $0x129] sm:$0xff] %v7759_v48  ;;  %6228 = vmatprep.subr.bf16.mxu1 %v7417_v16  ;;  %v434_v46 = vpack.c.bf16 %v8051_v45, %v8046_v42  ;;  %v435_v2 = vpack.c.bf16 %v8065_v63, %v8060_v62  ;;  %v8076_v8 = vld [vmem:[%s8761_s1 + $0x80] sm:$0xff]   ;;  %v2233_v47 = vpack.c.bf16 %v7805_v58, %v7800_v57  ;;  %v372_v48 = vld [vmem:[#allocation2 + $0x1b1] sm:$0xff] }
  0x37   :  { %188 = vst [vmem:[#allocation2 + $0x139] sm:$0xff] %v7769_v51  ;;  %189 = vst [vmem:[#allocation2 + $0x141] sm:$0xff] %v7775_v52  ;;  %v2670_v51 = vld [vmem:[#allocation2 + $0x22] sm:$0xff]  ;;  %v2234_v52 = vpack.c.bf16 %v7817_v60, %v7810_v59 }
  0x38   :  { %190 = vst [vmem:[#allocation2 + $0x151] sm:$0xff] %v7785_v54  ;;  %191 = vst [vmem:[#allocation2 + $0x159] sm:$0xff] %v7790_v55  ;;  %6549 = vmatpush3.bf16.msra.mxu0 %v7411_v15  ;;  %v373_v15 = vld [vmem:[#allocation2 + $0x1b9] sm:$0xff] }
  0x39   :  { %192 = vst [vmem:[#allocation2 + $0x169] sm:$0xff] %v7800_v57  ;;  %193 = vst [vmem:[#allocation2 + $0x171] sm:$0xff] %v7805_v58  ;;  %6550 = vmatprep.subr.bf16.mxu0 %v7413_v20  ;;  %6229 = vmatpush3.bf16.msra.mxu1 %v7417_v16  ;;  %v2669_v16 = vld [vmem:[#allocation2 + $0x1a] sm:$0xff]  ;;  %v2673_v57 = vld [vmem:[#allocation2 + $0x4a] sm:$0xff] }
  0x3a   :  { %194 = vst [vmem:[#allocation2 + $0x181] sm:$0xff] %v7810_v59  ;;  %195 = vst [vmem:[#allocation2 + $0x189] sm:$0xff] %v7817_v60  ;;  %6167 = vmatmul.mubr.bf16.gmra.mrb[12].mxu1 %v2225_v12  ;;  %6230 = vmatprep.subr.bf16.mxu1 %v7419_v31  ;;  %v2232_v12 = vpack.c.bf16 %v7790_v55, %v7785_v54  ;;  %v2671_v54 = vld [vmem:[#allocation2 + $0x32] sm:$0xff]  ;;  %v2672_v55 = vld [vmem:[#allocation2 + $0x3a] sm:$0xff] }
  0x3b   :  { %196 = vst [vmem:[#allocation2 + $0x1c9] sm:$0xff] %v7831_v0  ;;  %197 = vst [vmem:[#allocation2 + $0x1d1] sm:$0xff] %v7836_v1  ;;  %6487 = vmatmul.mubr.bf16.gmra.mrb[12].mxu0 %v2226_v25  ;;  %6170 = vmatprep.mubr.bf16.mxu1 %v2226_v25  ;;  %v2733_v25 = vpack.c.bf16 %v2670_v51, %v2669_v16  ;;  %v2674_v58 = vld [vmem:[#allocation2 + $0x52] sm:$0xff]  ;;  %v7418_v59 = vld [vmem:[%s8761_s1 + $0x188] sm:$0xff]  }
  0x3c   :  { %198 = vst [vmem:[#allocation2 + $0x1e1] sm:$0xff] %v7846_v3  ;;  %199 = vst [vmem:[#allocation2 + $0x1e9] sm:$0xff] %v7851_v4  ;;  %6490 = vmatprep.mubr.bf16.mxu0 %v2227_v29  ;;  %6551 = vmatpush3.bf16.msra.mxu0 %v7413_v20  ;;  %v420_v20 = vpack.c.bf16 %v373_v15, %v372_v48  ;;  %v161_v60 = vld [vmem:[%s8762_s0 + $0x1f0] sm:$0xff]  ;;  %v2680_v15 = vld [vmem:[#allocation2 + $0x9a] sm:$0xff] }
  0x3d   :  { %200 = vst [vmem:[#allocation2 + $0x1f9] sm:$0xff] %v7861_v6  ;;  %201 = vst [vmem:[#allocation2 + $0x201] sm:$0xff] %v7866_v7  ;;  %6552 = vmatprep.subr.bf16.mxu0 %v7414_v32  ;;  %6231 = vmatpush3.bf16.msra.mxu1 %v7419_v31  ;;  %v2734_v31 = vpack.c.bf16 %v2672_v55, %v2671_v54  ;;  %v2679_v48 = vld [vmem:[#allocation2 + $0x92] sm:$0xff]  ;;  %v2681_v16 = vld [vmem:[#allocation2 + $0xaa] sm:$0xff] }
  0x3e   :  { %202 = vst [vmem:[#allocation2 + $0x211] sm:$0xff] %v7876_v9  ;;  %203 = vst [vmem:[#allocation2 + $0x219] sm:$0xff] %v7883_v11  ;;  %6232 = vmatprep.subr.bf16.mxu1 %v7421_v41  ;;  %v2682_v51 = vld [vmem:[#allocation2 + $0xb2] sm:$0xff]  ;;  %v2684_v54 = vld [vmem:[#allocation2 + $0xca] sm:$0xff] }
  0x3f   :  { %204 = vst [vmem:[#allocation2 + $0x229] sm:$0xff] %v7892_v13  ;;  %205 = vst [vmem:[#allocation2 + $0x231] sm:$0xff] %v7897_v14  ;;  %v2685_v55 = vld [vmem:[#allocation2 + $0xda] sm:$0xff] }
  0x40   :  { %206 = vst [vmem:[#allocation2 + $0x241] sm:$0xff] %v7910_v17  ;;  %207 = vst [vmem:[#allocation2 + $0x249] sm:$0xff] %v7915_v18  ;;  %6553 = vmatpush3.bf16.msra.mxu0 %v7414_v32  ;;  %v422_v32 = vpack.c.bf16 %v7851_v4, %v7846_v3  ;;  %v2677_v3 = vld [vmem:[#allocation2 + $0x7a] sm:$0xff]  ;;  %v2678_v4 = vld [vmem:[#allocation2 + $0x82] sm:$0xff] }
  0x41   :  { %208 = vst [vmem:[#allocation2 + $0x259] sm:$0xff] %v7922_v19  ;;  %209 = vst [vmem:[#allocation2 + $0x261] sm:$0xff] %v7930_v21  ;;  %6618 = vmatprep.subr.bf16.mxu0 %v8001_v38  ;;  %6233 = vmatpush3.bf16.msra.mxu1 %v7421_v41  ;;  %v7420_v41 = vld [vmem:[%s8761_s1 + $0x190] sm:$0xff]   ;;  %v2691_v21 = vld [vmem:[#allocation2 + $0x122] sm:$0xff] }
  0x42   :  { %210 = vst [vmem:[#allocation2 + $0x271] sm:$0xff] %v7939_v23  ;;  %211 = vst [vmem:[#allocation2 + $0x279] sm:$0xff] %v7944_v24  ;;  %6171 = vmatmul.mubr.bf16.gmra.mrb[16].mxu1 %v2227_v29  ;;  %6298 = vmatprep.subr.bf16.mxu1 %v8076_v8  ;;  %v421_v29 = vpack.c.bf16 %v7836_v1, %v7831_v0  ;;  %v2675_v0 = vld [vmem:[#allocation2 + $0x62] sm:$0xff]  ;;  %v2676_v1 = vld [vmem:[#allocation2 + $0x6a] sm:$0xff] }
  0x43   :  { %212 = vst [vmem:[#allocation2 + $0x289] sm:$0xff] %v7955_v27  ;;  %213 = vst [vmem:[#allocation2 + $0x291] sm:$0xff] %v7960_v28  ;;  %6491 = vmatmul.mubr.bf16.gmra.mrb[16].mxu0 %v2228_v50  ;;  %6174 = vmatprep.mubr.bf16.mxu1 %v2228_v50  ;;  %v2735_v50 = vpack.c.bf16 %v2674_v58, %v2673_v57  ;;  %v2686_v57 = vld [vmem:[#allocation2 + $0xe2] sm:$0xff]  ;;  %v2687_v58 = vld [vmem:[#allocation2 + $0xf2] sm:$0xff] }
  0x44   :  { %214 = vst [vmem:[#allocation2 + $0x2a1] sm:$0xff] %v7977_v33  ;;  %215 = vst [vmem:[#allocation2 + $0x2a9] sm:$0xff] %v7982_v34  ;;  %6494 = vmatprep.mubr.bf16.mxu0 %v2229_v56  ;;  %v2693_v23 = vld [vmem:[#allocation2 + $0x13a] sm:$0xff]  ;;  %v2694_v24 = vld [vmem:[#allocation2 + $0x142] sm:$0xff] }
  0x45   :  { %216 = vst [vmem:[#allocation2 + $0x2b9] sm:$0xff] %v7991_v36  ;;  %217 = vst [vmem:[#allocation2 + $0x2c1] sm:$0xff] %v7996_v37  ;;  %v2695_v27 = vld [vmem:[#allocation2 + $0x152] sm:$0xff]  ;;  %v2696_v28 = vld [vmem:[#allocation2 + $0x15a] sm:$0xff] }
  0x46   :  { %218 = vst [vmem:[#allocation2 + $0x2d1] sm:$0xff] %v8010_v40  ;;  %219 = vst [vmem:[#allocation2 + $0x2d9] sm:$0xff] %v8015_v43  ;;  %v2698_v33 = vld [vmem:[#allocation2 + $0x172] sm:$0xff]  ;;  %v2746_v34 = vpack.c.bf16 %v2696_v28, %v2695_v27  ;;  %v2699_v36 = vld [vmem:[#allocation2 + $0x182] sm:$0xff] }
  0x47   :  { %220 = vst [vmem:[#allocation2 + $0x2e9] sm:$0xff] %v8024_v49  ;;  %221 = vst [vmem:[#allocation2 + $0x2f1] sm:$0xff] %v8031_v53  ;;  %v2700_v37 = vld [vmem:[#allocation2 + $0x18a] sm:$0xff]  ;;  %v2702_v43 = vld [vmem:[#allocation2 + $0x1d2] sm:$0xff] }
  0x48   :  { %222 = vst [vmem:[#allocation2 + $0x301] sm:$0xff] %v8046_v42  ;;  %223 = vst [vmem:[#allocation2 + $0x309] sm:$0xff] %v8051_v45  ;;  %v2701_v40 = vld [vmem:[#allocation2 + $0x1ca] sm:$0xff]  ;;  %v230_v49 = vld [vmem:[#allocation2 + $0x18] sm:$0xff] }
  0x49   :  { %224 = vst [vmem:[#allocation2 + $0x319] sm:$0xff] %v8060_v62  ;;  %225 = vst [vmem:[#allocation2 + $0x321] sm:$0xff] %v8065_v63  ;;  %v231_v53 = vld [vmem:[#allocation2 + $0x20] sm:$0xff]  ;;  %v2704_v42 = vld [vmem:[#allocation2 + $0x1ea] sm:$0xff] }
  0x4a   :  { %6175 = vmatmul.mubr.bf16.gmra.mrb[20].mxu1 %v2229_v56  ;;  %v162_v56 = vld [vmem:[%s8762_s0 + $0x1f8] sm:$0xff]  ;;  %226 = vst [vmem:[#allocation2 + $0x331] sm:$0xff] %v161_v60  ;;  %v2745_v60 = vpack.c.bf16 %v2694_v24, %v2693_v23  ;;  %v232_v45 = vld [vmem:[#allocation2 + $0x30] sm:$0xff]  ;;  %v7425_v62 = vld [vmem:[%s8761_s1 + $0x88] sm:$0xff]  }
  0x4b   :  { %6495 = vmatmul.mubr.bf16.gmra.mrb[20].mxu0 %v2230_v5  ;;  %6178 = vmatprep.mubr.bf16.mxu1 %v2230_v5  ;;  %227 = vst [vmem:[#allocation2 + $0x339] sm:$0xff] %v162_v56  ;;  %v423_v5 = vpack.c.bf16 %v7866_v7, %v7861_v6  ;;  %v7424_v6 = vld [vmem:[%s8761_s1 + $0x1a0] sm:$0xff]   ;;  %v425_v7 = vpack.c.bf16 %v7897_v14, %v7892_v13  ;;  %v7428_v13 = vld [vmem:[%s8761_s1 + $0x1b0] sm:$0xff]   ;;  %v8157_v56 = vld [vmem:[#allocation2 + $0x8] sm:$0xff] }
  0x4c   :  { %6498 = vmatprep.mubr.bf16.mxu0 %v2231_v10  ;;  %v234_v63 = vld [vmem:[#allocation2 + $0x48] sm:$0xff]  ;;  %v2716_v23 = vld [vmem:[#allocation2 + $0x27a] sm:$0xff]  ;;  %v2718_v27 = vld [vmem:[#allocation2 + $0x292] sm:$0xff] }
  0x4d   :  { %v244_v24 = vld [vmem:[#allocation2 + $0xc0] sm:$0xff]  ;;  %v7435_v28 = vld [vmem:[%s8761_s1 + $0xb0] sm:$0xff]  }
  0x52   :  { %6179 = vmatmul.mubr.bf16.gmra.mrb[24].mxu1 %v2231_v10  ;;  %v2736_v10 = vpack.c.bf16 %v2676_v1, %v2675_v0  ;;  %v8160_v1 = vpack.c.bf16 %v2702_v43, %v2701_v40  ;;  %v2719_v40 = vld [vmem:[#allocation2 + $0x2a2] sm:$0xff]  ;;  %v2720_v43 = vld [vmem:[#allocation2 + $0x2aa] sm:$0xff] }
  0x53   :  { %6499 = vmatmul.mubr.bf16.gmra.mrb[24].mxu0 %v2232_v12  ;;  %6182 = vmatprep.mubr.bf16.mxu1 %v2232_v12  ;;  %v424_v12 = vpack.c.bf16 %v7883_v11, %v7876_v9  ;;  %v2738_v9 = vpack.c.bf16 %v2680_v15, %v2679_v48  ;;  %v426_v11 = vpack.c.bf16 %v7915_v18, %v7910_v17  ;;  %v7430_v17 = vld [vmem:[%s8761_s1 + $0x1b8] sm:$0xff]   ;;  %v236_v48 = vld [vmem:[#allocation2 + $0x60] sm:$0xff]  ;;  %v237_v15 = vld [vmem:[#allocation2 + $0x68] sm:$0xff] }
  0x54   :  { %6502 = vmatprep.mubr.bf16.mxu0 %v2233_v47  ;;  %v2741_v18 = vpack.c.bf16 %v2686_v57, %v2685_v55  ;;  %v2712_v55 = vld [vmem:[#allocation2 + $0x24a] sm:$0xff] }
  0x55   :  { %v240_v57 = vld [vmem:[#allocation2 + $0x90] sm:$0xff] }
  0x5a   :  { %6183 = vmatmul.mubr.bf16.gmra.mrb[28].mxu1 %v2233_v47  ;;  %v2737_v47 = vpack.c.bf16 %v2678_v4, %v2677_v3  ;;  %v2705_v3 = vld [vmem:[#allocation2 + $0x1fa] sm:$0xff]  ;;  %v2706_v4 = vld [vmem:[#allocation2 + $0x202] sm:$0xff] }
  0x5b   :  { %6503 = vmatmul.mubr.bf16.gmra.mrb[28].mxu0 %v2234_v52  ;;  %6186 = vmatprep.mubr.bf16.mxu1 %v420_v20  ;;  %v7426_v52 = vld [vmem:[%s8761_s1 + $0x1a8] sm:$0xff]   ;;  %v2739_v20 = vpack.c.bf16 %v2682_v51, %v2681_v16  ;;  %v7427_v16 = vld [vmem:[%s8761_s1 + $0x90] sm:$0xff]  }
  0x5c   :  { %6554 = vmatprep.mubr.bf16.mxu0 %v2733_v25  ;;  %v2683_v25 = vld [vmem:[#allocation2 + $0xc2] sm:$0xff]  ;;  %v2709_v51 = vld [vmem:[#allocation2 + $0x22a] sm:$0xff] }
  0x5d   :  { %v2740_v14 = vpack.c.bf16 %v2684_v54, %v2683_v25  ;;  %v239_v25 = vld [vmem:[#allocation2 + $0x80] sm:$0xff] }
  0x5e   :  { %v2711_v54 = vld [vmem:[#allocation2 + $0x242] sm:$0xff] }
  0x62   :  { %6187 = vmatmul.mubr.bf16.gmra.mrb[32].mxu1 %v421_v29  ;;  %v2688_v29 = vld [vmem:[#allocation2 + $0xfa] sm:$0xff] }
  0x63   :  { %6555 = vmatmul.mubr.bf16.vlgmr.msra.gmra.mrb[0].mxu0 %v2734_v31  ;;  %6190 = vmatprep.mubr.bf16.mxu1 %v422_v32  ;;  %v2689_v31 = vld [vmem:[#allocation2 + $0x10a] sm:$0xff]  ;;  %v2690_v32 = vld [vmem:[#allocation2 + $0x112] sm:$0xff] }
  0x64   :  { %6619 = vmatpush3.bf16.msra.mxu0 %v8001_v38  ;;  %6558 = vmatprep.mubr.bf16.mxu0 %v2735_v50  ;;  %v7422_v38 = vld [vmem:[%s8761_s1 + $0x198] sm:$0xff]   ;;  %v8136_v50 = vld [vmem:[%s8761_s1 + $0x1c0] sm:$0xff]   ;;  %v2743_v19 = vpack.c.bf16 %v2690_v32, %v2689_v31 }
  0x65   :  { %6620 = vmatprep.subr.bf16.mxu0 %v7418_v59 }
  0x68   :  { %6621 = vmatpush3.bf16.msra.mxu0 %v7418_v59  ;;  %v2742_v59 = vpack.c.bf16 %v2688_v29, %v2687_v58  ;;  %v2754_v29 = vpack.c.bf16 %v2712_v55, %v2711_v54  ;;  %v256_v54 = vld [vmem:[#allocation2 + $0x150] sm:$0xff]  ;;  %v257_v55 = vld [vmem:[#allocation2 + $0x158] sm:$0xff] }
  0x69   :  { %6622 = vmatprep.subr.bf16.mxu0 %v7420_v41 }
  0x6a   :  { %6191 = vmatmul.mubr.bf16.gmra.mrb[36].mxu1 %v423_v5 }
  0x6b   :  { %6559 = vmatmul.mubr.bf16.gmra.mrb[4].mxu0 %v2736_v10  ;;  %6194 = vmatprep.mubr.bf16.mxu1 %v424_v12  ;;  %v8168_v12 = vpack.c.bf16 %v2706_v4, %v2705_v3  ;;  %v250_v4 = vld [vmem:[#allocation2 + $0x108] sm:$0xff] }
  0x6c   :  { %6562 = vmatprep.mubr.bf16.mxu0 %v2737_v47  ;;  %6623 = vmatpush3.bf16.msra.mxu0 %v7420_v41  ;;  %v293_v41 = vpack.c.bf16 %v231_v53, %v230_v49  ;;  %v2707_v47 = vld [vmem:[#allocation2 + $0x212] sm:$0xff]  ;;  %v2721_v49 = vld [vmem:[#allocation2 + $0x2ba] sm:$0xff]  ;;  %v2722_v53 = vld [vmem:[#allocation2 + $0x2c2] sm:$0xff] }
  0x6d   :  { %6624 = vmatprep.subr.bf16.mxu0 %v7422_v38  ;;  %v8236_v3 = vpack.c.bf16 %v2722_v53, %v2721_v49  ;;  %v269_v49 = vld [vmem:[#allocation2 + $0x218] sm:$0xff]  ;;  %v7436_v53 = vld [vmem:[%s8761_s1 + $0x1d0] sm:$0xff]  }
  0x70   :  { %6625 = vmatpush3.bf16.msra.mxu0 %v7422_v38  ;;  %v2708_v38 = vld [vmem:[#allocation2 + $0x21a] sm:$0xff] }
  0x71   :  { %6626 = vmatprep.subr.bf16.mxu0 %v7424_v6 }
  0x72   :  { %6195 = vmatmul.mubr.bf16.gmra.mrb[40].mxu1 %v425_v7 }
  0x73   :  { %6563 = vmatmul.mubr.bf16.gmra.mrb[8].mxu0 %v2738_v9  ;;  %6198 = vmatprep.mubr.bf16.mxu1 %v426_v11  ;;  %v8181_v9 = vpack.c.bf16 %v2708_v38, %v2707_v47  ;;  %v2725_v47 = vld [vmem:[#allocation2 + $0x2ea] sm:$0xff]  ;;  %v2726_v38 = vld [vmem:[#allocation2 + $0x2f2] sm:$0xff] }
  0x74   :  { %6566 = vmatprep.mubr.bf16.mxu0 %v2739_v20  ;;  %6627 = vmatpush3.bf16.msra.mxu0 %v7424_v6  ;;  %v2710_v6 = vld [vmem:[#allocation2 + $0x232] sm:$0xff] }
  0x75   :  { %6628 = vmatprep.subr.bf16.mxu0 %v7426_v52  ;;  %v8185_v11 = vpack.c.bf16 %v2710_v6, %v2709_v51  ;;  %v238_v20 = vld [vmem:[#allocation2 + $0x78] sm:$0xff]  ;;  %v8248_v51 = vpack.c.bf16 %v2726_v38, %v2725_v47  ;;  %v275_v47 = vld [vmem:[#allocation2 + $0x260] sm:$0xff]  ;;  %v276_v38 = vld [vmem:[#allocation2 + $0x270] sm:$0xff] }
  0x76   :  { %v8197_v58 = vpack.c.bf16 %v239_v25, %v238_v20  ;;  %v254_v6 = vld [vmem:[#allocation2 + $0x138] sm:$0xff]  ;;  %v2727_v20 = vld [vmem:[#allocation2 + $0x302] sm:$0xff]  ;;  %v2728_v25 = vld [vmem:[#allocation2 + $0x30a] sm:$0xff] }
  0x78   :  { %6629 = vmatpush3.bf16.msra.mxu0 %v7426_v52  ;;  %v7429_v52 = vld [vmem:[%s8761_s1 + $0x98] sm:$0xff]  }
  0x79   :  { %6630 = vmatprep.subr.bf16.mxu0 %v7428_v13 }
  0x7a   :  { %6199 = vmatmul.mubr.bf16.gmra.mrb[44].mxu1 %v427_v22  ;;  %v2692_v22 = vld [vmem:[#allocation2 + $0x12a] sm:$0xff] }
  0x7b   :  { %6567 = vmatmul.mubr.bf16.gmra.mrb[12].mxu0 %v2740_v14  ;;  %6202 = vmatprep.mubr.bf16.mxu1 %v428_v26  ;;  %v2744_v26 = vpack.c.bf16 %v2692_v22, %v2691_v21  ;;  %v2713_v14 = vld [vmem:[#allocation2 + $0x25a] sm:$0xff]  ;;  %v243_v21 = vld [vmem:[#allocation2 + $0xb0] sm:$0xff] }
  0x7c   :  { %6570 = vmatprep.mubr.bf16.mxu0 %v2741_v18  ;;  %6631 = vmatpush3.bf16.msra.mxu0 %v7428_v13  ;;  %v241_v13 = vld [vmem:[#allocation2 + $0x98] sm:$0xff]  ;;  %v7431_v18 = vld [vmem:[%s8761_s1 + $0xa0] sm:$0xff]  }
  0x7d   :  { %6632 = vmatprep.subr.bf16.mxu0 %v7430_v17  ;;  %v8199_v31 = vpack.c.bf16 %v241_v13, %v240_v57  ;;  %v2715_v22 = vld [vmem:[#allocation2 + $0x272] sm:$0xff]  ;;  %v2729_v57 = vld [vmem:[#allocation2 + $0x31a] sm:$0xff]  ;;  %v2730_v13 = vld [vmem:[#allocation2 + $0x322] sm:$0xff] }
  0x80   :  { %6633 = vmatpush3.bf16.msra.mxu0 %v7430_v17  ;;  %v2714_v17 = vld [vmem:[#allocation2 + $0x262] sm:$0xff] }
  0x81   :  { %6698 = vmatprep.subr.bf16.mxu0 %v8136_v50  ;;  %v8201_v32 = vpack.c.bf16 %v2714_v17, %v2713_v14  ;;  %v2762_v17 = vpack.c.bf16 %v2728_v25, %v2727_v20 }
  0x82   :  { %6203 = vmatmul.mubr.bf16.gmra.mrb[48].mxu1 %v429_v30  ;;  %v2697_v30 = vld [vmem:[#allocation2 + $0x16a] sm:$0xff] }
  0x83   :  { %6571 = vmatmul.mubr.bf16.gmra.mrb[16].mxu0 %v2742_v59  ;;  %6206 = vmatprep.mubr.bf16.mxu1 %v430_v35  ;;  %v2747_v35 = vpack.c.bf16 %v2698_v33, %v2697_v30  ;;  %v7433_v59 = vld [vmem:[%s8761_s1 + $0xa8] sm:$0xff]   ;;  %v8214_v33 = vpack.c.bf16 %v2716_v23, %v2715_v22  ;;  %v2732_v22 = vld [vmem:[#allocation2 + $0x33a] sm:$0xff]  ;;  %v260_v23 = vld [vmem:[#allocation2 + $0x1b0] sm:$0xff] }
  0x84   :  { %6574 = vmatprep.mubr.bf16.mxu0 %v2743_v19  ;;  %v242_v19 = vld [vmem:[#allocation2 + $0xa8] sm:$0xff] }
  0x85   :  { %v8212_v30 = vpack.c.bf16 %v243_v21, %v242_v19  ;;  %v259_v19 = vld [vmem:[#allocation2 + $0x170] sm:$0xff] }
  0x86   :  { %v2731_v21 = vld [vmem:[#allocation2 + $0x332] sm:$0xff] }
  0x8a   :  { %6207 = vmatmul.mubr.bf16.gmra.mrb[52].mxu1 %v431_v39  ;;  %v228_v39 = vld [vmem:[#allocation2] sm:$0xff] }
  0x8b   :  { %6575 = vmatmul.mubr.bf16.gmra.mrb[20].mxu0 %v2744_v26  ;;  %6210 = vmatprep.mubr.bf16.mxu1 %v432_v44  ;;  %v2748_v44 = vpack.c.bf16 %v2700_v37, %v2699_v36  ;;  %v292_v0 = vpack.c.bf16 %v8157_v56, %v228_v39  ;;  %v245_v26 = vld [vmem:[#allocation2 + $0xc8] sm:$0xff]  ;;  %v7437_v36 = vld [vmem:[%s8761_s1 + $0xb8] sm:$0xff]   ;;  %v247_v39 = vld [vmem:[#allocation2 + $0xe0] sm:$0xff] }
  0x8c   :  { %6578 = vmatprep.mubr.bf16.mxu0 %v2745_v60  ;;  %v2717_v60 = vld [vmem:[#allocation2 + $0x28a] sm:$0xff]  ;;  %v246_v37 = vld [vmem:[#allocation2 + $0xd8] sm:$0xff] }
  0x92   :  { %6211 = vmatmul.mubr.bf16.gmra.mrb[56].mxu1 %v433_v61  ;;  %v2703_v61 = vld [vmem:[#allocation2 + $0x1e2] sm:$0xff] }
  0x93   :  { %6579 = vmatmul.mubr.bf16.gmra.mrb[24].mxu0 %v2746_v34  ;;  %6214 = vmatprep.mubr.bf16.mxu1 %v434_v46  ;;  %v233_v46 = vld [vmem:[#allocation2 + $0x38] sm:$0xff]  ;;  %v2750_v5 = vpack.c.bf16 %v2704_v42, %v2703_v61  ;;  %v8216_v34 = vpack.c.bf16 %v245_v26, %v244_v24  ;;  %v8230_v61 = vld [vmem:[%s8761_s1 + $0xc0] sm:$0xff]   ;;  %v8232_v42 = vpack.c.bf16 %v247_v39, %v246_v37  ;;  %v265_v37 = vld [vmem:[#allocation2 + $0x1e8] sm:$0xff] }
  0x94   :  { %6582 = vmatprep.mubr.bf16.mxu0 %v2747_v35  ;;  %v8166_v10 = vpack.c.bf16 %v233_v46, %v232_v45  ;;  %v8218_v35 = vpack.c.bf16 %v2718_v27, %v2717_v60  ;;  %v2758_v45 = vpack.c.bf16 %v2720_v43, %v2719_v40  ;;  %v2764_v26 = vpack.c.bf16 %v2732_v22, %v2731_v21  ;;  %v262_v27 = vld [vmem:[#allocation2 + $0x1c8] sm:$0xff]  ;;  %v285_v21 = vld [vmem:[#allocation2 + $0x2d8] sm:$0xff] }
  0x95   :  { %v308_v60 = vpack.c.bf16 %v8157_v56, %v260_v23  ;;  %v7434_v43 = vld [vmem:[%s8761_s1 + $0x1c8] sm:$0xff]  }
  0x9a   :  { %6215 = vmatmul.mubr.bf16.gmra.mrb[60].mxu1 %v435_v2  ;;  %v235_v2 = vld [vmem:[#allocation2 + $0x50] sm:$0xff] }
  0x9b   :  { %6583 = vmatmul.mubr.bf16.gmra.mrb[28].mxu0 %v2748_v44  ;;  %6234 = vmatprep.mubr.bf16.mxu1 %v292_v0  ;;  %v8179_v7 = vpack.c.bf16 %v235_v2, %v234_v63  ;;  %v248_v44 = vld [vmem:[#allocation2 + $0xf0] sm:$0xff]  ;;  %v249_v0 = vld [vmem:[#allocation2 + $0xf8] sm:$0xff]  ;;  %v252_v63 = vld [vmem:[#allocation2 + $0x120] sm:$0xff] }
  0x9c   :  { %6586 = vmatprep.mubr.bf16.mxu0 %v8160_v1  ;;  %v8234_v46 = vpack.c.bf16 %v249_v0, %v248_v44  ;;  %v253_v2 = vld [vmem:[#allocation2 + $0x128] sm:$0xff]  ;;  %v266_v44 = vld [vmem:[#allocation2 + $0x1f8] sm:$0xff]  ;;  %v267_v0 = vld [vmem:[#allocation2 + $0x200] sm:$0xff] }
  0xa2   :  { %6235 = vmatmul.mubr.bf16.vlgmr.msra.gmra.mrb[0].mxu1 %v293_v41  ;;  %v251_v41 = vld [vmem:[#allocation2 + $0x110] sm:$0xff] }
  0xa3   :  { %6587 = vmatmul.mubr.bf16.gmra.mrb[32].mxu0 %v2750_v5  ;;  %6299 = vmatpush3.bf16.msra.mxu1 %v8076_v8  ;;  %v8183_v8 = vpack.c.bf16 %v237_v15, %v236_v48  ;;  %v2723_v5 = vld [vmem:[#allocation2 + $0x2d2] sm:$0xff]  ;;  %v8242_v48 = vpack.c.bf16 %v251_v41, %v250_v4  ;;  %v272_v41 = vld [vmem:[#allocation2 + $0x240] sm:$0xff] }
  0xa4   :  { %6238 = vmatprep.mubr.bf16.mxu1 %v8166_v10  ;;  %6590 = vmatprep.mubr.bf16.mxu0 %v8168_v12 }
  0xa5   :  { %6300 = vmatprep.subr.bf16.mxu1 %v7425_v62 }
  0xa7   :  { %6301 = vmatpush3.bf16.msra.mxu1 %v7425_v62  ;;  %v2724_v62 = vld [vmem:[#allocation2 + $0x2da] sm:$0xff] }
  0xa8   :  { %6302 = vmatprep.subr.bf16.mxu1 %v7427_v16  ;;  %v8244_v15 = vpack.c.bf16 %v2724_v62, %v2723_v5  ;;  %v273_v5 = vld [vmem:[#allocation2 + $0x248] sm:$0xff]  ;;  %v7440_v62 = vld [vmem:[%s8761_s1 + $0x1e0] sm:$0xff]  }
  0xaa   :  { %6239 = vmatmul.mubr.bf16.gmra.mrb[4].mxu1 %v8179_v7 }
  0xab   :  { %6591 = vmatmul.mubr.bf16.gmra.mrb[36].mxu0 %v8181_v9  ;;  %6242 = vmatprep.mubr.bf16.mxu1 %v8183_v8 }
  0xac   :  { %6594 = vmatprep.mubr.bf16.mxu0 %v8185_v11  ;;  %6303 = vmatpush3.bf16.msra.mxu1 %v7427_v16  ;;  %v8246_v16 = vpack.c.bf16 %v253_v2, %v252_v63  ;;  %v8296_v2 = vpack.c.bf16 %v273_v5, %v272_v41 }
  0xad   :  { %6304 = vmatprep.subr.bf16.mxu1 %v7429_v52 }
  0xb0   :  { %6305 = vmatpush3.bf16.msra.mxu1 %v7429_v52  ;;  %v255_v52 = vld [vmem:[#allocation2 + $0x140] sm:$0xff] }
  0xb1   :  { %6306 = vmatprep.subr.bf16.mxu1 %v7431_v18  ;;  %v8254_v14 = vpack.c.bf16 %v255_v52, %v254_v6  ;;  %v277_v6 = vld [vmem:[#allocation2 + $0x278] sm:$0xff]  ;;  %v7444_v52 = vld [vmem:[%s8761_s1 + $0x1f0] sm:$0xff]  }
  0xb2   :  { %6243 = vmatmul.mubr.bf16.gmra.mrb[8].mxu1 %v8197_v58  ;;  %v8310_v25 = vpack.c.bf16 %v277_v6, %v276_v38  ;;  %v7443_v38 = vld [vmem:[%s8761_s1 + $0xd0] sm:$0xff]  }
  0xb3   :  { %6595 = vmatmul.mubr.bf16.gmra.mrb[40].mxu0 %v2754_v29  ;;  %6246 = vmatprep.mubr.bf16.mxu1 %v8199_v31  ;;  %v8258_v29 = vpack.c.bf16 %v2730_v13, %v2729_v57  ;;  %v281_v57 = vld [vmem:[#allocation2 + $0x2a8] sm:$0xff]  ;;  %v8322_v13 = vld [vmem:[%s8761_s1 + $0x200] sm:$0xff]  }
  0xb4   :  { %6598 = vmatprep.mubr.bf16.mxu0 %v8201_v32  ;;  %6307 = vmatpush3.bf16.msra.mxu1 %v7431_v18  ;;  %v8256_v18 = vpack.c.bf16 %v257_v55, %v256_v54  ;;  %v279_v54 = vld [vmem:[#allocation2 + $0x290] sm:$0xff]  ;;  %v280_v55 = vld [vmem:[#allocation2 + $0x2a0] sm:$0xff] }
  0xb5   :  { %6308 = vmatprep.subr.bf16.mxu1 %v7433_v59 }
  0xb8   :  { %6309 = vmatpush3.bf16.msra.mxu1 %v7433_v59  ;;  %v258_v59 = vld [vmem:[#allocation2 + $0x168] sm:$0xff] }
  0xb9   :  { %6310 = vmatprep.subr.bf16.mxu1 %v7435_v28  ;;  %v8263_v24 = vpack.c.bf16 %v259_v19, %v258_v59  ;;  %v8326_v59 = vpack.c.bf16 %v281_v57, %v280_v55  ;;  %v284_v19 = vld [vmem:[#allocation2 + $0x2d0] sm:$0xff] }
  0xba   :  { %6247 = vmatmul.mubr.bf16.gmra.mrb[12].mxu1 %v8212_v30  ;;  %v8335_v23 = vpack.c.bf16 %v285_v21, %v284_v19  ;;  %v1144_v19 = vld [vmem:[#allocation2 + $0xca] sm:$0xff] }
  0xbb   :  { %6599 = vmatmul.mubr.bf16.gmra.mrb[44].mxu0 %v8214_v33  ;;  %6250 = vmatprep.mubr.bf16.mxu1 %v8216_v34  ;;  %v7451_v21 = vld [vmem:[%s8761_s1 + $0xf0] sm:$0xff]  }
  0xbc   :  { %6602 = vmatprep.mubr.bf16.mxu0 %v8218_v35  ;;  %6311 = vmatpush3.bf16.msra.mxu1 %v7435_v28  ;;  %v263_v28 = vld [vmem:[#allocation2 + $0x1d0] sm:$0xff] }
  0xbd   :  { %6312 = vmatprep.subr.bf16.mxu1 %v7437_v36  ;;  %v309_v39 = vpack.c.bf16 %v263_v28, %v262_v27  ;;  %v289_v27 = vld [vmem:[#allocation2 + $0x308] sm:$0xff]  ;;  %v3212_v28 = vld [vmem:[#allocation2 + $0x180] sm:$0xff] }
  0xc0   :  { %6313 = vmatpush3.bf16.msra.mxu1 %v7437_v36  ;;  %v264_v36 = vld [vmem:[#allocation2 + $0x1e0] sm:$0xff] }
  0xc1   :  { %6378 = vmatprep.subr.bf16.mxu1 %v8230_v61  ;;  %v8268_v40 = vpack.c.bf16 %v265_v37, %v264_v36 }
  0xc2   :  { %6251 = vmatmul.mubr.bf16.gmra.mrb[16].mxu1 %v8232_v42 }
  0xc3   :  { %6603 = vmatmul.mubr.bf16.gmra.mrb[48].mxu0 %v2758_v45  ;;  %6254 = vmatprep.mubr.bf16.mxu1 %v8234_v46  ;;  %v8280_v45 = vpack.c.bf16 %v267_v0, %v266_v44  ;;  %v1127_v44 = vld [vmem:[#allocation2 + $0x2] sm:$0xff]  ;;  %v1128_v0 = vld [vmem:[#allocation2 + $0xa] sm:$0xff] }
  0xc4   :  { %6606 = vmatprep.mubr.bf16.mxu0 %v8236_v3 }
  0xca   :  { %6255 = vmatmul.mubr.bf16.gmra.mrb[20].mxu1 %v8242_v48 }
  0xcb   :  { %6607 = vmatmul.mubr.bf16.gmra.mrb[52].mxu0 %v8244_v15  ;;  %6258 = vmatprep.mubr.bf16.mxu1 %v8246_v16 }
  0xcc   :  { %6610 = vmatprep.mubr.bf16.mxu0 %v8248_v51 }
  0xd2   :  { %6259 = vmatmul.mubr.bf16.gmra.mrb[24].mxu1 %v8254_v14 }
  0xd3   :  { %6611 = vmatmul.mubr.bf16.gmra.mrb[56].mxu0 %v2762_v17  ;;  %6262 = vmatprep.mubr.bf16.mxu1 %v8256_v18 }
  0xd4   :  { %6614 = vmatprep.mubr.bf16.mxu0 %v8258_v29 }
  0xda   :  { %6263 = vmatmul.mubr.bf16.gmra.mrb[28].mxu1 %v8263_v24 }
  0xdb   :  { %6615 = vmatmul.mubr.bf16.gmra.mrb[60].mxu0 %v2764_v26  ;;  %6266 = vmatprep.mubr.bf16.mxu1 %v308_v60  ;;  %v286_v26 = vld [vmem:[#allocation2 + $0x2e8] sm:$0xff]  ;;  %v288_v60 = vld [vmem:[#allocation2 + $0x300] sm:$0xff] }
  0xdc   :  { %6634 = vmatprep.mubr.bf16.mxu0 %v8166_v10  ;;  %v268_v10 = vld [vmem:[#allocation2 + $0x210] sm:$0xff]  ;;  %v8343_v37 = vpack.c.bf16 %v289_v27, %v288_v60  ;;  %v1146_v60 = vld [vmem:[#allocation2 + $0xe2] sm:$0xff] }
  0xdd   :  { %v8282_v4 = vpack.c.bf16 %v269_v49, %v268_v10  ;;  %v1147_v27 = vld [vmem:[#allocation2 + $0xf2] sm:$0xff] }
  0xe2   :  { %6267 = vmatmul.mubr.bf16.gmra.mrb[32].mxu1 %v309_v39 }
  0xe3   :  { %6635 = vmatmul.mubr.bf16.vlgmr.msra.gmra.mrb[0].mxu0 %v8179_v7  ;;  %6270 = vmatprep.mubr.bf16.mxu1 %v8268_v40  ;;  %v7438_v7 = vld [vmem:[%s8761_s1 + $0x1d8] sm:$0xff]  }
  0xe4   :  { %6699 = vmatpush3.bf16.msra.mxu0 %v8136_v50  ;;  %6638 = vmatprep.mubr.bf16.mxu0 %v8183_v8  ;;  %v270_v50 = vld [vmem:[#allocation2 + $0x228] sm:$0xff]  ;;  %v271_v8 = vld [vmem:[#allocation2 + $0x230] sm:$0xff] }
  0xe5   :  { %6700 = vmatprep.subr.bf16.mxu0 %v7434_v43  ;;  %v8294_v63 = vpack.c.bf16 %v271_v8, %v270_v50  ;;  %v1131_v50 = vld [vmem:[#allocation2 + $0x32] sm:$0xff]  ;;  %v1132_v8 = vld [vmem:[#allocation2 + $0x3a] sm:$0xff] }
  0xe6   :  { %v8356_v5 = vpack.c.bf16 %v1132_v8, %v1131_v50  ;;  %v3244_v50 = vld [vmem:[#allocation2 + $0x330] sm:$0xff] }
  0xe8   :  { %6701 = vmatpush3.bf16.msra.mxu0 %v7434_v43  ;;  %v291_v43 = vld [vmem:[#allocation2 + $0x320] sm:$0xff] }
  0xe9   :  { %6702 = vmatprep.subr.bf16.mxu0 %v7436_v53 }
  0xea   :  { %6271 = vmatmul.mubr.bf16.gmra.mrb[36].mxu1 %v8280_v45 }
  0xeb   :  { %6639 = vmatmul.mubr.bf16.gmra.mrb[4].mxu0 %v8197_v58  ;;  %6274 = vmatprep.mubr.bf16.mxu1 %v8282_v4  ;;  %v7442_v58 = vld [vmem:[%s8761_s1 + $0x1e8] sm:$0xff]  }
  0xec   :  { %6642 = vmatprep.mubr.bf16.mxu0 %v8199_v31  ;;  %6703 = vmatpush3.bf16.msra.mxu0 %v7436_v53  ;;  %v274_v31 = vld [vmem:[#allocation2 + $0x258] sm:$0xff]  ;;  %v1191_v53 = vpack.c.bf16 %v1128_v0, %v1127_v44  ;;  %v1152_v44 = vld [vmem:[#allocation2 + $0x12a] sm:$0xff] }
  0xed   :  { %6704 = vmatprep.subr.bf16.mxu0 %v7438_v7  ;;  %v8308_v20 = vpack.c.bf16 %v275_v47, %v274_v31  ;;  %v1134_v31 = vld [vmem:[#allocation2 + $0x52] sm:$0xff]  ;;  %v1136_v47 = vld [vmem:[#allocation2 + $0x6a] sm:$0xff] }
  0xf0   :  { %6705 = vmatpush3.bf16.msra.mxu0 %v7438_v7  ;;  %v1129_v7 = vld [vmem:[#allocation2 + $0x1a] sm:$0xff] }
  0xf1   :  { %6706 = vmatprep.subr.bf16.mxu0 %v7440_v62 }
  0xf2   :  { %6275 = vmatmul.mubr.bf16.gmra.mrb[40].mxu1 %v8294_v63 }
  0xf3   :  { %6643 = vmatmul.mubr.bf16.gmra.mrb[8].mxu0 %v8212_v30  ;;  %6278 = vmatprep.mubr.bf16.mxu1 %v8296_v2  ;;  %v7446_v30 = vld [vmem:[%s8761_s1 + $0x1f8] sm:$0xff]  }
  0xf4   :  { %6646 = vmatprep.mubr.bf16.mxu0 %v8216_v34  ;;  %6707 = vmatpush3.bf16.msra.mxu0 %v7440_v62  ;;  %v278_v34 = vld [vmem:[#allocation2 + $0x288] sm:$0xff] }
  0xf5   :  { %6708 = vmatprep.subr.bf16.mxu0 %v7442_v58  ;;  %v8324_v17 = vpack.c.bf16 %v279_v54, %v278_v34  ;;  %v7441_v62 = vld [vmem:[%s8761_s1 + $0xc8] sm:$0xff]   ;;  %v1140_v34 = vld [vmem:[#allocation2 + $0x9a] sm:$0xff] }
  0xf6   :  { %v7447_v54 = vld [vmem:[%s8761_s1 + $0xe0] sm:$0xff]  }
  0xf8   :  { %6709 = vmatpush3.bf16.msra.mxu0 %v7442_v58  ;;  %v1133_v58 = vld [vmem:[#allocation2 + $0x4a] sm:$0xff] }
  0xf9   :  { %6710 = vmatprep.subr.bf16.mxu0 %v7444_v52  ;;  %v8368_v6 = vpack.c.bf16 %v1134_v31, %v1133_v58  ;;  %v1158_v58 = vld [vmem:[#allocation2 + $0x172] sm:$0xff] }
  0xfa   :  { %6279 = vmatmul.mubr.bf16.gmra.mrb[44].mxu1 %v8308_v20  ;;  %v1159_v31 = vld [vmem:[#allocation2 + $0x1b2] sm:$0xff] }
  0xfb   :  { %6647 = vmatmul.mubr.bf16.gmra.mrb[12].mxu0 %v8232_v42  ;;  %6282 = vmatprep.mubr.bf16.mxu1 %v8310_v25  ;;  %v282_v42 = vld [vmem:[#allocation2 + $0x2b8] sm:$0xff] }
  0xfc   :  { %6650 = vmatprep.mubr.bf16.mxu0 %v8234_v46  ;;  %6711 = vmatpush3.bf16.msra.mxu0 %v7444_v52  ;;  %v283_v46 = vld [vmem:[#allocation2 + $0x2c0] sm:$0xff] }
  0xfd   :  { %6712 = vmatprep.subr.bf16.mxu0 %v7446_v30  ;;  %v8333_v22 = vpack.c.bf16 %v283_v46, %v282_v42  ;;  %v1142_v42 = vld [vmem:[#allocation2 + $0xb2] sm:$0xff]  ;;  %v1143_v46 = vld [vmem:[#allocation2 + $0xc2] sm:$0xff] }
 0x100   :  { %6713 = vmatpush3.bf16.msra.mxu0 %v7446_v30  ;;  %v1139_v30 = vld [vmem:[#allocation2 + $0x92] sm:$0xff] }
 0x101   :  { %6778 = vmatprep.subr.bf16.mxu0 %v8322_v13  ;;  %v8384_v57 = vpack.c.bf16 %v1140_v34, %v1139_v30  ;;  %v3701_v34 = vld [vmem:[#allocation2 + $0x51] sm:$0xff] }
 0x102   :  { %6283 = vmatmul.mubr.bf16.gmra.mrb[48].mxu1 %v8324_v17 }
 0x103   :  { %6651 = vmatmul.mubr.bf16.gmra.mrb[16].mxu0 %v8242_v48  ;;  %6286 = vmatprep.mubr.bf16.mxu1 %v8326_v59  ;;  %v287_v48 = vld [vmem:[#allocation2 + $0x2f0] sm:$0xff] }
 0x104   :  { %6654 = vmatprep.mubr.bf16.mxu0 %v8246_v16  ;;  %v3213_v16 = vld [vmem:[#allocation2 + $0x188] sm:$0xff]  ;;  %v8341_v36 = vpack.c.bf16 %v287_v48, %v286_v26  ;;  %v8398_v48 = vpack.c.bf16 %v1144_v19, %v1143_v46 }
 0x105   :  { %v8345_v39 = vpack.c.bf16 %v3213_v16, %v3212_v28  ;;  %v1148_v28 = vld [vmem:[#allocation2 + $0xfa] sm:$0xff] }
 0x10a   :  { %6287 = vmatmul.mubr.bf16.gmra.mrb[52].mxu1 %v8333_v22 }
 0x10b   :  { %6655 = vmatmul.mubr.bf16.gmra.mrb[20].mxu0 %v8254_v14  ;;  %6290 = vmatprep.mubr.bf16.mxu1 %v8335_v23  ;;  %v290_v14 = vld [vmem:[#allocation2 + $0x318] sm:$0xff] }
 0x10c   :  { %6658 = vmatprep.mubr.bf16.mxu0 %v8256_v18  ;;  %v3214_v18 = vld [vmem:[#allocation2 + $0x198] sm:$0xff]  ;;  %v8351_v10 = vpack.c.bf16 %v291_v43, %v290_v14  ;;  %v8409_v14 = vpack.c.bf16 %v1148_v28, %v1147_v27  ;;  %v8414_v43 = vld [vmem:[%s8761_s1 + $0x100] sm:$0xff]   ;;  %v7452_v28 = vld [vmem:[%s8761_s1 + $0x210] sm:$0xff]  }
 0x10d   :  { %v3263_v49 = vpack.c.bf16 %v8157_v56, %v3214_v18  ;;  %v1151_v18 = vld [vmem:[#allocation2 + $0x122] sm:$0xff]  ;;  %v3707_v27 = vld [vmem:[#allocation2 + $0x99] sm:$0xff] }
 0x112   :  { %6291 = vmatmul.mubr.bf16.gmra.mrb[56].mxu1 %v8341_v36 }
 0x113   :  { %6659 = vmatmul.mubr.bf16.gmra.mrb[24].mxu0 %v8263_v24  ;;  %6294 = vmatprep.mubr.bf16.mxu1 %v8343_v37  ;;  %v1130_v24 = vld [vmem:[#allocation2 + $0x22] sm:$0xff] }
 0x114   :  { %6662 = vmatprep.mubr.bf16.mxu0 %v8345_v39  ;;  %v1192_v41 = vpack.c.bf16 %v1130_v24, %v1129_v7  ;;  %v1155_v7 = vld [vmem:[#allocation2 + $0x152] sm:$0xff]  ;;  %v1156_v24 = vld [vmem:[#allocation2 + $0x15a] sm:$0xff] }
 0x11a   :  { %6295 = vmatmul.mubr.bf16.gmra.mrb[60].mxu1 %v8351_v10 }
 0x11b   :  { %6663 = vmatmul.mubr.bf16.gmra.mrb[28].mxu0 %v3263_v49  ;;  %6314 = vmatprep.mubr.bf16.mxu1 %v1191_v53  ;;  %v8423_v49 = vpack.c.bf16 %v1152_v44, %v1151_v18  ;;  %v1153_v53 = vld [vmem:[#allocation2 + $0x13a] sm:$0xff]  ;;  %v3709_v18 = vld [vmem:[#allocation2 + $0xb1] sm:$0xff]  ;;  %v1171_v44 = vld [vmem:[#allocation2 + $0x242] sm:$0xff] }
 0x11c   :  { %6666 = vmatprep.mubr.bf16.mxu0 %v8268_v40  ;;  %v1135_v40 = vld [vmem:[#allocation2 + $0x62] sm:$0xff] }
 0x11d   :  { %v8370_v52 = vpack.c.bf16 %v1136_v47, %v1135_v40  ;;  %v1160_v40 = vld [vmem:[#allocation2 + $0x1ba] sm:$0xff]  ;;  %v3698_v47 = vld [vmem:[#allocation2 + $0x31] sm:$0xff] }
 0x122   :  { %6315 = vmatmul.mubr.bf16.vlgmr.msra.gmra.mrb[0].mxu1 %v1192_v41  ;;  %v8431_v41 = vpack.c.bf16 %v1156_v24, %v1155_v7  ;;  %v3711_v7 = vld [vmem:[#allocation2 + $0xc9] sm:$0xff]  ;;  %v7455_v24 = vld [vmem:[%s8761_s1 + $0x220] sm:$0xff]  }
 0x123   :  { %6667 = vmatmul.mubr.bf16.gmra.mrb[32].mxu0 %v8280_v45  ;;  %6379 = vmatpush3.bf16.msra.mxu1 %v8230_v61  ;;  %v7445_v61 = vld [vmem:[%s8761_s1 + $0xd8] sm:$0xff]  }
 0x124   :  { %6318 = vmatprep.mubr.bf16.mxu1 %v8356_v5  ;;  %6670 = vmatprep.mubr.bf16.mxu0 %v8282_v4  ;;  %v1137_v45 = vld [vmem:[#allocation2 + $0x7a] sm:$0xff]  ;;  %v1138_v4 = vld [vmem:[#allocation2 + $0x82] sm:$0xff] }
 0x125   :  { %6380 = vmatprep.subr.bf16.mxu1 %v7441_v62  ;;  %v8382_v55 = vpack.c.bf16 %v1138_v4, %v1137_v45  ;;  %v1207_v4 = vpack.c.bf16 %v1160_v40, %v1159_v31  ;;  %v3715_v31 = vld [vmem:[#allocation2 + $0xf9] sm:$0xff]  ;;  %v7457_v40 = vld [vmem:[%s8761_s1 + $0x230] sm:$0xff]  }
 0x127   :  { %6381 = vmatpush3.bf16.msra.mxu1 %v7441_v62 }
 0x128   :  { %6382 = vmatprep.subr.bf16.mxu1 %v7443_v38 }
 0x12a   :  { %6319 = vmatmul.mubr.bf16.gmra.mrb[4].mxu1 %v8368_v6 }
 0x12b   :  { %6671 = vmatmul.mubr.bf16.gmra.mrb[36].mxu0 %v8294_v63  ;;  %6322 = vmatprep.mubr.bf16.mxu1 %v8370_v52  ;;  %v7449_v63 = vld [vmem:[%s8761_s1 + $0xe8] sm:$0xff]  }
 0x12c   :  { %6674 = vmatprep.mubr.bf16.mxu0 %v8296_v2  ;;  %6383 = vmatpush3.bf16.msra.mxu1 %v7443_v38  ;;  %v1141_v2 = vld [vmem:[#allocation2 + $0xaa] sm:$0xff]  ;;  %v3699_v38 = vld [vmem:[#allocation2 + $0x39] sm:$0xff] }
 0x12d   :  { %6384 = vmatprep.subr.bf16.mxu1 %v7445_v61  ;;  %v8396_v26 = vpack.c.bf16 %v1142_v42, %v1141_v2  ;;  %v3762_v30 = vpack.c.bf16 %v3699_v38, %v3698_v47  ;;  %v3702_v2 = vld [vmem:[#allocation2 + $0x61] sm:$0xff]  ;;  %v3703_v42 = vld [vmem:[#allocation2 + $0x69] sm:$0xff] }
 0x130   :  { %6385 = vmatpush3.bf16.msra.mxu1 %v7445_v61 }
 0x131   :  { %6386 = vmatprep.subr.bf16.mxu1 %v7447_v54 }
 0x132   :  { %6323 = vmatmul.mubr.bf16.gmra.mrb[8].mxu1 %v8382_v55 }
 0x133   :  { %6675 = vmatmul.mubr.bf16.gmra.mrb[40].mxu0 %v8308_v20  ;;  %6326 = vmatprep.mubr.bf16.mxu1 %v8384_v57  ;;  %v7453_v20 = vld [vmem:[%s8761_s1 + $0xf8] sm:$0xff]  }
 0x134   :  { %6678 = vmatprep.mubr.bf16.mxu0 %v8310_v25  ;;  %6387 = vmatpush3.bf16.msra.mxu1 %v7447_v54  ;;  %v1145_v25 = vld [vmem:[#allocation2 + $0xda] sm:$0xff]  ;;  %v1163_v54 = vld [vmem:[#allocation2 + $0x1e2] sm:$0xff] }
 0x135   :  { %6388 = vmatprep.subr.bf16.mxu1 %v7449_v63  ;;  %v8407_v16 = vpack.c.bf16 %v1146_v60, %v1145_v25  ;;  %v3705_v25 = vld [vmem:[#allocation2 + $0x81] sm:$0xff]  ;;  %v3706_v60 = vld [vmem:[#allocation2 + $0x91] sm:$0xff] }
 0x138   :  { %6389 = vmatpush3.bf16.msra.mxu1 %v7449_v63  ;;  %v1164_v63 = vld [vmem:[#allocation2 + $0x1ea] sm:$0xff] }
 0x139   :  { %6390 = vmatprep.subr.bf16.mxu1 %v7451_v21  ;;  %v8443_v19 = vpack.c.bf16 %v1164_v63, %v1163_v54  ;;  %v3719_v54 = vld [vmem:[#allocation2 + $0x129] sm:$0xff] }
 0x13a   :  { %6327 = vmatmul.mubr.bf16.gmra.mrb[12].mxu1 %v8396_v26 }
 0x13b   :  { %6679 = vmatmul.mubr.bf16.gmra.mrb[44].mxu0 %v8324_v17  ;;  %6330 = vmatprep.mubr.bf16.mxu1 %v8398_v48  ;;  %v1149_v17 = vld [vmem:[#allocation2 + $0x10a] sm:$0xff] }
 0x13c   :  { %6682 = vmatprep.mubr.bf16.mxu0 %v8326_v59  ;;  %6391 = vmatpush3.bf16.msra.mxu1 %v7451_v21  ;;  %v1150_v59 = vld [vmem:[#allocation2 + $0x112] sm:$0xff]  ;;  %v3764_v21 = vpack.c.bf16 %v3703_v42, %v3702_v2 }
 0x13d   :  { %6392 = vmatprep.subr.bf16.mxu1 %v7453_v20  ;;  %v8421_v0 = vpack.c.bf16 %v1150_v59, %v1149_v17  ;;  %v3766_v59 = vpack.c.bf16 %v3707_v27, %v3706_v60  ;;  %v3725_v60 = vld [vmem:[#allocation2 + $0x171] sm:$0xff]  ;;  %v1187_v27 = vld [vmem:[#allocation2 + $0x302] sm:$0xff] }
 0x140   :  { %6393 = vmatpush3.bf16.msra.mxu1 %v7453_v20  ;;  %v3704_v20 = vld [vmem:[#allocation2 + $0x79] sm:$0xff] }
 0x141   :  { %6858 = vmatprep.subr.bf16.mxu1 %v8414_v43  ;;  %v3765_v17 = vpack.c.bf16 %v3705_v25, %v3704_v20  ;;  %v3724_v25 = vld [vmem:[#allocation2 + $0x169] sm:$0xff] }
 0x142   :  { %6331 = vmatmul.mubr.bf16.gmra.mrb[16].mxu1 %v8407_v16 }
 0x143   :  { %6683 = vmatmul.mubr.bf16.gmra.mrb[48].mxu0 %v8333_v22  ;;  %6334 = vmatprep.mubr.bf16.mxu1 %v8409_v14  ;;  %v1154_v22 = vld [vmem:[#allocation2 + $0x142] sm:$0xff] }
 0x144   :  { %6686 = vmatprep.mubr.bf16.mxu0 %v8335_v23  ;;  %v3245_v23 = vld [vmem:[#allocation2 + $0x338] sm:$0xff]  ;;  %v8429_v8 = vpack.c.bf16 %v1154_v22, %v1153_v53  ;;  %v1172_v53 = vld [vmem:[#allocation2 + $0x24a] sm:$0xff]  ;;  %v3710_v22 = vld [vmem:[#allocation2 + $0xc1] sm:$0xff] }
 0x145   :  { %v8433_v62 = vpack.c.bf16 %v3245_v23, %v3244_v50  ;;  %v8462_v23 = vpack.c.bf16 %v1172_v53, %v1171_v44  ;;  %v1642_v44 = vld [vmem:[#allocation2 + $0x20] sm:$0xff] }
 0x146   :  { %v3730_v53 = vld [vmem:[#allocation2 + $0x1e1] sm:$0xff] }
 0x14a   :  { %6335 = vmatmul.mubr.bf16.gmra.mrb[20].mxu1 %v8421_v0 }
 0x14b   :  { %6687 = vmatmul.mubr.bf16.gmra.mrb[52].mxu0 %v8341_v36  ;;  %6338 = vmatprep.mubr.bf16.mxu1 %v8423_v49  ;;  %v1157_v36 = vld [vmem:[#allocation2 + $0x16a] sm:$0xff] }
 0x14c   :  { %6690 = vmatprep.mubr.bf16.mxu0 %v8343_v37  ;;  %v3246_v37 = vld [vmem:[#allocation2 + $0x348] sm:$0xff]  ;;  %v8439_v61 = vpack.c.bf16 %v1158_v58, %v1157_v36  ;;  %v3712_v36 = vld [vmem:[#allocation2 + $0xd9] sm:$0xff] }
 0x14d   :  { %v3279_v45 = vpack.c.bf16 %v8157_v56, %v3246_v37  ;;  %v7450_v56 = vld [vmem:[%s8761_s1 + $0x208] sm:$0xff]   ;;  %v3714_v37 = vld [vmem:[#allocation2 + $0xf1] sm:$0xff] }
 0x14e   :  { %v3713_v58 = vld [vmem:[#allocation2 + $0xe1] sm:$0xff]  ;;  %v3770_v38 = vpack.c.bf16 %v3715_v31, %v3714_v37  ;;  %v1646_v37 = vld [vmem:[#allocation2 + $0x50] sm:$0xff] }
 0x14f   :  { %v3769_v47 = vpack.c.bf16 %v3713_v58, %v3712_v36  ;;  %v3733_v36 = vld [vmem:[#allocation2 + $0x201] sm:$0xff]  ;;  %v3734_v31 = vld [vmem:[#allocation2 + $0x211] sm:$0xff] }
 0x150   :  { %v1645_v58 = vld [vmem:[#allocation2 + $0x48] sm:$0xff] }
 0x152   :  { %6339 = vmatmul.mubr.bf16.gmra.mrb[24].mxu1 %v8429_v8 }
 0x153   :  { %6691 = vmatmul.mubr.bf16.gmra.mrb[56].mxu0 %v8351_v10  ;;  %6342 = vmatprep.mubr.bf16.mxu1 %v8431_v41  ;;  %v3700_v10 = vld [vmem:[#allocation2 + $0x49] sm:$0xff] }
 0x154   :  { %6694 = vmatprep.mubr.bf16.mxu0 %v8433_v62  ;;  %v3763_v46 = vpack.c.bf16 %v3701_v34, %v3700_v10  ;;  %v1180_v10 = vld [vmem:[#allocation2 + $0x2aa] sm:$0xff]  ;;  %v3718_v34 = vld [vmem:[#allocation2 + $0x121] sm:$0xff] }
 0x155   :  { %v3772_v42 = vpack.c.bf16 %v3719_v54, %v3718_v34  ;;  %v1649_v34 = vld [vmem:[#allocation2 + $0x78] sm:$0xff]  ;;  %v1650_v54 = vld [vmem:[#allocation2 + $0x80] sm:$0xff] }
 0x15a   :  { %6343 = vmatmul.mubr.bf16.gmra.mrb[28].mxu1 %v8439_v61 }
 0x15b   :  { %6695 = vmatmul.mubr.bf16.gmra.mrb[60].mxu0 %v3279_v45  ;;  %6346 = vmatprep.mubr.bf16.mxu1 %v1207_v4  ;;  %v3716_v45 = vld [vmem:[#allocation2 + $0x109] sm:$0xff]  ;;  %v3717_v4 = vld [vmem:[#allocation2 + $0x111] sm:$0xff] }
 0x15c   :  { %6714 = vmatprep.mubr.bf16.mxu0 %v3762_v30  ;;  %v1179_v30 = vld [vmem:[#allocation2 + $0x2a2] sm:$0xff]  ;;  %v3771_v63 = vpack.c.bf16 %v3717_v4, %v3716_v45 }
 0x15d   :  { %v8477_v2 = vpack.c.bf16 %v1180_v10, %v1179_v30  ;;  %v1648_v4 = vld [vmem:[#allocation2 + $0x68] sm:$0xff]  ;;  %v3737_v10 = vld [vmem:[#allocation2 + $0x231] sm:$0xff] }
 0x15e   :  { %v3736_v30 = vld [vmem:[#allocation2 + $0x229] sm:$0xff] }
 0x162   :  { %6347 = vmatmul.mubr.bf16.gmra.mrb[32].mxu1 %v8160_v1  ;;  %v7454_v1 = vld [vmem:[%s8761_s1 + $0x218] sm:$0xff]  }
 0x163   :  { %6715 = vmatmul.mubr.bf16.vlgmr.msra.gmra.mrb[0].mxu0 %v3763_v46  ;;  %6350 = vmatprep.mubr.bf16.mxu1 %v8443_v19  ;;  %v3722_v46 = vld [vmem:[#allocation2 + $0x151] sm:$0xff] }
 0x164   :  { %6779 = vmatpush3.bf16.msra.mxu0 %v8322_v13  ;;  %6718 = vmatprep.mubr.bf16.mxu0 %v3764_v21  ;;  %v3708_v13 = vld [vmem:[#allocation2 + $0xa9] sm:$0xff]  ;;  %v3723_v21 = vld [vmem:[#allocation2 + $0x159] sm:$0xff] }
 0x165   :  { %6780 = vmatprep.subr.bf16.mxu0 %v7450_v56  ;;  %v3767_v50 = vpack.c.bf16 %v3709_v18, %v3708_v13  ;;  %v3774_v20 = vpack.c.bf16 %v3723_v21, %v3722_v46  ;;  %v3729_v18 = vld [vmem:[#allocation2 + $0x1a1] sm:$0xff]  ;;  %v8501_v46 = vpack.c.bf16 %v3737_v10, %v3736_v30  ;;  %v1660_v30 = vld [vmem:[#allocation2 + $0xf8] sm:$0xff] }
 0x166   :  { %v3748_v10 = vld [vmem:[#allocation2 + $0x2b9] sm:$0xff] }
 0x168   :  { %6781 = vmatpush3.bf16.msra.mxu0 %v7450_v56 }
 0x169   :  { %6782 = vmatprep.subr.bf16.mxu0 %v7452_v28 }
 0x16a   :  { %6351 = vmatmul.mubr.bf16.gmra.mrb[36].mxu1 %v8168_v12  ;;  %v3768_v12 = vpack.c.bf16 %v3711_v7, %v3710_v22  ;;  %v3731_v22 = vld [vmem:[#allocation2 + $0x1e9] sm:$0xff] }
 0x16b   :  { %6719 = vmatmul.mubr.bf16.gmra.mrb[4].mxu0 %v3765_v17  ;;  %6354 = vmatprep.mubr.bf16.mxu1 %v8181_v9  ;;  %v7456_v9 = vld [vmem:[%s8761_s1 + $0x228] sm:$0xff]  }
 0x16c   :  { %6722 = vmatprep.mubr.bf16.mxu0 %v3766_v59  ;;  %6783 = vmatpush3.bf16.msra.mxu0 %v7452_v28  ;;  %v3726_v28 = vld [vmem:[#allocation2 + $0x181] sm:$0xff]  ;;  %v3727_v17 = vld [vmem:[#allocation2 + $0x189] sm:$0xff]  ;;  %v3775_v59 = vpack.c.bf16 %v3725_v60, %v3724_v25  ;;  %v1652_v25 = vld [vmem:[#allocation2 + $0x98] sm:$0xff] }
 0x16d   :  { %6784 = vmatprep.subr.bf16.mxu0 %v7454_v1  ;;  %v3776_v13 = vpack.c.bf16 %v3727_v17, %v3726_v28  ;;  %v3740_v60 = vld [vmem:[#allocation2 + $0x259] sm:$0xff]  ;;  %v1654_v28 = vld [vmem:[#allocation2 + $0xb0] sm:$0xff] }
 0x16e   :  { %v3742_v17 = vld [vmem:[#allocation2 + $0x271] sm:$0xff] }
 0x170   :  { %6785 = vmatpush3.bf16.msra.mxu0 %v7454_v1 }
 0x171   :  { %6786 = vmatprep.subr.bf16.mxu0 %v7455_v24 }
 0x172   :  { %6355 = vmatmul.mubr.bf16.gmra.mrb[40].mxu1 %v8185_v11  ;;  %v7458_v11 = vld [vmem:[%s8761_s1 + $0x238] sm:$0xff]  }
 0x173   :  { %6723 = vmatmul.mubr.bf16.gmra.mrb[8].mxu0 %v3767_v50  ;;  %6358 = vmatprep.mubr.bf16.mxu1 %v8462_v23  ;;  %v8487_v50 = vpack.c.bf16 %v3731_v22, %v3730_v53  ;;  %v7464_v53 = vld [vmem:[%s8761_s1 + $0x120] sm:$0xff]  }
 0x174   :  { %6726 = vmatprep.mubr.bf16.mxu0 %v3768_v12  ;;  %6787 = vmatpush3.bf16.msra.mxu0 %v7455_v24  ;;  %v1643_v12 = vld [vmem:[#allocation2 + $0x30] sm:$0xff]  ;;  %v1655_v22 = vld [vmem:[#allocation2 + $0xc0] sm:$0xff] }
 0x175   :  { %6788 = vmatprep.subr.bf16.mxu0 %v7456_v9 }
 0x178   :  { %6789 = vmatpush3.bf16.msra.mxu0 %v7456_v9  ;;  %v3732_v9 = vld [vmem:[#allocation2 + $0x1f9] sm:$0xff] }
 0x179   :  { %6790 = vmatprep.subr.bf16.mxu0 %v7457_v40 }
 0x17a   :  { %6359 = vmatmul.mubr.bf16.gmra.mrb[44].mxu1 %v8201_v32  ;;  %v3720_v32 = vld [vmem:[#allocation2 + $0x139] sm:$0xff] }
 0x17b   :  { %6727 = vmatmul.mubr.bf16.gmra.mrb[12].mxu0 %v3769_v47  ;;  %6362 = vmatprep.mubr.bf16.mxu1 %v8214_v33  ;;  %v3721_v33 = vld [vmem:[#allocation2 + $0x141] sm:$0xff] }
 0x17c   :  { %6730 = vmatprep.mubr.bf16.mxu0 %v3770_v38  ;;  %6791 = vmatpush3.bf16.msra.mxu0 %v7457_v40  ;;  %v3773_v56 = vpack.c.bf16 %v3721_v33, %v3720_v32  ;;  %v3735_v40 = vld [vmem:[#allocation2 + $0x219] sm:$0xff]  ;;  %v8491_v38 = vpack.c.bf16 %v3733_v36, %v3732_v9  ;;  %v7461_v32 = vld [vmem:[%s8761_s1 + $0x108] sm:$0xff]  }
 0x17d   :  { %6792 = vmatprep.subr.bf16.mxu0 %v7458_v11  ;;  %v8493_v45 = vpack.c.bf16 %v3735_v40, %v3734_v31  ;;  %v1658_v9 = vld [vmem:[#allocation2 + $0xe0] sm:$0xff] }
 0x17e   :  { %v3746_v36 = vld [vmem:[#allocation2 + $0x2a1] sm:$0xff] }
 0x180   :  { %6793 = vmatpush3.bf16.msra.mxu0 %v7458_v11  ;;  %v1707_v11 = vpack.c.bf16 %v1646_v37, %v1645_v58  ;;  %v3747_v58 = vld [vmem:[#allocation2 + $0x2a9] sm:$0xff] }
 0x181   :  { %v7465_v37 = vld [vmem:[%s8761_s1 + $0x128] sm:$0xff]  }
 0x182   :  { %6363 = vmatmul.mubr.bf16.gmra.mrb[48].mxu1 %v8218_v35  ;;  %v1188_v35 = vld [vmem:[#allocation2 + $0x30a] sm:$0xff] }
 0x183   :  { %6731 = vmatmul.mubr.bf16.gmra.mrb[16].mxu0 %v3771_v63  ;;  %6366 = vmatprep.mubr.bf16.mxu1 %v8477_v2  ;;  %v8483_v1 = vpack.c.bf16 %v1188_v35, %v1187_v27  ;;  %v3738_v63 = vld [vmem:[#allocation2 + $0x241] sm:$0xff] }
 0x184   :  { %6734 = vmatprep.mubr.bf16.mxu0 %v3772_v42  ;;  %v3739_v42 = vld [vmem:[#allocation2 + $0x249] sm:$0xff]  ;;  %v3741_v27 = vld [vmem:[#allocation2 + $0x261] sm:$0xff] }
 0x185   :  { %v8503_v21 = vpack.c.bf16 %v3739_v42, %v3738_v63  ;;  %v1653_v35 = vld [vmem:[#allocation2 + $0xa8] sm:$0xff]  ;;  %v1662_v63 = vld [vmem:[#allocation2 + $0x110] sm:$0xff] }
 0x186   :  { %v3750_v42 = vld [vmem:[#allocation2 + $0x2d1] sm:$0xff] }
 0x18a   :  { %6367 = vmatmul.mubr.bf16.gmra.mrb[52].mxu1 %v8236_v3  ;;  %v3728_v3 = vld [vmem:[#allocation2 + $0x199] sm:$0xff] }
 0x18b   :  { %6735 = vmatmul.mubr.bf16.gmra.mrb[20].mxu0 %v3773_v56  ;;  %6370 = vmatprep.mubr.bf16.mxu1 %v8244_v15  ;;  %v1641_v15 = vld [vmem:[#allocation2 + $0x18] sm:$0xff]  ;;  %v3777_v7 = vpack.c.bf16 %v3729_v18, %v3728_v3  ;;  %v7462_v56 = vld [vmem:[%s8761_s1 + $0x110] sm:$0xff]   ;;  %v8513_v18 = vpack.c.bf16 %v3741_v27, %v3740_v60  ;;  %v1663_v60 = vld [vmem:[#allocation2 + $0x120] sm:$0xff] }
 0x18c   :  { %6738 = vmatprep.mubr.bf16.mxu0 %v3774_v20  ;;  %v1705_v24 = vpack.c.bf16 %v1642_v44, %v1641_v15  ;;  %v1651_v20 = vld [vmem:[#allocation2 + $0x90] sm:$0xff]  ;;  %v1711_v15 = vpack.c.bf16 %v1654_v28, %v1653_v35  ;;  %v1664_v27 = vld [vmem:[#allocation2 + $0x128] sm:$0xff] }
 0x18d   :  { %v1710_v3 = vpack.c.bf16 %v1652_v25, %v1651_v20  ;;  %v3752_v35 = vld [vmem:[#allocation2 + $0x2e9] sm:$0xff]  ;;  %v3753_v28 = vld [vmem:[#allocation2 + $0x2f1] sm:$0xff] }
 0x192   :  { %6371 = vmatmul.mubr.bf16.gmra.mrb[56].mxu1 %v8248_v51  ;;  %v1644_v51 = vld [vmem:[#allocation2 + $0x38] sm:$0xff] }
 0x193   :  { %6739 = vmatmul.mubr.bf16.gmra.mrb[24].mxu0 %v3775_v59  ;;  %6374 = vmatprep.mubr.bf16.mxu1 %v8483_v1  ;;  %v1706_v47 = vpack.c.bf16 %v1644_v51, %v1643_v12  ;;  %v3743_v59 = vld [vmem:[#allocation2 + $0x279] sm:$0xff]  ;;  %v3745_v12 = vld [vmem:[#allocation2 + $0x291] sm:$0xff] }
 0x194   :  { %6742 = vmatprep.mubr.bf16.mxu0 %v3776_v13  ;;  %v7463_v13 = vld [vmem:[%s8761_s1 + $0x118] sm:$0xff]   ;;  %v8515_v44 = vpack.c.bf16 %v3743_v59, %v3742_v17  ;;  %v1666_v59 = vld [vmem:[#allocation2 + $0x140] sm:$0xff] }
 0x195   :  { %v1657_v51 = vld [vmem:[#allocation2 + $0xd8] sm:$0xff] }
 0x196   :  { %v1665_v17 = vld [vmem:[#allocation2 + $0x138] sm:$0xff] }
 0x19a   :  { %6375 = vmatmul.mubr.bf16.gmra.mrb[60].mxu1 %v8258_v29  ;;  %v1647_v29 = vld [vmem:[#allocation2 + $0x60] sm:$0xff] }
 0x19b   :  { %6743 = vmatmul.mubr.bf16.gmra.mrb[28].mxu0 %v3777_v7  ;;  %6394 = vmatprep.mubr.bf16.mxu1 %v1705_v24  ;;  %v1708_v33 = vpack.c.bf16 %v1648_v4, %v1647_v29  ;;  %v1656_v7 = vld [vmem:[#allocation2 + $0xc8] sm:$0xff]  ;;  %v7466_v29 = vld [vmem:[%s8761_s1 + $0x130] sm:$0xff]  }
 0x19c   :  { %6746 = vmatprep.mubr.bf16.mxu0 %v8487_v50  ;;  %v3744_v24 = vld [vmem:[#allocation2 + $0x289] sm:$0xff]  ;;  %v1712_v31 = vpack.c.bf16 %v1656_v7, %v1655_v22  ;;  %v1717_v22 = vpack.c.bf16 %v1666_v59, %v1665_v17  ;;  %v1680_v17 = vld [vmem:[#allocation2 + $0x218] sm:$0xff] }
 0x19d   :  { %v8525_v40 = vpack.c.bf16 %v3745_v12, %v3744_v24  ;;  %v1659_v4 = vld [vmem:[#allocation2 + $0xf0] sm:$0xff]  ;;  %v1668_v12 = vld [vmem:[#allocation2 + $0x158] sm:$0xff]  ;;  %v1681_v59 = vld [vmem:[#allocation2 + $0x228] sm:$0xff] }
 0x19e   :  { %v1667_v24 = vld [vmem:[#allocation2 + $0x150] sm:$0xff] }
 0x1a2   :  { %6395 = vmatmul.mubr.bf16.vlgmr.msra.gmra.mrb[0].mxu1 %v1706_v47  ;;  %v1713_v47 = vpack.c.bf16 %v1658_v9, %v1657_v51  ;;  %v3756_v51 = vld [vmem:[#allocation2 + $0x319] sm:$0xff]  ;;  %v3757_v9 = vld [vmem:[#allocation2 + $0x321] sm:$0xff] }
 0x1a3   :  { %6747 = vmatmul.mubr.bf16.gmra.mrb[32].mxu0 %v8491_v38  ;;  %6866 = vmatpush3.bf16.msra.mxu1 %v8414_v43  ;;  %v1709_v43 = vpack.c.bf16 %v1650_v54, %v1649_v34  ;;  %v3749_v34 = vld [vmem:[#allocation2 + $0x2c1] sm:$0xff] }
 0x1a4   :  { %6398 = vmatprep.mubr.bf16.mxu1 %v1707_v11  ;;  %6750 = vmatprep.mubr.bf16.mxu0 %v8493_v45  ;;  %v8527_v11 = vpack.c.bf16 %v3747_v58, %v3746_v36  ;;  %v1661_v54 = vld [vmem:[#allocation2 + $0x108] sm:$0xff]  ;;  %v1670_v58 = vld [vmem:[#allocation2 + $0x170] sm:$0xff] }
 0x1a5   :  { %6859 = vmatprep.subr.bf16.mxu1 %v7461_v32  ;;  %v1715_v20 = vpack.c.bf16 %v1662_v63, %v1661_v54  ;;  %v1669_v36 = vld [vmem:[#allocation2 + $0x168] sm:$0xff]  ;;  %v1674_v63 = vld [vmem:[#allocation2 + $0x1d0] sm:$0xff] }
 0x1a6   :  { %v1673_v54 = vld [vmem:[#allocation2 + $0x1c8] sm:$0xff] }
 0x1a7   :  { %6867 = vmatpush3.bf16.msra.mxu1 %v7461_v32  ;;  %v3751_v32 = vld [vmem:[#allocation2 + $0x2d9] sm:$0xff] }
 0x1a8   :  { %6860 = vmatprep.subr.bf16.mxu1 %v7462_v56  ;;  %v8539_v25 = vpack.c.bf16 %v3751_v32, %v3750_v42  ;;  %v1721_v32 = vpack.c.bf16 %v1674_v63, %v1673_v54  ;;  %v1698_v54 = vld [vmem:[#allocation2 + $0x2f0] sm:$0xff] }
 0x1aa   :  { %6399 = vmatmul.mubr.bf16.gmra.mrb[4].mxu1 %v1708_v33  ;;  %v7467_v33 = vld [vmem:[%s8761_s1 + $0x138] sm:$0xff]  }
 0x1ab   :  { %6751 = vmatmul.mubr.bf16.gmra.mrb[36].mxu0 %v8501_v46  ;;  %6402 = vmatprep.mubr.bf16.mxu1 %v1709_v43  ;;  %v1714_v43 = vpack.c.bf16 %v1660_v30, %v1659_v4  ;;  %v1719_v4 = vpack.c.bf16 %v1670_v58, %v1669_v36  ;;  %v1690_v36 = vld [vmem:[#allocation2 + $0x290] sm:$0xff] }
 0x1ac   :  { %6754 = vmatprep.mubr.bf16.mxu0 %v8503_v21  ;;  %6868 = vmatpush3.bf16.msra.mxu1 %v7462_v56  ;;  %v8537_v56 = vpack.c.bf16 %v3749_v34, %v3748_v10  ;;  %v3760_v10 = vld [vmem:[#allocation2 + $0x349] sm:$0xff]  ;;  %v3761_v34 = vld [vmem:[#allocation2 + $0x351] sm:$0xff] }
 0x1ad   :  { %6861 = vmatprep.subr.bf16.mxu1 %v7463_v13  ;;  %v3793_v42 = vpack.c.bf16 %v3761_v34, %v3760_v10  ;;  %v1696_v10 = vld [vmem:[#allocation2 + $0x2d8] sm:$0xff]  ;;  %v1697_v34 = vld [vmem:[#allocation2 + $0x2e8] sm:$0xff] }
 0x1ae   :  { %v1733_v63 = vpack.c.bf16 %v1698_v54, %v1697_v34 }
 0x1b0   :  { %6869 = vmatpush3.bf16.msra.mxu1 %v7463_v13  ;;  %v3754_v13 = vld [vmem:[#allocation2 + $0x301] sm:$0xff] }
 0x1b1   :  { %6862 = vmatprep.subr.bf16.mxu1 %v7464_v53 }
 0x1b2   :  { %6403 = vmatmul.mubr.bf16.gmra.mrb[8].mxu1 %v1710_v3  ;;  %v3755_v3 = vld [vmem:[#allocation2 + $0x309] sm:$0xff] }
 0x1b3   :  { %6755 = vmatmul.mubr.bf16.gmra.mrb[40].mxu0 %v8513_v18  ;;  %6406 = vmatprep.mubr.bf16.mxu1 %v1711_v15  ;;  %v1716_v15 = vpack.c.bf16 %v1664_v27, %v1663_v60  ;;  %v8545_v7 = vpack.c.bf16 %v3755_v3, %v3754_v13  ;;  %v1678_v60 = vld [vmem:[#allocation2 + $0x200] sm:$0xff] }
 0x1b4   :  { %6758 = vmatprep.mubr.bf16.mxu0 %v8515_v44  ;;  %6870 = vmatpush3.bf16.msra.mxu1 %v7464_v53  ;;  %v8543_v53 = vpack.c.bf16 %v3753_v28, %v3752_v35  ;;  %v1679_v28 = vld [vmem:[#allocation2 + $0x210] sm:$0xff] }
 0x1b5   :  { %6863 = vmatprep.subr.bf16.mxu1 %v7465_v37  ;;  %v1724_v13 = vpack.c.bf16 %v1680_v17, %v1679_v28  ;;  %v2188_v28 = vld [vmem:[#allocation2 + $0x1d1] sm:$0xff] }
 0x1b8   :  { %6871 = vmatpush3.bf16.msra.mxu1 %v7465_v37  ;;  %v3758_v37 = vld [vmem:[#allocation2 + $0x331] sm:$0xff] }
 0x1b9   :  { %6864 = vmatprep.subr.bf16.mxu1 %v7466_v29 }
 0x1ba   :  { %6407 = vmatmul.mubr.bf16.gmra.mrb[12].mxu1 %v1712_v31  ;;  %v3759_v31 = vld [vmem:[#allocation2 + $0x339] sm:$0xff] }
 0x1bb   :  { %6759 = vmatmul.mubr.bf16.gmra.mrb[44].mxu0 %v8525_v40  ;;  %6410 = vmatprep.mubr.bf16.mxu1 %v1713_v47  ;;  %v1718_v47 = vpack.c.bf16 %v1668_v12, %v1667_v24  ;;  %v8551_v30 = vpack.c.bf16 %v3759_v31, %v3758_v37  ;;  %v1686_v24 = vld [vmem:[#allocation2 + $0x260] sm:$0xff]  ;;  %v1692_v37 = vld [vmem:[#allocation2 + $0x2a8] sm:$0xff]  ;;  %v1693_v31 = vld [vmem:[#allocation2 + $0x2b8] sm:$0xff] }
 0x1bc   :  { %6762 = vmatprep.mubr.bf16.mxu0 %v8527_v11  ;;  %6872 = vmatpush3.bf16.msra.mxu1 %v7466_v29  ;;  %v8549_v29 = vpack.c.bf16 %v3757_v9, %v3756_v51  ;;  %v1688_v51 = vld [vmem:[#allocation2 + $0x278] sm:$0xff]  ;;  %v1689_v9 = vld [vmem:[#allocation2 + $0x288] sm:$0xff] }
 0x1bd   :  { %6865 = vmatprep.subr.bf16.mxu1 %v7467_v33  ;;  %v1729_v58 = vpack.c.bf16 %v1690_v36, %v1689_v9  ;;  %v4264_v9 = vld [vmem:[#allocation2 + $0x2d2] sm:$0xff]  ;;  %v4265_v36 = vld [vmem:[#allocation2 + $0x2da] sm:$0xff] }
 0x1c0   :  { %6873 = vmatpush3.bf16.msra.mxu1 %v7467_v33  ;;  %v1675_v33 = vld [vmem:[#allocation2 + $0x1e0] sm:$0xff] }
 0x1c2   :  { %6411 = vmatmul.mubr.bf16.gmra.mrb[16].mxu1 %v1714_v43  ;;  %v1676_v43 = vld [vmem:[#allocation2 + $0x1e8] sm:$0xff] }
 0x1c3   :  { %6763 = vmatmul.mubr.bf16.gmra.mrb[48].mxu0 %v8537_v56  ;;  %6414 = vmatprep.mubr.bf16.mxu1 %v1715_v20  ;;  %v1677_v20 = vld [vmem:[#allocation2 + $0x1f8] sm:$0xff]  ;;  %v1722_v27 = vpack.c.bf16 %v1676_v43, %v1675_v33  ;;  %v1702_v33 = vld [vmem:[#allocation2 + $0x320] sm:$0xff]  ;;  %v4241_v43 = vld [vmem:[#allocation2 + $0x18a] sm:$0xff] }
 0x1c4   :  { %6766 = vmatprep.mubr.bf16.mxu0 %v8539_v25  ;;  %v1723_v35 = vpack.c.bf16 %v1678_v60, %v1677_v20 }
 0x1ca   :  { %6415 = vmatmul.mubr.bf16.gmra.mrb[20].mxu1 %v1716_v15  ;;  %v1684_v15 = vld [vmem:[#allocation2 + $0x248] sm:$0xff] }
 0x1cb   :  { %6767 = vmatmul.mubr.bf16.gmra.mrb[52].mxu0 %v8543_v53  ;;  %6418 = vmatprep.mubr.bf16.mxu1 %v1717_v22  ;;  %v1685_v22 = vld [vmem:[#allocation2 + $0x258] sm:$0xff] }
 0x1cc   :  { %6770 = vmatprep.mubr.bf16.mxu0 %v8545_v7  ;;  %v1727_v12 = vpack.c.bf16 %v1686_v24, %v1685_v22  ;;  %v4251_v22 = vld [vmem:[#allocation2 + $0x232] sm:$0xff] }
 0x1d2   :  { %6419 = vmatmul.mubr.bf16.gmra.mrb[24].mxu1 %v1718_v47  ;;  %v1694_v47 = vld [vmem:[#allocation2 + $0x2c0] sm:$0xff] }
 0x1d3   :  { %6771 = vmatmul.mubr.bf16.gmra.mrb[56].mxu0 %v8549_v29  ;;  %6422 = vmatprep.mubr.bf16.mxu1 %v1719_v4  ;;  %v1731_v4 = vpack.c.bf16 %v1694_v47, %v1693_v31  ;;  %v4275_v47 = vld [vmem:[#allocation2 + $0x352] sm:$0xff] }
 0x1d4   :  { %6774 = vmatprep.mubr.bf16.mxu0 %v8551_v30 }
 0x1da   :  { %6423 = vmatmul.mubr.bf16.gmra.mrb[28].mxu1 %v8345_v39  ;;  %v1682_v39 = vld [vmem:[#allocation2 + $0x230] sm:$0xff] }
 0x1db   :  { %6775 = vmatmul.mubr.bf16.gmra.mrb[60].mxu0 %v3793_v42  ;;  %6426 = vmatprep.mubr.bf16.mxu1 %v1721_v32  ;;  %v1725_v3 = vpack.c.bf16 %v1682_v39, %v1681_v59  ;;  %v1700_v42 = vld [vmem:[#allocation2 + $0x308] sm:$0xff]  ;;  %v1701_v32 = vld [vmem:[#allocation2 + $0x318] sm:$0xff] }
 0x1dc   :  { %6794 = vmatprep.mubr.bf16.mxu0 %v8356_v5  ;;  %v1683_v5 = vld [vmem:[#allocation2 + $0x240] sm:$0xff]  ;;  %v1735_v60 = vpack.c.bf16 %v1702_v33, %v1701_v32 }
 0x1dd   :  { %v4247_v39 = vld [vmem:[#allocation2 + $0x202] sm:$0xff] }
 0x1e2   :  { %6427 = vmatmul.mubr.bf16.gmra.mrb[32].mxu1 %v1722_v27 }
 0x1e3   :  { %6795 = vmatmul.mubr.bf16.vlgmr.msra.gmra.mrb[0].mxu0 %v8368_v6  ;;  %6430 = vmatprep.mubr.bf16.mxu1 %v1723_v35  ;;  %v1726_v6 = vpack.c.bf16 %v1684_v15, %v1683_v5  ;;  %v4243_v35 = vld [vmem:[#allocation2 + $0x1a2] sm:$0xff]  ;;  %v4250_v15 = vld [vmem:[#allocation2 + $0x22a] sm:$0xff] }
 0x1e4   :  { %6798 = vmatprep.mubr.bf16.mxu0 %v8370_v52  ;;  %v1687_v52 = vld [vmem:[#allocation2 + $0x270] sm:$0xff]  ;;  %v4295_v24 = vpack.c.bf16 %v4251_v22, %v4250_v15 }
 0x1ea   :  { %6431 = vmatmul.mubr.bf16.gmra.mrb[36].mxu1 %v1724_v13  ;;  %v4248_v13 = vld [vmem:[#allocation2 + $0x212] sm:$0xff] }
 0x1eb   :  { %6799 = vmatmul.mubr.bf16.gmra.mrb[4].mxu0 %v8382_v55  ;;  %6434 = vmatprep.mubr.bf16.mxu1 %v1725_v3  ;;  %v1728_v55 = vpack.c.bf16 %v1688_v51, %v1687_v52  ;;  %v4249_v3 = vld [vmem:[#allocation2 + $0x21a] sm:$0xff]  ;;  %v4259_v51 = vld [vmem:[#allocation2 + $0x292] sm:$0xff] }
 0x1ec   :  { %6802 = vmatprep.mubr.bf16.mxu0 %v8384_v57  ;;  %v1691_v57 = vld [vmem:[#allocation2 + $0x2a0] sm:$0xff] }
 0x1f2   :  { %6435 = vmatmul.mubr.bf16.gmra.mrb[40].mxu1 %v1726_v6  ;;  %v4256_v6 = vld [vmem:[#allocation2 + $0x272] sm:$0xff] }
 0x1f3   :  { %6803 = vmatmul.mubr.bf16.gmra.mrb[8].mxu0 %v8396_v26  ;;  %6438 = vmatprep.mubr.bf16.mxu1 %v1727_v12  ;;  %v1730_v26 = vpack.c.bf16 %v1692_v37, %v1691_v57  ;;  %v4257_v12 = vld [vmem:[#allocation2 + $0x27a] sm:$0xff]  ;;  %v4272_v57 = vld [vmem:[#allocation2 + $0x332] sm:$0xff] }
 0x1f4   :  { %6806 = vmatprep.mubr.bf16.mxu0 %v8398_v48  ;;  %v1695_v48 = vld [vmem:[#allocation2 + $0x2d0] sm:$0xff]  ;;  %v4273_v37 = vld [vmem:[#allocation2 + $0x33a] sm:$0xff] }
 0x1fa   :  { %6439 = vmatmul.mubr.bf16.gmra.mrb[44].mxu1 %v1728_v55 }
 0x1fb   :  { %6807 = vmatmul.mubr.bf16.gmra.mrb[12].mxu0 %v8407_v16  ;;  %6442 = vmatprep.mubr.bf16.mxu1 %v1729_v58  ;;  %v1732_v16 = vpack.c.bf16 %v1696_v10, %v1695_v48  ;;  %v4267_v58 = vld [vmem:[#allocation2 + $0x2f2] sm:$0xff] }
 0x1fc   :  { %6810 = vmatprep.mubr.bf16.mxu0 %v8409_v14  ;;  %v1699_v14 = vld [vmem:[#allocation2 + $0x300] sm:$0xff] }
 0x1fd   :  { %v1734_v20 = vpack.c.bf16 %v1700_v42, %v1699_v14 }
 0x202   :  { %6443 = vmatmul.mubr.bf16.gmra.mrb[48].mxu1 %v1730_v26 }
 0x203   :  { %6811 = vmatmul.mubr.bf16.gmra.mrb[16].mxu0 %v8421_v0  ;;  %6446 = vmatprep.mubr.bf16.mxu1 %v1731_v4  ;;  %v4240_v0 = vld [vmem:[#allocation2 + $0x182] sm:$0xff] }
 0x204   :  { %6814 = vmatprep.mubr.bf16.mxu0 %v8423_v49  ;;  %v4290_v27 = vpack.c.bf16 %v4241_v43, %v4240_v0  ;;  %v4242_v49 = vld [vmem:[#allocation2 + $0x19a] sm:$0xff] }
 0x205   :  { %v4291_v17 = vpack.c.bf16 %v4243_v35, %v4242_v49 }
 0x20a   :  { %6447 = vmatmul.mubr.bf16.gmra.mrb[52].mxu1 %v1732_v16 }
 0x20b   :  { %6815 = vmatmul.mubr.bf16.gmra.mrb[20].mxu0 %v8429_v8  ;;  %6450 = vmatprep.mubr.bf16.mxu1 %v1733_v63  ;;  %v2187_v8 = vld [vmem:[#allocation2 + $0x1c9] sm:$0xff] }
 0x20c   :  { %6818 = vmatprep.mubr.bf16.mxu0 %v8431_v41  ;;  %v2235_v59 = vpack.c.bf16 %v2188_v28, %v2187_v8  ;;  %v4246_v41 = vld [vmem:[#allocation2 + $0x1fa] sm:$0xff] }
 0x20d   :  { %v4293_v5 = vpack.c.bf16 %v4247_v39, %v4246_v41 }
 0x212   :  { %6451 = vmatmul.mubr.bf16.gmra.mrb[56].mxu1 %v1734_v20 }
 0x213   :  { %6819 = vmatmul.mubr.bf16.gmra.mrb[24].mxu0 %v8439_v61  ;;  %6454 = vmatprep.mubr.bf16.mxu1 %v1735_v60  ;;  %v4294_v61 = vpack.c.bf16 %v4249_v3, %v4248_v13 }
 0x214   :  { %6822 = vmatprep.mubr.bf16.mxu0 %v4290_v27 }
 0x21a   :  { %6455 = vmatmul.mubr.bf16.gmra.mrb[60].mxu1 %v8433_v62  ;;  %v4254_v62 = vld [vmem:[#allocation2 + $0x25a] sm:$0xff] }
 0x21b   :  { %6823 = vmatmul.mubr.bf16.gmra.mrb[28].mxu0 %v4291_v17  ;;  %6506 = vmatprep.mubr.bf16.mxu1 %v2235_v59 }
 0x21c   :  { %6826 = vmatprep.mubr.bf16.mxu0 %v8443_v19  ;;  %v4255_v19 = vld [vmem:[#allocation2 + $0x262] sm:$0xff] }
 0x21d   :  { %v4297_v52 = vpack.c.bf16 %v4255_v19, %v4254_v62 }
 0x222   :  { %6507 = vmatmul.mubr.bf16.vlgmr.msra.gmra.mrb[32].mxu1 %v8487_v50  ;;  %v4298_v50 = vpack.c.bf16 %v4257_v12, %v4256_v6 }
 0x223   :  { %6827 = vmatmul.mubr.bf16.gmra.mrb[32].mxu0 %v4293_v5  ;;  %6510 = vmatprep.mubr.bf16.mxu1 %v8491_v38  ;;  %v4258_v38 = vld [vmem:[#allocation2 + $0x28a] sm:$0xff] }
 0x224   :  { %6830 = vmatprep.mubr.bf16.mxu0 %v4294_v61 }
 0x22a   :  { %6511 = vmatmul.mubr.bf16.gmra.mrb[36].mxu1 %v8493_v45  ;;  %v4299_v45 = vpack.c.bf16 %v4259_v51, %v4258_v38 }
 0x22b   :  { %6831 = vmatmul.mubr.bf16.gmra.mrb[36].mxu0 %v4295_v24  ;;  %6514 = vmatprep.mubr.bf16.mxu1 %v8501_v46  ;;  %v4263_v46 = vld [vmem:[#allocation2 + $0x2c2] sm:$0xff] }
 0x22c   :  { %6834 = vmatprep.mubr.bf16.mxu0 %v8462_v23  ;;  %v4262_v23 = vld [vmem:[#allocation2 + $0x2ba] sm:$0xff] }
 0x22d   :  { %v4301_v55 = vpack.c.bf16 %v4263_v46, %v4262_v23 }
 0x232   :  { %6515 = vmatmul.mubr.bf16.gmra.mrb[40].mxu1 %v8503_v21  ;;  %v4302_v21 = vpack.c.bf16 %v4265_v36, %v4264_v9 }
 0x233   :  { %6835 = vmatmul.mubr.bf16.gmra.mrb[40].mxu0 %v4297_v52  ;;  %6518 = vmatprep.mubr.bf16.mxu1 %v8513_v18  ;;  %v4266_v18 = vld [vmem:[#allocation2 + $0x2ea] sm:$0xff] }
 0x234   :  { %6838 = vmatprep.mubr.bf16.mxu0 %v4298_v50 }
 0x23a   :  { %6519 = vmatmul.mubr.bf16.gmra.mrb[44].mxu1 %v8515_v44  ;;  %v4303_v44 = vpack.c.bf16 %v4267_v58, %v4266_v18 }
 0x23b   :  { %6839 = vmatmul.mubr.bf16.gmra.mrb[44].mxu0 %v4299_v45  ;;  %6522 = vmatprep.mubr.bf16.mxu1 %v8525_v40  ;;  %v4271_v40 = vld [vmem:[#allocation2 + $0x322] sm:$0xff] }
 0x23c   :  { %6842 = vmatprep.mubr.bf16.mxu0 %v8477_v2  ;;  %v4270_v2 = vld [vmem:[#allocation2 + $0x31a] sm:$0xff] }
 0x23d   :  { %v4305_v31 = vpack.c.bf16 %v4271_v40, %v4270_v2 }
 0x242   :  { %6523 = vmatmul.mubr.bf16.gmra.mrb[48].mxu1 %v8527_v11  ;;  %v4306_v11 = vpack.c.bf16 %v4273_v37, %v4272_v57 }
 0x243   :  { %6843 = vmatmul.mubr.bf16.gmra.mrb[48].mxu0 %v4301_v55  ;;  %6526 = vmatprep.mubr.bf16.mxu1 %v8537_v56  ;;  %v4274_v56 = vld [vmem:[#allocation2 + $0x34a] sm:$0xff] }
 0x244   :  { %6846 = vmatprep.mubr.bf16.mxu0 %v4302_v21 }
 0x24a   :  { %6527 = vmatmul.mubr.bf16.gmra.mrb[52].mxu1 %v8539_v25  ;;  %v4307_v25 = vpack.c.bf16 %v4275_v47, %v4274_v56 }
 0x24b   :  { %6847 = vmatmul.mubr.bf16.gmra.mrb[52].mxu0 %v4303_v44  ;;  %6530 = vmatprep.mubr.bf16.mxu1 %v8543_v53 }
 0x24c   :  { %6850 = vmatprep.mubr.bf16.mxu0 %v8483_v1 }
 0x252   :  { %6531 = vmatmul.mubr.bf16.gmra.mrb[56].mxu1 %v8545_v7 }
 0x253   :  { %6851 = vmatmul.mubr.bf16.gmra.mrb[56].mxu0 %v4305_v31  ;;  %6534 = vmatprep.mubr.bf16.mxu1 %v8549_v29 }
 0x254   :  { %6854 = vmatprep.mubr.bf16.mxu0 %v4306_v11 }
 0x25a   :  { %6535 = vmatmul.mubr.bf16.gmra.mrb[60].mxu1 %v8551_v30 }
 0x25b   :  { %6855 = vmatmul.mubr.bf16.gmra.mrb[60].mxu0 %v4307_v25 }
 0x275   :  { %v6396_v53 = vpop.f32.mrb[0].mxu1 }
 0x276   :  { %v1836_v1 = vpop.f32.mrb[1].mxu1 }
 0x277   :  { %v6397_v26 = vpop.f32.mrb[2].mxu1 }
 0x278   :  { %v1839_v4 = vpop.f32.mrb[3].mxu1 }
 0x27d   :  { %v6400_v48 = vpop.f32.mrb[4].mxu1 }
 0x27e   :  { %v1852_v10 = vpop.f32.mrb[5].mxu1 }
 0x27f   :  { %v6401_v34 = vpop.f32.mrb[6].mxu1 }
 0x280   :  { %v1855_v54 = vpop.f32.mrb[7].mxu1 }
 0x285   :  { %v8590_v16 = vpop.f32.mrb[8].mxu1 }
 0x286   :  { %v8592_v7 = vpop.f32.mrb[9].mxu1 }
 0x287   :  { %v8594_v29 = vpop.f32.mrb[10].mxu1 }
 0x288   :  { %v8596_v63 = vpop.f32.mrb[11].mxu1 }
 0x28d   :  { %v8598_v14 = vpop.f32.mrb[12].mxu1 }
 0x28e   :  { %v8600_v30 = vpop.f32.mrb[13].mxu1 }
 0x28f   :  { %v8602_v42 = vpop.f32.mrb[14].mxu1 }
 0x290   :  { %v8604_v32 = vpop.f32.mrb[15].mxu1 }
 0x295   :  { %v8606_v33 = vpop.f32.mrb[16].mxu1 }
 0x296   :  { %v8608_v0 = vpop.f32.mrb[17].mxu1 }
 0x297   :  { %v8610_v43 = vpop.f32.mrb[18].mxu1 }
 0x298   :  { %v8612_v20 = vpop.f32.mrb[19].mxu1 }
 0x29d   :  { %v8614_v60 = vpop.f32.mrb[20].mxu1 }
 0x29e   :  { %v8616_v27 = vpop.f32.mrb[21].mxu1 }
 0x29f   :  { %v8618_v49 = vpop.f32.mrb[22].mxu1 }
 0x2a0   :  { %v8620_v35 = vpop.f32.mrb[23].mxu1 }
 0x2a5   :  { %v8622_v8 = vpop.f32.mrb[24].mxu1 }
 0x2a6   :  { %v8624_v28 = vpop.f32.mrb[25].mxu1 }
 0x2a7   :  { %v8626_v17 = vpop.f32.mrb[26].mxu1 }
 0x2a8   :  { %v8628_v59 = vpop.f32.mrb[27].mxu1 }
 0x2ad   :  { %v8630_v41 = vpop.f32.mrb[28].mxu1 }
 0x2ae   :  { %v8632_v39 = vpop.f32.mrb[29].mxu1 }
 0x2af   :  { %v8634_v13 = vpop.f32.mrb[30].mxu1 }
 0x2b0   :  { %v8636_v3 = vpop.f32.mrb[31].mxu1 }
 0x2b6   :  { %v6796_v5 = vpop.f32.mrb[0].mxu0 }
 0x2b7   :  { %v6874_v61 = vadd.f32 %v6796_v5, %v6396_v53  ;;  %v4407_v15 = vpop.f32.mrb[1].mxu0 }
 0x2b8   :  { %v6875_v22 = vadd.f32 %v4407_v15, %v1836_v1  ;;  %v6797_v24 = vpop.f32.mrb[2].mxu0 }
 0x2b9   :  { %v6876_v62 = vadd.f32 %v6797_v24, %v6397_v26  ;;  %v4410_v19 = vpop.f32.mrb[3].mxu0  ;;  %v5117_v45 = vmul.f32 %v6874_v61, %v6874_v61 }
 0x2ba   :  { %v6877_v6 = vadd.f32 %v4410_v19, %v1839_v4  ;;  %v5115_v52 = vmul.f32 %v6875_v22, %v6875_v22 }
 0x2bb   :  { %v5595_v12 = vpack.c.bf16 %v6876_v62, %v6874_v61  ;;  %v5118_v21 = vmul.f32 %v6876_v62, %v6876_v62 }
 0x2bc   :  { %v5590_v50 = vpack.c.bf16 %v6877_v6, %v6875_v22  ;;  %v5046_v38 = vadd.f32 %v6877_v6, %v6875_v22  ;;  %v5116_v51 = vmul.f32 %v6877_v6, %v6877_v6 }
 0x2bd   :  { %5747 = vst [vmem:[%s8763_s2 + $0x8] sm:$0xff] %v5595_v12  }
 0x2be   :  { %5591 = vst [vmem:[%s8763_s2] sm:$0xff] %v5590_v50   ;;  %v5047_v23 = vadd.f32 %v6874_v61, %v5046_v38  ;;  %v5179_v46 = vadd.f32 %v5116_v51, %v5115_v52  ;;  %v6800_v9 = vpop.f32.mrb[4].mxu0 }
 0x2bf   :  { %v6878_v36 = vadd.f32 %v6800_v9, %v6400_v48  ;;  %v4423_v55 = vpop.f32.mrb[5].mxu0 }
 0x2c0   :  { %v5180_v18 = vadd.f32 %v5179_v46, %v5117_v45  ;;  %v6879_v58 = vadd.f32 %v4423_v55, %v1852_v10  ;;  %v5048_v44 = vadd.f32 %v6876_v62, %v5047_v23  ;;  %v6801_v2 = vpop.f32.mrb[6].mxu0 }
 0x2c1   :  { %v6880_v40 = vadd.f32 %v6801_v2, %v6401_v34  ;;  %v4426_v57 = vpop.f32.mrb[7].mxu0  ;;  %v5121_v4 = vmul.f32 %v6878_v36, %v6878_v36 }
 0x2c2   :  { %v5049_v37 = vadd.f32 %v6879_v58, %v5048_v44  ;;  %v5119_v31 = vmul.f32 %v6879_v58, %v6879_v58  ;;  %v5181_v11 = vadd.f32 %v5180_v18, %v5118_v21  ;;  %v6881_v56 = vadd.f32 %v4426_v57, %v1855_v54 }
 0x2c3   :  { %v5605_v47 = vpack.c.bf16 %v6880_v40, %v6878_v36  ;;  %v5122_v61 = vmul.f32 %v6880_v40, %v6880_v40 }
 0x2c4   :  { %v5182_v25 = vadd.f32 %v5181_v11, %v5119_v31  ;;  %v5600_v53 = vpack.c.bf16 %v6881_v56, %v6879_v58  ;;  %v5050_v1 = vadd.f32 %v6881_v56, %v5049_v37  ;;  %v5120_v26 = vmul.f32 %v6881_v56, %v6881_v56 }
 0x2c5   :  { %5749 = vst [vmem:[%s8763_s2 + $0x18] sm:$0xff] %v5605_v47  }
 0x2c6   :  { %5748 = vst [vmem:[%s8763_s2 + $0x10] sm:$0xff] %v5600_v53   ;;  %v5051_v48 = vadd.f32 %v6878_v36, %v5050_v1  ;;  %v5183_v10 = vadd.f32 %v5182_v25, %v5120_v26  ;;  %v6804_v34 = vpop.f32.mrb[8].mxu0 }
 0x2c7   :  { %v6882_v5 = vadd.f32 %v6804_v34, %v8590_v16  ;;  %v4439_v54 = vpop.f32.mrb[9].mxu0 }
 0x2c8   :  { %v5184_v15 = vadd.f32 %v5183_v10, %v5121_v4  ;;  %v6883_v22 = vadd.f32 %v4439_v54, %v8592_v7  ;;  %v5052_v24 = vadd.f32 %v6880_v40, %v5051_v48  ;;  %v6805_v62 = vpop.f32.mrb[10].mxu0 }
 0x2c9   :  { %v6884_v19 = vadd.f32 %v6805_v62, %v8594_v29  ;;  %v4442_v6 = vpop.f32.mrb[11].mxu0  ;;  %v5125_v7 = vmul.f32 %v6882_v5, %v6882_v5 }
 0x2ca   :  { %v5053_v12 = vadd.f32 %v6883_v22, %v5052_v24  ;;  %v5123_v52 = vmul.f32 %v6883_v22, %v6883_v22  ;;  %v5185_v50 = vadd.f32 %v5184_v15, %v5122_v61  ;;  %v6885_v38 = vadd.f32 %v4442_v6, %v8596_v63 }
 0x2cb   :  { %v5615_v51 = vpack.c.bf16 %v6884_v19, %v6882_v5  ;;  %v5126_v21 = vmul.f32 %v6884_v19, %v6884_v19 }
 0x2cc   :  { %v5186_v45 = vadd.f32 %v5185_v50, %v5123_v52  ;;  %v5610_v23 = vpack.c.bf16 %v6885_v38, %v6883_v22  ;;  %v5054_v46 = vadd.f32 %v6885_v38, %v5053_v12  ;;  %v5124_v16 = vmul.f32 %v6885_v38, %v6885_v38 }
 0x2cd   :  { %5751 = vst [vmem:[%s8763_s2 + $0x28] sm:$0xff] %v5615_v51  }
 0x2ce   :  { %5750 = vst [vmem:[%s8763_s2 + $0x20] sm:$0xff] %v5610_v23   ;;  %v5055_v29 = vadd.f32 %v6882_v5, %v5054_v46  ;;  %v5187_v9 = vadd.f32 %v5186_v45, %v5124_v16  ;;  %v6808_v36 = vpop.f32.mrb[12].mxu0 }
 0x2cf   :  { %v6886_v55 = vadd.f32 %v6808_v36, %v8598_v14  ;;  %v4455_v63 = vpop.f32.mrb[13].mxu0 }
 0x2d0   :  { %v5188_v18 = vadd.f32 %v5187_v9, %v5125_v7  ;;  %v6887_v58 = vadd.f32 %v4455_v63, %v8600_v30  ;;  %v5056_v44 = vadd.f32 %v6884_v19, %v5055_v29  ;;  %v6809_v2 = vpop.f32.mrb[14].mxu0 }
 0x2d1   :  { %v6888_v40 = vadd.f32 %v6809_v2, %v8602_v42  ;;  %v4458_v57 = vpop.f32.mrb[15].mxu0  ;;  %v5129_v30 = vmul.f32 %v6886_v55, %v6886_v55 }
 0x2d2   :  { %v5057_v37 = vadd.f32 %v6887_v58, %v5056_v44  ;;  %v5127_v31 = vmul.f32 %v6887_v58, %v6887_v58  ;;  %v5189_v11 = vadd.f32 %v5188_v18, %v5126_v21  ;;  %v6889_v56 = vadd.f32 %v4458_v57, %v8604_v32 }
 0x2d3   :  { %v5625_v47 = vpack.c.bf16 %v6888_v40, %v6886_v55  ;;  %v5130_v10 = vmul.f32 %v6888_v40, %v6888_v40 }
 0x2d4   :  { %v5190_v25 = vadd.f32 %v5189_v11, %v5127_v31  ;;  %v5620_v53 = vpack.c.bf16 %v6889_v56, %v6887_v58  ;;  %v5058_v1 = vadd.f32 %v6889_v56, %v5057_v37  ;;  %v5128_v14 = vmul.f32 %v6889_v56, %v6889_v56 }
 0x2d5   :  { %5753 = vst [vmem:[%s8763_s2 + $0x38] sm:$0xff] %v5625_v47  }
 0x2d6   :  { %5752 = vst [vmem:[%s8763_s2 + $0x30] sm:$0xff] %v5620_v53   ;;  %v5059_v42 = vadd.f32 %v6886_v55, %v5058_v1  ;;  %v5191_v26 = vadd.f32 %v5190_v25, %v5128_v14  ;;  %v6812_v4 = vpop.f32.mrb[16].mxu0 }
 0x2d7   :  { %v6890_v48 = vadd.f32 %v6812_v4, %v8606_v33  ;;  %v4471_v32 = vpop.f32.mrb[17].mxu0 }
 0x2d8   :  { %v5192_v34 = vadd.f32 %v5191_v26, %v5129_v30  ;;  %v6891_v5 = vadd.f32 %v4471_v32, %v8608_v0  ;;  %v5060_v54 = vadd.f32 %v6888_v40, %v5059_v42  ;;  %v6813_v61 = vpop.f32.mrb[18].mxu0 }
 0x2d9   :  { %v6892_v15 = vadd.f32 %v6813_v61, %v8610_v43  ;;  %v4474_v22 = vpop.f32.mrb[19].mxu0  ;;  %v5133_v0 = vmul.f32 %v6890_v48, %v6890_v48 }
 0x2da   :  { %v5061_v24 = vadd.f32 %v6891_v5, %v5060_v54  ;;  %v5131_v62 = vmul.f32 %v6891_v5, %v6891_v5  ;;  %v5193_v19 = vadd.f32 %v5192_v34, %v5130_v10  ;;  %v6893_v6 = vadd.f32 %v4474_v22, %v8612_v20 }
 0x2db   :  { %v5635_v12 = vpack.c.bf16 %v6892_v15, %v6890_v48  ;;  %v5134_v46 = vmul.f32 %v6892_v15, %v6892_v15 }
 0x2dc   :  { %v5194_v52 = vadd.f32 %v5193_v19, %v5131_v62  ;;  %v5630_v50 = vpack.c.bf16 %v6893_v6, %v6891_v5  ;;  %v5062_v38 = vadd.f32 %v6893_v6, %v5061_v24  ;;  %v5132_v33 = vmul.f32 %v6893_v6, %v6893_v6 }
 0x2dd   :  { %5755 = vst [vmem:[%s8763_s2 + $0x48] sm:$0xff] %v5635_v12  }
 0x2de   :  { %5754 = vst [vmem:[%s8763_s2 + $0x40] sm:$0xff] %v5630_v50   ;;  %v5063_v43 = vadd.f32 %v6890_v48, %v5062_v38  ;;  %v5195_v51 = vadd.f32 %v5194_v52, %v5132_v33  ;;  %v6816_v45 = vpop.f32.mrb[20].mxu0 }
 0x2df   :  { %v6894_v23 = vadd.f32 %v6816_v45, %v8614_v60  ;;  %v4487_v20 = vpop.f32.mrb[21].mxu0 }
 0x2e0   :  { %v5196_v16 = vadd.f32 %v5195_v51, %v5133_v0  ;;  %v6895_v7 = vadd.f32 %v4487_v20, %v8616_v27  ;;  %v5064_v29 = vadd.f32 %v6892_v15, %v5063_v43  ;;  %v6817_v9 = vpop.f32.mrb[22].mxu0 }
 0x2e1   :  { %v6896_v36 = vadd.f32 %v6817_v9, %v8618_v49  ;;  %v4490_v55 = vpop.f32.mrb[23].mxu0  ;;  %v5137_v27 = vmul.f32 %v6894_v23, %v6894_v23 }
 0x2e2   :  { %v5065_v63 = vadd.f32 %v6895_v7, %v5064_v29  ;;  %v5135_v21 = vmul.f32 %v6895_v7, %v6895_v7  ;;  %v5197_v18 = vadd.f32 %v5196_v16, %v5134_v46  ;;  %v6897_v58 = vadd.f32 %v4490_v55, %v8620_v35 }
 0x2e3   :  { %v5645_v44 = vpack.c.bf16 %v6896_v36, %v6894_v23  ;;  %v5138_v56 = vmul.f32 %v6896_v36, %v6896_v36 }
 0x2e4   :  { %v5198_v2 = vadd.f32 %v5197_v18, %v5135_v21  ;;  %v5640_v40 = vpack.c.bf16 %v6897_v58, %v6895_v7  ;;  %v5066_v57 = vadd.f32 %v6897_v58, %v5065_v63  ;;  %v5136_v60 = vmul.f32 %v6897_v58, %v6897_v58 }
 0x2e5   :  { %5757 = vst [vmem:[%s8763_s2 + $0x58] sm:$0xff] %v5645_v44  }
 0x2e6   :  { %5756 = vst [vmem:[%s8763_s2 + $0x50] sm:$0xff] %v5640_v40   ;;  %v5067_v49 = vadd.f32 %v6894_v23, %v5066_v57  ;;  %v5199_v37 = vadd.f32 %v5198_v2, %v5136_v60  ;;  %v6820_v31 = vpop.f32.mrb[24].mxu0 }
 0x2e7   :  { %v6898_v11 = vadd.f32 %v6820_v31, %v8622_v8  ;;  %v4503_v35 = vpop.f32.mrb[25].mxu0 }
 0x2e8   :  { %v5200_v47 = vadd.f32 %v5199_v37, %v5137_v27  ;;  %v6899_v25 = vadd.f32 %v4503_v35, %v8624_v28  ;;  %v5068_v53 = vadd.f32 %v6896_v36, %v5067_v49  ;;  %v6821_v1 = vpop.f32.mrb[26].mxu0 }
 0x2e9   :  { %v6900_v14 = vadd.f32 %v6821_v1, %v8626_v17  ;;  %v4506_v30 = vpop.f32.mrb[27].mxu0  ;;  %v5141_v28 = vmul.f32 %v6898_v11, %v6898_v11 }
 0x2ea   :  { %v5069_v42 = vadd.f32 %v6899_v25, %v5068_v53  ;;  %v5139_v26 = vmul.f32 %v6899_v25, %v6899_v25  ;;  %v5201_v4 = vadd.f32 %v5200_v47, %v5138_v56  ;;  %v6901_v48 = vadd.f32 %v4506_v30, %v8628_v59 }
 0x2eb   :  { %v5655_v32 = vpack.c.bf16 %v6900_v14, %v6898_v11  ;;  %v5142_v22 = vmul.f32 %v6900_v14, %v6900_v14 }
 0x2ec   :  { %v5202_v10 = vadd.f32 %v5201_v4, %v5139_v26  ;;  %v5650_v34 = vpack.c.bf16 %v6901_v48, %v6899_v25  ;;  %v5070_v5 = vadd.f32 %v6901_v48, %v5069_v42  ;;  %v5140_v8 = vmul.f32 %v6901_v48, %v6901_v48 }
 0x2ed   :  { %5759 = vst [vmem:[%s8763_s2 + $0x68] sm:$0xff] %v5655_v32  }
 0x2ee   :  { %5758 = vst [vmem:[%s8763_s2 + $0x60] sm:$0xff] %v5650_v34   ;;  %v5071_v17 = vadd.f32 %v6898_v11, %v5070_v5  ;;  %v5203_v54 = vadd.f32 %v5202_v10, %v5140_v8  ;;  %v6824_v61 = vpop.f32.mrb[28].mxu0 }
 0x2ef   :  { %v6902_v15 = vadd.f32 %v6824_v61, %v8630_v41  ;;  %v4519_v59 = vpop.f32.mrb[29].mxu0 }
 0x2f0   :  { %v5204_v24 = vadd.f32 %v5203_v54, %v5141_v28  ;;  %v6903_v62 = vadd.f32 %v4519_v59, %v8632_v39  ;;  %v5072_v19 = vadd.f32 %v6900_v14, %v5071_v17  ;;  %v6825_v6 = vpop.f32.mrb[30].mxu0 }
 0x2f1   :  { %v6904_v12 = vadd.f32 %v6825_v6, %v8634_v13  ;;  %v4522_v52 = vpop.f32.mrb[31].mxu0  ;;  %v5145_v20 = vmul.f32 %v6902_v15, %v6902_v15 }
 0x2f2   :  { %v5073_v50 = vadd.f32 %v6903_v62, %v5072_v19  ;;  %v5143_v38 = vmul.f32 %v6903_v62, %v6903_v62  ;;  %v5205_v33 = vadd.f32 %v5204_v24, %v5142_v22  ;;  %v6905_v0 = vadd.f32 %v4522_v52, %v8636_v3 }
 0x2f3   :  { %v5665_v43 = vpack.c.bf16 %v6904_v12, %v6902_v15  ;;  %v5146_v36 = vmul.f32 %v6904_v12, %v6904_v12 }
 0x2f4   :  { %v5206_v51 = vadd.f32 %v5205_v33, %v5143_v38  ;;  %v5660_v45 = vpack.c.bf16 %v6905_v0, %v6903_v62  ;;  %v5074_v23 = vadd.f32 %v6905_v0, %v5073_v50  ;;  %v5144_v41 = vmul.f32 %v6905_v0, %v6905_v0 }
 0x2f5   :  { %5761 = vst [vmem:[%s8763_s2 + $0x78] sm:$0xff] %v5665_v43   ;;  %v6508_v39 = vpop.f32.mrb[32].mxu1 }
 0x2f6   :  { %5760 = vst [vmem:[%s8763_s2 + $0x70] sm:$0xff] %v5660_v45   ;;  %v5075_v13 = vadd.f32 %v6902_v15, %v5074_v23  ;;  %v5207_v46 = vadd.f32 %v5206_v51, %v5144_v41  ;;  %v6828_v16 = vpop.f32.mrb[32].mxu0  ;;  %v2478_v7 = vpop.f32.mrb[33].mxu1 }
 0x2f7   :  { %v6906_v3 = vadd.f32 %v6828_v16, %v6508_v39  ;;  %v4535_v29 = vpop.f32.mrb[33].mxu0  ;;  %v6509_v9 = vpop.f32.mrb[34].mxu1 }
 0x2f8   :  { %v5208_v55 = vadd.f32 %v5207_v46, %v5145_v20  ;;  %v6907_v63 = vadd.f32 %v4535_v29, %v2478_v7  ;;  %v5076_v21 = vadd.f32 %v6904_v12, %v5075_v13  ;;  %v6829_v18 = vpop.f32.mrb[34].mxu0  ;;  %v2481_v58 = vpop.f32.mrb[35].mxu1 }
 0x2f9   :  { %v6908_v44 = vadd.f32 %v6829_v18, %v6509_v9  ;;  %v4538_v2 = vpop.f32.mrb[35].mxu0  ;;  %v5149_v47 = vmul.f32 %v6906_v3, %v6906_v3 }
 0x2fa   :  { %v5077_v40 = vadd.f32 %v6907_v63, %v5076_v21  ;;  %v5147_v57 = vmul.f32 %v6907_v63, %v6907_v63  ;;  %v5209_v60 = vadd.f32 %v5208_v55, %v5146_v36  ;;  %v6909_v27 = vadd.f32 %v4538_v2, %v2481_v58 }
 0x2fb   :  { %v5675_v49 = vpack.c.bf16 %v6908_v44, %v6906_v3  ;;  %v5150_v4 = vmul.f32 %v6908_v44, %v6908_v44 }
 0x2fc   :  { %v5210_v37 = vadd.f32 %v5209_v60, %v5147_v57  ;;  %v5670_v31 = vpack.c.bf16 %v6909_v27, %v6907_v63  ;;  %v5078_v11 = vadd.f32 %v6909_v27, %v5077_v40  ;;  %v5148_v35 = vmul.f32 %v6909_v27, %v6909_v27 }
 0x2fd   :  { %5763 = vst [vmem:[%s8763_s2 + $0x88] sm:$0xff] %v5675_v49   ;;  %v6512_v56 = vpop.f32.mrb[36].mxu1 }
 0x2fe   :  { %5762 = vst [vmem:[%s8763_s2 + $0x80] sm:$0xff] %v5670_v31   ;;  %v5079_v25 = vadd.f32 %v6906_v3, %v5078_v11  ;;  %v5211_v53 = vadd.f32 %v5210_v37, %v5148_v35  ;;  %v6832_v1 = vpop.f32.mrb[36].mxu0  ;;  %v2494_v14 = vpop.f32.mrb[37].mxu1 }
 0x2ff   :  { %v6910_v30 = vadd.f32 %v6832_v1, %v6512_v56  ;;  %v4551_v42 = vpop.f32.mrb[37].mxu0  ;;  %v6513_v26 = vpop.f32.mrb[38].mxu1 }
 0x300   :  { %v5212_v48 = vadd.f32 %v5211_v53, %v5149_v47  ;;  %v6911_v32 = vadd.f32 %v4551_v42, %v2494_v14  ;;  %v5080_v10 = vadd.f32 %v6908_v44, %v5079_v25  ;;  %v6833_v34 = vpop.f32.mrb[38].mxu0  ;;  %v2497_v5 = vpop.f32.mrb[39].mxu1 }
 0x301   :  { %v6912_v8 = vadd.f32 %v6833_v34, %v6513_v26  ;;  %v4554_v28 = vpop.f32.mrb[39].mxu0  ;;  %v5153_v12 = vmul.f32 %v6910_v30, %v6910_v30 }
 0x302   :  { %v5081_v17 = vadd.f32 %v6911_v32, %v5080_v10  ;;  %v5151_v54 = vmul.f32 %v6911_v32, %v6911_v32  ;;  %v5213_v61 = vadd.f32 %v5212_v48, %v5150_v4  ;;  %v6913_v15 = vadd.f32 %v4554_v28, %v2497_v5 }
 0x303   :  { %v5685_v59 = vpack.c.bf16 %v6912_v8, %v6910_v30  ;;  %v5154_v45 = vmul.f32 %v6912_v8, %v6912_v8 }
 0x304   :  { %v5214_v22 = vadd.f32 %v5213_v61, %v5151_v54  ;;  %v5680_v24 = vpack.c.bf16 %v6913_v15, %v6911_v32  ;;  %v5082_v62 = vadd.f32 %v6913_v15, %v5081_v17  ;;  %v5152_v19 = vmul.f32 %v6913_v15, %v6913_v15 }
 0x305   :  { %5765 = vst [vmem:[%s8763_s2 + $0x98] sm:$0xff] %v5685_v59   ;;  %v6516_v6 = vpop.f32.mrb[40].mxu1 }
 0x306   :  { %5764 = vst [vmem:[%s8763_s2 + $0x90] sm:$0xff] %v5680_v24   ;;  %v5083_v52 = vadd.f32 %v6910_v30, %v5082_v62  ;;  %v5215_v50 = vadd.f32 %v5214_v22, %v5152_v19  ;;  %v6836_v38 = vpop.f32.mrb[40].mxu0  ;;  %v2510_v33 = vpop.f32.mrb[41].mxu1 }
 0x307   :  { %v6914_v0 = vadd.f32 %v6836_v38, %v6516_v6  ;;  %v4567_v43 = vpop.f32.mrb[41].mxu0  ;;  %v6517_v51 = vpop.f32.mrb[42].mxu1 }
 0x308   :  { %v5216_v23 = vadd.f32 %v5215_v50, %v5153_v12  ;;  %v6915_v41 = vadd.f32 %v4567_v43, %v2510_v33  ;;  %v5084_v39 = vadd.f32 %v6912_v8, %v5083_v52  ;;  %v6837_v20 = vpop.f32.mrb[42].mxu0  ;;  %v2513_v13 = vpop.f32.mrb[43].mxu1 }
 0x309   :  { %v6916_v46 = vadd.f32 %v6837_v20, %v6517_v51  ;;  %v4570_v16 = vpop.f32.mrb[43].mxu0  ;;  %v5157_v44 = vmul.f32 %v6914_v0, %v6914_v0 }
 0x30a   :  { %v5085_v7 = vadd.f32 %v6915_v41, %v5084_v39  ;;  %v5155_v3 = vmul.f32 %v6915_v41, %v6915_v41  ;;  %v5217_v29 = vadd.f32 %v5216_v23, %v5154_v45  ;;  %v6917_v9 = vadd.f32 %v4570_v16, %v2513_v13 }
 0x30b   :  { %v5695_v36 = vpack.c.bf16 %v6916_v46, %v6914_v0  ;;  %v5158_v31 = vmul.f32 %v6916_v46, %v6916_v46 }
 0x30c   :  { %v5218_v55 = vadd.f32 %v5217_v29, %v5155_v3  ;;  %v5690_v63 = vpack.c.bf16 %v6917_v9, %v6915_v41  ;;  %v5086_v21 = vadd.f32 %v6917_v9, %v5085_v7  ;;  %v5156_v18 = vmul.f32 %v6917_v9, %v6917_v9 }
 0x30d   :  { %5767 = vst [vmem:[%s8763_s2 + $0xa8] sm:$0xff] %v5695_v36   ;;  %v6520_v58 = vpop.f32.mrb[44].mxu1 }
 0x30e   :  { %5766 = vst [vmem:[%s8763_s2 + $0xa0] sm:$0xff] %v5690_v63   ;;  %v5087_v2 = vadd.f32 %v6914_v0, %v5086_v21  ;;  %v5219_v40 = vadd.f32 %v5218_v55, %v5156_v18  ;;  %v6840_v57 = vpop.f32.mrb[44].mxu0  ;;  %v2526_v60 = vpop.f32.mrb[45].mxu1 }
 0x30f   :  { %v6918_v27 = vadd.f32 %v6840_v57, %v6520_v58  ;;  %v4583_v49 = vpop.f32.mrb[45].mxu0  ;;  %v6521_v37 = vpop.f32.mrb[46].mxu1 }
 0x310   :  { %v5220_v11 = vadd.f32 %v5219_v40, %v5157_v44  ;;  %v6919_v35 = vadd.f32 %v4583_v49, %v2526_v60  ;;  %v5088_v56 = vadd.f32 %v6916_v46, %v5087_v2  ;;  %v6841_v47 = vpop.f32.mrb[46].mxu0  ;;  %v2529_v25 = vpop.f32.mrb[47].mxu1 }
 0x311   :  { %v6920_v53 = vadd.f32 %v6841_v47, %v6521_v37  ;;  %v4586_v1 = vpop.f32.mrb[47].mxu0  ;;  %v5161_v8 = vmul.f32 %v6918_v27, %v6918_v27 }
 0x312   :  { %v5089_v14 = vadd.f32 %v6919_v35, %v5088_v56  ;;  %v5159_v30 = vmul.f32 %v6919_v35, %v6919_v35  ;;  %v5221_v42 = vadd.f32 %v5220_v11, %v5158_v31  ;;  %v6921_v26 = vadd.f32 %v4586_v1, %v2529_v25 }
 0x313   :  { %v5705_v4 = vpack.c.bf16 %v6920_v53, %v6918_v27  ;;  %v5162_v24 = vmul.f32 %v6920_v53, %v6920_v53 }
 0x314   :  { %v5222_v48 = vadd.f32 %v5221_v42, %v5159_v30  ;;  %v5700_v32 = vpack.c.bf16 %v6921_v26, %v6919_v35  ;;  %v5090_v10 = vadd.f32 %v6921_v26, %v5089_v14  ;;  %v5160_v34 = vmul.f32 %v6921_v26, %v6921_v26 }
 0x315   :  { %5769 = vst [vmem:[%s8763_s2 + $0xb8] sm:$0xff] %v5705_v4   ;;  %v6524_v5 = vpop.f32.mrb[48].mxu1 }
 0x316   :  { %5768 = vst [vmem:[%s8763_s2 + $0xb0] sm:$0xff] %v5700_v32   ;;  %v5091_v28 = vadd.f32 %v6918_v27, %v5090_v10  ;;  %v5223_v17 = vadd.f32 %v5222_v48, %v5160_v34  ;;  %v6844_v54 = vpop.f32.mrb[48].mxu0  ;;  %v2542_v61 = vpop.f32.mrb[49].mxu1 }
 0x317   :  { %v6922_v15 = vadd.f32 %v6844_v54, %v6524_v5  ;;  %v4599_v59 = vpop.f32.mrb[49].mxu0  ;;  %v6525_v22 = vpop.f32.mrb[50].mxu1 }
 0x318   :  { %v5224_v62 = vadd.f32 %v5223_v17, %v5161_v8  ;;  %v6923_v19 = vadd.f32 %v4599_v59, %v2542_v61  ;;  %v5092_v6 = vadd.f32 %v6920_v53, %v5091_v28  ;;  %v6845_v12 = vpop.f32.mrb[50].mxu0  ;;  %v2545_v52 = vpop.f32.mrb[51].mxu1 }
 0x319   :  { %v6924_v50 = vadd.f32 %v6845_v12, %v6525_v22  ;;  %v4602_v38 = vpop.f32.mrb[51].mxu0  ;;  %v5165_v46 = vmul.f32 %v6922_v15, %v6922_v15 }
 0x31a   :  { %v5093_v33 = vadd.f32 %v6923_v19, %v5092_v6  ;;  %v5163_v0 = vmul.f32 %v6923_v19, %v6923_v19  ;;  %v5225_v43 = vadd.f32 %v5224_v62, %v5162_v24  ;;  %v6925_v51 = vadd.f32 %v4602_v38, %v2545_v52 }
 0x31b   :  { %v5715_v45 = vpack.c.bf16 %v6924_v50, %v6922_v15  ;;  %v5166_v63 = vmul.f32 %v6924_v50, %v6924_v50 }
 0x31c   :  { %v5226_v23 = vadd.f32 %v5225_v43, %v5163_v0  ;;  %v5710_v41 = vpack.c.bf16 %v6925_v51, %v6923_v19  ;;  %v5094_v39 = vadd.f32 %v6925_v51, %v5093_v33  ;;  %v5164_v20 = vmul.f32 %v6925_v51, %v6925_v51 }
 0x31d   :  { %5771 = vst [vmem:[%s8763_s2 + $0xc8] sm:$0xff] %v5715_v45   ;;  %v6528_v13 = vpop.f32.mrb[52].mxu1 }
 0x31e   :  { %5770 = vst [vmem:[%s8763_s2 + $0xc0] sm:$0xff] %v5710_v41   ;;  %v5095_v16 = vadd.f32 %v6922_v15, %v5094_v39  ;;  %v5227_v7 = vadd.f32 %v5226_v23, %v5164_v20  ;;  %v6848_v3 = vpop.f32.mrb[52].mxu0  ;;  %v2558_v29 = vpop.f32.mrb[53].mxu1 }
 0x31f   :  { %v6926_v9 = vadd.f32 %v6848_v3, %v6528_v13  ;;  %v4615_v36 = vpop.f32.mrb[53].mxu0  ;;  %v6529_v55 = vpop.f32.mrb[54].mxu1 }
 0x320   :  { %v5228_v21 = vadd.f32 %v5227_v7, %v5165_v46  ;;  %v6927_v18 = vadd.f32 %v4615_v36, %v2558_v29  ;;  %v5096_v58 = vadd.f32 %v6924_v50, %v5095_v16  ;;  %v6849_v44 = vpop.f32.mrb[54].mxu0  ;;  %v2561_v2 = vpop.f32.mrb[55].mxu1 }
 0x321   :  { %v6928_v40 = vadd.f32 %v6849_v44, %v6529_v55  ;;  %v4618_v57 = vpop.f32.mrb[55].mxu0  ;;  %v5169_v53 = vmul.f32 %v6926_v9, %v6926_v9 }
 0x322   :  { %v5097_v60 = vadd.f32 %v6927_v18, %v5096_v58  ;;  %v5167_v27 = vmul.f32 %v6927_v18, %v6927_v18  ;;  %v5229_v49 = vadd.f32 %v5228_v21, %v5166_v63  ;;  %v6929_v37 = vadd.f32 %v4618_v57, %v2561_v2 }
 0x323   :  { %v5725_v31 = vpack.c.bf16 %v6928_v40, %v6926_v9  ;;  %v5170_v32 = vmul.f32 %v6928_v40, %v6928_v40 }
 0x324   :  { %v5230_v11 = vadd.f32 %v5229_v49, %v5167_v27  ;;  %v5720_v35 = vpack.c.bf16 %v6929_v37, %v6927_v18  ;;  %v5098_v56 = vadd.f32 %v6929_v37, %v5097_v60  ;;  %v5168_v47 = vmul.f32 %v6929_v37, %v6929_v37 }
 0x325   :  { %5773 = vst [vmem:[%s8763_s2 + $0xd8] sm:$0xff] %v5725_v31   ;;  %v6532_v25 = vpop.f32.mrb[56].mxu1 }
 0x326   :  { %5772 = vst [vmem:[%s8763_s2 + $0xd0] sm:$0xff] %v5720_v35   ;;  %v5099_v1 = vadd.f32 %v6926_v9, %v5098_v56  ;;  %v5231_v14 = vadd.f32 %v5230_v11, %v5168_v47  ;;  %v6852_v30 = vpop.f32.mrb[56].mxu0  ;;  %v2574_v42 = vpop.f32.mrb[57].mxu1 }
 0x327   :  { %v6930_v26 = vadd.f32 %v6852_v30, %v6532_v25  ;;  %v4631_v4 = vpop.f32.mrb[57].mxu0  ;;  %v6533_v48 = vpop.f32.mrb[58].mxu1 }
 0x328   :  { %v5232_v10 = vadd.f32 %v5231_v14, %v5169_v53  ;;  %v6931_v34 = vadd.f32 %v4631_v4, %v2574_v42  ;;  %v5100_v5 = vadd.f32 %v6928_v40, %v5099_v1  ;;  %v6853_v8 = vpop.f32.mrb[58].mxu0  ;;  %v2577_v28 = vpop.f32.mrb[59].mxu1 }
 0x329   :  { %v6932_v17 = vadd.f32 %v6853_v8, %v6533_v48  ;;  %v4634_v54 = vpop.f32.mrb[59].mxu0  ;;  %v5173_v50 = vmul.f32 %v6930_v26, %v6930_v26 }
 0x32a   :  { %v5101_v61 = vadd.f32 %v6931_v34, %v5100_v5  ;;  %v5171_v15 = vmul.f32 %v6931_v34, %v6931_v34  ;;  %v5233_v59 = vadd.f32 %v5232_v10, %v5170_v32  ;;  %v6933_v22 = vadd.f32 %v4634_v54, %v2577_v28 }
 0x32b   :  { %v5735_v24 = vpack.c.bf16 %v6932_v17, %v6930_v26  ;;  %v5174_v41 = vmul.f32 %v6932_v17, %v6932_v17 }
 0x32c   :  { %v5234_v62 = vadd.f32 %v5233_v59, %v5171_v15  ;;  %v5730_v19 = vpack.c.bf16 %v6933_v22, %v6931_v34  ;;  %v5102_v6 = vadd.f32 %v6933_v22, %v5101_v61  ;;  %v5172_v12 = vmul.f32 %v6933_v22, %v6933_v22 }
 0x32d   :  { %5775 = vst [vmem:[%s8763_s2 + $0xe8] sm:$0xff] %v5735_v24   ;;  %v6536_v52 = vpop.f32.mrb[60].mxu1 }
 0x32e   :  { %5774 = vst [vmem:[%s8763_s2 + $0xe0] sm:$0xff] %v5730_v19   ;;  %v5103_v38 = vadd.f32 %v6930_v26, %v5102_v6  ;;  %v5235_v33 = vadd.f32 %v5234_v62, %v5172_v12  ;;  %v6856_v0 = vpop.f32.mrb[60].mxu0  ;;  %v2590_v43 = vpop.f32.mrb[61].mxu1 }
 0x32f   :  { %v6934_v51 = vadd.f32 %v6856_v0, %v6536_v52  ;;  %v4647_v45 = vpop.f32.mrb[61].mxu0  ;;  %v6537_v23 = vpop.f32.mrb[62].mxu1 }
 0x330   :  { %v5236_v39 = vadd.f32 %v5235_v33, %v5173_v50  ;;  %v6935_v20 = vadd.f32 %v4647_v45, %v2590_v43  ;;  %v5104_v13 = vadd.f32 %v6932_v17, %v5103_v38  ;;  %v6857_v46 = vpop.f32.mrb[62].mxu0  ;;  %v2593_v16 = vpop.f32.mrb[63].mxu1 }
 0x331   :  { %v6936_v7 = vadd.f32 %v6857_v46, %v6537_v23  ;;  %v4650_v3 = vpop.f32.mrb[63].mxu0  ;;  %v5177_v2 = vmul.f32 %v6934_v51, %v6934_v51 }
 0x332   :  { %v5105_v29 = vadd.f32 %v6935_v20, %v5104_v13  ;;  %v5175_v9 = vmul.f32 %v6935_v20, %v6935_v20  ;;  %v5237_v36 = vadd.f32 %v5236_v39, %v5174_v41  ;;  %v6937_v55 = vadd.f32 %v4650_v3, %v2593_v16 }
 0x333   :  { %v5745_v63 = vpack.c.bf16 %v6936_v7, %v6934_v51  ;;  %v5178_v60 = vmul.f32 %v6936_v7, %v6936_v7 }
 0x334   :  { %v5238_v21 = vadd.f32 %v5237_v36, %v5175_v9  ;;  %v5740_v18 = vpack.c.bf16 %v6937_v55, %v6935_v20  ;;  %v5106_v58 = vadd.f32 %v6937_v55, %v5105_v29  ;;  %v5176_v44 = vmul.f32 %v6937_v55, %v6937_v55 }
 0x335   :  { %5777 = vst [vmem:[%s8763_s2 + $0xf8] sm:$0xff] %v5745_v63  }
 0x336   :  { %5776 = vst [vmem:[%s8763_s2 + $0xf0] sm:$0xff] %v5740_v18   ;;  %v5107_v40 = vadd.f32 %v6934_v51, %v5106_v58  ;;  %v5239_v57 = vadd.f32 %v5238_v21, %v5176_v44 }
 0x338   :  { %v5108_v27 = vadd.f32 %v6936_v7, %v5107_v40  ;;  %v5240_v49 = vadd.f32 %v5239_v57, %v5177_v2 }
 0x33a   :  { %v5109_v37 = vrot.slane %v5108_v27, 4  ;;  %v5241_v31 = vadd.f32 %v5240_v49, %v5178_v60 }
 0x33c   :  { %v5110_v11 = vadd.f32 %v5109_v37, %v5108_v27  ;;  %v5242_v35 = vrot.slane %v5241_v31, 4 }
 0x33e   :  { %v5111_v56 = vrot.slane %v5110_v11, 2  ;;  %v5243_v47 = vadd.f32 %v5242_v35, %v5241_v31 }
 0x340   :  { %v5112_v25 = vadd.f32 %v5111_v56, %v5110_v11  ;;  %v5244_v53 = vrot.slane %v5243_v47, 2 }
 0x342   :  { %v5113_v1 = vrot.slane %v5112_v25, 1  ;;  %v5245_v14 = vadd.f32 %v5244_v53, %v5243_v47 }
 0x344   :  { %v5246_v30 = vrot.slane %v5245_v14, 1  ;;  %v5114_v42 = vadd.f32 %v5113_v1, %v5112_v25 }
 0x346   :  { %v5247_v26 = vadd.f32 %v5246_v30, %v5245_v14 }
 0x348   :  { %v5249_v4 = vsel %vm5248_vm0, %v5114_v42, %v5247_v26 }
 0x349   :  { %5250 = vst [vmem:[%s8764_s3] sm:$0x3] %v5249_v4 }

</bundles_post_ra>
